<compile_context>
chip_gen: v7x
topology: tpu7x:2x2x1
jax: 0.10.0
libtpu: 0.0.40
codegen_flags: <defaults>
</compile_context>

<pallas_src>
import functools

import jax
import jax.numpy as jnp
from jax.experimental import pallas as pl
from jax.experimental.pallas import tpu as pltpu


def _decoder_block_kernel(up_ref, left_ref, wu_ref, bu_ref, w1_ref, b1_ref,
                          w2_ref, b2_ref, o_ref, pad_a, pad_b,
                          *, H2, W2, C, compute_dtype):
    """Fused upconv -> concat -> conv1(+relu) -> conv2(+relu), one batch element.

    up_ref:   (1, H2, W2, 2C)   nearest-upsampled `down` (compute_dtype)
    left_ref: (1, H2, W2, C)    skip connection (compute_dtype)
    w*_ref:   (9*Cin, C)        im2col-reshaped 3x3 weights (compute_dtype)
    b*_ref:   (1, C)            biases (f32)
    o_ref:    (1, H2, W2, C)    output tile
    pad_a:    (H2+2, W2+2, 2C)  f32 scratch: zero halo, upconv/conv1 input
    pad_b:    (H2+2, W2+2, C)   f32 scratch: zero halo, conv2 input
    """
    f32 = jnp.float32

    def conv3x3(src_ref, w_ref, b_ref, relu):
        # im2col: 9 shifted (H2, W2, Cin) windows concatenated on the lane axis,
        # contracted against (9*Cin, C) in one MXU matmul with f32 accumulation.
        taps = [src_ref[dh:dh + H2, dw:dw + W2, :]
                for dh in range(3) for dw in range(3)]
        patches = jnp.concatenate(taps, axis=-1).astype(compute_dtype)
        acc = jnp.einsum("hwc,cd->hwd", patches, w_ref[...],
                         preferred_element_type=f32)
        acc = acc + b_ref[0][None, None, :]        # f32 epilogue (bias)
        return jnp.maximum(acc, 0.0) if relu else acc

    # Stage 1: upconv on the upsampled input. Zero halo lives in VMEM scratch,
    # so no padded copy is ever materialized in HBM.
    pad_a[...] = jnp.zeros_like(pad_a)
    pad_a[1:1 + H2, 1:1 + W2, :] = up_ref[0].astype(f32)
    y_up = conv3x3(pad_a, wu_ref, bu_ref, relu=False)                # (H2, W2, C)

    # Stage 2: channel-concat([upconv_out, left]) written straight into the
    # (still zero-bordered) scratch -> conv1 input; no HBM concat intermediate.
    cat = jnp.concatenate([y_up, left_ref[0].astype(f32)], axis=-1)  # (H2, W2, 2C)
    pad_a[1:1 + H2, 1:1 + W2, :] = cat
    y1 = conv3x3(pad_a, w1_ref, b1_ref, relu=True)                   # (H2, W2, C)

    # Stage 3: conv2 on conv1's output, again through a zero-halo scratch.
    pad_b[...] = jnp.zeros_like(pad_b)
    pad_b[1:1 + H2, 1:1 + W2, :] = y1
    y2 = conv3x3(pad_b, w2_ref, b2_ref, relu=True)                   # (H2, W2, C)

    o_ref[...] = y2[None].astype(o_ref.dtype)


def nearest_upsample_2x(x_nhwc):
    # mode='nearest', scale_factor=2 (cheap layout glue; see TODO at top).
    return jnp.repeat(jnp.repeat(x_nhwc, 2, axis=1), 2, axis=2)


def _im2col_weights(w_hwio, dtype):
    # (3, 3, Cin, Cout) -> (9*Cin, Cout); row-major over (kh, kw, cin) matches
    # the tap-concatenation order used inside the kernel.
    kh, kw, cin, cout = w_hwio.shape
    return w_hwio.reshape(kh * kw * cin, cout).astype(dtype)


def decoder_block_forward(params, down_nhwc, left_nhwc, *,
                          compute_dtype=jnp.bfloat16):
    """Forward pass matching DecoderBlock.forward, NHWC layout, fused kernel."""
    N, H, W, C2 = down_nhwc.shape
    C = C2 // 2
    H2, W2 = 2 * H, 2 * W
    assert left_nhwc.shape == (N, H2, W2, C), left_nhwc.shape

    up = nearest_upsample_2x(down_nhwc.astype(compute_dtype))   # (N, H2, W2, 2C)
    left = left_nhwc.astype(compute_dtype)

    wu = _im2col_weights(params["upconv_w"], compute_dtype)
    w1 = _im2col_weights(params["conv1_w"], compute_dtype)
    w2 = _im2col_weights(params["conv2_w"], compute_dtype)
    bu = params["upconv_b"].reshape(1, C).astype(jnp.float32)
    b1 = params["conv1_b"].reshape(1, C).astype(jnp.float32)
    b2 = params["conv2_b"].reshape(1, C).astype(jnp.float32)

    kernel = functools.partial(_decoder_block_kernel, H2=H2, W2=W2, C=C,
                               compute_dtype=compute_dtype)

    return pl.pallas_call(
        kernel,
        out_shape=jax.ShapeDtypeStruct((N, H2, W2, C), down_nhwc.dtype),
        grid=(N,),
        in_specs=[
            pl.BlockSpec((1, H2, W2, C2), lambda n: (n, 0, 0, 0)),   # up
            pl.BlockSpec((1, H2, W2, C), lambda n: (n, 0, 0, 0)),    # left
            pl.BlockSpec((9 * C2, C), lambda n: (0, 0)),             # upconv_w
            pl.BlockSpec((1, C), lambda n: (0, 0)),                  # upconv_b
            pl.BlockSpec((9 * C2, C), lambda n: (0, 0)),             # conv1_w
            pl.BlockSpec((1, C), lambda n: (0, 0)),                  # conv1_b
            pl.BlockSpec((9 * C, C), lambda n: (0, 0)),              # conv2_w
            pl.BlockSpec((1, C), lambda n: (0, 0)),                  # conv2_b
        ],
        out_specs=pl.BlockSpec((1, H2, W2, C), lambda n: (n, 0, 0, 0)),
        scratch_shapes=[
            pltpu.VMEM((H2 + 2, W2 + 2, C2), jnp.float32),
            pltpu.VMEM((H2 + 2, W2 + 2, C), jnp.float32),
        ],
        compiler_params=pltpu.CompilerParams(
            dimension_semantics=("parallel",),
            vmem_limit_bytes=32 * 1024 * 1024,
        ),
    )(up, left, wu, bu, w1, b1, w2, b2)


def init_params(key, out_channels):
    """Deterministic synthetic parameters (HWIO weight layout)."""
    c = out_channels
    ks = jax.random.split(key, 6)

    def w(k, cin, cout):
        return (jax.random.normal(k, (3, 3, cin, cout), jnp.float32)
                * (1.0 / (3.0 * jnp.sqrt(float(cin)))))

    def b(k, cout):
        return jax.random.normal(k, (cout,), jnp.float32) * 0.01

    return {
        "upconv_w": w(ks[0], 2 * c, c), "upconv_b": b(ks[1], c),
        "conv1_w":  w(ks[2], 2 * c, c), "conv1_b":  b(ks[3], c),
        "conv2_w":  w(ks[4],     c, c), "conv2_b":  b(ks[5], c),
    }


# ----------------------- pure-JAX reference (for checking) -----------------------

def _ref_conv3x3(x_nhwc, w_hwio, bias, apply_relu):
    y = jax.lax.conv_general_dilated(
        x_nhwc, w_hwio, window_strides=(1, 1), padding="SAME",
        dimension_numbers=("NHWC", "HWIO", "NHWC"))
    y = y + bias[None, None, None, :]
    return jnp.maximum(y, 0.0) if apply_relu else y


def _ref_forward(params, down_nhwc, left_nhwc):
    x = nearest_upsample_2x(down_nhwc)
    x = _ref_conv3x3(x, params["upconv_w"], params["upconv_b"], False)
    x = jnp.concatenate([x, left_nhwc], axis=-1)
    x = _ref_conv3x3(x, params["conv1_w"], params["conv1_b"], True)
    x = _ref_conv3x3(x, params["conv2_w"], params["conv2_b"], True)
    return x


if __name__ == "__main__":
    out_channels = 4
    N, H, W = 2, 8, 8            # `down` spatial; `left` is 2H x 2W

    key = jax.random.PRNGKey(0)
    k_down, k_left, k_params = jax.random.split(key, 3)

    # layout: NHWC activations
    down = jax.random.normal(k_down, (N, H, W, 2 * out_channels), jnp.float32)
    left = jax.random.normal(k_left, (N, 2 * H, 2 * W, out_channels), jnp.float32)
    params = init_params(k_params, out_channels)

    ref = jax.block_until_ready(_ref_forward(params, down, left))

    # f32-on-MXU path: tight check against the XLA reference.
    out_f32 = jax.block_until_ready(
        decoder_block_forward(params, down, left, compute_dtype=jnp.float32))
    assert out_f32.shape == (N, 2 * H, 2 * W, out_channels), out_f32.shape
    err_f32 = float(jnp.max(jnp.abs(out_f32 - ref)))
    assert jnp.allclose(out_f32, ref, atol=5e-4, rtol=5e-4), err_f32

    # Recommended production path: bf16 MXU operands, f32 accumulation.
    out_bf16 = jax.block_until_ready(
        decoder_block_forward(params, down, left, compute_dtype=jnp.bfloat16))
    err_bf16 = float(jnp.max(jnp.abs(out_bf16 - ref)))
    assert jnp.allclose(out_bf16, ref, atol=5e-2, rtol=5e-2), err_bf16

    print("KERNEL_OK")
</pallas_src>

<mosaic_0001>
module attributes {stable_mosaic.version = 11 : i64} {
  func.func @_decoder_block_kernel(%arg0: i32, %arg1: memref<1x16x16x8xf32, #tpu.memory_space<vmem>>, %arg2: memref<1x16x16x4xf32, #tpu.memory_space<vmem>>, %arg3: memref<72x4xf32, #tpu.memory_space<vmem>>, %arg4: memref<1x4xf32, #tpu.memory_space<vmem>>, %arg5: memref<72x4xf32, #tpu.memory_space<vmem>>, %arg6: memref<1x4xf32, #tpu.memory_space<vmem>>, %arg7: memref<36x4xf32, #tpu.memory_space<vmem>>, %arg8: memref<1x4xf32, #tpu.memory_space<vmem>>, %arg9: memref<1x16x16x4xf32, #tpu.memory_space<vmem>>, %arg10: memref<18x18x8xf32, #tpu.memory_space<vmem>>, %arg11: memref<18x18x4xf32, #tpu.memory_space<vmem>>) attributes {dimension_semantics = [#tpu.dimension_semantics<parallel>], iteration_bounds = array<i64: 2>, scalar_prefetch = 0 : i64, scratch_operands = 2 : i64, tpu.core_type = #tpu.core_type<tc>, window_params = [{transform_indices = @transform_0, window_bounds = array<i64: 1, 16, 16, 8>}, {transform_indices = @transform_1, window_bounds = array<i64: 1, 16, 16, 4>}, {pipeline_mode = #tpu.pipeline_mode<synchronous>, transform_indices = @transform_2, window_bounds = array<i64: 72, 4>}, {pipeline_mode = #tpu.pipeline_mode<synchronous>, transform_indices = @transform_3, window_bounds = array<i64: 1, 4>}, {pipeline_mode = #tpu.pipeline_mode<synchronous>, transform_indices = @transform_4, window_bounds = array<i64: 72, 4>}, {pipeline_mode = #tpu.pipeline_mode<synchronous>, transform_indices = @transform_5, window_bounds = array<i64: 1, 4>}, {pipeline_mode = #tpu.pipeline_mode<synchronous>, transform_indices = @transform_6, window_bounds = array<i64: 36, 4>}, {pipeline_mode = #tpu.pipeline_mode<synchronous>, transform_indices = @transform_7, window_bounds = array<i64: 1, 4>}, {transform_indices = @transform_8, window_bounds = array<i64: 1, 16, 16, 4>}]} {
    %cst = arith.constant 0.000000e+00 : f32
    %0 = vector.broadcast %cst : f32 to vector<18x18x8xf32>
    %c0 = arith.constant 0 : index
    %c0_0 = arith.constant 0 : index
    %c0_1 = arith.constant 0 : index
    %1 = vector.load %arg10[%c0, %c0_0, %c0_1] : memref<18x18x8xf32, #tpu.memory_space<vmem>>, vector<18x18x8xf32>
    tpu.vector_store %arg10[%c0, %c0_0, %c0_1], %0 {strides = array<i32>} : memref<18x18x8xf32, #tpu.memory_space<vmem>>, vector<18x18x8xf32>,
    %c0_2 = arith.constant 0 : index
    %c0_3 = arith.constant 0 : index
    %c0_4 = arith.constant 0 : index
    %c0_5 = arith.constant 0 : index
    %2 = vector.load %arg1[%c0_2, %c0_3, %c0_4, %c0_5] : memref<1x16x16x8xf32, #tpu.memory_space<vmem>>, vector<1x16x16x8xf32>
    %3 = vector.shape_cast %2 : vector<1x16x16x8xf32> to vector<16x16x8xf32>
    %c1 = arith.constant 1 : index
    %c1_6 = arith.constant 1 : index
    %c0_7 = arith.constant 0 : index
    %4 = vector.load %arg10[%c1, %c1_6, %c0_7] : memref<18x18x8xf32, #tpu.memory_space<vmem>>, vector<16x16x8xf32>
    tpu.vector_store %arg10[%c1, %c1_6, %c0_7], %3 {strides = array<i32>} : memref<18x18x8xf32, #tpu.memory_space<vmem>>, vector<16x16x8xf32>,
    %c0_8 = arith.constant 0 : index
    %c0_9 = arith.constant 0 : index
    %c0_10 = arith.constant 0 : index
    %5 = vector.load %arg10[%c0_8, %c0_9, %c0_10] : memref<18x18x8xf32, #tpu.memory_space<vmem>>, vector<16x16x8xf32>
    %c0_11 = arith.constant 0 : index
    %c1_12 = arith.constant 1 : index
    %c0_13 = arith.constant 0 : index
    %6 = vector.load %arg10[%c0_11, %c1_12, %c0_13] : memref<18x18x8xf32, #tpu.memory_space<vmem>>, vector<16x16x8xf32>
    %c0_14 = arith.constant 0 : index
    %c2 = arith.constant 2 : index
    %c0_15 = arith.constant 0 : index
    %7 = vector.load %arg10[%c0_14, %c2, %c0_15] : memref<18x18x8xf32, #tpu.memory_space<vmem>>, vector<16x16x8xf32>
    %c1_16 = arith.constant 1 : index
    %c0_17 = arith.constant 0 : index
    %c0_18 = arith.constant 0 : index
    %8 = vector.load %arg10[%c1_16, %c0_17, %c0_18] : memref<18x18x8xf32, #tpu.memory_space<vmem>>, vector<16x16x8xf32>
    %c1_19 = arith.constant 1 : index
    %c1_20 = arith.constant 1 : index
    %c0_21 = arith.constant 0 : index
    %9 = vector.load %arg10[%c1_19, %c1_20, %c0_21] : memref<18x18x8xf32, #tpu.memory_space<vmem>>, vector<16x16x8xf32>
    %c1_22 = arith.constant 1 : index
    %c2_23 = arith.constant 2 : index
    %c0_24 = arith.constant 0 : index
    %10 = vector.load %arg10[%c1_22, %c2_23, %c0_24] : memref<18x18x8xf32, #tpu.memory_space<vmem>>, vector<16x16x8xf32>
    %c2_25 = arith.constant 2 : index
    %c0_26 = arith.constant 0 : index
    %c0_27 = arith.constant 0 : index
    %11 = vector.load %arg10[%c2_25, %c0_26, %c0_27] : memref<18x18x8xf32, #tpu.memory_space<vmem>>, vector<16x16x8xf32>
    %c2_28 = arith.constant 2 : index
    %c1_29 = arith.constant 1 : index
    %c0_30 = arith.constant 0 : index
    %12 = vector.load %arg10[%c2_28, %c1_29, %c0_30] : memref<18x18x8xf32, #tpu.memory_space<vmem>>, vector<16x16x8xf32>
    %c2_31 = arith.constant 2 : index
    %c2_32 = arith.constant 2 : index
    %c0_33 = arith.constant 0 : index
    %13 = vector.load %arg10[%c2_31, %c2_32, %c0_33] : memref<18x18x8xf32, #tpu.memory_space<vmem>>, vector<16x16x8xf32>
    %14 = tpu.concatenate %5, %6, %7, %8, %9, %10, %11, %12, %13 in 2 : vector<16x16x8xf32>, vector<16x16x8xf32>, vector<16x16x8xf32>, vector<16x16x8xf32>, vector<16x16x8xf32>, vector<16x16x8xf32>, vector<16x16x8xf32>, vector<16x16x8xf32>, vector<16x16x8xf32> -> vector<16x16x72xf32>
    %c0_34 = arith.constant 0 : index
    %c0_35 = arith.constant 0 : index
    %15 = vector.load %arg3[%c0_34, %c0_35] : memref<72x4xf32, #tpu.memory_space<vmem>>, vector<72x4xf32>
    "tpu.trace_start"() <{level = 10 : i32, message = "hwc,cd->hwd"}> : () -> ()
    %cst_36 = arith.constant dense<0.000000e+00> : vector<16x16x4xf32>
    %16 = tpu.matmul %14, %15, %cst_36 {dimension_numbers = #tpu.dot_dimension_numbers<[2], [0], [0, 1], [1], [0, 0, 0, 1, 1, 1], [], []>} : vector<16x16x72xf32>, vector<72x4xf32>, vector<16x16x4xf32> -> vector<16x16x4xf32>
    "tpu.trace_stop"() : () -> ()
    %c0_37 = arith.constant 0 : index
    %c0_38 = arith.constant 0 : index
    %17 = vector.load %arg4[%c0_37, %c0_38] : memref<1x4xf32, #tpu.memory_space<vmem>>, vector<1x4xf32>
    %18 = vector.shape_cast %17 : vector<1x4xf32> to vector<4xf32>
    %19 = vector.shape_cast %18 : vector<4xf32> to vector<1x1x4xf32>
    %20 = vector.broadcast %19 : vector<1x1x4xf32> to vector<16x16x4xf32>
    %21 = arith.addf %16, %20 : vector<16x16x4xf32>
    %c0_39 = arith.constant 0 : index
    %c0_40 = arith.constant 0 : index
    %c0_41 = arith.constant 0 : index
    %c0_42 = arith.constant 0 : index
    %22 = vector.load %arg2[%c0_39, %c0_40, %c0_41, %c0_42] : memref<1x16x16x4xf32, #tpu.memory_space<vmem>>, vector<1x16x16x4xf32>
    %23 = vector.shape_cast %22 : vector<1x16x16x4xf32> to vector<16x16x4xf32>
    %24 = tpu.concatenate %21, %23 in 2 : vector<16x16x4xf32>, vector<16x16x4xf32> -> vector<16x16x8xf32>
    %c1_43 = arith.constant 1 : index
    %c1_44 = arith.constant 1 : index
    %c0_45 = arith.constant 0 : index
    %25 = vector.load %arg10[%c1_43, %c1_44, %c0_45] : memref<18x18x8xf32, #tpu.memory_space<vmem>>, vector<16x16x8xf32>
    tpu.vector_store %arg10[%c1_43, %c1_44, %c0_45], %24 {strides = array<i32>} : memref<18x18x8xf32, #tpu.memory_space<vmem>>, vector<16x16x8xf32>,
    %c0_46 = arith.constant 0 : index
    %c0_47 = arith.constant 0 : index
    %c0_48 = arith.constant 0 : index
    %26 = vector.load %arg10[%c0_46, %c0_47, %c0_48] : memref<18x18x8xf32, #tpu.memory_space<vmem>>, vector<16x16x8xf32>
    %c0_49 = arith.constant 0 : index
    %c1_50 = arith.constant 1 : index
    %c0_51 = arith.constant 0 : index
    %27 = vector.load %arg10[%c0_49, %c1_50, %c0_51] : memref<18x18x8xf32, #tpu.memory_space<vmem>>, vector<16x16x8xf32>
    %c0_52 = arith.constant 0 : index
    %c2_53 = arith.constant 2 : index
    %c0_54 = arith.constant 0 : index
    %28 = vector.load %arg10[%c0_52, %c2_53, %c0_54] : memref<18x18x8xf32, #tpu.memory_space<vmem>>, vector<16x16x8xf32>
    %c1_55 = arith.constant 1 : index
    %c0_56 = arith.constant 0 : index
    %c0_57 = arith.constant 0 : index
    %29 = vector.load %arg10[%c1_55, %c0_56, %c0_57] : memref<18x18x8xf32, #tpu.memory_space<vmem>>, vector<16x16x8xf32>
    %c1_58 = arith.constant 1 : index
    %c1_59 = arith.constant 1 : index
    %c0_60 = arith.constant 0 : index
    %30 = vector.load %arg10[%c1_58, %c1_59, %c0_60] : memref<18x18x8xf32, #tpu.memory_space<vmem>>, vector<16x16x8xf32>
    %c1_61 = arith.constant 1 : index
    %c2_62 = arith.constant 2 : index
    %c0_63 = arith.constant 0 : index
    %31 = vector.load %arg10[%c1_61, %c2_62, %c0_63] : memref<18x18x8xf32, #tpu.memory_space<vmem>>, vector<16x16x8xf32>
    %c2_64 = arith.constant 2 : index
    %c0_65 = arith.constant 0 : index
    %c0_66 = arith.constant 0 : index
    %32 = vector.load %arg10[%c2_64, %c0_65, %c0_66] : memref<18x18x8xf32, #tpu.memory_space<vmem>>, vector<16x16x8xf32>
    %c2_67 = arith.constant 2 : index
    %c1_68 = arith.constant 1 : index
    %c0_69 = arith.constant 0 : index
    %33 = vector.load %arg10[%c2_67, %c1_68, %c0_69] : memref<18x18x8xf32, #tpu.memory_space<vmem>>, vector<16x16x8xf32>
    %c2_70 = arith.constant 2 : index
    %c2_71 = arith.constant 2 : index
    %c0_72 = arith.constant 0 : index
    %34 = vector.load %arg10[%c2_70, %c2_71, %c0_72] : memref<18x18x8xf32, #tpu.memory_space<vmem>>, vector<16x16x8xf32>
    %35 = tpu.concatenate %26, %27, %28, %29, %30, %31, %32, %33, %34 in 2 : vector<16x16x8xf32>, vector<16x16x8xf32>, vector<16x16x8xf32>, vector<16x16x8xf32>, vector<16x16x8xf32>, vector<16x16x8xf32>, vector<16x16x8xf32>, vector<16x16x8xf32>, vector<16x16x8xf32> -> vector<16x16x72xf32>
    %c0_73 = arith.constant 0 : index
    %c0_74 = arith.constant 0 : index
    %36 = vector.load %arg5[%c0_73, %c0_74] : memref<72x4xf32, #tpu.memory_space<vmem>>, vector<72x4xf32>
    "tpu.trace_start"() <{level = 10 : i32, message = "hwc,cd->hwd"}> : () -> ()
    %cst_75 = arith.constant dense<0.000000e+00> : vector<16x16x4xf32>
    %37 = tpu.matmul %35, %36, %cst_75 {dimension_numbers = #tpu.dot_dimension_numbers<[2], [0], [0, 1], [1], [0, 0, 0, 1, 1, 1], [], []>} : vector<16x16x72xf32>, vector<72x4xf32>, vector<16x16x4xf32> -> vector<16x16x4xf32>
    "tpu.trace_stop"() : () -> ()
    %c0_76 = arith.constant 0 : index
    %c0_77 = arith.constant 0 : index
    %38 = vector.load %arg6[%c0_76, %c0_77] : memref<1x4xf32, #tpu.memory_space<vmem>>, vector<1x4xf32>
    %39 = vector.shape_cast %38 : vector<1x4xf32> to vector<4xf32>
    %40 = vector.shape_cast %39 : vector<4xf32> to vector<1x1x4xf32>
    %41 = vector.broadcast %40 : vector<1x1x4xf32> to vector<16x16x4xf32>
    %42 = arith.addf %37, %41 : vector<16x16x4xf32>
    %cst_78 = arith.constant 0.000000e+00 : f32
    %43 = vector.broadcast %cst_78 : f32 to vector<16x16x4xf32>
    %44 = arith.maximumf %42, %43 : vector<16x16x4xf32>
    %cst_79 = arith.constant 0.000000e+00 : f32
    %45 = vector.broadcast %cst_79 : f32 to vector<18x18x4xf32>
    %c0_80 = arith.constant 0 : index
    %c0_81 = arith.constant 0 : index
    %c0_82 = arith.constant 0 : index
    %46 = vector.load %arg11[%c0_80, %c0_81, %c0_82] : memref<18x18x4xf32, #tpu.memory_space<vmem>>, vector<18x18x4xf32>
    tpu.vector_store %arg11[%c0_80, %c0_81, %c0_82], %45 {strides = array<i32>} : memref<18x18x4xf32, #tpu.memory_space<vmem>>, vector<18x18x4xf32>,
    %c1_83 = arith.constant 1 : index
    %c1_84 = arith.constant 1 : index
    %c0_85 = arith.constant 0 : index
    %47 = vector.load %arg11[%c1_83, %c1_84, %c0_85] : memref<18x18x4xf32, #tpu.memory_space<vmem>>, vector<16x16x4xf32>
    tpu.vector_store %arg11[%c1_83, %c1_84, %c0_85], %44 {strides = array<i32>} : memref<18x18x4xf32, #tpu.memory_space<vmem>>, vector<16x16x4xf32>,
    %c0_86 = arith.constant 0 : index
    %c0_87 = arith.constant 0 : index
    %c0_88 = arith.constant 0 : index
    %48 = vector.load %arg11[%c0_86, %c0_87, %c0_88] : memref<18x18x4xf32, #tpu.memory_space<vmem>>, vector<16x16x4xf32>
    %c0_89 = arith.constant 0 : index
    %c1_90 = arith.constant 1 : index
    %c0_91 = arith.constant 0 : index
    %49 = vector.load %arg11[%c0_89, %c1_90, %c0_91] : memref<18x18x4xf32, #tpu.memory_space<vmem>>, vector<16x16x4xf32>
    %c0_92 = arith.constant 0 : index
    %c2_93 = arith.constant 2 : index
    %c0_94 = arith.constant 0 : index
    %50 = vector.load %arg11[%c0_92, %c2_93, %c0_94] : memref<18x18x4xf32, #tpu.memory_space<vmem>>, vector<16x16x4xf32>
    %c1_95 = arith.constant 1 : index
    %c0_96 = arith.constant 0 : index
    %c0_97 = arith.constant 0 : index
    %51 = vector.load %arg11[%c1_95, %c0_96, %c0_97] : memref<18x18x4xf32, #tpu.memory_space<vmem>>, vector<16x16x4xf32>
    %c1_98 = arith.constant 1 : index
    %c1_99 = arith.constant 1 : index
    %c0_100 = arith.constant 0 : index
    %52 = vector.load %arg11[%c1_98, %c1_99, %c0_100] : memref<18x18x4xf32, #tpu.memory_space<vmem>>, vector<16x16x4xf32>
    %c1_101 = arith.constant 1 : index
    %c2_102 = arith.constant 2 : index
    %c0_103 = arith.constant 0 : index
    %53 = vector.load %arg11[%c1_101, %c2_102, %c0_103] : memref<18x18x4xf32, #tpu.memory_space<vmem>>, vector<16x16x4xf32>
    %c2_104 = arith.constant 2 : index
    %c0_105 = arith.constant 0 : index
    %c0_106 = arith.constant 0 : index
    %54 = vector.load %arg11[%c2_104, %c0_105, %c0_106] : memref<18x18x4xf32, #tpu.memory_space<vmem>>, vector<16x16x4xf32>
    %c2_107 = arith.constant 2 : index
    %c1_108 = arith.constant 1 : index
    %c0_109 = arith.constant 0 : index
    %55 = vector.load %arg11[%c2_107, %c1_108, %c0_109] : memref<18x18x4xf32, #tpu.memory_space<vmem>>, vector<16x16x4xf32>
    %c2_110 = arith.constant 2 : index
    %c2_111 = arith.constant 2 : index
    %c0_112 = arith.constant 0 : index
    %56 = vector.load %arg11[%c2_110, %c2_111, %c0_112] : memref<18x18x4xf32, #tpu.memory_space<vmem>>, vector<16x16x4xf32>
    %57 = tpu.concatenate %48, %49, %50, %51, %52, %53, %54, %55, %56 in 2 : vector<16x16x4xf32>, vector<16x16x4xf32>, vector<16x16x4xf32>, vector<16x16x4xf32>, vector<16x16x4xf32>, vector<16x16x4xf32>, vector<16x16x4xf32>, vector<16x16x4xf32>, vector<16x16x4xf32> -> vector<16x16x36xf32>
    %c0_113 = arith.constant 0 : index
    %c0_114 = arith.constant 0 : index
    %58 = vector.load %arg7[%c0_113, %c0_114] : memref<36x4xf32, #tpu.memory_space<vmem>>, vector<36x4xf32>
    "tpu.trace_start"() <{level = 10 : i32, message = "hwc,cd->hwd"}> : () -> ()
    %cst_115 = arith.constant dense<0.000000e+00> : vector<16x16x4xf32>
    %59 = tpu.matmul %57, %58, %cst_115 {dimension_numbers = #tpu.dot_dimension_numbers<[2], [0], [0, 1], [1], [0, 0, 0, 1, 1, 1], [], []>} : vector<16x16x36xf32>, vector<36x4xf32>, vector<16x16x4xf32> -> vector<16x16x4xf32>
    "tpu.trace_stop"() : () -> ()
    %c0_116 = arith.constant 0 : index
    %c0_117 = arith.constant 0 : index
    %60 = vector.load %arg8[%c0_116, %c0_117] : memref<1x4xf32, #tpu.memory_space<vmem>>, vector<1x4xf32>
    %61 = vector.shape_cast %60 : vector<1x4xf32> to vector<4xf32>
    %62 = vector.shape_cast %61 : vector<4xf32> to vector<1x1x4xf32>
    %63 = vector.broadcast %62 : vector<1x1x4xf32> to vector<16x16x4xf32>
    %64 = arith.addf %59, %63 : vector<16x16x4xf32>
    %cst_118 = arith.constant 0.000000e+00 : f32
    %65 = vector.broadcast %cst_118 : f32 to vector<16x16x4xf32>
    %66 = arith.maximumf %64, %65 : vector<16x16x4xf32>
    %67 = vector.shape_cast %66 : vector<16x16x4xf32> to vector<1x16x16x4xf32>
    %c0_119 = arith.constant 0 : index
    %c0_120 = arith.constant 0 : index
    %c0_121 = arith.constant 0 : index
    %c0_122 = arith.constant 0 : index
    %68 = vector.load %arg9[%c0_119, %c0_120, %c0_121, %c0_122] : memref<1x16x16x4xf32, #tpu.memory_space<vmem>>, vector<1x16x16x4xf32>
    tpu.vector_store %arg9[%c0_119, %c0_120, %c0_121, %c0_122], %67 {strides = array<i32>} : memref<1x16x16x4xf32, #tpu.memory_space<vmem>>, vector<1x16x16x4xf32>,
    return
  }
  func.func @transform_0(%arg0: i32) -> (i32, i32, i32, i32) {
    %c0_i32 = arith.constant 0 : i32
    %c0_i32_0 = arith.constant 0 : i32
    %c0_i32_1 = arith.constant 0 : i32
    %c0_i32_2 = arith.constant 0 : i32
    return %arg0, %c0_i32, %c0_i32_0, %c0_i32_1 : i32, i32, i32, i32
  }
  func.func @transform_1(%arg0: i32) -> (i32, i32, i32, i32) {
    %c0_i32 = arith.constant 0 : i32
    %c0_i32_0 = arith.constant 0 : i32
    %c0_i32_1 = arith.constant 0 : i32
    %c0_i32_2 = arith.constant 0 : i32
    return %arg0, %c0_i32, %c0_i32_0, %c0_i32_1 : i32, i32, i32, i32
  }
  func.func @transform_2(%arg0: i32) -> (i32, i32) {
    %c0_i32 = arith.constant 0 : i32
    %c0_i32_0 = arith.constant 0 : i32
    %c0_i32_1 = arith.constant 0 : i32
    return %c0_i32, %c0_i32_0 : i32, i32
  }
  func.func @transform_3(%arg0: i32) -> (i32, i32) {
    %c0_i32 = arith.constant 0 : i32
    %c0_i32_0 = arith.constant 0 : i32
    %c0_i32_1 = arith.constant 0 : i32
    return %c0_i32, %c0_i32_0 : i32, i32
  }
  func.func @transform_4(%arg0: i32) -> (i32, i32) {
    %c0_i32 = arith.constant 0 : i32
    %c0_i32_0 = arith.constant 0 : i32
    %c0_i32_1 = arith.constant 0 : i32
    return %c0_i32, %c0_i32_0 : i32, i32
  }
  func.func @transform_5(%arg0: i32) -> (i32, i32) {
    %c0_i32 = arith.constant 0 : i32
    %c0_i32_0 = arith.constant 0 : i32
    %c0_i32_1 = arith.constant 0 : i32
    return %c0_i32, %c0_i32_0 : i32, i32
  }
  func.func @transform_6(%arg0: i32) -> (i32, i32) {
    %c0_i32 = arith.constant 0 : i32
    %c0_i32_0 = arith.constant 0 : i32
    %c0_i32_1 = arith.constant 0 : i32
    return %c0_i32, %c0_i32_0 : i32, i32
  }
  func.func @transform_7(%arg0: i32) -> (i32, i32) {
    %c0_i32 = arith.constant 0 : i32
    %c0_i32_0 = arith.constant 0 : i32
    %c0_i32_1 = arith.constant 0 : i32
    return %c0_i32, %c0_i32_0 : i32, i32
  }
  func.func @transform_8(%arg0: i32) -> (i32, i32, i32, i32) {
    %c0_i32 = arith.constant 0 : i32
    %c0_i32_0 = arith.constant 0 : i32
    %c0_i32_1 = arith.constant 0 : i32
    %c0_i32_2 = arith.constant 0 : i32
    return %arg0, %c0_i32, %c0_i32_0, %c0_i32_1 : i32, i32, i32, i32
  }
}

</mosaic_0001>

<bundles_post_ra>
// kernel: tpu_custom_call.1
= control target key start
LH: loop header
LB: loop body
LE: loop exit
PB: predicated region body
PF: predicated region fallthrough
CT: control target
= control target key end

     0   :  { %s7280_s27 = smov 0   ;;  %s12184_s0 = inlined_call_operand.vmem [shape: f32[2,16,16,8], index: 0, kind: input, shape index: {}]   ;;  %s12185_s1 = inlined_call_operand.vmem [shape: f32[2,16,16,4], index: 1, kind: input, shape index: {}]   ;;  %s12186_s2 = inlined_call_operand.vmem [shape: f32[72,4], index: 2, kind: input, shape index: {}]   ;;  %s12187_s3 = inlined_call_operand.vmem [shape: f32[1,4], index: 3, kind: input, shape index: {}]   ;;  %s12188_s4 = inlined_call_operand.vmem [shape: f32[72,4], index: 4, kind: input, shape index: {}]   ;;  %s12189_s5 = inlined_call_operand.vmem [shape: f32[1,4], index: 5, kind: input, shape index: {}]   ;;  %s12190_s6 = inlined_call_operand.vmem [shape: f32[36,4], index: 6, kind: input, shape index: {}]   ;;  %s12191_s7 = inlined_call_operand.vmem [shape: f32[1,4], index: 7, kind: input, shape index: {}]   ;;  %s12192_s8 = inlined_call_operand.vmem [shape: f32[2,16,16,4], index: 8, kind: output, shape index: {}]  }
   0x1 LB: > { %s6652_s28 = sadd.s32 4294967295, %s7220_s27   ;;  %p6656_p0 = scmp.ge.s32.totalorder %s7220_s27, 1  ;;  %s7220_s27 = sphi %s7280_s27, %s18_s27  }
   0x2   : > { %p272_p1 = scmp.lt.s32.totalorder %s7220_s27, 3 }
   0x4   : > { %p273_p2 = pnand %p6656_p0, %p272_p1 }
   0x6   : > { %276 = sbr.rel (%p273_p2) target bundleno = 2463 (0x99f), region = 52 }
   0xd   : > { %vm326_vm0 = vcmask 64512   ;;  %vm329_vm1 = vcmask 58368   ;;  %p7290_p3 = scmp.lt.s32.totalorder %s6652_s28, 1  ;;  %v12193_v0 = vmov 0.0   ;;  %s7223_s12 = smov 8   ;;  %vm1792_vm2 = vcmask 130048  }
   0xe   : > { %327 = vst.msk [vmem:[#allocation2] sm:$0xff] %vm326_vm0, %v12193_v0  ;;  %328 = vst.msk [vmem:[#allocation2 + $0x8] sm:$0xff] %vm326_vm0, %v12193_v0  ;;  %s7224_s13 = smov 16   ;;  %s7225_s14 = smov 24   ;;  %vm1825_vm3 = vcmask 195584   ;;  %vm1858_vm4 = vcmask 261120  }
   0xf   : > { %331 = vst.msk [vmem:[#allocation2 + $0x18] sm:$0xff] %vm326_vm0, %v12193_v0  ;;  %332 = vst.msk [vmem:[#allocation2 + $0x20] sm:$0xff] %vm326_vm0, %v12193_v0  ;;  %s13161_s28 = smov (!%p7290_p3, %s6652_s28), 1  ;;  %s7226_s15 = smov 32   ;;  %vm1891_vm5 = vcmask 326656   ;;  %vm1924_vm6 = vcmask 392192  }
  0x10   : > { %334 = vst.msk [vmem:[#allocation2 + $0x30] sm:$0xff] %vm326_vm0, %v12193_v0  ;;  %335 = vst.msk [vmem:[#allocation2 + $0x38] sm:$0xff] %vm326_vm0, %v12193_v0  ;;  %s7406_s30 = sshll.u32 %s13161_s28, 8  ;;  %s7227_s16 = smov 40   ;;  %vm1957_vm7 = vcmask 457728   ;;  %vm1990_vm8 = vcmask 523264  }
  0x11   : > { %337 = vst.msk [vmem:[#allocation2 + $0x48] sm:$0xff] %vm326_vm0, %v12193_v0  ;;  %338 = vst.msk [vmem:[#allocation2 + $0x50] sm:$0xff] %vm326_vm0, %v12193_v0  ;;  %s7412_s11 = scalar_lea.vmem %s12184_s0, %s7406_s30  ;;  %s7228_s17 = smov 48   ;;  %vm2039_vm9 = vcmask 588800   ;;  %vm2521_vm10 = vcmask 31744   ;;  %vm4525_vm11 = vcmask 25600  }
  0x12   : > { %340 = vst.msk [vmem:[#allocation2 + $0x60] sm:$0xff] %vm326_vm0, %v12193_v0  ;;  %341 = vst.msk [vmem:[#allocation2 + $0x68] sm:$0xff] %vm326_vm0, %v12193_v0  ;;  %v382_v1 = vld [vmem:[%s7412_s11] sm:$0xff]  ;;  %v384_v2 = vld [vmem:[%s7412_s11 + $0x10] sm:$0xff]  ;;  %s7229_s18 = smov 56   ;;  %s7230_s24 = smov 64  }
  0x13   : > { %343 = vst.msk [vmem:[#allocation2 + $0x78] sm:$0xff] %vm326_vm0, %v12193_v0  ;;  %344 = vst.msk [vmem:[#allocation2 + $0x80] sm:$0xff] %vm326_vm0, %v12193_v0  ;;  %v383_v3 = vld [vmem:[%s7412_s11 + $0x8] sm:$0xff]  ;;  %v386_v4 = vld [vmem:[%s7412_s11 + $0x20] sm:$0xff]  ;;  %s8529_s28 = scalar_lea.vmem %s12185_s1, %s7406_s30  ;;  %s7231_s29 = smov 4   ;;  %vm6292_vm12 = vcmask 1043456  }
  0x14   : > { %346 = vst.msk [vmem:[#allocation2 + $0x90] sm:$0xff] %vm326_vm0, %v12193_v0  ;;  %347 = vst.msk [vmem:[#allocation2 + $0x98] sm:$0xff] %vm326_vm0, %v12193_v0  ;;  %v385_v5 = vld [vmem:[%s7412_s11 + $0x18] sm:$0xff]  ;;  %v388_v6 = vld [vmem:[%s7412_s11 + $0x30] sm:$0xff]  ;;  %s7233_s26 = smov 20   ;;  %s7234_s20 = smov 28  }
  0x15   : > { %349 = vst.msk [vmem:[#allocation2 + $0xa8] sm:$0xff] %vm326_vm0, %v12193_v0  ;;  %350 = vst.msk [vmem:[#allocation2 + $0xb0] sm:$0xff] %vm326_vm0, %v12193_v0  ;;  %v479_v7 = vld [vmem:[#allocation2 + $0x1] sm:$0xff]  ;;  %v389_v11 = vld [vmem:[%s7412_s11 + $0x38] sm:$0xff]  ;;  %vm5988_vm13 = vcmask 97280   ;;  %vm6053_vm14 = vcmask 162816   ;;  %s11977_s22 = scalar_lea.vmem %s12192_s8, %s7406_s30 }
  0x16   : > { %352 = vst.msk [vmem:[#allocation2 + $0xc0] sm:$0xff] %vm326_vm0, %v12193_v0  ;;  %353 = vst.msk [vmem:[#allocation2 + $0xc8] sm:$0xff] %vm326_vm0, %v12193_v0  ;;  %v387_v9 = vld [vmem:[%s7412_s11 + $0x28] sm:$0xff]  ;;  %768 = vrot.lane.b32.xlu0 %v479_v7, %s7223_s12  ;;  %v390_v10 = vld [vmem:[%s7412_s11 + $0x40] sm:$0xff]  ;;  %vm6118_vm15 = vcmask 228352  }
  0x17   : > { %355 = vst.msk [vmem:[#allocation2 + $0xd8] sm:$0xff] %vm326_vm0, %v12193_v0  ;;  %356 = vst.msk [vmem:[#allocation2 + $0xe0] sm:$0xff] %vm326_vm0, %v12193_v0  ;;  %v392_v12 = vld [vmem:[%s7412_s11 + $0x50] sm:$0xff]  ;;  %v391_v13 = vld [vmem:[%s7412_s11 + $0x48] sm:$0xff] }
  0x18   : > { %358 = vst.msk [vmem:[#allocation2 + $0xf0] sm:$0xff] %vm326_vm0, %v12193_v0  ;;  %359 = vst.msk [vmem:[#allocation2 + $0xf8] sm:$0xff] %vm326_vm0, %v12193_v0  ;;  %v394_v14 = vld [vmem:[%s7412_s11 + $0x60] sm:$0xff]  ;;  %v393_v15 = vld [vmem:[%s7412_s11 + $0x58] sm:$0xff] }
  0x19   : > { %361 = vst.msk [vmem:[#allocation2 + $0x108] sm:$0xff] %vm326_vm0, %v12193_v0  ;;  %362 = vst.msk [vmem:[#allocation2 + $0x110] sm:$0xff] %vm326_vm0, %v12193_v0  ;;  %v396_v16 = vld [vmem:[%s7412_s11 + $0x70] sm:$0xff]  ;;  %v395_v17 = vld [vmem:[%s7412_s11 + $0x68] sm:$0xff] }
  0x1a   : > { %364 = vst.msk [vmem:[#allocation2 + $0x120] sm:$0xff] %vm326_vm0, %v12193_v0  ;;  %365 = vst.msk [vmem:[#allocation2 + $0x128] sm:$0xff] %vm326_vm0, %v12193_v0  ;;  %v398_v18 = vld [vmem:[%s7412_s11 + $0x80] sm:$0xff]  ;;  %v397_v19 = vld [vmem:[%s7412_s11 + $0x78] sm:$0xff] }
  0x1b   : > { %367 = vst.msk [vmem:[#allocation2 + $0x138] sm:$0xff] %vm326_vm0, %v12193_v0  ;;  %368 = vst.msk [vmem:[#allocation2 + $0x140] sm:$0xff] %vm326_vm0, %v12193_v0  ;;  %v400_v20 = vld [vmem:[%s7412_s11 + $0x90] sm:$0xff]  ;;  %v399_v21 = vld [vmem:[%s7412_s11 + $0x88] sm:$0xff] }
  0x1c   : > { %370 = vst.msk [vmem:[#allocation2 + $0x150] sm:$0xff] %vm326_vm0, %v12193_v0  ;;  %371 = vst.msk [vmem:[#allocation2 + $0x158] sm:$0xff] %vm326_vm0, %v12193_v0  ;;  %v402_v22 = vld [vmem:[%s7412_s11 + $0xa0] sm:$0xff]  ;;  %v401_v23 = vld [vmem:[%s7412_s11 + $0x98] sm:$0xff] }
  0x1d   : > { %373 = vst.msk [vmem:[#allocation2 + $0x168] sm:$0xff] %vm326_vm0, %v12193_v0  ;;  %374 = vst.msk [vmem:[#allocation2 + $0x170] sm:$0xff] %vm326_vm0, %v12193_v0  ;;  %v404_v24 = vld [vmem:[%s7412_s11 + $0xb0] sm:$0xff]  ;;  %v403_v28 = vld [vmem:[%s7412_s11 + $0xa8] sm:$0xff] }
  0x1e   : > { %376 = vst.msk [vmem:[#allocation2 + $0x180] sm:$0xff] %vm326_vm0, %v12193_v0  ;;  %377 = vst.msk [vmem:[#allocation2 + $0x188] sm:$0xff] %vm326_vm0, %v12193_v0  ;;  %v406_v29 = vld [vmem:[%s7412_s11 + $0xc0] sm:$0xff]  ;;  %v405_v33 = vld [vmem:[%s7412_s11 + $0xb8] sm:$0xff] }
  0x1f   : > { %379 = vst.msk [vmem:[#allocation2 + $0x198] sm:$0xff] %vm326_vm0, %v12193_v0  ;;  %380 = vst.msk [vmem:[#allocation2 + $0x1a0] sm:$0xff] %vm326_vm0, %v12193_v0  ;;  %v408_v34 = vld [vmem:[%s7412_s11 + $0xd0] sm:$0xff]  ;;  %v407_v35 = vld [vmem:[%s7412_s11 + $0xc8] sm:$0xff] }
  0x20   : > { %330 = vst.msk [vmem:[#allocation2 + $0x10] sm:$0x3] %vm329_vm1, %v12193_v0  ;;  %333 = vst.msk [vmem:[#allocation2 + $0x28] sm:$0x3] %vm329_vm1, %v12193_v0  ;;  %v410_v36 = vld [vmem:[%s7412_s11 + $0xe0] sm:$0xff]  ;;  %v409_v37 = vld [vmem:[%s7412_s11 + $0xd8] sm:$0xff] }
  0x21   : > { %336 = vst.msk [vmem:[#allocation2 + $0x40] sm:$0x3] %vm329_vm1, %v12193_v0  ;;  %339 = vst.msk [vmem:[#allocation2 + $0x58] sm:$0x3] %vm329_vm1, %v12193_v0  ;;  %v411_v39 = vld [vmem:[%s7412_s11 + $0xe8] sm:$0xff]  ;;  %v412_v58 = vld [vmem:[%s7412_s11 + $0xf0] sm:$0xff] }
  0x22   : > { %342 = vst.msk [vmem:[#allocation2 + $0x70] sm:$0x3] %vm329_vm1, %v12193_v0  ;;  %345 = vst.msk [vmem:[#allocation2 + $0x88] sm:$0x3] %vm329_vm1, %v12193_v0  ;;  %v413_v62 = vld [vmem:[%s7412_s11 + $0xf8] sm:$0xff] }
  0x23   : > { %348 = vst.msk [vmem:[#allocation2 + $0xa0] sm:$0x3] %vm329_vm1, %v12193_v0  ;;  %351 = vst.msk [vmem:[#allocation2 + $0xb8] sm:$0x3] %vm329_vm1, %v12193_v0 }
  0x24   : > { %354 = vst.msk [vmem:[#allocation2 + $0xd0] sm:$0x3] %vm329_vm1, %v12193_v0  ;;  %357 = vst.msk [vmem:[#allocation2 + $0xe8] sm:$0x3] %vm329_vm1, %v12193_v0 }
  0x25   : > { %360 = vst.msk [vmem:[#allocation2 + $0x100] sm:$0x3] %vm329_vm1, %v12193_v0  ;;  %363 = vst.msk [vmem:[#allocation2 + $0x118] sm:$0x3] %vm329_vm1, %v12193_v0 }
  0x26   : > { %366 = vst.msk [vmem:[#allocation2 + $0x130] sm:$0x3] %vm329_vm1, %v12193_v0  ;;  %369 = vst.msk [vmem:[#allocation2 + $0x148] sm:$0x3] %vm329_vm1, %v12193_v0 }
  0x27   : > { %372 = vst.msk [vmem:[#allocation2 + $0x160] sm:$0x3] %vm329_vm1, %v12193_v0  ;;  %375 = vst.msk [vmem:[#allocation2 + $0x178] sm:$0x3] %vm329_vm1, %v12193_v0  ;;  %v480_v8 = vld [vmem:[#allocation2 + $0x9] sm:$0xff] }
  0x28   : > { %378 = vst.msk [vmem:[#allocation2 + $0x190] sm:$0x3] %vm329_vm1, %v12193_v0  ;;  %381 = vst.msk [vmem:[#allocation2 + $0x1a8] sm:$0x3] %vm329_vm1, %v12193_v0  ;;  %770 = vrot.lane.b32.xlu0 %v480_v8, %s7223_s12  ;;  %vm6195_vm1 = vcmask 293888  }
  0x29   : > { %415 = vst.msk [vmem:[#allocation2 + $0x19] sm:$0xff] %vm326_vm0, %v382_v1  ;;  %417 = vst.msk [vmem:[#allocation2 + $0x31] sm:$0xff] %vm326_vm0, %v384_v2  ;;  %v511_v1 = vld [vmem:[#allocation2 + $0x2] sm:$0xff] }
  0x2a   : > { %416 = vst.msk [vmem:[#allocation2 + $0x21] sm:$0xff] %vm326_vm0, %v383_v3  ;;  %419 = vst.msk [vmem:[#allocation2 + $0x49] sm:$0xff] %vm326_vm0, %v386_v4  ;;  %v512_v4 = vld [vmem:[#allocation2 + $0xa] sm:$0xff] }
  0x2b   : > { %418 = vst.msk [vmem:[#allocation2 + $0x39] sm:$0xff] %vm326_vm0, %v385_v5  ;;  %421 = vst.msk [vmem:[#allocation2 + $0x61] sm:$0xff] %vm326_vm0, %v388_v6 }
  0x2c   : > { %420 = vst.msk [vmem:[#allocation2 + $0x51] sm:$0xff] %vm326_vm0, %v387_v9  ;;  %423 = vst.msk [vmem:[#allocation2 + $0x79] sm:$0xff] %vm326_vm0, %v390_v10 }
  0x2d   : > { %422 = vst.msk [vmem:[#allocation2 + $0x69] sm:$0xff] %vm326_vm0, %v389_v11  ;;  %425 = vst.msk [vmem:[#allocation2 + $0x91] sm:$0xff] %vm326_vm0, %v392_v12 }
  0x2e   : > { %424 = vst.msk [vmem:[#allocation2 + $0x81] sm:$0xff] %vm326_vm0, %v391_v13  ;;  %427 = vst.msk [vmem:[#allocation2 + $0xa9] sm:$0xff] %vm326_vm0, %v394_v14 }
  0x2f   : > { %426 = vst.msk [vmem:[#allocation2 + $0x99] sm:$0xff] %vm326_vm0, %v393_v15  ;;  %429 = vst.msk [vmem:[#allocation2 + $0xc1] sm:$0xff] %vm326_vm0, %v396_v16 }
  0x30   : > { %428 = vst.msk [vmem:[#allocation2 + $0xb1] sm:$0xff] %vm326_vm0, %v395_v17  ;;  %431 = vst.msk [vmem:[#allocation2 + $0xd9] sm:$0xff] %vm326_vm0, %v398_v18  ;;  %v7457_v25 = vld [vmem:[#allocation2 + $0x19] sm:$0xff]  ;;  %v7459_v26 = vld [vmem:[#allocation2 + $0x31] sm:$0xff] }
  0x31   : > { %430 = vst.msk [vmem:[#allocation2 + $0xc9] sm:$0xff] %vm326_vm0, %v397_v19  ;;  %433 = vst.msk [vmem:[#allocation2 + $0xf1] sm:$0xff] %vm326_vm0, %v400_v20  ;;  %772 = vrot.lane.b32.xlu1 %v7457_v25, %s7223_s12  ;;  %v7466_v27 = vld [vmem:[#allocation2 + $0x21] sm:$0xff]  ;;  %776 = vrot.lane.b32.xlu0 %v7459_v26, %s7223_s12  ;;  %v7474_v30 = vld [vmem:[#allocation2 + $0x49] sm:$0xff] }
  0x32   : > { %432 = vst.msk [vmem:[#allocation2 + $0xe1] sm:$0xff] %vm326_vm0, %v399_v21  ;;  %435 = vst.msk [vmem:[#allocation2 + $0x109] sm:$0xff] %vm326_vm0, %v402_v22  ;;  %v7478_v31 = vld [vmem:[#allocation2 + $0x39] sm:$0xff]  ;;  %v7482_v32 = vld [vmem:[#allocation2 + $0x61] sm:$0xff] }
  0x33   : > { %434 = vst.msk [vmem:[#allocation2 + $0xf9] sm:$0xff] %vm326_vm0, %v401_v23  ;;  %437 = vst.msk [vmem:[#allocation2 + $0x121] sm:$0xff] %vm326_vm0, %v404_v24  ;;  %v7494_v38 = vld [vmem:[#allocation2 + $0x51] sm:$0xff]  ;;  %v7502_v40 = vld [vmem:[#allocation2 + $0x79] sm:$0xff] }
  0x34   : > { %436 = vst.msk [vmem:[#allocation2 + $0x111] sm:$0xff] %vm326_vm0, %v403_v28  ;;  %439 = vst.msk [vmem:[#allocation2 + $0x139] sm:$0xff] %vm326_vm0, %v406_v29  ;;  %v7506_v41 = vld [vmem:[#allocation2 + $0x69] sm:$0xff]  ;;  %v7510_v42 = vld [vmem:[#allocation2 + $0x91] sm:$0xff] }
  0x35   : > { %774 = vrot.lane.b32.xlu1 %v7466_v27, %s7223_s12  ;;  %780 = vrot.lane.b32.xlu0 %v7474_v30, %s7223_s12  ;;  %438 = vst.msk [vmem:[#allocation2 + $0x129] sm:$0xff] %vm326_vm0, %v405_v33  ;;  %441 = vst.msk [vmem:[#allocation2 + $0x151] sm:$0xff] %vm326_vm0, %v408_v34  ;;  %v7514_v43 = vld [vmem:[#allocation2 + $0x81] sm:$0xff]  ;;  %v7518_v44 = vld [vmem:[#allocation2 + $0xa9] sm:$0xff] }
  0x36   : > { %440 = vst.msk [vmem:[#allocation2 + $0x141] sm:$0xff] %vm326_vm0, %v407_v35  ;;  %443 = vst.msk [vmem:[#allocation2 + $0x169] sm:$0xff] %vm326_vm0, %v410_v36  ;;  %v7522_v45 = vld [vmem:[#allocation2 + $0x99] sm:$0xff]  ;;  %v7526_v46 = vld [vmem:[#allocation2 + $0xc1] sm:$0xff] }
  0x37   : > { %442 = vst.msk [vmem:[#allocation2 + $0x159] sm:$0xff] %vm326_vm0, %v409_v37  ;;  %444 = vst.msk [vmem:[#allocation2 + $0x171] sm:$0xff] %vm326_vm0, %v411_v39  ;;  %v7530_v47 = vld [vmem:[#allocation2 + $0xb1] sm:$0xff]  ;;  %v7534_v48 = vld [vmem:[#allocation2 + $0xd9] sm:$0xff] }
  0x38   : > { %v7538_v49 = vld [vmem:[#allocation2 + $0xc9] sm:$0xff]  ;;  %v7542_v50 = vld [vmem:[#allocation2 + $0xf1] sm:$0xff]  ;;  %445 = vst.msk [vmem:[#allocation2 + $0x181] sm:$0xff] %vm326_vm0, %v412_v58  ;;  %446 = vst.msk [vmem:[#allocation2 + $0x189] sm:$0xff] %vm326_vm0, %v413_v62 }
  0x39   : > { %778 = vrot.lane.b32.xlu1 %v7478_v31, %s7223_s12  ;;  %784 = vrot.lane.b32.xlu0 %v7482_v32, %s7223_s12  ;;  %v7546_v51 = vld [vmem:[#allocation2 + $0xe1] sm:$0xff]  ;;  %v7550_v52 = vld [vmem:[#allocation2 + $0x109] sm:$0xff]  ;;  %v7605_v5 = vld [vmem:[#allocation2 + $0x32] sm:$0xff] }
  0x3a   : > { %v7554_v53 = vld [vmem:[#allocation2 + $0xf9] sm:$0xff]  ;;  %v7558_v54 = vld [vmem:[#allocation2 + $0x121] sm:$0xff]  ;;  %v7612_v7 = vld [vmem:[#allocation2 + $0x4a] sm:$0xff] }
  0x3b   : > { %v7562_v55 = vld [vmem:[#allocation2 + $0x111] sm:$0xff]  ;;  %v7566_v56 = vld [vmem:[#allocation2 + $0x139] sm:$0xff]  ;;  %v7608_v6 = vld [vmem:[#allocation2 + $0x22] sm:$0xff] }
  0x3c   : > { %v7570_v57 = vld [vmem:[#allocation2 + $0x129] sm:$0xff]  ;;  %v7576_v59 = vld [vmem:[#allocation2 + $0x151] sm:$0xff]  ;;  %v7599_v3 = vld [vmem:[#allocation2 + $0x1a] sm:$0xff] }
  0x3d   : > { %782 = vrot.lane.b32.xlu1 %v7494_v38, %s7223_s12  ;;  %788 = vrot.lane.b32.xlu0 %v7502_v40, %s7223_s12  ;;  %v7580_v60 = vld [vmem:[#allocation2 + $0x141] sm:$0xff]  ;;  %v7584_v61 = vld [vmem:[#allocation2 + $0x169] sm:$0xff]  ;;  %v7624_v10 = vld [vmem:[#allocation2 + $0x52] sm:$0xff] }
  0x3e   : > { %v7590_v63 = vld [vmem:[#allocation2 + $0x159] sm:$0xff]  ;;  %v7596_v2 = vld [vmem:[#allocation2 + $0x171] sm:$0xff]  ;;  %v7620_v9 = vld [vmem:[#allocation2 + $0x62] sm:$0xff] }
  0x3f   : > { %v7616_v8 = vld [vmem:[#allocation2 + $0x3a] sm:$0xff]  ;;  %v7632_v12 = vld [vmem:[#allocation2 + $0x6a] sm:$0xff]  ;;  %v7636_v13 = vld [vmem:[#allocation2 + $0x92] sm:$0xff] }
  0x40   : > { %v7628_v11 = vld [vmem:[#allocation2 + $0x7a] sm:$0xff]  ;;  %v7640_v14 = vld [vmem:[#allocation2 + $0x82] sm:$0xff]  ;;  %v7644_v15 = vld [vmem:[#allocation2 + $0xaa] sm:$0xff] }
  0x41   : > { %786 = vrot.lane.b32.xlu1 %v7506_v41, %s7223_s12  ;;  %792 = vrot.lane.b32.xlu0 %v7510_v42, %s7223_s12  ;;  %v7648_v16 = vld [vmem:[#allocation2 + $0x9a] sm:$0xff]  ;;  %v7652_v17 = vld [vmem:[#allocation2 + $0xc2] sm:$0xff]  ;;  %v7656_v18 = vld [vmem:[#allocation2 + $0xb2] sm:$0xff] }
  0x42   : > { %v7660_v19 = vld [vmem:[#allocation2 + $0xda] sm:$0xff]  ;;  %v7664_v20 = vld [vmem:[#allocation2 + $0xca] sm:$0xff]  ;;  %v7668_v21 = vld [vmem:[#allocation2 + $0xf2] sm:$0xff] }
  0x43   : > { %v7672_v22 = vld [vmem:[#allocation2 + $0xe2] sm:$0xff]  ;;  %v7676_v23 = vld [vmem:[#allocation2 + $0x10a] sm:$0xff]  ;;  %v7680_v24 = vld [vmem:[#allocation2 + $0xfa] sm:$0xff] }
  0x44   : > { %v7684_v28 = vld [vmem:[#allocation2 + $0x122] sm:$0xff]  ;;  %v7688_v29 = vld [vmem:[#allocation2 + $0x112] sm:$0xff]  ;;  %v7692_v33 = vld [vmem:[#allocation2 + $0x13a] sm:$0xff] }
  0x45   : > { %790 = vrot.lane.b32.xlu1 %v7514_v43, %s7223_s12  ;;  %796 = vrot.lane.b32.xlu0 %v7518_v44, %s7223_s12  ;;  %v7698_v35 = vld [vmem:[#allocation2 + $0x12a] sm:$0xff]  ;;  %v7702_v36 = vld [vmem:[#allocation2 + $0x152] sm:$0xff]  ;;  %v7708_v39 = vld [vmem:[#allocation2 + $0x142] sm:$0xff] }
  0x46   : > { %12266 = vst [vmem:[#allocation6_spill] sm:$0xff] %v7708_v39  ;;  %v7714_v62 = vld [vmem:[#allocation2 + $0x16a] sm:$0xff] }
  0x47   : > { %12268 = vst [vmem:[#allocation8_spill] sm:$0xff] %v7714_v62 }
  0x49   : > { %794 = vrot.lane.b32.xlu1 %v7522_v45, %s7223_s12  ;;  %800 = vrot.lane.b32.xlu0 %v7526_v46, %s7223_s12 }
  0x4d   : > { %798 = vrot.lane.b32.xlu1 %v7530_v47, %s7223_s12  ;;  %804 = vrot.lane.b32.xlu0 %v7534_v48, %s7223_s12 }
  0x51   : > { %802 = vrot.lane.b32.xlu1 %v7538_v49, %s7223_s12  ;;  %808 = vrot.lane.b32.xlu0 %v7542_v50, %s7223_s12 }
  0x55   : > { %806 = vrot.lane.b32.xlu1 %v7546_v51, %s7223_s12  ;;  %812 = vrot.lane.b32.xlu0 %v7550_v52, %s7223_s12 }
  0x59   : > { %810 = vrot.lane.b32.xlu1 %v7554_v53, %s7223_s12  ;;  %816 = vrot.lane.b32.xlu0 %v7558_v54, %s7223_s12 }
  0x5d   : > { %814 = vrot.lane.b32.xlu1 %v7562_v55, %s7223_s12  ;;  %820 = vrot.lane.b32.xlu0 %v7566_v56, %s7223_s12 }
  0x61   : > { %818 = vrot.lane.b32.xlu1 %v7570_v57, %s7223_s12  ;;  %824 = vrot.lane.b32.xlu0 %v7576_v59, %s7223_s12 }
  0x65   : > { %822 = vrot.lane.b32.xlu1 %v7580_v60, %s7223_s12  ;;  %828 = vrot.lane.b32.xlu0 %v7584_v61, %s7223_s12 }
  0x69   : > { %826 = vrot.lane.b32.xlu1 %v7590_v63, %s7223_s12  ;;  %896 = vrot.lane.b32.xlu0 %v511_v1, %s7224_s13 }
  0x6d   : > { %830 = vrot.lane.b32.xlu1 %v7596_v2, %s7223_s12  ;;  %900 = vrot.lane.b32.xlu0 %v7599_v3, %s7224_s13 }
  0x71   : > { %898 = vrot.lane.b32.xlu1 %v512_v4, %s7224_s13  ;;  %904 = vrot.lane.b32.xlu0 %v7605_v5, %s7224_s13  ;;  %v7720_v4 = vld [vmem:[#allocation2 + $0x15a] sm:$0xff] }
  0x72   : > { %12270 = vst [vmem:[#allocation10_spill] sm:$0xff] %v7720_v4 }
  0x75   : > { %902 = vrot.lane.b32.xlu1 %v7608_v6, %s7224_s13  ;;  %908 = vrot.lane.b32.xlu0 %v7612_v7, %s7224_s13 }
  0x79   : > { %906 = vrot.lane.b32.xlu1 %v7616_v8, %s7224_s13  ;;  %912 = vrot.lane.b32.xlu0 %v7620_v9, %s7224_s13 }
  0x7d   : > { %910 = vrot.lane.b32.xlu1 %v7624_v10, %s7224_s13  ;;  %916 = vrot.lane.b32.xlu0 %v7628_v11, %s7224_s13 }
  0x81   : > { %914 = vrot.lane.b32.xlu1 %v7632_v12, %s7224_s13  ;;  %920 = vrot.lane.b32.xlu0 %v7636_v13, %s7224_s13 }
  0x85   : > { %918 = vrot.lane.b32.xlu1 %v7640_v14, %s7224_s13  ;;  %924 = vrot.lane.b32.xlu0 %v7644_v15, %s7224_s13 }
  0x88   : > { %v7694_v34 = vpop.permute.xlu0 %768 }
  0x89   : > { %922 = vrot.lane.b32.xlu1 %v7648_v16, %s7224_s13  ;;  %928 = vrot.lane.b32.xlu0 %v7652_v17, %s7224_s13  ;;  %12264 = vst [vmem:[#allocation4_spill] sm:$0xff] %v7694_v34  ;;  %v7730_v34 = vld [vmem:[#allocation2 + $0x172] sm:$0xff] }
  0x8a   : > { %12273 = vst [vmem:[#allocation13_spill] sm:$0xff] %v7730_v34 }
  0x8d   : > { %926 = vrot.lane.b32.xlu1 %v7656_v18, %s7224_s13  ;;  %932 = vrot.lane.b32.xlu0 %v7660_v19, %s7224_s13 }
  0x91   : > { %930 = vrot.lane.b32.xlu1 %v7664_v20, %s7224_s13  ;;  %936 = vrot.lane.b32.xlu0 %v7668_v21, %s7224_s13 }
  0x95   : > { %934 = vrot.lane.b32.xlu1 %v7672_v22, %s7224_s13  ;;  %940 = vrot.lane.b32.xlu0 %v7676_v23, %s7224_s13 }
  0x99   : > { %938 = vrot.lane.b32.xlu1 %v7680_v24, %s7224_s13  ;;  %944 = vrot.lane.b32.xlu0 %v7684_v28, %s7224_s13 }
  0x9a   : > { %v7704_v37 = vpop.permute.xlu0 %770 }
  0x9b   : > { %12265 = vst [vmem:[#allocation5_spill] sm:$0xff] %v7704_v37 }
  0x9d   : > { %942 = vrot.lane.b32.xlu1 %v7688_v29, %s7224_s13  ;;  %948 = vrot.lane.b32.xlu0 %v7692_v33, %s7224_s13 }
  0xa1   : > { %946 = vrot.lane.b32.xlu1 %v7698_v35, %s7224_s13  ;;  %952 = vrot.lane.b32.xlu0 %v7702_v36, %s7224_s13 }
  0xa3   : > { %v7712_v58 = vpop.permute.xlu1 %772  ;;  %v7716_v1 = vpop.permute.xlu0 %776 }
  0xa4   : > { %12267 = vst [vmem:[#allocation7_spill] sm:$0xff] %v7712_v58  ;;  %12269 = vst [vmem:[#allocation9_spill] sm:$0xff] %v7716_v1  ;;  %v449_v58 = vld [vmem:[#allocation2 + $0x18] sm:$0xff] }
  0xa5   : > { %950 = vrot.lane.b32.xlu1 %v7708_v39, %s7224_s13  ;;  %956 = vrot.lane.b32.xlu0 %v7714_v62, %s7224_s13  ;;  %v7739_v62 = vld [vmem:[#allocation2 + $0x30] sm:$0xff] }
  0xa6   : > { %12276 = vst [vmem:[#allocation16_spill] sm:$0xff] %v7739_v62 }
  0xa7   : > { %v7724_v0 = vpop.permute.xlu1 %774  ;;  %v7726_v37 = vpop.permute.xlu0 %780 }
  0xa8   : > { %12271 = vst [vmem:[#allocation11_spill] sm:$0xff] %v7724_v0  ;;  %12272 = vst [vmem:[#allocation12_spill] sm:$0xff] %v7726_v37  ;;  %v450_v0 = vld [vmem:[#allocation2 + $0x20] sm:$0xff] }
  0xa9   : > { %954 = vrot.lane.b32.xlu1 %v7720_v4, %s7224_s13  ;;  %1024 = vrot.lane.b32.xlu0 %v449_v58, %s7225_s14  ;;  %v7748_v58 = vld [vmem:[#allocation2 + $0x48] sm:$0xff] }
  0xaa   : > { %12279 = vst [vmem:[#allocation19_spill] sm:$0xff] %v7748_v58 }
  0xab   : > { %v7733_v1 = vpop.permute.xlu1 %778  ;;  %v7735_v39 = vpop.permute.xlu0 %784 }
  0xac   : > { %12274 = vst [vmem:[#allocation14_spill] sm:$0xff] %v7733_v1  ;;  %12275 = vst [vmem:[#allocation15_spill] sm:$0xff] %v7735_v39  ;;  %v7754_v1 = vld [vmem:[#allocation2 + $0x38] sm:$0xff] }
  0xad   : > { %958 = vrot.lane.b32.xlu1 %v7730_v34, %s7224_s13  ;;  %1028 = vrot.lane.b32.xlu0 %v7739_v62, %s7225_s14  ;;  %12281 = vst [vmem:[#allocation21_spill] sm:$0xff] %v7754_v1 }
  0xaf   : > { %v7743_v37 = vpop.permute.xlu1 %782  ;;  %v7745_v4 = vpop.permute.xlu0 %788 }
  0xb0   : > { %12277 = vst [vmem:[#allocation17_spill] sm:$0xff] %v7743_v37  ;;  %12278 = vst [vmem:[#allocation18_spill] sm:$0xff] %v7745_v4  ;;  %v7760_v37 = vld [vmem:[#allocation2 + $0x60] sm:$0xff]  ;;  %v7766_v4 = vld [vmem:[#allocation2 + $0x50] sm:$0xff] }
  0xb1   : > { %1026 = vrot.lane.b32.xlu1 %v450_v0, %s7225_s14  ;;  %1032 = vrot.lane.b32.xlu0 %v7748_v58, %s7225_s14  ;;  %12283 = vst [vmem:[#allocation23_spill] sm:$0xff] %v7760_v37  ;;  %12285 = vst [vmem:[#allocation25_spill] sm:$0xff] %v7766_v4 }
  0xb3   : > { %v7752_v39 = vpop.permute.xlu1 %786  ;;  %v7756_v34 = vpop.permute.xlu0 %792 }
  0xb4   : > { %12280 = vst [vmem:[#allocation20_spill] sm:$0xff] %v7752_v39  ;;  %12282 = vst [vmem:[#allocation22_spill] sm:$0xff] %v7756_v34  ;;  %v7772_v39 = vld [vmem:[#allocation2 + $0x78] sm:$0xff] }
  0xb5   : > { %1030 = vrot.lane.b32.xlu1 %v7754_v1, %s7225_s14  ;;  %1036 = vrot.lane.b32.xlu0 %v7760_v37, %s7225_s14  ;;  %12287 = vst [vmem:[#allocation27_spill] sm:$0xff] %v7772_v39  ;;  %v7778_v1 = vld [vmem:[#allocation2 + $0x68] sm:$0xff] }
  0xb6   : > { %12289 = vst [vmem:[#allocation29_spill] sm:$0xff] %v7778_v1 }
  0xb7   : > { %v7764_v0 = vpop.permute.xlu1 %790  ;;  %v7768_v62 = vpop.permute.xlu0 %796 }
  0xb8   : > { %12284 = vst [vmem:[#allocation24_spill] sm:$0xff] %v7764_v0  ;;  %12286 = vst [vmem:[#allocation26_spill] sm:$0xff] %v7768_v62  ;;  %v7784_v0 = vld [vmem:[#allocation2 + $0x90] sm:$0xff] }
  0xb9   : > { %1034 = vrot.lane.b32.xlu1 %v7766_v4, %s7225_s14  ;;  %1040 = vrot.lane.b32.xlu0 %v7772_v39, %s7225_s14  ;;  %12291 = vst [vmem:[#allocation31_spill] sm:$0xff] %v7784_v0  ;;  %v7790_v4 = vld [vmem:[#allocation2 + $0x80] sm:$0xff] }
  0xba   : > { %12293 = vst [vmem:[#allocation33_spill] sm:$0xff] %v7790_v4 }
  0xbb   : > { %v7776_v34 = vpop.permute.xlu1 %794  ;;  %v7780_v58 = vpop.permute.xlu0 %800 }
  0xbc   : > { %12288 = vst [vmem:[#allocation28_spill] sm:$0xff] %v7776_v34  ;;  %12290 = vst [vmem:[#allocation30_spill] sm:$0xff] %v7780_v58  ;;  %v7796_v34 = vld [vmem:[#allocation2 + $0xa8] sm:$0xff] }
  0xbd   : > { %1038 = vrot.lane.b32.xlu1 %v7778_v1, %s7225_s14  ;;  %1044 = vrot.lane.b32.xlu0 %v7784_v0, %s7225_s14  ;;  %12295 = vst [vmem:[#allocation35_spill] sm:$0xff] %v7796_v34  ;;  %v7802_v1 = vld [vmem:[#allocation2 + $0x98] sm:$0xff] }
  0xbe   : > { %12297 = vst [vmem:[#allocation37_spill] sm:$0xff] %v7802_v1 }
  0xbf   : > { %v7788_v62 = vpop.permute.xlu1 %798  ;;  %v7792_v37 = vpop.permute.xlu0 %804 }
  0xc0   : > { %12292 = vst [vmem:[#allocation32_spill] sm:$0xff] %v7788_v62  ;;  %12294 = vst [vmem:[#allocation34_spill] sm:$0xff] %v7792_v37  ;;  %v7808_v62 = vld [vmem:[#allocation2 + $0xc0] sm:$0xff] }
  0xc1   : > { %1042 = vrot.lane.b32.xlu1 %v7790_v4, %s7225_s14  ;;  %1048 = vrot.lane.b32.xlu0 %v7796_v34, %s7225_s14  ;;  %12299 = vst [vmem:[#allocation39_spill] sm:$0xff] %v7808_v62  ;;  %v7814_v4 = vld [vmem:[#allocation2 + $0xb0] sm:$0xff] }
  0xc2   : > { %12301 = vst [vmem:[#allocation41_spill] sm:$0xff] %v7814_v4 }
  0xc3   : > { %v7800_v58 = vpop.permute.xlu1 %802  ;;  %v7804_v39 = vpop.permute.xlu0 %808 }
  0xc4   : > { %12296 = vst [vmem:[#allocation36_spill] sm:$0xff] %v7800_v58  ;;  %12298 = vst [vmem:[#allocation38_spill] sm:$0xff] %v7804_v39  ;;  %v7820_v58 = vld [vmem:[#allocation2 + $0xd8] sm:$0xff] }
  0xc5   : > { %1046 = vrot.lane.b32.xlu1 %v7802_v1, %s7225_s14  ;;  %1052 = vrot.lane.b32.xlu0 %v7808_v62, %s7225_s14  ;;  %12303 = vst [vmem:[#allocation43_spill] sm:$0xff] %v7820_v58  ;;  %v7826_v1 = vld [vmem:[#allocation2 + $0xc8] sm:$0xff] }
  0xc6   : > { %12305 = vst [vmem:[#allocation45_spill] sm:$0xff] %v7826_v1 }
  0xc7   : > { %v7812_v37 = vpop.permute.xlu1 %806  ;;  %v7816_v0 = vpop.permute.xlu0 %812 }
  0xc8   : > { %12300 = vst [vmem:[#allocation40_spill] sm:$0xff] %v7812_v37  ;;  %12302 = vst [vmem:[#allocation42_spill] sm:$0xff] %v7816_v0  ;;  %v7832_v37 = vld [vmem:[#allocation2 + $0xf0] sm:$0xff] }
  0xc9   : > { %1050 = vrot.lane.b32.xlu1 %v7814_v4, %s7225_s14  ;;  %1056 = vrot.lane.b32.xlu0 %v7820_v58, %s7225_s14  ;;  %12307 = vst [vmem:[#allocation47_spill] sm:$0xff] %v7832_v37  ;;  %v7838_v4 = vld [vmem:[#allocation2 + $0xe0] sm:$0xff] }
  0xca   : > { %12309 = vst [vmem:[#allocation49_spill] sm:$0xff] %v7838_v4 }
  0xcb   : > { %v7824_v39 = vpop.permute.xlu1 %810  ;;  %v7828_v34 = vpop.permute.xlu0 %816 }
  0xcc   : > { %12304 = vst [vmem:[#allocation44_spill] sm:$0xff] %v7824_v39  ;;  %12306 = vst [vmem:[#allocation46_spill] sm:$0xff] %v7828_v34  ;;  %v7844_v39 = vld [vmem:[#allocation2 + $0x108] sm:$0xff] }
  0xcd   : > { %1054 = vrot.lane.b32.xlu1 %v7826_v1, %s7225_s14  ;;  %1060 = vrot.lane.b32.xlu0 %v7832_v37, %s7225_s14  ;;  %12311 = vst [vmem:[#allocation51_spill] sm:$0xff] %v7844_v39  ;;  %v7850_v1 = vld [vmem:[#allocation2 + $0xf8] sm:$0xff] }
  0xce   : > { %12313 = vst [vmem:[#allocation53_spill] sm:$0xff] %v7850_v1 }
  0xcf   : > { %v7836_v0 = vpop.permute.xlu1 %814  ;;  %v7840_v62 = vpop.permute.xlu0 %820 }
  0xd0   : > { %12308 = vst [vmem:[#allocation48_spill] sm:$0xff] %v7836_v0  ;;  %12310 = vst [vmem:[#allocation50_spill] sm:$0xff] %v7840_v62  ;;  %v7856_v0 = vld [vmem:[#allocation2 + $0x120] sm:$0xff] }
  0xd1   : > { %1058 = vrot.lane.b32.xlu1 %v7838_v4, %s7225_s14  ;;  %1064 = vrot.lane.b32.xlu0 %v7844_v39, %s7225_s14  ;;  %12315 = vst [vmem:[#allocation55_spill] sm:$0xff] %v7856_v0  ;;  %v7862_v4 = vld [vmem:[#allocation2 + $0x110] sm:$0xff] }
  0xd2   : > { %12317 = vst [vmem:[#allocation57_spill] sm:$0xff] %v7862_v4 }
  0xd3   : > { %v7848_v34 = vpop.permute.xlu1 %818  ;;  %v7852_v58 = vpop.permute.xlu0 %824 }
  0xd4   : > { %12312 = vst [vmem:[#allocation52_spill] sm:$0xff] %v7848_v34  ;;  %12314 = vst [vmem:[#allocation54_spill] sm:$0xff] %v7852_v58  ;;  %v7868_v34 = vld [vmem:[#allocation2 + $0x138] sm:$0xff] }
  0xd5   : > { %1062 = vrot.lane.b32.xlu1 %v7850_v1, %s7225_s14  ;;  %1068 = vrot.lane.b32.xlu0 %v7856_v0, %s7225_s14  ;;  %12319 = vst [vmem:[#allocation59_spill] sm:$0xff] %v7868_v34  ;;  %v7874_v1 = vld [vmem:[#allocation2 + $0x128] sm:$0xff] }
  0xd6   : > { %12321 = vst [vmem:[#allocation61_spill] sm:$0xff] %v7874_v1 }
  0xd7   : > { %v7860_v62 = vpop.permute.xlu1 %822  ;;  %v7864_v37 = vpop.permute.xlu0 %828 }
  0xd8   : > { %12316 = vst [vmem:[#allocation56_spill] sm:$0xff] %v7860_v62  ;;  %12318 = vst [vmem:[#allocation58_spill] sm:$0xff] %v7864_v37  ;;  %v7880_v62 = vld [vmem:[#allocation2 + $0x150] sm:$0xff] }
  0xd9   : > { %1066 = vrot.lane.b32.xlu1 %v7862_v4, %s7225_s14  ;;  %1072 = vrot.lane.b32.xlu0 %v7868_v34, %s7225_s14  ;;  %12323 = vst [vmem:[#allocation63_spill] sm:$0xff] %v7880_v62  ;;  %v7886_v4 = vld [vmem:[#allocation2 + $0x140] sm:$0xff] }
  0xda   : > { %12325 = vst [vmem:[#allocation65_spill] sm:$0xff] %v7886_v4  ;;  %v7900_v34 = vld [vmem:[#allocation2 + $0x180] sm:$0xff] }
  0xdb   : > { %v7872_v58 = vpop.permute.xlu1 %826  ;;  %v7876_v39 = vpop.permute.xlu0 %896 }
  0xdc   : > { %12320 = vst [vmem:[#allocation60_spill] sm:$0xff] %v7872_v58  ;;  %12322 = vst [vmem:[#allocation62_spill] sm:$0xff] %v7876_v39  ;;  %v7892_v58 = vld [vmem:[#allocation2 + $0x168] sm:$0xff] }
  0xdd   : > { %1070 = vrot.lane.b32.xlu1 %v7874_v1, %s7225_s14  ;;  %1076 = vrot.lane.b32.xlu0 %v7880_v62, %s7225_s14  ;;  %v7898_v1 = vld [vmem:[#allocation2 + $0x158] sm:$0xff] }
  0xde   : > { %12328 = vst [vmem:[#allocation68_spill] sm:$0xff] %v7898_v1 }
  0xdf   : > { %v7884_v37 = vpop.permute.xlu1 %830  ;;  %v7888_v0 = vpop.permute.xlu0 %900 }
  0xe0   : > { %12324 = vst [vmem:[#allocation64_spill] sm:$0xff] %v7884_v37  ;;  %12326 = vst [vmem:[#allocation66_spill] sm:$0xff] %v7888_v0  ;;  %v7910_v0 = vld [vmem:[#allocation2 + $0x170] sm:$0xff] }
  0xe1   : > { %1074 = vrot.lane.b32.xlu1 %v7886_v4, %s7225_s14  ;;  %1080 = vrot.lane.b32.xlu0 %v7892_v58, %s7225_s14 }
  0xe3   : > { %v7896_v39 = vpop.permute.xlu1 %898  ;;  %v7902_v62 = vpop.permute.xlu0 %904 }
  0xe4   : > { %12327 = vst [vmem:[#allocation67_spill] sm:$0xff] %v7896_v39  ;;  %12329 = vst [vmem:[#allocation69_spill] sm:$0xff] %v7902_v62  ;;  %v7916_v39 = vld [vmem:[#allocation2 + $0x188] sm:$0xff] }
  0xe5   : > { %1078 = vrot.lane.b32.xlu1 %v7898_v1, %s7225_s14  ;;  %1084 = vrot.lane.b32.xlu0 %v7900_v34, %s7225_s14 }
  0xe7   : > { %v7908_v37 = vpop.permute.xlu1 %902  ;;  %v7912_v4 = vpop.permute.xlu0 %908 }
  0xe8   : > { %12330 = vst [vmem:[#allocation70_spill] sm:$0xff] %v7908_v37  ;;  %12331 = vst [vmem:[#allocation71_spill] sm:$0xff] %v7912_v4 }
  0xe9   : > { %1082 = vrot.lane.b32.xlu1 %v7910_v0, %s7225_s14  ;;  %1152 = vrot.lane.b32.xlu0 %v7457_v25, %s7226_s15 }
  0xeb   : > { %v7920_v62 = vpop.permute.xlu1 %906  ;;  %v7922_v1 = vpop.permute.xlu0 %912 }
  0xec   : > { %12332 = vst [vmem:[#allocation72_spill] sm:$0xff] %v7920_v62  ;;  %12333 = vst [vmem:[#allocation73_spill] sm:$0xff] %v7922_v1 }
  0xed   : > { %1086 = vrot.lane.b32.xlu1 %v7916_v39, %s7225_s14  ;;  %1156 = vrot.lane.b32.xlu0 %v7459_v26, %s7226_s15 }
  0xef   : > { %v7928_v4 = vpop.permute.xlu1 %910  ;;  %v7930_v37 = vpop.permute.xlu0 %916 }
  0xf1   : > { %1154 = vrot.lane.b32.xlu1 %v7466_v27, %s7226_s15  ;;  %1160 = vrot.lane.b32.xlu0 %v7474_v30, %s7226_s15 }
  0xf3   : > { %v7936_v25 = vpop.permute.xlu1 %914  ;;  %v7938_v62 = vpop.permute.xlu0 %920 }
  0xf4   : > { %12334 = vst [vmem:[#allocation74_spill] sm:$0xff] %v7938_v62 }
  0xf5   : > { %1158 = vrot.lane.b32.xlu1 %v7478_v31, %s7226_s15  ;;  %1164 = vrot.lane.b32.xlu0 %v7482_v32, %s7226_s15 }
  0xf7   : > { %v7944_v26 = vpop.permute.xlu1 %918  ;;  %v7946_v1 = vpop.permute.xlu0 %924 }
  0xf8   : > { %12335 = vst [vmem:[#allocation75_spill] sm:$0xff] %v7944_v26  ;;  %12336 = vst [vmem:[#allocation76_spill] sm:$0xff] %v7946_v1  ;;  %v712_v1 = vld [vmem:[#allocation2 + $0x92] sm:$0xff]  ;;  %v2385_v26 = vld [vmem:[%s8529_s28 + $0xc0] sm:$0xff] }
  0xf9   : > { %1162 = vrot.lane.b32.xlu1 %v7494_v38, %s7226_s15  ;;  %1168 = vrot.lane.b32.xlu0 %v7502_v40, %s7226_s15 }
  0xfb   : > { %v7952_v27 = vpop.permute.xlu1 %922  ;;  %v7954_v30 = vpop.permute.xlu0 %928 }
  0xfc   : > { %12337 = vst [vmem:[#allocation77_spill] sm:$0xff] %v7952_v27  ;;  %12338 = vst [vmem:[#allocation78_spill] sm:$0xff] %v7954_v30 }
  0xfd   : > { %1166 = vrot.lane.b32.xlu1 %v7506_v41, %s7226_s15  ;;  %1172 = vrot.lane.b32.xlu0 %v7510_v42, %s7226_s15 }
  0xff   : > { %v7960_v31 = vpop.permute.xlu1 %926  ;;  %v7962_v32 = vpop.permute.xlu0 %932 }
 0x100   : > { %12339 = vst [vmem:[#allocation79_spill] sm:$0xff] %v7960_v31  ;;  %12340 = vst [vmem:[#allocation80_spill] sm:$0xff] %v7962_v32  ;;  %v682_v31 = vld [vmem:[#allocation2 + $0xa9] sm:$0xff] }
 0x101   : > { %1170 = vrot.lane.b32.xlu1 %v7514_v43, %s7226_s15  ;;  %1176 = vrot.lane.b32.xlu0 %v7518_v44, %s7226_s15 }
 0x103   : > { %v7968_v38 = vpop.permute.xlu1 %930  ;;  %v7970_v40 = vpop.permute.xlu0 %936 }
 0x104   : > { %12341 = vst [vmem:[#allocation81_spill] sm:$0xff] %v7968_v38  ;;  %12342 = vst [vmem:[#allocation82_spill] sm:$0xff] %v7970_v40  ;;  %v12403_v40 = vld [vmem:[#allocation41_spill] sm:$0xff]  ;;  %v678_v38 = vld [vmem:[#allocation2 + $0x79] sm:$0xff] }
 0x105   : > { %1174 = vrot.lane.b32.xlu1 %v7522_v45, %s7226_s15  ;;  %1180 = vrot.lane.b32.xlu0 %v7526_v46, %s7226_s15 }
 0x107   : > { %v7976_v41 = vpop.permute.xlu1 %934  ;;  %v7978_v42 = vpop.permute.xlu0 %940 }
 0x108   : > { %12343 = vst [vmem:[#allocation83_spill] sm:$0xff] %v7976_v41  ;;  %12344 = vst [vmem:[#allocation84_spill] sm:$0xff] %v7978_v42  ;;  %v12395_v42 = vld [vmem:[#allocation33_spill] sm:$0xff] }
 0x109   : > { %1178 = vrot.lane.b32.xlu1 %v7530_v47, %s7226_s15  ;;  %1184 = vrot.lane.b32.xlu0 %v7534_v48, %s7226_s15 }
 0x10b   : > { %v7984_v43 = vpop.permute.xlu1 %938  ;;  %v7986_v44 = vpop.permute.xlu0 %944 }
 0x10c   : > { %12345 = vst [vmem:[#allocation85_spill] sm:$0xff] %v7984_v43  ;;  %12346 = vst [vmem:[#allocation86_spill] sm:$0xff] %v7986_v44  ;;  %v12388_v44 = vld [vmem:[#allocation27_spill] sm:$0xff] }
 0x10d   : > { %1182 = vrot.lane.b32.xlu1 %v7538_v49, %s7226_s15  ;;  %1188 = vrot.lane.b32.xlu0 %v7542_v50, %s7226_s15 }
 0x10f   : > { %v7992_v45 = vpop.permute.xlu1 %942  ;;  %v7994_v46 = vpop.permute.xlu0 %948 }
 0x110   : > { %12347 = vst [vmem:[#allocation87_spill] sm:$0xff] %v7992_v45  ;;  %12348 = vst [vmem:[#allocation88_spill] sm:$0xff] %v7994_v46 }
 0x111   : > { %1186 = vrot.lane.b32.xlu1 %v7546_v51, %s7226_s15  ;;  %1192 = vrot.lane.b32.xlu0 %v7550_v52, %s7226_s15 }
 0x113   : > { %v8000_v47 = vpop.permute.xlu1 %946  ;;  %v8002_v48 = vpop.permute.xlu0 %952 }
 0x114   : > { %12349 = vst [vmem:[#allocation89_spill] sm:$0xff] %v8000_v47  ;;  %12350 = vst [vmem:[#allocation90_spill] sm:$0xff] %v8002_v48  ;;  %v12384_v47 = vld [vmem:[#allocation23_spill] sm:$0xff] }
 0x115   : > { %1190 = vrot.lane.b32.xlu1 %v7554_v53, %s7226_s15  ;;  %1196 = vrot.lane.b32.xlu0 %v7558_v54, %s7226_s15 }
 0x117   : > { %v8008_v49 = vpop.permute.xlu1 %950  ;;  %v8010_v50 = vpop.permute.xlu0 %956 }
 0x118   : > { %12351 = vst [vmem:[#allocation91_spill] sm:$0xff] %v8008_v49  ;;  %12352 = vst [vmem:[#allocation92_spill] sm:$0xff] %v8010_v50 }
 0x119   : > { %1194 = vrot.lane.b32.xlu1 %v7562_v55, %s7226_s15  ;;  %1200 = vrot.lane.b32.xlu0 %v7566_v56, %s7226_s15  ;;  %v8034_v56 = vld [vmem:[#allocation2 + $0x181] sm:$0xff] }
 0x11b   : > { %v8016_v51 = vpop.permute.xlu1 %954  ;;  %v8018_v52 = vpop.permute.xlu0 %1024 }
 0x11c   : > { %12353 = vst [vmem:[#allocation93_spill] sm:$0xff] %v8016_v51 }
 0x11d   : > { %1198 = vrot.lane.b32.xlu1 %v7570_v57, %s7226_s15  ;;  %1204 = vrot.lane.b32.xlu0 %v7576_v59, %s7226_s15 }
 0x11f   : > { %v8024_v53 = vpop.permute.xlu1 %958  ;;  %v8026_v54 = vpop.permute.xlu0 %1028 }
 0x120   : > { %12354 = vst [vmem:[#allocation94_spill] sm:$0xff] %v8024_v53 }
 0x121   : > { %1202 = vrot.lane.b32.xlu1 %v7580_v60, %s7226_s15  ;;  %1208 = vrot.lane.b32.xlu0 %v7584_v61, %s7226_s15  ;;  %v8048_v60 = vld [vmem:[#allocation2 + $0x189] sm:$0xff] }
 0x123   : > { %v8032_v55 = vpop.permute.xlu1 %1026  ;;  %v8036_v50 = vpop.permute.xlu0 %1032 }
 0x125   : > { %1206 = vrot.lane.b32.xlu1 %v7590_v63, %s7226_s15  ;;  %1212 = vrot.lane.b32.xlu0 %v8034_v56, %s7226_s15 }
 0x127   : > { %v8042_v57 = vpop.permute.xlu1 %1030  ;;  %v8044_v59 = vpop.permute.xlu0 %1036 }
 0x129   : > { %1210 = vrot.lane.b32.xlu1 %v7596_v2, %s7226_s15  ;;  %1280 = vrot.lane.b32.xlu0 %v7599_v3, %s7227_s16 }
 0x12b   : > { %v8052_v61 = vpop.permute.xlu1 %1034  ;;  %v8054_v53 = vpop.permute.xlu0 %1040 }
 0x12d   : > { %1214 = vrot.lane.b32.xlu1 %v8048_v60, %s7226_s15  ;;  %1284 = vrot.lane.b32.xlu0 %v7605_v5, %s7227_s16 }
 0x12f   : > { %v8060_v63 = vpop.permute.xlu1 %1038  ;;  %v8062_v51 = vpop.permute.xlu0 %1044 }
 0x131   : > { %1282 = vrot.lane.b32.xlu1 %v7608_v6, %s7227_s16  ;;  %1288 = vrot.lane.b32.xlu0 %v7612_v7, %s7227_s16 }
 0x133   : > { %v8068_v2 = vpop.permute.xlu1 %1042  ;;  %v8070_v3 = vpop.permute.xlu0 %1048 }
 0x134   : > { %12355 = vst [vmem:[#allocation95_spill] sm:$0xff] %v8070_v3 }
 0x135   : > { %1286 = vrot.lane.b32.xlu1 %v7616_v8, %s7227_s16  ;;  %1292 = vrot.lane.b32.xlu0 %v7620_v9, %s7227_s16 }
 0x137   : > { %v8076_v5 = vpop.permute.xlu1 %1046  ;;  %v8078_v48 = vpop.permute.xlu0 %1052 }
 0x138   : > { %12356 = vst [vmem:[#allocation96_spill] sm:$0xff] %v8076_v5  ;;  %12357 = vst [vmem:[#allocation97_spill] sm:$0xff] %v8078_v48  ;;  %v706_v48 = vld [vmem:[#allocation2 + $0x4a] sm:$0xff] }
 0x139   : > { %1290 = vrot.lane.b32.xlu1 %v7624_v10, %s7227_s16  ;;  %1296 = vrot.lane.b32.xlu0 %v7628_v11, %s7227_s16 }
 0x13b   : > { %v8084_v6 = vpop.permute.xlu1 %1050  ;;  %v8086_v7 = vpop.permute.xlu0 %1056 }
 0x13c   : > { %12358 = vst [vmem:[#allocation98_spill] sm:$0xff] %v8084_v6  ;;  %12359 = vst [vmem:[#allocation99_spill] sm:$0xff] %v8086_v7  ;;  %v684_v7 = vld [vmem:[#allocation2 + $0xc1] sm:$0xff] }
 0x13d   : > { %1294 = vrot.lane.b32.xlu1 %v7632_v12, %s7227_s16  ;;  %1300 = vrot.lane.b32.xlu0 %v7636_v13, %s7227_s16 }
 0x13f   : > { %v8092_v8 = vpop.permute.xlu1 %1054  ;;  %v8094_v9 = vpop.permute.xlu0 %1060 }
 0x140   : > { %12360 = vst [vmem:[#allocation100_spill] sm:$0xff] %v8092_v8  ;;  %12361 = vst [vmem:[#allocation101_spill] sm:$0xff] %v8094_v9  ;;  %v680_v8 = vld [vmem:[#allocation2 + $0x91] sm:$0xff] }
 0x141   : > { %1298 = vrot.lane.b32.xlu1 %v7640_v14, %s7227_s16  ;;  %1304 = vrot.lane.b32.xlu0 %v7644_v15, %s7227_s16 }
 0x143   : > { %v8100_v10 = vpop.permute.xlu1 %1058  ;;  %v8102_v11 = vpop.permute.xlu0 %1064 }
 0x144   : > { %12362 = vst [vmem:[#allocation102_spill] sm:$0xff] %v8100_v10  ;;  %12363 = vst [vmem:[#allocation103_spill] sm:$0xff] %v8102_v11  ;;  %v12399_v11 = vld [vmem:[#allocation37_spill] sm:$0xff] }
 0x145   : > { %1302 = vrot.lane.b32.xlu1 %v7648_v16, %s7227_s16  ;;  %1308 = vrot.lane.b32.xlu0 %v7652_v17, %s7227_s16  ;;  %v676_v10 = vld [vmem:[#allocation2 + $0x61] sm:$0xff] }
 0x147   : > { %v8108_v12 = vpop.permute.xlu1 %1062  ;;  %v8110_v13 = vpop.permute.xlu0 %1068 }
 0x148   : > { %12364 = vst [vmem:[#allocation104_spill] sm:$0xff] %v8108_v12  ;;  %12365 = vst [vmem:[#allocation105_spill] sm:$0xff] %v8110_v13  ;;  %v12391_v13 = vld [vmem:[#allocation29_spill] sm:$0xff] }
 0x149   : > { %1306 = vrot.lane.b32.xlu1 %v7656_v18, %s7227_s16  ;;  %1312 = vrot.lane.b32.xlu0 %v7660_v19, %s7227_s16 }
 0x14b   : > { %v8116_v14 = vpop.permute.xlu1 %1066  ;;  %v8118_v15 = vpop.permute.xlu0 %1072 }
 0x14c   : > { %12366 = vst [vmem:[#allocation106_spill] sm:$0xff] %v8116_v14  ;;  %12367 = vst [vmem:[#allocation107_spill] sm:$0xff] %v8118_v15 }
 0x14d   : > { %1310 = vrot.lane.b32.xlu1 %v7664_v20, %s7227_s16  ;;  %1316 = vrot.lane.b32.xlu0 %v7668_v21, %s7227_s16 }
 0x14f   : > { %v8124_v16 = vpop.permute.xlu1 %1070  ;;  %v8126_v17 = vpop.permute.xlu0 %1076 }
 0x150   : > { %12368 = vst [vmem:[#allocation108_spill] sm:$0xff] %v8124_v16  ;;  %12369 = vst [vmem:[#allocation109_spill] sm:$0xff] %v8126_v17  ;;  %v12387_v16 = vld [vmem:[#allocation25_spill] sm:$0xff] }
 0x151   : > { %1314 = vrot.lane.b32.xlu1 %v7672_v22, %s7227_s16  ;;  %1320 = vrot.lane.b32.xlu0 %v7676_v23, %s7227_s16 }
 0x153   : > { %v8132_v18 = vpop.permute.xlu1 %1074  ;;  %v8134_v19 = vpop.permute.xlu0 %1080 }
 0x154   : > { %12370 = vst [vmem:[#allocation110_spill] sm:$0xff] %v8132_v18  ;;  %12371 = vst [vmem:[#allocation111_spill] sm:$0xff] %v8134_v19 }
 0x155   : > { %1318 = vrot.lane.b32.xlu1 %v7680_v24, %s7227_s16  ;;  %1324 = vrot.lane.b32.xlu0 %v7684_v28, %s7227_s16 }
 0x157   : > { %v8140_v20 = vpop.permute.xlu1 %1078  ;;  %v8142_v21 = vpop.permute.xlu0 %1084 }
 0x158   : > { %12372 = vst [vmem:[#allocation112_spill] sm:$0xff] %v8140_v20  ;;  %12373 = vst [vmem:[#allocation113_spill] sm:$0xff] %v8142_v21  ;;  %v12376_v21 = vld [vmem:[#allocation6_spill] sm:$0xff]  ;;  %v12380_v20 = vld [vmem:[#allocation16_spill] sm:$0xff] }
 0x159   : > { %1322 = vrot.lane.b32.xlu1 %v7688_v29, %s7227_s16  ;;  %1328 = vrot.lane.b32.xlu0 %v7692_v33, %s7227_s16  ;;  %v12377_v29 = vld [vmem:[#allocation8_spill] sm:$0xff] }
 0x15b   : > { %v8148_v22 = vpop.permute.xlu1 %1082  ;;  %v8150_v23 = vpop.permute.xlu0 %1152 }
 0x15c   : > { %12374 = vst [vmem:[#allocation114_spill] sm:$0xff] %v8148_v22  ;;  %v8166_v22 = vld [vmem:[#allocation2 + $0x182] sm:$0xff] }
 0x15d   : > { %1326 = vrot.lane.b32.xlu1 %v7698_v35, %s7227_s16  ;;  %1332 = vrot.lane.b32.xlu0 %v7702_v36, %s7227_s16  ;;  %v12378_v35 = vld [vmem:[#allocation10_spill] sm:$0xff] }
 0x15f   : > { %v8156_v24 = vpop.permute.xlu1 %1086  ;;  %v8158_v28 = vpop.permute.xlu0 %1156 }
 0x160   : > { %12375 = vst [vmem:[#allocation115_spill] sm:$0xff] %v8156_v24 }
 0x161   : > { %1330 = vrot.lane.b32.xlu1 %v12376_v21, %s7227_s16  ;;  %1336 = vrot.lane.b32.xlu0 %v12377_v29, %s7227_s16  ;;  %v12379_v21 = vld [vmem:[#allocation13_spill] sm:$0xff] }
 0x162   : > { %v8180_v29 = vld [vmem:[#allocation2 + $0x18a] sm:$0xff] }
 0x163   : > { %v8164_v33 = vpop.permute.xlu1 %1154  ;;  %v8168_v19 = vpop.permute.xlu0 %1160 }
 0x165   : > { %1334 = vrot.lane.b32.xlu1 %v12378_v35, %s7227_s16  ;;  %1340 = vrot.lane.b32.xlu0 %v8166_v22, %s7227_s16  ;;  %v12381_v35 = vld [vmem:[#allocation19_spill] sm:$0xff] }
 0x167   : > { %v8174_v36 = vpop.permute.xlu1 %1158  ;;  %v8176_v24 = vpop.permute.xlu0 %1164 }
 0x169   : > { %1338 = vrot.lane.b32.xlu1 %v12379_v21, %s7227_s16  ;;  %1408 = vrot.lane.b32.xlu0 %v12380_v20, %s7228_s17  ;;  %v12383_v21 = vld [vmem:[#allocation21_spill] sm:$0xff] }
 0x16b   : > { %v8184_v49 = vpop.permute.xlu1 %1162  ;;  %v8186_v17 = vpop.permute.xlu0 %1168 }
 0x16d   : > { %1342 = vrot.lane.b32.xlu1 %v8180_v29, %s7227_s16  ;;  %1412 = vrot.lane.b32.xlu0 %v12381_v35, %s7228_s17 }
 0x16f   : > { %v8192_v18 = vpop.permute.xlu1 %1166  ;;  %v8194_v46 = vpop.permute.xlu0 %1172 }
 0x170   : > { %12382 = vst [vmem:[#allocation6_spill] sm:$0xff] %v8194_v46 }
 0x171   : > { %1410 = vrot.lane.b32.xlu1 %v12383_v21, %s7228_s17  ;;  %1416 = vrot.lane.b32.xlu0 %v12384_v47, %s7228_s17  ;;  %v12392_v21 = vld [vmem:[#allocation31_spill] sm:$0xff] }
 0x173   : > { %v8200_v20 = vpop.permute.xlu1 %1170  ;;  %v8202_v15 = vpop.permute.xlu0 %1176 }
 0x174   : > { %12385 = vst [vmem:[#allocation8_spill] sm:$0xff] %v8200_v20  ;;  %12386 = vst [vmem:[#allocation10_spill] sm:$0xff] %v8202_v15  ;;  %v714_v15 = vld [vmem:[#allocation2 + $0xaa] sm:$0xff] }
 0x175   : > { %1414 = vrot.lane.b32.xlu1 %v12387_v16, %s7228_s17  ;;  %1420 = vrot.lane.b32.xlu0 %v12388_v44, %s7228_s17  ;;  %v12396_v16 = vld [vmem:[#allocation35_spill] sm:$0xff] }
 0x177   : > { %v8208_v35 = vpop.permute.xlu1 %1174  ;;  %v8210_v45 = vpop.permute.xlu0 %1180 }
 0x178   : > { %12389 = vst [vmem:[#allocation13_spill] sm:$0xff] %v8208_v35  ;;  %12390 = vst [vmem:[#allocation16_spill] sm:$0xff] %v8210_v45 }
 0x179   : > { %1418 = vrot.lane.b32.xlu1 %v12391_v13, %s7228_s17  ;;  %1424 = vrot.lane.b32.xlu0 %v12392_v21, %s7228_s17  ;;  %v12400_v13 = vld [vmem:[#allocation39_spill] sm:$0xff] }
 0x17b   : > { %v8216_v47 = vpop.permute.xlu1 %1178  ;;  %v8218_v14 = vpop.permute.xlu0 %1184 }
 0x17c   : > { %12393 = vst [vmem:[#allocation19_spill] sm:$0xff] %v8216_v47  ;;  %12394 = vst [vmem:[#allocation21_spill] sm:$0xff] %v8218_v14 }
 0x17d   : > { %1422 = vrot.lane.b32.xlu1 %v12395_v42, %s7228_s17  ;;  %1428 = vrot.lane.b32.xlu0 %v12396_v16, %s7228_s17  ;;  %v12404_v42 = vld [vmem:[#allocation43_spill] sm:$0xff] }
 0x17f   : > { %v8224_v44 = vpop.permute.xlu1 %1182  ;;  %v8226_v43 = vpop.permute.xlu0 %1188 }
 0x180   : > { %12397 = vst [vmem:[#allocation23_spill] sm:$0xff] %v8224_v44  ;;  %12398 = vst [vmem:[#allocation25_spill] sm:$0xff] %v8226_v43  ;;  %v12407_v43 = vld [vmem:[#allocation45_spill] sm:$0xff] }
 0x181   : > { %1426 = vrot.lane.b32.xlu1 %v12399_v11, %s7228_s17  ;;  %1432 = vrot.lane.b32.xlu0 %v12400_v13, %s7228_s17  ;;  %v12408_v11 = vld [vmem:[#allocation47_spill] sm:$0xff] }
 0x183   : > { %v8232_v21 = vpop.permute.xlu1 %1186  ;;  %v8234_v12 = vpop.permute.xlu0 %1192 }
 0x184   : > { %12401 = vst [vmem:[#allocation27_spill] sm:$0xff] %v8232_v21  ;;  %12402 = vst [vmem:[#allocation29_spill] sm:$0xff] %v8234_v12  ;;  %v12411_v12 = vld [vmem:[#allocation49_spill] sm:$0xff] }
 0x185   : > { %1430 = vrot.lane.b32.xlu1 %v12403_v40, %s7228_s17  ;;  %1436 = vrot.lane.b32.xlu0 %v12404_v42, %s7228_s17  ;;  %v12412_v40 = vld [vmem:[#allocation51_spill] sm:$0xff] }
 0x187   : > { %v8240_v16 = vpop.permute.xlu1 %1190  ;;  %v8242_v41 = vpop.permute.xlu0 %1196 }
 0x188   : > { %12405 = vst [vmem:[#allocation31_spill] sm:$0xff] %v8240_v16  ;;  %12406 = vst [vmem:[#allocation33_spill] sm:$0xff] %v8242_v41  ;;  %v12415_v41 = vld [vmem:[#allocation53_spill] sm:$0xff] }
 0x189   : > { %1434 = vrot.lane.b32.xlu1 %v12407_v43, %s7228_s17  ;;  %1440 = vrot.lane.b32.xlu0 %v12408_v11, %s7228_s17  ;;  %v12416_v43 = vld [vmem:[#allocation55_spill] sm:$0xff] }
 0x18b   : > { %v8248_v13 = vpop.permute.xlu1 %1194  ;;  %v8250_v21 = vpop.permute.xlu0 %1200 }
 0x18c   : > { %12409 = vst [vmem:[#allocation35_spill] sm:$0xff] %v8248_v13  ;;  %12410 = vst [vmem:[#allocation37_spill] sm:$0xff] %v8250_v21  ;;  %v12419_v21 = vld [vmem:[#allocation57_spill] sm:$0xff] }
 0x18d   : > { %1438 = vrot.lane.b32.xlu1 %v12411_v12, %s7228_s17  ;;  %1444 = vrot.lane.b32.xlu0 %v12412_v40, %s7228_s17  ;;  %v12420_v12 = vld [vmem:[#allocation59_spill] sm:$0xff] }
 0x18f   : > { %v8256_v42 = vpop.permute.xlu1 %1198  ;;  %v8258_v16 = vpop.permute.xlu0 %1204 }
 0x190   : > { %12413 = vst [vmem:[#allocation39_spill] sm:$0xff] %v8256_v42  ;;  %12414 = vst [vmem:[#allocation41_spill] sm:$0xff] %v8258_v16  ;;  %v12423_v16 = vld [vmem:[#allocation61_spill] sm:$0xff] }
 0x191   : > { %1442 = vrot.lane.b32.xlu1 %v12415_v41, %s7228_s17  ;;  %1448 = vrot.lane.b32.xlu0 %v12416_v43, %s7228_s17  ;;  %v12424_v41 = vld [vmem:[#allocation63_spill] sm:$0xff] }
 0x193   : > { %v8264_v11 = vpop.permute.xlu1 %1202  ;;  %v8266_v13 = vpop.permute.xlu0 %1208 }
 0x194   : > { %12417 = vst [vmem:[#allocation43_spill] sm:$0xff] %v8264_v11  ;;  %12418 = vst [vmem:[#allocation45_spill] sm:$0xff] %v8266_v13  ;;  %v12426_v13 = vld [vmem:[#allocation65_spill] sm:$0xff] }
 0x195   : > { %1446 = vrot.lane.b32.xlu1 %v12419_v21, %s7228_s17  ;;  %1452 = vrot.lane.b32.xlu0 %v12420_v12, %s7228_s17 }
 0x197   : > { %v8272_v40 = vpop.permute.xlu1 %1206  ;;  %v8274_v42 = vpop.permute.xlu0 %1212 }
 0x198   : > { %12421 = vst [vmem:[#allocation47_spill] sm:$0xff] %v8272_v40  ;;  %12422 = vst [vmem:[#allocation49_spill] sm:$0xff] %v8274_v42  ;;  %v12428_v42 = vld [vmem:[#allocation68_spill] sm:$0xff]  ;;  %v674_v40 = vld [vmem:[#allocation2 + $0x49] sm:$0xff] }
 0x199   : > { %1450 = vrot.lane.b32.xlu1 %v12423_v16, %s7228_s17  ;;  %1456 = vrot.lane.b32.xlu0 %v12424_v41, %s7228_s17  ;;  %v670_v41 = vld [vmem:[#allocation2 + $0x198] sm:$0xff] }
 0x19b   : > { %v8280_v43 = vpop.permute.xlu1 %1210  ;;  %v8282_v11 = vpop.permute.xlu0 %1280 }
 0x19c   : > { %12425 = vst [vmem:[#allocation51_spill] sm:$0xff] %v8280_v43 }
 0x19d   : > { %1454 = vrot.lane.b32.xlu1 %v12426_v13, %s7228_s17  ;;  %1460 = vrot.lane.b32.xlu0 %v7892_v58, %s7228_s17  ;;  %v672_v13 = vld [vmem:[#allocation2 + $0x31] sm:$0xff] }
 0x19f   : > { %v8288_v21 = vpop.permute.xlu1 %1214  ;;  %v8290_v12 = vpop.permute.xlu0 %1284 }
 0x1a0   : > { %12427 = vst [vmem:[#allocation53_spill] sm:$0xff] %v8288_v21 }
 0x1a1   : > { %1458 = vrot.lane.b32.xlu1 %v12428_v42, %s7228_s17  ;;  %1464 = vrot.lane.b32.xlu0 %v7900_v34, %s7228_s17  ;;  %v671_v42 = vld [vmem:[#allocation2 + $0x1a0] sm:$0xff] }
 0x1a3   : > { %v8296_v16 = vpop.permute.xlu1 %1282  ;;  %v8298_v43 = vpop.permute.xlu0 %1288 }
 0x1a5   : > { %1462 = vrot.lane.b32.xlu1 %v7910_v0, %s7228_s17  ;;  %1468 = vrot.lane.b32.xlu0 %v670_v41, %s7228_s17  ;;  %v673_v0 = vld [vmem:[#allocation2 + $0x39] sm:$0xff] }
 0x1a7   : > { %v8303_v58 = vpop.permute.xlu1 %1286  ;;  %v8305_v21 = vpop.permute.xlu0 %1292 }
 0x1a9   : > { %1466 = vrot.lane.b32.xlu1 %v7916_v39, %s7228_s17  ;;  %1536 = vrot.lane.b32.xlu0 %v672_v13, %s7229_s18  ;;  %v675_v39 = vld [vmem:[#allocation2 + $0x51] sm:$0xff] }
 0x1ab   : > { %v8310_v34 = vpop.permute.xlu1 %1290  ;;  %v8312_v9 = vpop.permute.xlu0 %1296 }
 0x1ad   : > { %1470 = vrot.lane.b32.xlu1 %v671_v42, %s7228_s17  ;;  %1540 = vrot.lane.b32.xlu0 %v674_v40, %s7229_s18  ;;  %v677_v42 = vld [vmem:[#allocation2 + $0x69] sm:$0xff] }
 0x1af   : > { %v8316_v41 = vpop.permute.xlu1 %1294  ;;  %v8318_v32 = vpop.permute.xlu0 %1300 }
 0x1b0   : > { %12429 = vst [vmem:[#allocation55_spill] sm:$0xff] %v8318_v32 }
 0x1b1   : > { %1538 = vrot.lane.b32.xlu1 %v673_v0, %s7229_s18  ;;  %1544 = vrot.lane.b32.xlu0 %v676_v10, %s7229_s18  ;;  %v679_v0 = vld [vmem:[#allocation2 + $0x81] sm:$0xff] }
 0x1b3   : > { %v8322_v13 = vpop.permute.xlu1 %1298  ;;  %v8324_v44 = vpop.permute.xlu0 %1304 }
 0x1b4   : > { %12430 = vst [vmem:[#allocation57_spill] sm:$0xff] %v8322_v13  ;;  %12431 = vst [vmem:[#allocation59_spill] sm:$0xff] %v8324_v44  ;;  %v710_v44 = vld [vmem:[#allocation2 + $0x7a] sm:$0xff] }
 0x1b5   : > { %1542 = vrot.lane.b32.xlu1 %v675_v39, %s7229_s18  ;;  %1548 = vrot.lane.b32.xlu0 %v678_v38, %s7229_s18  ;;  %v681_v39 = vld [vmem:[#allocation2 + $0x99] sm:$0xff] }
 0x1b7   : > { %v8328_v40 = vpop.permute.xlu1 %1302  ;;  %v8330_v14 = vpop.permute.xlu0 %1308 }
 0x1b8   : > { %12432 = vst [vmem:[#allocation61_spill] sm:$0xff] %v8328_v40  ;;  %12433 = vst [vmem:[#allocation63_spill] sm:$0xff] %v8330_v14  ;;  %v686_v14 = vld [vmem:[#allocation2 + $0xd9] sm:$0xff] }
 0x1b9   : > { %1546 = vrot.lane.b32.xlu1 %v677_v42, %s7229_s18  ;;  %1552 = vrot.lane.b32.xlu0 %v680_v8, %s7229_s18  ;;  %v683_v42 = vld [vmem:[#allocation2 + $0xb1] sm:$0xff] }
 0x1bb   : > { %v8334_v10 = vpop.permute.xlu1 %1306  ;;  %v8336_v45 = vpop.permute.xlu0 %1312 }
 0x1bc   : > { %12434 = vst [vmem:[#allocation65_spill] sm:$0xff] %v8334_v10  ;;  %12435 = vst [vmem:[#allocation68_spill] sm:$0xff] %v8336_v45 }
 0x1bd   : > { %1550 = vrot.lane.b32.xlu1 %v679_v0, %s7229_s18  ;;  %1556 = vrot.lane.b32.xlu0 %v682_v31, %s7229_s18  ;;  %v685_v0 = vld [vmem:[#allocation2 + $0xc9] sm:$0xff] }
 0x1bf   : > { %v8340_v38 = vpop.permute.xlu1 %1310  ;;  %v8342_v47 = vpop.permute.xlu0 %1316 }
 0x1c0   : > { %12436 = vst [vmem:[#allocation116_spill] sm:$0xff] %v8340_v38  ;;  %12437 = vst [vmem:[#allocation117_spill] sm:$0xff] %v8342_v47  ;;  %v688_v38 = vld [vmem:[#allocation2 + $0xf1] sm:$0xff]  ;;  %v690_v47 = vld [vmem:[#allocation2 + $0x109] sm:$0xff] }
 0x1c1   : > { %1554 = vrot.lane.b32.xlu1 %v681_v39, %s7229_s18  ;;  %1560 = vrot.lane.b32.xlu0 %v684_v7, %s7229_s18  ;;  %v687_v39 = vld [vmem:[#allocation2 + $0xe1] sm:$0xff] }
 0x1c3   : > { %v8346_v8 = vpop.permute.xlu1 %1314  ;;  %v8348_v10 = vpop.permute.xlu0 %1320 }
 0x1c4   : > { %12438 = vst [vmem:[#allocation118_spill] sm:$0xff] %v8346_v8  ;;  %12439 = vst [vmem:[#allocation119_spill] sm:$0xff] %v8348_v10  ;;  %v692_v10 = vld [vmem:[#allocation2 + $0x121] sm:$0xff] }
 0x1c5   : > { %1558 = vrot.lane.b32.xlu1 %v683_v42, %s7229_s18  ;;  %1564 = vrot.lane.b32.xlu0 %v686_v14, %s7229_s18  ;;  %v689_v42 = vld [vmem:[#allocation2 + $0xf9] sm:$0xff] }
 0x1c7   : > { %v8352_v31 = vpop.permute.xlu1 %1318  ;;  %v8354_v45 = vpop.permute.xlu0 %1324 }
 0x1c8   : > { %12440 = vst [vmem:[#allocation120_spill] sm:$0xff] %v8352_v31  ;;  %12441 = vst [vmem:[#allocation121_spill] sm:$0xff] %v8354_v45  ;;  %v2026_v31 = vld [vmem:[%s12186_s2 + $0x18] sm:$0xff] }
 0x1c9   : > { %1562 = vrot.lane.b32.xlu1 %v685_v0, %s7229_s18  ;;  %1568 = vrot.lane.b32.xlu0 %v688_v38, %s7229_s18  ;;  %v2023_v0 = vld [vmem:[%s12186_s2] sm:$0xff]  ;;  %v2024_v38 = vld [vmem:[%s12186_s2 + $0x8] sm:$0xff] }
 0x1cb   : > { %v8358_v7 = vpop.permute.xlu1 %1322  ;;  %v8360_v8 = vpop.permute.xlu0 %1328 }
 0x1cc   : > { %12442 = vst [vmem:[#allocation122_spill] sm:$0xff] %v8358_v7  ;;  %12443 = vst [vmem:[#allocation123_spill] sm:$0xff] %v8360_v8  ;;  %v7077_v8 = vpack.c.bf16 %v2024_v38, %v2023_v0  ;;  %v2025_v7 = vld [vmem:[%s12186_s2 + $0x10] sm:$0xff] }
 0x1cd   : > { %1566 = vrot.lane.b32.xlu1 %v687_v39, %s7229_s18  ;;  %1572 = vrot.lane.b32.xlu0 %v690_v47, %s7229_s18  ;;  %v691_v39 = vld [vmem:[#allocation2 + $0x111] sm:$0xff] }
 0x1ce   : > { %7078 = vmatprep.subr.bf16.mxu0 %v7077_v8  ;;  %7117 = vmatprep.subr.bf16.mxu1 %v7077_v8  ;;  %v696_v38 = vld [vmem:[#allocation2 + $0x151] sm:$0xff] }
 0x1cf   : > { %v8364_v14 = vpop.permute.xlu1 %1326  ;;  %v8372_v45 = vpop.permute.xlu0 %1332  ;;  %7080 = vmatpush3.bf16.msra.mxu0 %v7077_v8  ;;  %7122 = vmatpush3.bf16.msra.mxu1 %v7077_v8 }
 0x1d0   : > { %12444 = vst [vmem:[#allocation124_spill] sm:$0xff] %v8364_v14  ;;  %12445 = vst [vmem:[#allocation125_spill] sm:$0xff] %v8372_v45  ;;  %v694_v14 = vld [vmem:[#allocation2 + $0x139] sm:$0xff] }
 0x1d1   : > { %1570 = vrot.lane.b32.xlu1 %v689_v42, %s7229_s18  ;;  %1576 = vrot.lane.b32.xlu0 %v692_v10, %s7229_s18  ;;  %v7081_v42 = vpack.c.bf16 %v2026_v31, %v2025_v7  ;;  %v693_v10 = vld [vmem:[#allocation2 + $0x129] sm:$0xff]  ;;  %v695_v31 = vld [vmem:[#allocation2 + $0x141] sm:$0xff] }
 0x1d3   : > { %v8376_v47 = vpop.permute.xlu1 %1330  ;;  %v8384_v45 = vpop.permute.xlu0 %1336  ;;  %7082 = vmatprep.subr.bf16.mxu0 %v7081_v42  ;;  %7118 = vmatprep.subr.bf16.mxu1 %v7081_v42 }
 0x1d4   : > { %12446 = vst [vmem:[#allocation126_spill] sm:$0xff] %v8376_v47  ;;  %12447 = vst [vmem:[#allocation127_spill] sm:$0xff] %v8384_v45  ;;  %7084 = vmatpush3.bf16.msra.mxu0 %v7081_v42  ;;  %v2027_v47 = vld [vmem:[%s12186_s2 + $0x20] sm:$0xff]  ;;  %v2028_v45 = vld [vmem:[%s12186_s2 + $0x28] sm:$0xff]  ;;  %7123 = vmatpush3.bf16.msra.mxu1 %v7081_v42 }
 0x1d5   : > { %1574 = vrot.lane.b32.xlu1 %v691_v39, %s7229_s18  ;;  %1580 = vrot.lane.b32.xlu0 %v694_v14, %s7229_s18  ;;  %v7085_v8 = vpack.c.bf16 %v2028_v45, %v2027_v47  ;;  %v698_v14 = vld [vmem:[#allocation2 + $0x169] sm:$0xff]  ;;  %v697_v47 = vld [vmem:[#allocation2 + $0x159] sm:$0xff] }
 0x1d7   : > { %v8388_v0 = vpop.permute.xlu1 %1334  ;;  %v8396_v39 = vpop.permute.xlu0 %1340  ;;  %7086 = vmatprep.subr.bf16.mxu0 %v7085_v8  ;;  %7119 = vmatprep.subr.bf16.mxu1 %v7085_v8 }
 0x1d8   : > { %12448 = vst [vmem:[#allocation128_spill] sm:$0xff] %v8388_v0  ;;  %12449 = vst [vmem:[#allocation129_spill] sm:$0xff] %v8396_v39  ;;  %7088 = vmatpush3.bf16.msra.mxu0 %v7085_v8  ;;  %v2029_v0 = vld [vmem:[%s12186_s2 + $0x30] sm:$0xff]  ;;  %v2030_v39 = vld [vmem:[%s12186_s2 + $0x38] sm:$0xff]  ;;  %7124 = vmatpush3.bf16.msra.mxu1 %v7085_v8 }
 0x1d9   : > { %1578 = vrot.lane.b32.xlu1 %v693_v10, %s7229_s18  ;;  %1584 = vrot.lane.b32.xlu0 %v696_v38, %s7229_s18  ;;  %v7089_v45 = vpack.c.bf16 %v2030_v39, %v2029_v0  ;;  %v702_v39 = vld [vmem:[#allocation2 + $0x199] sm:$0xff] }
 0x1db   : > { %v8400_v7 = vpop.permute.xlu1 %1338  ;;  %v8408_v10 = vpop.permute.xlu0 %1408  ;;  %7090 = vmatprep.subr.bf16.mxu0 %v7089_v45  ;;  %7120 = vmatprep.subr.bf16.mxu1 %v7089_v45 }
 0x1dc   : > { %12450 = vst [vmem:[#allocation130_spill] sm:$0xff] %v8400_v7  ;;  %7092 = vmatpush3.bf16.msra.mxu0 %v7089_v45  ;;  %7125 = vmatpush3.bf16.msra.mxu1 %v7089_v45  ;;  %v699_v7 = vld [vmem:[#allocation2 + $0x171] sm:$0xff] }
 0x1dd   : > { %1582 = vrot.lane.b32.xlu1 %v695_v31, %s7229_s18  ;;  %1588 = vrot.lane.b32.xlu0 %v698_v14, %s7229_s18  ;;  %v2031_v31 = vld [vmem:[%s12186_s2 + $0x40] sm:$0xff]  ;;  %v704_v45 = vld [vmem:[#allocation2 + $0x32] sm:$0xff] }
 0x1de   : > { %6903 = vmatprep.subr.mxu0 %v2031_v31  ;;  %7121 = vmatprep.subr.mxu1 %v2031_v31 }
 0x1df   : > { %v8412_v42 = vpop.permute.xlu1 %1342  ;;  %v8414_v38 = vpop.permute.xlu0 %1412 }
 0x1e0   : > { %12451 = vst [vmem:[#allocation131_spill] sm:$0xff] %v8412_v42  ;;  %6904 = vmatpush3.msra.mxu0 %v2031_v31  ;;  %7126 = vmatpush3.msra.mxu1 %v2031_v31 }
 0x1e1   : > { %1586 = vrot.lane.b32.xlu1 %v697_v47, %s7229_s18  ;;  %1592 = vrot.lane.b32.xlu0 %v8034_v56, %s7229_s18  ;;  %v703_v56 = vld [vmem:[#allocation2 + $0x1a1] sm:$0xff] }
 0x1e3   : > { %v8422_v0 = vpop.permute.xlu1 %1410  ;;  %v8424_v8 = vpop.permute.xlu0 %1416 }
 0x1e5   : > { %1590 = vrot.lane.b32.xlu1 %v699_v7, %s7229_s18  ;;  %1596 = vrot.lane.b32.xlu0 %v702_v39, %s7229_s18  ;;  %v705_v7 = vld [vmem:[#allocation2 + $0x3a] sm:$0xff]  ;;  %v708_v39 = vld [vmem:[#allocation2 + $0x62] sm:$0xff] }
 0x1e7   : > { %v8428_v14 = vpop.permute.xlu1 %1414  ;;  %v8430_v47 = vpop.permute.xlu0 %1420 }
 0x1e9   : > { %1594 = vrot.lane.b32.xlu1 %v8048_v60, %s7229_s18  ;;  %1664 = vrot.lane.b32.xlu0 %v704_v45, %s7230_s24  ;;  %v707_v60 = vld [vmem:[#allocation2 + $0x52] sm:$0xff] }
 0x1eb   : > { %v8435_v42 = vpop.permute.xlu1 %1418  ;;  %v8437_v6 = vpop.permute.xlu0 %1424 }
 0x1ed   : > { %1598 = vrot.lane.b32.xlu1 %v703_v56, %s7229_s18  ;;  %1668 = vrot.lane.b32.xlu0 %v706_v48, %s7230_s24  ;;  %v709_v56 = vld [vmem:[#allocation2 + $0x6a] sm:$0xff] }
 0x1ef   : > { %v8441_v31 = vpop.permute.xlu1 %1422  ;;  %v8443_v30 = vpop.permute.xlu0 %1428 }
 0x1f0   : > { %12452 = vst [vmem:[#allocation132_spill] sm:$0xff] %v8443_v30 }
 0x1f1   : > { %1666 = vrot.lane.b32.xlu1 %v705_v7, %s7230_s24  ;;  %1672 = vrot.lane.b32.xlu0 %v708_v39, %s7230_s24  ;;  %v711_v7 = vld [vmem:[#allocation2 + $0x82] sm:$0xff] }
 0x1f3   : > { %v8447_v45 = vpop.permute.xlu1 %1426  ;;  %v8449_v27 = vpop.permute.xlu0 %1432 }
 0x1f4   : > { %12453 = vst [vmem:[#allocation133_spill] sm:$0xff] %v8447_v45  ;;  %12454 = vst [vmem:[#allocation134_spill] sm:$0xff] %v8449_v27  ;;  %v716_v27 = vld [vmem:[#allocation2 + $0xc2] sm:$0xff] }
 0x1f5   : > { %1670 = vrot.lane.b32.xlu1 %v707_v60, %s7230_s24  ;;  %1676 = vrot.lane.b32.xlu0 %v710_v44, %s7230_s24  ;;  %v713_v60 = vld [vmem:[#allocation2 + $0x9a] sm:$0xff] }
 0x1f7   : > { %v8453_v48 = vpop.permute.xlu1 %1430  ;;  %v8455_v40 = vpop.permute.xlu0 %1436 }
 0x1f8   : > { %12455 = vst [vmem:[#allocation135_spill] sm:$0xff] %v8453_v48  ;;  %12456 = vst [vmem:[#allocation136_spill] sm:$0xff] %v8455_v40  ;;  %v718_v40 = vld [vmem:[#allocation2 + $0xda] sm:$0xff] }
 0x1f9   : > { %1674 = vrot.lane.b32.xlu1 %v709_v56, %s7230_s24  ;;  %1680 = vrot.lane.b32.xlu0 %v712_v1, %s7230_s24  ;;  %v715_v56 = vld [vmem:[#allocation2 + $0xb2] sm:$0xff] }
 0x1fb   : > { %v8459_v39 = vpop.permute.xlu1 %1434  ;;  %v8461_v35 = vpop.permute.xlu0 %1440 }
 0x1fc   : > { %12457 = vst [vmem:[#allocation137_spill] sm:$0xff] %v8459_v39  ;;  %12458 = vst [vmem:[#allocation138_spill] sm:$0xff] %v8461_v35 }
 0x1fd   : > { %1678 = vrot.lane.b32.xlu1 %v711_v7, %s7230_s24  ;;  %1684 = vrot.lane.b32.xlu0 %v714_v15, %s7230_s24  ;;  %v717_v7 = vld [vmem:[#allocation2 + $0xca] sm:$0xff] }
 0x1ff   : > { %v8465_v44 = vpop.permute.xlu1 %1438  ;;  %v8467_v48 = vpop.permute.xlu0 %1444 }
 0x200   : > { %12459 = vst [vmem:[#allocation139_spill] sm:$0xff] %v8465_v44  ;;  %12460 = vst [vmem:[#allocation140_spill] sm:$0xff] %v8467_v48  ;;  %v720_v44 = vld [vmem:[#allocation2 + $0xf2] sm:$0xff]  ;;  %v722_v48 = vld [vmem:[#allocation2 + $0x10a] sm:$0xff] }
 0x201   : > { %1682 = vrot.lane.b32.xlu1 %v713_v60, %s7230_s24  ;;  %1688 = vrot.lane.b32.xlu0 %v716_v27, %s7230_s24  ;;  %v719_v60 = vld [vmem:[#allocation2 + $0xe2] sm:$0xff] }
 0x203   : > { %v8471_v1 = vpop.permute.xlu1 %1442  ;;  %v8473_v39 = vpop.permute.xlu0 %1448 }
 0x204   : > { %12461 = vst [vmem:[#allocation141_spill] sm:$0xff] %v8471_v1  ;;  %12462 = vst [vmem:[#allocation142_spill] sm:$0xff] %v8473_v39  ;;  %v724_v39 = vld [vmem:[#allocation2 + $0x122] sm:$0xff] }
 0x205   : > { %1686 = vrot.lane.b32.xlu1 %v715_v56, %s7230_s24  ;;  %1692 = vrot.lane.b32.xlu0 %v718_v40, %s7230_s24  ;;  %v721_v56 = vld [vmem:[#allocation2 + $0xfa] sm:$0xff] }
 0x207   : > { %v8477_v15 = vpop.permute.xlu1 %1446  ;;  %v8479_v35 = vpop.permute.xlu0 %1452 }
 0x208   : > { %12463 = vst [vmem:[#allocation143_spill] sm:$0xff] %v8477_v15  ;;  %12464 = vst [vmem:[#allocation144_spill] sm:$0xff] %v8479_v35  ;;  %v726_v35 = vld [vmem:[#allocation2 + $0x13a] sm:$0xff] }
 0x209   : > { %1690 = vrot.lane.b32.xlu1 %v717_v7, %s7230_s24  ;;  %1696 = vrot.lane.b32.xlu0 %v720_v44, %s7230_s24  ;;  %v723_v7 = vld [vmem:[#allocation2 + $0x112] sm:$0xff] }
 0x20b   : > { %v8483_v27 = vpop.permute.xlu1 %1450  ;;  %v8485_v1 = vpop.permute.xlu0 %1456 }
 0x20c   : > { %12465 = vst [vmem:[#allocation145_spill] sm:$0xff] %v8483_v27  ;;  %12466 = vst [vmem:[#allocation146_spill] sm:$0xff] %v8485_v1  ;;  %v728_v1 = vld [vmem:[#allocation2 + $0x152] sm:$0xff] }
 0x20d   : > { %1694 = vrot.lane.b32.xlu1 %v719_v60, %s7230_s24  ;;  %1700 = vrot.lane.b32.xlu0 %v722_v48, %s7230_s24  ;;  %v725_v60 = vld [vmem:[#allocation2 + $0x12a] sm:$0xff] }
 0x20f   : > { %v8489_v40 = vpop.permute.xlu1 %1454  ;;  %v8491_v15 = vpop.permute.xlu0 %1460 }
 0x210   : > { %12467 = vst [vmem:[#allocation147_spill] sm:$0xff] %v8489_v40  ;;  %12468 = vst [vmem:[#allocation148_spill] sm:$0xff] %v8491_v15  ;;  %v730_v15 = vld [vmem:[#allocation2 + $0x16a] sm:$0xff] }
 0x211   : > { %1698 = vrot.lane.b32.xlu1 %v721_v56, %s7230_s24  ;;  %1704 = vrot.lane.b32.xlu0 %v724_v39, %s7230_s24  ;;  %v727_v56 = vld [vmem:[#allocation2 + $0x142] sm:$0xff] }
 0x213   : > { %v8495_v44 = vpop.permute.xlu1 %1458  ;;  %v8497_v27 = vpop.permute.xlu0 %1464 }
 0x214   : > { %12469 = vst [vmem:[#allocation149_spill] sm:$0xff] %v8495_v44  ;;  %12470 = vst [vmem:[#allocation150_spill] sm:$0xff] %v8497_v27 }
 0x215   : > { %1702 = vrot.lane.b32.xlu1 %v723_v7, %s7230_s24  ;;  %1708 = vrot.lane.b32.xlu0 %v726_v35, %s7230_s24  ;;  %v729_v7 = vld [vmem:[#allocation2 + $0x15a] sm:$0xff] }
 0x217   : > { %v8501_v48 = vpop.permute.xlu1 %1462  ;;  %v8503_v40 = vpop.permute.xlu0 %1468 }
 0x218   : > { %12471 = vst [vmem:[#allocation151_spill] sm:$0xff] %v8501_v48  ;;  %12472 = vst [vmem:[#allocation152_spill] sm:$0xff] %v8503_v40  ;;  %v734_v40 = vld [vmem:[#allocation2 + $0x19a] sm:$0xff] }
 0x219   : > { %1706 = vrot.lane.b32.xlu1 %v725_v60, %s7230_s24  ;;  %1712 = vrot.lane.b32.xlu0 %v728_v1, %s7230_s24  ;;  %v731_v60 = vld [vmem:[#allocation2 + $0x172] sm:$0xff] }
 0x21b   : > { %v8507_v39 = vpop.permute.xlu1 %1466  ;;  %v8509_v27 = vpop.permute.xlu0 %1536 }
 0x21c   : > { %12473 = vst [vmem:[#allocation153_spill] sm:$0xff] %v8507_v39 }
 0x21d   : > { %1710 = vrot.lane.b32.xlu1 %v727_v56, %s7230_s24  ;;  %1716 = vrot.lane.b32.xlu0 %v730_v15, %s7230_s24 }
 0x21f   : > { %v8513_v35 = vpop.permute.xlu1 %1470  ;;  %v8515_v48 = vpop.permute.xlu0 %1540 }
 0x220   : > { %12474 = vst [vmem:[#allocation154_spill] sm:$0xff] %v8513_v35  ;;  %v2363_v35 = vld [vmem:[%s8529_s28 + $0x10] sm:$0xff] }
 0x221   : > { %1714 = vrot.lane.b32.xlu1 %v729_v7, %s7230_s24  ;;  %1720 = vrot.lane.b32.xlu0 %v8166_v22, %s7230_s24  ;;  %v2361_v22 = vld [vmem:[%s8529_s28] sm:$0xff] }
 0x222   : > { %v735_v7 = vld [vmem:[#allocation2 + $0x1a2] sm:$0xff] }
 0x223   : > { %v8520_v1 = vpop.permute.xlu1 %1538  ;;  %v8522_v39 = vpop.permute.xlu0 %1544 }
 0x225   : > { %1718 = vrot.lane.b32.xlu1 %v731_v60, %s7230_s24  ;;  %1724 = vrot.lane.b32.xlu0 %v734_v40, %s7230_s24  ;;  %v2362_v40 = vld [vmem:[%s8529_s28 + $0x8] sm:$0xff] }
 0x227   : > { %v8532_v15 = vpop.permute.xlu1 %1542  ;;  %v8535_v56 = vpop.permute.xlu0 %1548 }
 0x229   : > { %1722 = vrot.lane.b32.xlu1 %v8180_v29, %s7230_s24  ;;  %2425 = vrot.lane.b32.xlu0 %v2361_v22, %s7231_s29  ;;  %v2365_v29 = vld [vmem:[%s8529_s28 + $0x20] sm:$0xff]  ;;  %v2364_v22 = vld [vmem:[%s8529_s28 + $0x18] sm:$0xff] }
 0x22b   : > { %v8539_v60 = vpop.permute.xlu1 %1546  ;;  %v8543_v44 = vpop.permute.xlu0 %1552 }
 0x22c   : > { %12475 = vst [vmem:[#allocation155_spill] sm:$0xff] %v8543_v44  ;;  %v12504_v44 = vld [vmem:[#allocation67_spill] sm:$0xff] }
 0x22d   : > { %1726 = vrot.lane.b32.xlu1 %v735_v7, %s7230_s24  ;;  %2429 = vrot.lane.b32.xlu0 %v2363_v35, %s7231_s29  ;;  %v2367_v7 = vld [vmem:[%s8529_s28 + $0x30] sm:$0xff]  ;;  %v2366_v35 = vld [vmem:[%s8529_s28 + $0x28] sm:$0xff] }
 0x22f   : > { %v8547_v3 = vpop.permute.xlu1 %1550  ;;  %v8551_v30 = vpop.permute.xlu0 %1556 }
 0x230   : > { %12476 = vst [vmem:[#allocation156_spill] sm:$0xff] %v8551_v30 }
 0x231   : > { %2427 = vrot.lane.b32.xlu1 %v2362_v40, %s7231_s29  ;;  %2433 = vrot.lane.b32.xlu0 %v2365_v29, %s7231_s29  ;;  %v2369_v40 = vld [vmem:[%s8529_s28 + $0x40] sm:$0xff]  ;;  %v2368_v29 = vld [vmem:[%s8529_s28 + $0x38] sm:$0xff] }
 0x233   : > { %v8555_v5 = vpop.permute.xlu1 %1554  ;;  %v8559_v62 = vpop.permute.xlu0 %1560 }
 0x234   : > { %12477 = vst [vmem:[#allocation157_spill] sm:$0xff] %v8555_v5  ;;  %12478 = vst [vmem:[#allocation158_spill] sm:$0xff] %v8559_v62 }
 0x235   : > { %2431 = vrot.lane.b32.xlu1 %v2364_v22, %s7231_s29  ;;  %2437 = vrot.lane.b32.xlu0 %v2367_v7, %s7231_s29  ;;  %v2371_v22 = vld [vmem:[%s8529_s28 + $0x50] sm:$0xff]  ;;  %v2370_v7 = vld [vmem:[%s8529_s28 + $0x48] sm:$0xff] }
 0x237   : > { %v8563_v45 = vpop.permute.xlu1 %1558  ;;  %v8567_v30 = vpop.permute.xlu0 %1564 }
 0x238   : > { %12479 = vst [vmem:[#allocation159_spill] sm:$0xff] %v8563_v45  ;;  %12480 = vst [vmem:[#allocation160_spill] sm:$0xff] %v8567_v30 }
 0x239   : > { %2435 = vrot.lane.b32.xlu1 %v2366_v35, %s7231_s29  ;;  %2441 = vrot.lane.b32.xlu0 %v2369_v40, %s7231_s29  ;;  %v2373_v35 = vld [vmem:[%s8529_s28 + $0x60] sm:$0xff]  ;;  %v2372_v40 = vld [vmem:[%s8529_s28 + $0x58] sm:$0xff] }
 0x23b   : > { %v8571_v5 = vpop.permute.xlu1 %1562  ;;  %v8575_v62 = vpop.permute.xlu0 %1568 }
 0x23c   : > { %12481 = vst [vmem:[#allocation161_spill] sm:$0xff] %v8571_v5  ;;  %12482 = vst [vmem:[#allocation162_spill] sm:$0xff] %v8575_v62 }
 0x23d   : > { %2439 = vrot.lane.b32.xlu1 %v2368_v29, %s7231_s29  ;;  %2445 = vrot.lane.b32.xlu0 %v2371_v22, %s7231_s29  ;;  %v2375_v29 = vld [vmem:[%s8529_s28 + $0x70] sm:$0xff]  ;;  %v2374_v22 = vld [vmem:[%s8529_s28 + $0x68] sm:$0xff] }
 0x23f   : > { %v8579_v45 = vpop.permute.xlu1 %1566  ;;  %v8583_v30 = vpop.permute.xlu0 %1572 }
 0x240   : > { %12483 = vst [vmem:[#allocation163_spill] sm:$0xff] %v8579_v45  ;;  %12484 = vst [vmem:[#allocation164_spill] sm:$0xff] %v8583_v30 }
 0x241   : > { %2443 = vrot.lane.b32.xlu1 %v2370_v7, %s7231_s29  ;;  %2449 = vrot.lane.b32.xlu0 %v2373_v35, %s7231_s29  ;;  %v2377_v7 = vld [vmem:[%s8529_s28 + $0x80] sm:$0xff] }
 0x243   : > { %v8587_v5 = vpop.permute.xlu1 %1570  ;;  %v8591_v62 = vpop.permute.xlu0 %1576 }
 0x244   : > { %12485 = vst [vmem:[#allocation165_spill] sm:$0xff] %v8587_v5  ;;  %12486 = vst [vmem:[#allocation166_spill] sm:$0xff] %v8591_v62  ;;  %v2376_v5 = vld [vmem:[%s8529_s28 + $0x78] sm:$0xff]  ;;  %v2379_v62 = vld [vmem:[%s8529_s28 + $0x90] sm:$0xff] }
 0x245   : > { %2447 = vrot.lane.b32.xlu1 %v2372_v40, %s7231_s29  ;;  %2453 = vrot.lane.b32.xlu0 %v2375_v29, %s7231_s29 }
 0x247   : > { %v8595_v45 = vpop.permute.xlu1 %1574  ;;  %v8599_v30 = vpop.permute.xlu0 %1580 }
 0x248   : > { %12487 = vst [vmem:[#allocation167_spill] sm:$0xff] %v8595_v45  ;;  %12488 = vst [vmem:[#allocation168_spill] sm:$0xff] %v8599_v30  ;;  %v2378_v45 = vld [vmem:[%s8529_s28 + $0x88] sm:$0xff]  ;;  %v2381_v30 = vld [vmem:[%s8529_s28 + $0xa0] sm:$0xff] }
 0x249   : > { %2451 = vrot.lane.b32.xlu1 %v2374_v22, %s7231_s29  ;;  %2457 = vrot.lane.b32.xlu0 %v2377_v7, %s7231_s29  ;;  %v2380_v22 = vld [vmem:[%s8529_s28 + $0x98] sm:$0xff]  ;;  %v447_v7 = vld [vmem:[#allocation2] sm:$0xff] }
 0x24b   : > { %v8603_v35 = vpop.permute.xlu1 %1578  ;;  %v8607_v40 = vpop.permute.xlu0 %1584 }
 0x24c   : > { %12489 = vst [vmem:[#allocation169_spill] sm:$0xff] %v8603_v35  ;;  %12490 = vst [vmem:[#allocation170_spill] sm:$0xff] %v8607_v40  ;;  %v2383_v40 = vld [vmem:[%s8529_s28 + $0xb0] sm:$0xff] }
 0x24d   : > { %2455 = vrot.lane.b32.xlu1 %v2376_v5, %s7231_s29  ;;  %2461 = vrot.lane.b32.xlu0 %v2379_v62, %s7231_s29  ;;  %v2382_v62 = vld [vmem:[%s8529_s28 + $0xa8] sm:$0xff] }
 0x24f   : > { %v8611_v29 = vpop.permute.xlu1 %1582  ;;  %v8615_v32 = vpop.permute.xlu0 %1588 }
 0x250   : > { %12491 = vst [vmem:[#allocation171_spill] sm:$0xff] %v8611_v29  ;;  %12492 = vst [vmem:[#allocation172_spill] sm:$0xff] %v8615_v32  ;;  %v12495_v29 = vld [vmem:[#allocation4_spill] sm:$0xff] }
 0x251   : > { %2459 = vrot.lane.b32.xlu1 %v2378_v45, %s7231_s29  ;;  %2465 = vrot.lane.b32.xlu0 %v2381_v30, %s7231_s29  ;;  %v1760_v32 = vsel %vm326_vm0, %v447_v7, %v12495_v29  ;;  %v448_v29 = vld [vmem:[#allocation2 + $0x8] sm:$0xff] }
 0x253   : > { %v8619_v35 = vpop.permute.xlu1 %1586  ;;  %v8623_v5 = vpop.permute.xlu0 %1592 }
 0x254   : > { %12493 = vst [vmem:[#allocation173_spill] sm:$0xff] %v8619_v35  ;;  %12494 = vst [vmem:[#allocation174_spill] sm:$0xff] %v8623_v5  ;;  %v12497_v35 = vld [vmem:[#allocation62_spill] sm:$0xff] }
 0x255   : > { %2463 = vrot.lane.b32.xlu1 %v2380_v22, %s7231_s29  ;;  %2469 = vrot.lane.b32.xlu0 %v2383_v40, %s7231_s29  ;;  %v1793_v30 = vsel %vm1792_vm2, %v1760_v32, %v12497_v35  ;;  %v2384_v40 = vld [vmem:[%s8529_s28 + $0xb8] sm:$0xff] }
 0x256   : > { %v1826_v22 = vsel %vm1825_vm3, %v1793_v30, %v8018_v52  ;;  %v12500_v30 = vld [vmem:[#allocation5_spill] sm:$0xff] }
 0x257   : > { %v8629_v45 = vpop.permute.xlu1 %1590  ;;  %v8637_v5 = vpop.permute.xlu0 %1596  ;;  %v1859_v7 = vsel %vm1858_vm4, %v1826_v22, %v8150_v23  ;;  %v7148_v23 = vld [vmem:[#allocation2 + $0x18] sm:$0xff] }
 0x258   : > { %12496 = vst [vmem:[#allocation4_spill] sm:$0xff] %v8629_v45  ;;  %12498 = vst [vmem:[#allocation62_spill] sm:$0xff] %v8637_v5  ;;  %v1892_v32 = vsel %vm1891_vm5, %v1859_v7, %v8282_v11  ;;  %v1761_v5 = vsel %vm326_vm0, %v448_v29, %v12500_v30  ;;  %v12501_v22 = vld [vmem:[#allocation7_spill] sm:$0xff] }
 0x259   : > { %2467 = vrot.lane.b32.xlu1 %v2382_v62, %s7231_s29  ;;  %2473 = vrot.lane.b32.xlu0 %v2385_v26, %s7231_s29  ;;  %v1925_v52 = vsel %vm1924_vm6, %v1892_v32, %v8408_v10  ;;  %v2387_v62 = vld [vmem:[%s8529_s28 + $0xd0] sm:$0xff]  ;;  %v1762_v45 = vsel %vm326_vm0, %v7148_v23, %v12501_v22  ;;  %v7150_v10 = vld [vmem:[#allocation2 + $0x20] sm:$0xff]  ;;  %v12503_v32 = vld [vmem:[#allocation11_spill] sm:$0xff]  ;;  %v1794_v29 = vsel %vm1792_vm2, %v1761_v5, %v12504_v44 }
 0x25a   : > { %v1958_v11 = vsel %vm1957_vm7, %v1925_v52, %v8509_v27  ;;  %v7149_v26 = vld [vmem:[#allocation2 + $0x30] sm:$0xff]  ;;  %v1763_v46 = vsel %vm326_vm0, %v7150_v10, %v12503_v32  ;;  %v2386_v23 = vld [vmem:[%s8529_s28 + $0xc8] sm:$0xff]  ;;  %v12505_v27 = vld [vmem:[#allocation12_spill] sm:$0xff] }
 0x25b   : > { %v8645_v35 = vpop.permute.xlu1 %1594  ;;  %v1665_v7 = vpop.permute.xlu0 %1664  ;;  %v7151_v22 = vld [vmem:[#allocation2 + $0x48] sm:$0xff]  ;;  %v7152_v44 = vld [vmem:[#allocation2 + $0x38] sm:$0xff]  ;;  %v12507_v5 = vld [vmem:[#allocation14_spill] sm:$0xff] }
 0x25c   : > { %12499 = vst [vmem:[#allocation175_spill] sm:$0xff] %v8645_v35  ;;  %v12502_v35 = vld [vmem:[#allocation9_spill] sm:$0xff]  ;;  %v1991_v30 = vsel %vm1990_vm8, %v1958_v11, %v1665_v7  ;;  %v1766_v52 = vsel %vm326_vm0, %v7151_v22, %v12505_v27  ;;  %v1765_v11 = vsel %vm326_vm0, %v7152_v44, %v12507_v5  ;;  %v7153_v7 = vld [vmem:[#allocation2 + $0x60] sm:$0xff]  ;;  %v12508_v10 = vld [vmem:[#allocation15_spill] sm:$0xff] }
 0x25d   : > { %2471 = vrot.lane.b32.xlu1 %v2384_v40, %s7231_s29  ;;  %v1764_v13 = vsel %vm326_vm0, %v7149_v26, %v12502_v35  ;;  %v12506_v40 = vld [vmem:[#allocation66_spill] sm:$0xff]  ;;  %v1827_v35 = vsel %vm1825_vm3, %v1794_v29, %v8032_v55  ;;  %6905 = vmatprep.mubr.msk.f32.mxu0 %vm2039_vm9, %v1991_v30  ;;  %v8680_v32 = vsel %vm326_vm0, %v7153_v7, %v12508_v10  ;;  %v2389_v29 = vld [vmem:[%s8529_s28 + $0xe0] sm:$0xff]  ;;  %v12509_v22 = vld [vmem:[#allocation17_spill] sm:$0xff] }
 0x25e   : > { %v1795_v20 = vsel %vm1792_vm2, %v1762_v45, %v12506_v40  ;;  %2477 = vrot.lane.b32.xlu0 %v2387_v62, %s7231_s29  ;;  %v1860_v55 = vsel %vm1858_vm4, %v1827_v35, %v8164_v33  ;;  %v7154_v30 = vld [vmem:[#allocation2 + $0x50] sm:$0xff]  ;;  %v7155_v27 = vld [vmem:[#allocation2 + $0x78] sm:$0xff]  ;;  %v7156_v33 = vld [vmem:[#allocation2 + $0x68] sm:$0xff] }
 0x25f   : > { %v8673_v26 = vpop.permute.xlu1 %1598  ;;  %v1828_v45 = vsel %vm1825_vm3, %v1795_v20, %v8026_v54  ;;  %v1767_v62 = vsel %vm326_vm0, %v7154_v30, %v12509_v22  ;;  %v12510_v40 = vld [vmem:[#allocation18_spill] sm:$0xff]  ;;  %v1893_v54 = vsel %vm1891_vm5, %v1860_v55, %v8296_v16  ;;  %v1669_v20 = vpop.permute.xlu0 %1668  ;;  %v12511_v35 = vld [vmem:[#allocation20_spill] sm:$0xff]  ;;  %v12513_v16 = vld [vmem:[#allocation69_spill] sm:$0xff] }
 0x260   : > { %v8691_v44 = vsel %vm326_vm0, %v7155_v27, %v12510_v40  ;;  %v1861_v5 = vsel %vm1858_vm4, %v1828_v45, %v8158_v28  ;;  %v8700_v7 = vsel %vm326_vm0, %v7156_v33, %v12511_v35  ;;  %v12512_v10 = vld [vmem:[#allocation70_spill] sm:$0xff]  ;;  %v1926_v28 = vsel %vm1924_vm6, %v1893_v54, %v8422_v0  ;;  %v2388_v45 = vld [vmem:[%s8529_s28 + $0xd8] sm:$0xff]  ;;  %v12515_v33 = vld [vmem:[#allocation72_spill] sm:$0xff] }
 0x261   : > { %2475 = vrot.lane.b32.xlu1 %v2386_v23, %s7231_s29  ;;  %v1796_v30 = vsel %vm1792_vm2, %v1763_v46, %v12512_v10  ;;  %v1894_v22 = vsel %vm1891_vm5, %v1861_v5, %v8290_v12  ;;  %v1797_v55 = vsel %vm1792_vm2, %v1764_v13, %v12513_v16  ;;  %v1959_v40 = vsel %vm1957_vm7, %v1926_v28, %v8520_v1  ;;  %v2391_v5 = vld [vmem:[%s8529_s28 + $0xf0] sm:$0xff]  ;;  %v12516_v10 = vld [vmem:[#allocation71_spill] sm:$0xff] }
 0x262   : > { %v1829_v23 = vsel %vm1825_vm3, %v1796_v30, %v8042_v57  ;;  %v1927_v27 = vsel %vm1924_vm6, %v1894_v22, %v8414_v38  ;;  %2481 = vrot.lane.b32.xlu0 %v2389_v29, %s7231_s29  ;;  %v1830_v12 = vsel %vm1825_vm3, %v1797_v55, %v8036_v50  ;;  %v7157_v50 = vld [vmem:[#allocation2 + $0x90] sm:$0xff]  ;;  %v1798_v35 = vsel %vm1792_vm2, %v1765_v11, %v12515_v33 }
 0x263   : > { %v1667_v46 = vpop.permute.xlu1 %1666  ;;  %v1862_v0 = vsel %vm1858_vm4, %v1829_v23, %v8174_v36  ;;  %v1960_v13 = vsel %vm1957_vm7, %v1927_v27, %v8515_v48  ;;  %v1863_v38 = vsel %vm1858_vm4, %v1830_v12, %v8168_v19  ;;  %v1673_v54 = vpop.permute.xlu0 %1672  ;;  %v12514_v36 = vld [vmem:[#allocation22_spill] sm:$0xff]  ;;  %v1799_v30 = vsel %vm1792_vm2, %v1766_v52, %v12516_v10  ;;  %v2392_v27 = vld [vmem:[%s8529_s28 + $0xf8] sm:$0xff] }
 0x264   : > { %v1992_v57 = vsel %vm1990_vm8, %v1959_v40, %v1667_v46  ;;  %v1895_v1 = vsel %vm1891_vm5, %v1862_v0, %v8303_v58  ;;  %v1993_v29 = vsel %vm1990_vm8, %v1960_v13, %v1669_v20  ;;  %v8735_v48 = vsel %vm326_vm0, %v7157_v50, %v12514_v36  ;;  %v2390_v20 = vld [vmem:[%s8529_s28 + $0xe8] sm:$0xff]  ;;  %v12521_v50 = vld [vmem:[#allocation155_spill] sm:$0xff]  ;;  %v12525_v10 = vld [vmem:[#allocation30_spill] sm:$0xff] }
 0x265   : > { %6906 = vmatmul.mubr.msk.f32.vlgmr.msra.gmra.mrb[0].mxu0 %vm2039_vm9, %v1992_v57  ;;  %2479 = vrot.lane.b32.xlu1 %v2388_v45, %s7231_s29  ;;  %v1896_v19 = vsel %vm1891_vm5, %v1863_v38, %v8298_v43  ;;  %v1928_v58 = vsel %vm1924_vm6, %v1895_v1, %v8428_v14  ;;  %v1831_v22 = vsel %vm1825_vm3, %v1798_v35, %v8052_v61  ;;  %v12518_v40 = vld [vmem:[#allocation73_spill] sm:$0xff] }
 0x266   : > { %6908 = vmatprep.mubr.msk.f32.mxu0 %vm2039_vm9, %v1993_v29  ;;  %v1929_v28 = vsel %vm1924_vm6, %v1896_v19, %v8424_v8  ;;  %v1961_v11 = vsel %vm1957_vm7, %v1928_v58, %v8532_v15  ;;  %2485 = vrot.lane.b32.xlu0 %v2391_v5, %s7231_s29  ;;  %v1832_v43 = vsel %vm1825_vm3, %v1799_v30, %v8044_v59  ;;  %v7158_v59 = vld [vmem:[#allocation2 + $0x80] sm:$0xff] }
 0x267   : > { %v1671_v45 = vpop.permute.xlu1 %1670  ;;  %v1864_v14 = vsel %vm1858_vm4, %v1831_v22, %v8184_v49  ;;  %v1962_v52 = vsel %vm1957_vm7, %v1929_v28, %v8522_v39  ;;  %v1865_v8 = vsel %vm1858_vm4, %v1832_v43, %v8176_v24  ;;  %v1677_v55 = vpop.permute.xlu0 %1676  ;;  %v12517_v49 = vld [vmem:[#allocation24_spill] sm:$0xff]  ;;  %v1800_v39 = vsel %vm1792_vm2, %v1767_v62, %v7928_v4  ;;  %v12526_v22 = vld [vmem:[#allocation75_spill] sm:$0xff]  ;;  %v12528_v43 = vld [vmem:[#allocation133_spill] sm:$0xff] }
 0x268   : > { %v1994_v61 = vsel %vm1990_vm8, %v1961_v11, %v1671_v45  ;;  %v1897_v15 = vsel %vm1891_vm5, %v1864_v14, %v8310_v34  ;;  %v1995_v16 = vsel %vm1990_vm8, %v1962_v52, %v1673_v54  ;;  %v1771_v23 = vsel %vm326_vm0, %v7158_v59, %v12517_v49  ;;  %v12527_v11 = vld [vmem:[#allocation55_spill] sm:$0xff]  ;;  %v12529_v52 = vld [vmem:[#allocation74_spill] sm:$0xff]  ;;  %v12532_v59 = vld [vmem:[#allocation157_spill] sm:$0xff] }
 0x269   : > { %6909 = vmatmul.mubr.msk.f32.gmra.mrb[2].mxu0 %vm2039_vm9, %v1994_v61  ;;  %2483 = vrot.lane.b32.xlu1 %v2390_v20, %s7231_s29  ;;  %v1898_v24 = vsel %vm1891_vm5, %v1865_v8, %v8305_v21  ;;  %v1930_v34 = vsel %vm1924_vm6, %v1897_v15, %v8435_v42  ;;  %v1801_v46 = vsel %vm1792_vm2, %v8680_v32, %v12518_v40  ;;  %v7161_v20 = vld [vmem:[#allocation2 + $0xc0] sm:$0xff] }
 0x26a   : > { %6911 = vmatprep.mubr.msk.f32.mxu0 %vm2039_vm9, %v1995_v16  ;;  %v1833_v12 = vsel %vm1825_vm3, %v1800_v39, %v8060_v63  ;;  %v1931_v0 = vsel %vm1924_vm6, %v1898_v24, %v8430_v47  ;;  %v1963_v4 = vsel %vm1957_vm7, %v1930_v34, %v8539_v60  ;;  %v1834_v42 = vsel %vm1825_vm3, %v1801_v46, %v8054_v53  ;;  %v7159_v53 = vld [vmem:[#allocation2 + $0xa8] sm:$0xff]  ;;  %v12530_v8 = vld [vmem:[#allocation96_spill] sm:$0xff]  ;;  %v12533_v39 = vld [vmem:[#allocation95_spill] sm:$0xff] }
 0x26b   : > { %v1675_v21 = vpop.permute.xlu1 %1674  ;;  %v1866_v62 = vsel %vm1858_vm4, %v1833_v12, %v8192_v18  ;;  %v1964_v13 = vsel %vm1957_vm7, %v1931_v0, %v8535_v56  ;;  %v1867_v63 = vsel %vm1858_vm4, %v1834_v42, %v8186_v17  ;;  %v1681_v57 = vpop.permute.xlu0 %1680  ;;  %v12519_v18 = vld [vmem:[#allocation26_spill] sm:$0xff]  ;;  %v1802_v56 = vsel %vm1792_vm2, %v8700_v7, %v7936_v25  ;;  %v12531_v16 = vld [vmem:[#allocation132_spill] sm:$0xff]  ;;  %v12534_v34 = vld [vmem:[#allocation13_spill] sm:$0xff] }
 0x26c   : > { %v1996_v32 = vsel %vm1990_vm8, %v1963_v4, %v1675_v21  ;;  %v1899_v47 = vsel %vm1891_vm5, %v1866_v62, %v8316_v41  ;;  %v1997_v60 = vsel %vm1990_vm8, %v1964_v13, %v1677_v55  ;;  %v1774_v5 = vsel %vm326_vm0, %v7159_v53, %v12519_v18  ;;  %v12535_v40 = vld [vmem:[#allocation156_spill] sm:$0xff]  ;;  %v7162_v12 = vld [vmem:[#allocation2 + $0xb0] sm:$0xff]  ;;  %v12538_v62 = vld [vmem:[#allocation61_spill] sm:$0xff] }
 0x26d   : > { %6912 = vmatmul.mubr.msk.f32.gmra.mrb[4].mxu0 %vm2039_vm9, %v1996_v32  ;;  %2487 = vrot.lane.b32.xlu1 %v2392_v27, %s7231_s29  ;;  %v1900_v17 = vsel %vm1891_vm5, %v1867_v63, %v8312_v9  ;;  %v1932_v41 = vsel %vm1924_vm6, %v1899_v47, %v8441_v31  ;;  %v1803_v38 = vsel %vm1792_vm2, %v8691_v44, %v7930_v37  ;;  %v12520_v31 = vld [vmem:[#allocation8_spill] sm:$0xff]  ;;  %v7160_v44 = vld [vmem:[#allocation2 + $0x98] sm:$0xff]  ;;  %v12537_v21 = vld [vmem:[#allocation10_spill] sm:$0xff] }
 0x26e   : > { %6914 = vmatprep.mubr.msk.f32.mxu0 %vm2039_vm9, %v1997_v60  ;;  %v1835_v1 = vsel %vm1825_vm3, %v1802_v56, %v8068_v2  ;;  %v1933_v29 = vsel %vm1924_vm6, %v1900_v17, %v8437_v6  ;;  %v1965_v25 = vsel %vm1957_vm7, %v1932_v41, %v8547_v3  ;;  %v1836_v9 = vsel %vm1825_vm3, %v1803_v38, %v8062_v51  ;;  %v12522_v2 = vld [vmem:[#allocation28_spill] sm:$0xff]  ;;  %v12523_v6 = vld [vmem:[#allocation6_spill] sm:$0xff]  ;;  %v12524_v3 = vld [vmem:[#allocation57_spill] sm:$0xff] }
 0x26f   : > { %v1679_v7 = vpop.permute.xlu1 %1678  ;;  %v1868_v54 = vsel %vm1858_vm4, %v1835_v1, %v12520_v31  ;;  %v1966_v36 = vsel %vm1957_vm7, %v1933_v29, %v12521_v50  ;;  %v1773_v33 = vsel %vm326_vm0, %v7160_v44, %v12522_v2  ;;  %v1869_v35 = vsel %vm1858_vm4, %v1836_v9, %v12523_v6  ;;  %v1685_v58 = vpop.permute.xlu0 %1684  ;;  %v12536_v0 = vld [vmem:[#allocation32_spill] sm:$0xff]  ;;  %v12541_v18 = vld [vmem:[#allocation59_spill] sm:$0xff]  ;;  %v12543_v38 = vld [vmem:[#allocation78_spill] sm:$0xff] }
 0x270   : > { %v1998_v37 = vsel %vm1990_vm8, %v1965_v25, %v1679_v7  ;;  %v1901_v19 = vsel %vm1891_vm5, %v1868_v54, %v12524_v3  ;;  %v1999_v51 = vsel %vm1990_vm8, %v1966_v36, %v1681_v57  ;;  %v1776_v30 = vsel %vm326_vm0, %v7161_v20, %v12525_v10  ;;  %v12539_v47 = vld [vmem:[#allocation76_spill] sm:$0xff]  ;;  %v12540_v57 = vld [vmem:[#allocation77_spill] sm:$0xff]  ;;  %v12542_v17 = vld [vmem:[#allocation135_spill] sm:$0xff] }
 0x271   : > { %6915 = vmatmul.mubr.msk.f32.gmra.mrb[6].mxu0 %vm2039_vm9, %v1998_v37  ;;  %v1804_v28 = vsel %vm1792_vm2, %v1771_v23, %v12526_v22  ;;  %v1902_v45 = vsel %vm1891_vm5, %v1869_v35, %v12527_v11  ;;  %v1934_v14 = vsel %vm1924_vm6, %v1901_v19, %v12528_v43  ;;  %v1805_v61 = vsel %vm1792_vm2, %v8735_v48, %v12529_v52  ;;  %v12544_v29 = vld [vmem:[#allocation98_spill] sm:$0xff]  ;;  %v12546_v9 = vld [vmem:[#allocation159_spill] sm:$0xff]  ;;  %v12547_v50 = vld [vmem:[#allocation97_spill] sm:$0xff] }
 0x272   : > { %6917 = vmatprep.mubr.msk.f32.mxu0 %vm2039_vm9, %v1999_v51  ;;  %v1837_v15 = vsel %vm1825_vm3, %v1804_v28, %v12530_v8  ;;  %v1935_v55 = vsel %vm1924_vm6, %v1902_v45, %v12531_v16  ;;  %v1967_v49 = vsel %vm1957_vm7, %v1934_v14, %v12532_v59  ;;  %v1838_v24 = vsel %vm1825_vm3, %v1805_v61, %v12533_v39  ;;  %v12545_v7 = vld [vmem:[#allocation134_spill] sm:$0xff]  ;;  %v12548_v37 = vld [vmem:[#allocation19_spill] sm:$0xff]  ;;  %v12551_v19 = vld [vmem:[#allocation16_spill] sm:$0xff] }
 0x273   : > { %v1683_v23 = vpop.permute.xlu1 %1682  ;;  %v1870_v27 = vsel %vm1858_vm4, %v1837_v15, %v12534_v34  ;;  %v1968_v46 = vsel %vm1957_vm7, %v1935_v55, %v12535_v40  ;;  %v1775_v4 = vsel %vm326_vm0, %v7162_v12, %v12536_v0  ;;  %v1871_v42 = vsel %vm1858_vm4, %v1838_v24, %v12537_v21  ;;  %v1689_v63 = vpop.permute.xlu0 %1688  ;;  %v12549_v2 = vld [vmem:[#allocation158_spill] sm:$0xff]  ;;  %v12550_v35 = vld [vmem:[#allocation99_spill] sm:$0xff]  ;;  %v12554_v11 = vld [vmem:[#allocation21_spill] sm:$0xff] }
 0x274   : > { %v2000_v48 = vsel %vm1990_vm8, %v1967_v49, %v1683_v23  ;;  %v1903_v13 = vsel %vm1891_vm5, %v1870_v27, %v12538_v62  ;;  %v2001_v32 = vsel %vm1990_vm8, %v1968_v46, %v1685_v58  ;;  %v1807_v60 = vsel %vm1792_vm2, %v1774_v5, %v12539_v47  ;;  %v12552_v58 = vld [vmem:[#allocation65_spill] sm:$0xff]  ;;  %v12553_v22 = vld [vmem:[#allocation79_spill] sm:$0xff]  ;;  %v12557_v8 = vld [vmem:[#allocation100_spill] sm:$0xff] }
 0x275   : > { %6918 = vmatmul.mubr.msk.f32.gmra.mrb[8].mxu0 %vm2039_vm9, %v2000_v48  ;;  %v1806_v53 = vsel %vm1792_vm2, %v1773_v33, %v12540_v57  ;;  %v1904_v56 = vsel %vm1891_vm5, %v1871_v42, %v12541_v18  ;;  %v1936_v41 = vsel %vm1924_vm6, %v1903_v13, %v12542_v17  ;;  %v1809_v1 = vsel %vm1792_vm2, %v1776_v30, %v12543_v38  ;;  %v12555_v43 = vld [vmem:[#allocation63_spill] sm:$0xff]  ;;  %v12556_v52 = vld [vmem:[#allocation137_spill] sm:$0xff]  ;;  %v12558_v16 = vld [vmem:[#allocation68_spill] sm:$0xff] }
 0x276   : > { %6920 = vmatprep.mubr.msk.f32.mxu0 %vm2039_vm9, %v2001_v32  ;;  %v1839_v25 = vsel %vm1825_vm3, %v1806_v53, %v12544_v29  ;;  %v1937_v5 = vsel %vm1924_vm6, %v1904_v56, %v12545_v7  ;;  %v1969_v31 = vsel %vm1957_vm7, %v1936_v41, %v12546_v9  ;;  %v1840_v36 = vsel %vm1825_vm3, %v1807_v60, %v12547_v50  ;;  %v12559_v59 = vld [vmem:[#allocation136_spill] sm:$0xff]  ;;  %v12560_v23 = vld [vmem:[#allocation161_spill] sm:$0xff]  ;;  %v12561_v34 = vld [vmem:[#allocation23_spill] sm:$0xff] }
 0x277   : > { %v1687_v54 = vpop.permute.xlu1 %1686  ;;  %v1872_v44 = vsel %vm1858_vm4, %v1839_v25, %v12548_v37  ;;  %v1970_v33 = vsel %vm1957_vm7, %v1937_v5, %v12549_v2  ;;  %v1842_v3 = vsel %vm1825_vm3, %v1809_v1, %v12550_v35  ;;  %v1873_v51 = vsel %vm1858_vm4, %v1840_v36, %v12551_v19  ;;  %v1693_v30 = vpop.permute.xlu0 %1692  ;;  %v12562_v40 = vld [vmem:[#allocation138_spill] sm:$0xff]  ;;  %v12563_v48 = vld [vmem:[#allocation160_spill] sm:$0xff]  ;;  %v7164_v57 = vld [vmem:[#allocation2 + $0xd8] sm:$0xff] }
 0x278   : > { %v2002_v6 = vsel %vm1990_vm8, %v1969_v31, %v1687_v54  ;;  %v1905_v20 = vsel %vm1891_vm5, %v1872_v44, %v12552_v58  ;;  %v2003_v10 = vsel %vm1990_vm8, %v1970_v33, %v1689_v63  ;;  %v1808_v28 = vsel %vm1792_vm2, %v1775_v4, %v12553_v22  ;;  %v7163_v4 = vld [vmem:[#allocation2 + $0xc8] sm:$0xff]  ;;  %v12564_v21 = vld [vmem:[#allocation36_spill] sm:$0xff]  ;;  %v12566_v32 = vld [vmem:[#allocation162_spill] sm:$0xff] }
 0x279   : > { %6921 = vmatmul.mubr.msk.f32.gmra.mrb[10].mxu0 %vm2039_vm9, %v2002_v6  ;;  %v1875_v45 = vsel %vm1858_vm4, %v1842_v3, %v12554_v11  ;;  %v1906_v14 = vsel %vm1891_vm5, %v1873_v51, %v12555_v43  ;;  %v1938_v61 = vsel %vm1924_vm6, %v1905_v20, %v12556_v52  ;;  %v1841_v15 = vsel %vm1825_vm3, %v1808_v28, %v12557_v8  ;;  %v12565_v62 = vld [vmem:[#allocation116_spill] sm:$0xff]  ;;  %v12567_v53 = vld [vmem:[#allocation34_spill] sm:$0xff]  ;;  %v12568_v56 = vld [vmem:[#allocation81_spill] sm:$0xff] }
 0x27a   : > { %6923 = vmatprep.mubr.msk.f32.mxu0 %vm2039_vm9, %v2003_v10  ;;  %v1908_v55 = vsel %vm1891_vm5, %v1875_v45, %v12558_v16  ;;  %v1939_v49 = vsel %vm1924_vm6, %v1906_v14, %v12559_v59  ;;  %v1971_v39 = vsel %vm1957_vm7, %v1938_v61, %v12560_v23  ;;  %v1874_v27 = vsel %vm1858_vm4, %v1841_v15, %v12561_v34  ;;  %v12569_v41 = vld [vmem:[#allocation139_spill] sm:$0xff]  ;;  %v12570_v29 = vld [vmem:[#allocation80_spill] sm:$0xff]  ;;  %v12571_v7 = vld [vmem:[#allocation102_spill] sm:$0xff] }
 0x27b   : > { %v1691_v24 = vpop.permute.xlu1 %1690  ;;  %v1941_v46 = vsel %vm1924_vm6, %v1908_v55, %v12562_v40  ;;  %v1972_v12 = vsel %vm1957_vm7, %v1939_v49, %v12563_v48  ;;  %v1777_v42 = vsel %vm326_vm0, %v7163_v4, %v12564_v21  ;;  %v1907_v13 = vsel %vm1891_vm5, %v1874_v27, %v12565_v62  ;;  %v1697_v60 = vpop.permute.xlu0 %1696  ;;  %v12572_v9 = vld [vmem:[#allocation163_spill] sm:$0xff]  ;;  %v12573_v50 = vld [vmem:[#allocation101_spill] sm:$0xff]  ;;  %v7165_v33 = vld [vmem:[#allocation2 + $0xe0] sm:$0xff] }
 0x27c   : > { %v2004_v0 = vsel %vm1990_vm8, %v1971_v39, %v1691_v24  ;;  %v1974_v63 = vsel %vm1957_vm7, %v1941_v46, %v12566_v32  ;;  %v2005_v47 = vsel %vm1990_vm8, %v1972_v12, %v1693_v30  ;;  %v1778_v18 = vsel %vm326_vm0, %v7164_v57, %v12567_v53  ;;  %v12574_v37 = vld [vmem:[#allocation27_spill] sm:$0xff]  ;;  %v12575_v6 = vld [vmem:[#allocation40_spill] sm:$0xff]  ;;  %v12576_v3 = vld [vmem:[#allocation25_spill] sm:$0xff] }
 0x27d   : > { %6924 = vmatmul.mubr.msk.f32.gmra.mrb[12].mxu0 %vm2039_vm9, %v2004_v0  ;;  %v1810_v17 = vsel %vm1792_vm2, %v1777_v42, %v12568_v56  ;;  %v1940_v38 = vsel %vm1924_vm6, %v1907_v13, %v12569_v41  ;;  %v2007_v1 = vsel %vm1990_vm8, %v1974_v63, %v1697_v60  ;;  %v1811_v25 = vsel %vm1792_vm2, %v1778_v18, %v12570_v29  ;;  %v12577_v51 = vld [vmem:[#allocation118_spill] sm:$0xff]  ;;  %v12579_v28 = vld [vmem:[#allocation83_spill] sm:$0xff]  ;;  %v12580_v45 = vld [vmem:[#allocation117_spill] sm:$0xff] }
 0x27e   : > { %6926 = vmatprep.mubr.msk.f32.mxu0 %vm2039_vm9, %v2005_v47  ;;  %v1843_v5 = vsel %vm1825_vm3, %v1810_v17, %v12571_v7  ;;  %v1973_v31 = vsel %vm1957_vm7, %v1940_v38, %v12572_v9  ;;  %6929 = vmatprep.mubr.msk.f32.mxu1 %vm2039_vm9, %v2007_v1  ;;  %v1844_v36 = vsel %vm1825_vm3, %v1811_v25, %v12573_v50  ;;  %v7166_v10 = vld [vmem:[#allocation2 + $0xf0] sm:$0xff]  ;;  %v12581_v14 = vld [vmem:[#allocation141_spill] sm:$0xff]  ;;  %v12583_v15 = vld [vmem:[#allocation104_spill] sm:$0xff] }
 0x27f   : > { %v1695_v54 = vpop.permute.xlu1 %1694  ;;  %v1876_v44 = vsel %vm1858_vm4, %v1843_v5, %v12574_v37  ;;  %v1779_v35 = vsel %vm326_vm0, %v7165_v33, %v12575_v6  ;;  %v1877_v19 = vsel %vm1858_vm4, %v1844_v36, %v12576_v3  ;;  %v1701_v20 = vpop.permute.xlu0 %1700  ;;  %v12578_v30 = vld [vmem:[#allocation38_spill] sm:$0xff]  ;;  %v12584_v55 = vld [vmem:[#allocation140_spill] sm:$0xff]  ;;  %v12585_v49 = vld [vmem:[#allocation165_spill] sm:$0xff] }
 0x280   : > { %v2006_v2 = vsel %vm1990_vm8, %v1973_v31, %v1695_v54  ;;  %v1909_v58 = vsel %vm1891_vm5, %v1876_v44, %v12577_v51  ;;  %v1780_v22 = vsel %vm326_vm0, %v7166_v10, %v12578_v30  ;;  %v1812_v11 = vsel %vm1792_vm2, %v1779_v35, %v12579_v28  ;;  %v12582_v61 = vld [vmem:[#allocation82_spill] sm:$0xff]  ;;  %v12586_v24 = vld [vmem:[#allocation103_spill] sm:$0xff]  ;;  %v12588_v46 = vld [vmem:[#allocation164_spill] sm:$0xff] }
 0x281   : > { %6927 = vmatmul.mubr.msk.f32.gmra.mrb[14].mxu0 %vm2039_vm9, %v2006_v2  ;;  %v1910_v43 = vsel %vm1891_vm5, %v1877_v19, %v12580_v45  ;;  %v1942_v52 = vsel %vm1924_vm6, %v1909_v58, %v12581_v14  ;;  %v1813_v8 = vsel %vm1792_vm2, %v1780_v22, %v12582_v61  ;;  %v1845_v16 = vsel %vm1825_vm3, %v1812_v11, %v12583_v15  ;;  %v12587_v27 = vld [vmem:[#allocation31_spill] sm:$0xff]  ;;  %v12589_v4 = vld [vmem:[#allocation44_spill] sm:$0xff]  ;;  %v12590_v42 = vld [vmem:[#allocation29_spill] sm:$0xff] }
 0x282   : > { %v1943_v59 = vsel %vm1924_vm6, %v1910_v43, %v12584_v55  ;;  %v1975_v23 = vsel %vm1957_vm7, %v1942_v52, %v12585_v49  ;;  %v1846_v34 = vsel %vm1825_vm3, %v1813_v8, %v12586_v24  ;;  %v1878_v40 = vsel %vm1858_vm4, %v1845_v16, %v12587_v27  ;;  %v7167_v0 = vld [vmem:[#allocation2 + $0xf8] sm:$0xff]  ;;  %v12591_v13 = vld [vmem:[#allocation120_spill] sm:$0xff]  ;;  %v7168_v60 = vld [vmem:[#allocation2 + $0x108] sm:$0xff] }
 0x283   : > { %v1699_v39 = vpop.permute.xlu1 %1698  ;;  %v1976_v48 = vsel %vm1957_vm7, %v1943_v59, %v12588_v46  ;;  %v1781_v21 = vsel %vm326_vm0, %v7167_v0, %v12589_v4  ;;  %v1879_v62 = vsel %vm1858_vm4, %v1846_v34, %v12590_v42  ;;  %v1911_v32 = vsel %vm1891_vm5, %v1878_v40, %v12591_v13  ;;  %v1705_v47 = vpop.permute.xlu0 %1704  ;;  %v12592_v57 = vld [vmem:[#allocation42_spill] sm:$0xff]  ;;  %v12593_v18 = vld [vmem:[#allocation85_spill] sm:$0xff]  ;;  %v12594_v17 = vld [vmem:[#allocation119_spill] sm:$0xff] }
 0x284   : > { %v2008_v12 = vsel %vm1990_vm8, %v1975_v23, %v1699_v39  ;;  %v2009_v63 = vsel %vm1990_vm8, %v1976_v48, %v1701_v20  ;;  %v1782_v53 = vsel %vm326_vm0, %v7168_v60, %v12592_v57  ;;  %v1814_v56 = vsel %vm1792_vm2, %v1781_v21, %v12593_v18  ;;  %v12595_v38 = vld [vmem:[#allocation143_spill] sm:$0xff]  ;;  %v12596_v29 = vld [vmem:[#allocation84_spill] sm:$0xff]  ;;  %v12597_v7 = vld [vmem:[#allocation106_spill] sm:$0xff] }
 0x285   : > { %6930 = vmatmul.mubr.msk.f32.vlgmr.msra.gmra.mrb[0].mxu1 %vm2039_vm9, %v2008_v12  ;;  %v1912_v41 = vsel %vm1891_vm5, %v1879_v62, %v12594_v17  ;;  %v1944_v1 = vsel %vm1924_vm6, %v1911_v32, %v12595_v38  ;;  %v1815_v25 = vsel %vm1792_vm2, %v1782_v53, %v12596_v29  ;;  %v1847_v5 = vsel %vm1825_vm3, %v1814_v56, %v12597_v7  ;;  %v12598_v9 = vld [vmem:[#allocation142_spill] sm:$0xff]  ;;  %v12599_v54 = vld [vmem:[#allocation167_spill] sm:$0xff]  ;;  %v12600_v37 = vld [vmem:[#allocation105_spill] sm:$0xff] }
 0x286   : > { %6932 = vmatprep.mubr.msk.f32.mxu1 %vm2039_vm9, %v2009_v63  ;;  %v1945_v31 = vsel %vm1924_vm6, %v1912_v41, %v12598_v9  ;;  %v1977_v50 = vsel %vm1957_vm7, %v1944_v1, %v12599_v54  ;;  %v1848_v44 = vsel %vm1825_vm3, %v1815_v25, %v12600_v37  ;;  %v12601_v2 = vld [vmem:[#allocation35_spill] sm:$0xff]  ;;  %v12602_v6 = vld [vmem:[#allocation166_spill] sm:$0xff]  ;;  %v12603_v51 = vld [vmem:[#allocation48_spill] sm:$0xff] }
 0x287   : > { %v1703_v36 = vpop.permute.xlu1 %1702  ;;  %v1880_v33 = vsel %vm1858_vm4, %v1847_v5, %v12601_v2  ;;  %v1978_v35 = vsel %vm1957_vm7, %v1945_v31, %v12602_v6  ;;  %v7169_v19 = vld [vmem:[#allocation2 + $0x110] sm:$0xff]  ;;  %v12604_v20 = vld [vmem:[#allocation33_spill] sm:$0xff]  ;;  %v1709_v11 = vpop.permute.xlu0 %1708  ;;  %v7170_v45 = vld [vmem:[#allocation2 + $0x120] sm:$0xff] }
 0x288   : > { %v2010_v3 = vsel %vm1990_vm8, %v1977_v50, %v1703_v36  ;;  %v1783_v58 = vsel %vm326_vm0, %v7169_v19, %v12603_v51  ;;  %v1881_v10 = vsel %vm1858_vm4, %v1848_v44, %v12604_v20  ;;  %v12605_v30 = vld [vmem:[#allocation122_spill] sm:$0xff]  ;;  %v2011_v28 = vsel %vm1990_vm8, %v1978_v35, %v1705_v47  ;;  %v12607_v52 = vld [vmem:[#allocation87_spill] sm:$0xff]  ;;  %v12608_v8 = vld [vmem:[#allocation121_spill] sm:$0xff] }
 0x289   : > { %v1913_v22 = vsel %vm1891_vm5, %v1880_v33, %v12605_v30  ;;  %6933 = vmatmul.mubr.msk.f32.gmra.mrb[2].mxu1 %vm2039_vm9, %v2010_v3  ;;  %v12606_v43 = vld [vmem:[#allocation46_spill] sm:$0xff]  ;;  %v1816_v61 = vsel %vm1792_vm2, %v1783_v58, %v12607_v52  ;;  %v1914_v15 = vsel %vm1891_vm5, %v1881_v10, %v12608_v8  ;;  %v12609_v16 = vld [vmem:[#allocation145_spill] sm:$0xff]  ;;  %v12611_v23 = vld [vmem:[#allocation108_spill] sm:$0xff] }
 0x28a   : > { %v1784_v14 = vsel %vm326_vm0, %v7170_v45, %v12606_v43  ;;  %v1946_v55 = vsel %vm1924_vm6, %v1913_v22, %v12609_v16  ;;  %6935 = vmatprep.mubr.msk.f32.mxu1 %vm2039_vm9, %v2011_v28  ;;  %v12610_v59 = vld [vmem:[#allocation86_spill] sm:$0xff]  ;;  %v1849_v39 = vsel %vm1825_vm3, %v1816_v61, %v12611_v23  ;;  %v12612_v24 = vld [vmem:[#allocation144_spill] sm:$0xff]  ;;  %v12613_v27 = vld [vmem:[#allocation169_spill] sm:$0xff] }
 0x28b   : > { %v1817_v49 = vsel %vm1792_vm2, %v1784_v14, %v12610_v59  ;;  %v1947_v34 = vsel %vm1924_vm6, %v1914_v15, %v12612_v24  ;;  %v1979_v40 = vsel %vm1957_vm7, %v1946_v55, %v12613_v27  ;;  %v1707_v46 = vpop.permute.xlu1 %1706  ;;  %v12614_v48 = vld [vmem:[#allocation107_spill] sm:$0xff]  ;;  %v12616_v21 = vld [vmem:[#allocation168_spill] sm:$0xff]  ;;  %v7171_v13 = vld [vmem:[#allocation2 + $0x128] sm:$0xff]  ;;  %v1713_v56 = vpop.permute.xlu0 %1712 }
 0x28c   : > { %v1850_v12 = vsel %vm1825_vm3, %v1817_v49, %v12614_v48  ;;  %v12615_v0 = vld [vmem:[#allocation39_spill] sm:$0xff]  ;;  %v1980_v42 = vsel %vm1957_vm7, %v1947_v34, %v12616_v21  ;;  %v2012_v62 = vsel %vm1990_vm8, %v1979_v40, %v1707_v46  ;;  %v12617_v32 = vld [vmem:[#allocation52_spill] sm:$0xff]  ;;  %v12618_v47 = vld [vmem:[#allocation37_spill] sm:$0xff] }
 0x28d   : > { %v1882_v4 = vsel %vm1858_vm4, %v1849_v39, %v12615_v0  ;;  %v1785_v63 = vsel %vm326_vm0, %v7171_v13, %v12617_v32  ;;  %v1883_v60 = vsel %vm1858_vm4, %v1850_v12, %v12618_v47  ;;  %v12619_v57 = vld [vmem:[#allocation124_spill] sm:$0xff]  ;;  %v2013_v18 = vsel %vm1990_vm8, %v1980_v42, %v1709_v11  ;;  %6936 = vmatmul.mubr.msk.f32.gmra.mrb[4].mxu1 %vm2039_vm9, %v2012_v62  ;;  %v7172_v17 = vld [vmem:[#allocation2 + $0x138] sm:$0xff]  ;;  %v12620_v41 = vld [vmem:[#allocation50_spill] sm:$0xff] }
 0x28e   : > { %v1915_v53 = vsel %vm1891_vm5, %v1882_v4, %v12619_v57  ;;  %v1786_v38 = vsel %vm326_vm0, %v7172_v17, %v12620_v41  ;;  %v12621_v1 = vld [vmem:[#allocation89_spill] sm:$0xff]  ;;  %v12622_v25 = vld [vmem:[#allocation123_spill] sm:$0xff]  ;;  %6938 = vmatprep.mubr.msk.f32.mxu1 %vm2039_vm9, %v2013_v18  ;;  %v12624_v31 = vld [vmem:[#allocation88_spill] sm:$0xff] }
 0x28f   : > { %v1818_v29 = vsel %vm1792_vm2, %v1785_v63, %v12621_v1  ;;  %v1916_v7 = vsel %vm1891_vm5, %v1883_v60, %v12622_v25  ;;  %v12623_v5 = vld [vmem:[#allocation147_spill] sm:$0xff]  ;;  %v1819_v54 = vsel %vm1792_vm2, %v1786_v38, %v12624_v31  ;;  %v12625_v50 = vld [vmem:[#allocation110_spill] sm:$0xff]  ;;  %v1711_v6 = vpop.permute.xlu1 %1710  ;;  %v12628_v35 = vld [vmem:[#allocation109_spill] sm:$0xff]  ;;  %v1717_v61 = vpop.permute.xlu0 %1716 }
 0x290   : > { %v1948_v9 = vsel %vm1924_vm6, %v1915_v53, %v12623_v5  ;;  %v1851_v36 = vsel %vm1825_vm3, %v1818_v29, %v12625_v50  ;;  %v12626_v37 = vld [vmem:[#allocation146_spill] sm:$0xff]  ;;  %v12627_v2 = vld [vmem:[#allocation171_spill] sm:$0xff]  ;;  %v1852_v3 = vsel %vm1825_vm3, %v1819_v54, %v12628_v35  ;;  %v7173_v30 = vld [vmem:[#allocation2 + $0x140] sm:$0xff] }
 0x291   : > { %v1949_v44 = vsel %vm1924_vm6, %v1916_v7, %v12626_v37  ;;  %v1981_v33 = vsel %vm1957_vm7, %v1948_v9, %v12627_v2  ;;  %v12629_v19 = vld [vmem:[#allocation43_spill] sm:$0xff]  ;;  %v12630_v58 = vld [vmem:[#allocation170_spill] sm:$0xff]  ;;  %v12631_v22 = vld [vmem:[#allocation56_spill] sm:$0xff] }
 0x292   : > { %v1884_v51 = vsel %vm1858_vm4, %v1851_v36, %v12629_v19  ;;  %v1982_v20 = vsel %vm1957_vm7, %v1949_v44, %v12630_v58  ;;  %v2014_v10 = vsel %vm1990_vm8, %v1981_v33, %v1711_v6  ;;  %v1787_v28 = vsel %vm326_vm0, %v7173_v30, %v12631_v22  ;;  %v12632_v11 = vld [vmem:[#allocation41_spill] sm:$0xff]  ;;  %v12633_v43 = vld [vmem:[#allocation126_spill] sm:$0xff]  ;;  %v12635_v55 = vld [vmem:[#allocation91_spill] sm:$0xff] }
 0x293   : > { %v1885_v45 = vsel %vm1858_vm4, %v1852_v3, %v12632_v11  ;;  %v1917_v14 = vsel %vm1891_vm5, %v1884_v51, %v12633_v43  ;;  %v2015_v52 = vsel %vm1990_vm8, %v1982_v20, %v1713_v56  ;;  %6939 = vmatmul.mubr.msk.f32.gmra.mrb[6].mxu1 %vm2039_vm9, %v2014_v10  ;;  %v7174_v8 = vld [vmem:[#allocation2 + $0x150] sm:$0xff]  ;;  %v1820_v59 = vsel %vm1792_vm2, %v1787_v28, %v12635_v55  ;;  %v12636_v49 = vld [vmem:[#allocation125_spill] sm:$0xff]  ;;  %v12639_v40 = vld [vmem:[#allocation112_spill] sm:$0xff]  ;;  %v1715_v21 = vpop.permute.xlu1 %1714  ;;  %v1721_v29 = vpop.permute.xlu0 %1720 }
 0x294   : > { %v12634_v15 = vld [vmem:[#allocation54_spill] sm:$0xff]  ;;  %v1918_v23 = vsel %vm1891_vm5, %v1885_v45, %v12636_v49  ;;  %v12637_v39 = vld [vmem:[#allocation149_spill] sm:$0xff]  ;;  %6941 = vmatprep.mubr.msk.f32.mxu1 %vm2039_vm9, %v2015_v52  ;;  %v1853_v46 = vsel %vm1825_vm3, %v1820_v59, %v12639_v40  ;;  %v12640_v48 = vld [vmem:[#allocation148_spill] sm:$0xff] }
 0x295   : > { %v1788_v16 = vsel %vm326_vm0, %v7174_v8, %v12634_v15  ;;  %v1950_v24 = vsel %vm1924_vm6, %v1917_v14, %v12637_v39  ;;  %v12638_v34 = vld [vmem:[#allocation90_spill] sm:$0xff]  ;;  %v1951_v12 = vsel %vm1924_vm6, %v1918_v23, %v12640_v48  ;;  %v12641_v0 = vld [vmem:[#allocation173_spill] sm:$0xff]  ;;  %v12642_v42 = vld [vmem:[#allocation111_spill] sm:$0xff] }
 0x296   : > { %v1821_v27 = vsel %vm1792_vm2, %v1788_v16, %v12638_v34  ;;  %v1983_v4 = vsel %vm1957_vm7, %v1950_v24, %v12641_v0  ;;  %v12643_v13 = vld [vmem:[#allocation47_spill] sm:$0xff]  ;;  %v12644_v63 = vld [vmem:[#allocation172_spill] sm:$0xff]  ;;  %v12646_v56 = vld [vmem:[#allocation45_spill] sm:$0xff] }
 0x297   : > { %v1854_v62 = vsel %vm1825_vm3, %v1821_v27, %v12642_v42  ;;  %v1886_v32 = vsel %vm1858_vm4, %v1853_v46, %v12643_v13  ;;  %v1984_v47 = vsel %vm1957_vm7, %v1951_v12, %v12644_v63  ;;  %v2016_v60 = vsel %vm1990_vm8, %v1983_v4, %v1715_v21  ;;  %v7175_v57 = vld [vmem:[#allocation2 + $0x158] sm:$0xff]  ;;  %v12645_v53 = vld [vmem:[#allocation60_spill] sm:$0xff]  ;;  %v7176_v25 = vld [vmem:[#allocation2 + $0x168] sm:$0xff]  ;;  %v1719_v58 = vpop.permute.xlu1 %1718  ;;  %v1725_v27 = vpop.permute.xlu0 %1724 }
 0x298   : > { %v1789_v18 = vsel %vm326_vm0, %v7175_v57, %v12645_v53  ;;  %v1887_v17 = vsel %vm1858_vm4, %v1854_v62, %v12646_v56  ;;  %v12647_v41 = vld [vmem:[#allocation128_spill] sm:$0xff]  ;;  %v2017_v1 = vsel %vm1990_vm8, %v1984_v47, %v1717_v61  ;;  %6942 = vmatmul.mubr.msk.f32.gmra.mrb[8].mxu1 %vm2039_vm9, %v2016_v60  ;;  %v12648_v7 = vld [vmem:[#allocation58_spill] sm:$0xff]  ;;  %v12649_v9 = vld [vmem:[#allocation93_spill] sm:$0xff] }
 0x299   : > { %v1919_v38 = vsel %vm1891_vm5, %v1886_v32, %v12647_v41  ;;  %v1790_v5 = vsel %vm326_vm0, %v7176_v25, %v12648_v7  ;;  %v1822_v31 = vsel %vm1792_vm2, %v1789_v18, %v12649_v9  ;;  %v12650_v54 = vld [vmem:[#allocation127_spill] sm:$0xff]  ;;  %6944 = vmatprep.mubr.msk.f32.mxu1 %vm2039_vm9, %v2017_v1  ;;  %v12652_v44 = vld [vmem:[#allocation92_spill] sm:$0xff]  ;;  %v12653_v33 = vld [vmem:[#allocation114_spill] sm:$0xff] }
 0x29a   : > { %v1920_v50 = vsel %vm1891_vm5, %v1887_v17, %v12650_v54  ;;  %v12651_v36 = vld [vmem:[#allocation151_spill] sm:$0xff]  ;;  %v1823_v2 = vsel %vm1792_vm2, %v1790_v5, %v12652_v44  ;;  %v1855_v6 = vsel %vm1825_vm3, %v1822_v31, %v12653_v33  ;;  %v12654_v35 = vld [vmem:[#allocation150_spill] sm:$0xff]  ;;  %v12655_v19 = vld [vmem:[#allocation4_spill] sm:$0xff] }
 0x29b   : > { %v1952_v37 = vsel %vm1924_vm6, %v1919_v38, %v12651_v36  ;;  %v1953_v3 = vsel %vm1924_vm6, %v1920_v50, %v12654_v35  ;;  %v12656_v20 = vld [vmem:[#allocation113_spill] sm:$0xff]  ;;  %v12657_v30 = vld [vmem:[#allocation51_spill] sm:$0xff]  ;;  %v12658_v28 = vld [vmem:[#allocation174_spill] sm:$0xff]  ;;  %v1723_v21 = vpop.permute.xlu1 %1722  ;;  %v12672_v38 = vmov 0.0   ;;  %v2426_v25 = vpop.permute.xlu0 %2425 }
 0x29c   : > { %v1985_v51 = vsel %vm1957_vm7, %v1952_v37, %v12655_v19  ;;  %v1856_v10 = vsel %vm1825_vm3, %v1823_v2, %v12656_v20  ;;  %v1888_v22 = vsel %vm1858_vm4, %v1855_v6, %v12657_v30  ;;  %v1986_v11 = vsel %vm1957_vm7, %v1953_v3, %v12658_v28  ;;  %v7177_v43 = vld [vmem:[#allocation2 + $0x170] sm:$0xff]  ;;  %v12659_v14 = vld [vmem:[#allocation64_spill] sm:$0xff]  ;;  %v12660_v61 = vld [vmem:[#allocation49_spill] sm:$0xff]  ;;  %4523 = vst.msk [vmem:[#allocation3] sm:$0xff] %vm2521_vm10, %v12672_v38 }
 0x29d   : > { %v2018_v45 = vsel %vm1990_vm8, %v1985_v51, %v1719_v58  ;;  %v1791_v52 = vsel %vm326_vm0, %v7177_v43, %v12659_v14  ;;  %v1889_v8 = vsel %vm1858_vm4, %v1856_v10, %v12660_v61  ;;  %v12661_v15 = vld [vmem:[#allocation130_spill] sm:$0xff]  ;;  %v2019_v55 = vsel %vm1990_vm8, %v1986_v11, %v1721_v29  ;;  %v12663_v23 = vld [vmem:[#allocation129_spill] sm:$0xff]  ;;  %v12665_v40 = vld [vmem:[#allocation115_spill] sm:$0xff]  ;;  %4524 = vst.msk [vmem:[#allocation3 + $0x8] sm:$0xff] %vm2521_vm10, %v12672_v38 }
 0x29e   : > { %v1921_v16 = vsel %vm1891_vm5, %v1888_v22, %v12661_v15  ;;  %6945 = vmatmul.mubr.msk.f32.gmra.mrb[10].mxu1 %vm2039_vm9, %v2018_v45  ;;  %v12662_v59 = vld [vmem:[#allocation94_spill] sm:$0xff]  ;;  %v1922_v39 = vsel %vm1891_vm5, %v1889_v8, %v12663_v23  ;;  %v12664_v24 = vld [vmem:[#allocation153_spill] sm:$0xff]  ;;  %v12666_v48 = vld [vmem:[#allocation152_spill] sm:$0xff]  ;;  %4527 = vst.msk [vmem:[#allocation3 + $0x18] sm:$0xff] %vm2521_vm10, %v12672_v38 }
 0x29f   : > { %v1824_v49 = vsel %vm1792_vm2, %v1791_v52, %v12662_v59  ;;  %v1954_v34 = vsel %vm1924_vm6, %v1921_v16, %v12664_v24  ;;  %6947 = vmatprep.mubr.msk.f32.mxu1 %vm2039_vm9, %v2019_v55  ;;  %v1955_v12 = vsel %vm1924_vm6, %v1922_v39, %v12666_v48  ;;  %v12667_v0 = vld [vmem:[#allocation175_spill] sm:$0xff]  ;;  %v12668_v42 = vld [vmem:[#allocation53_spill] sm:$0xff]  ;;  %v12669_v13 = vld [vmem:[#allocation62_spill] sm:$0xff]  ;;  %v1727_v17 = vpop.permute.xlu1 %1726  ;;  %4528 = vst.msk [vmem:[#allocation3 + $0x20] sm:$0xff] %vm2521_vm10, %v12672_v38  ;;  %v2430_v5 = vpop.permute.xlu0 %2429 }
 0x2a0   : > { %v1857_v46 = vsel %vm1825_vm3, %v1824_v49, %v12665_v40  ;;  %v1987_v4 = vsel %vm1957_vm7, %v1954_v34, %v12667_v0  ;;  %v1988_v32 = vsel %vm1957_vm7, %v1955_v12, %v12669_v13  ;;  %v12670_v47 = vld [vmem:[#allocation131_spill] sm:$0xff]  ;;  %v12671_v53 = vld [vmem:[#allocation154_spill] sm:$0xff]  ;;  %4530 = vst.msk [vmem:[#allocation3 + $0x30] sm:$0xff] %vm2521_vm10, %v12672_v38  ;;  %4531 = vst.msk [vmem:[#allocation3 + $0x38] sm:$0xff] %vm2521_vm10, %v12672_v38 }
 0x2a1   : > { %v1890_v62 = vsel %vm1858_vm4, %v1857_v46, %v12668_v42  ;;  %v2020_v63 = vsel %vm1990_vm8, %v1987_v4, %v1723_v21  ;;  %v2021_v57 = vsel %vm1990_vm8, %v1988_v32, %v1725_v27  ;;  %4533 = vst.msk [vmem:[#allocation3 + $0x48] sm:$0xff] %vm2521_vm10, %v12672_v38  ;;  %4534 = vst.msk [vmem:[#allocation3 + $0x50] sm:$0xff] %vm2521_vm10, %v12672_v38  ;;  %v2618_v1 = vld [vmem:[#allocation2 + $0x1] sm:$0xff]  ;;  %v9256_v44 = vld [vmem:[%s12187_s3] ss:$0 sm:$0xff] }
 0x2a2   : > { %v1923_v60 = vsel %vm1891_vm5, %v1890_v62, %v12670_v47  ;;  %6948 = vmatmul.mubr.msk.f32.gmra.mrb[12].mxu1 %vm2039_vm9, %v2020_v63  ;;  %4536 = vst.msk [vmem:[#allocation3 + $0x60] sm:$0xff] %vm2521_vm10, %v12672_v38  ;;  %4537 = vst.msk [vmem:[#allocation3 + $0x68] sm:$0xff] %vm2521_vm10, %v12672_v38  ;;  %2906 = vrot.lane.b32.xlu0 %v2618_v1, %s7223_s12 }
 0x2a3   : > { %v1956_v18 = vsel %vm1924_vm6, %v1923_v60, %v12671_v53  ;;  %6950 = vmatprep.mubr.msk.f32.mxu1 %vm2039_vm9, %v2021_v57  ;;  %4539 = vst.msk [vmem:[#allocation3 + $0x78] sm:$0xff] %vm2521_vm10, %v12672_v38  ;;  %4540 = vst.msk [vmem:[#allocation3 + $0x80] sm:$0xff] %vm2521_vm10, %v12672_v38  ;;  %v2428_v29 = vpop.permute.xlu1 %2427  ;;  %v2434_v31 = vpop.permute.xlu0 %2433 }
 0x2a4   : > { %v1989_v56 = vsel %vm1957_vm7, %v1956_v18, %v8673_v26  ;;  %4542 = vst.msk [vmem:[#allocation3 + $0x90] sm:$0xff] %vm2521_vm10, %v12672_v38  ;;  %4543 = vst.msk [vmem:[#allocation3 + $0x98] sm:$0xff] %vm2521_vm10, %v12672_v38  ;;  %v2619_v26 = vld [vmem:[#allocation2 + $0x9] sm:$0xff] }
 0x2a5   : > { %v2022_v41 = vsel %vm1990_vm8, %v1989_v56, %v1727_v17  ;;  %4545 = vst.msk [vmem:[#allocation3 + $0xa8] sm:$0xff] %vm2521_vm10, %v12672_v38  ;;  %4546 = vst.msk [vmem:[#allocation3 + $0xb0] sm:$0xff] %vm2521_vm10, %v12672_v38  ;;  %2908 = vrot.lane.b32.xlu1 %v2619_v26, %s7223_s12 }
 0x2a6   : > { %6951 = vmatmul.mubr.msk.f32.gmra.mrb[14].mxu1 %vm2039_vm9, %v2022_v41  ;;  %4548 = vst.msk [vmem:[#allocation3 + $0xc0] sm:$0xff] %vm2521_vm10, %v12672_v38  ;;  %4549 = vst.msk [vmem:[#allocation3 + $0xc8] sm:$0xff] %vm2521_vm10, %v12672_v38 }
 0x2a7   : > { %4551 = vst.msk [vmem:[#allocation3 + $0xd8] sm:$0xff] %vm2521_vm10, %v12672_v38  ;;  %4552 = vst.msk [vmem:[#allocation3 + $0xe0] sm:$0xff] %vm2521_vm10, %v12672_v38  ;;  %v2432_v7 = vpop.permute.xlu1 %2431  ;;  %v2438_v50 = vpop.permute.xlu0 %2437 }
 0x2a8   : > { %4554 = vst.msk [vmem:[#allocation3 + $0xf0] sm:$0xff] %vm2521_vm10, %v12672_v38  ;;  %4555 = vst.msk [vmem:[#allocation3 + $0xf8] sm:$0xff] %vm2521_vm10, %v12672_v38 }
 0x2a9   : > { %4557 = vst.msk [vmem:[#allocation3 + $0x108] sm:$0xff] %vm2521_vm10, %v12672_v38  ;;  %4558 = vst.msk [vmem:[#allocation3 + $0x110] sm:$0xff] %vm2521_vm10, %v12672_v38 }
 0x2aa   : > { %4560 = vst.msk [vmem:[#allocation3 + $0x120] sm:$0xff] %vm2521_vm10, %v12672_v38  ;;  %4561 = vst.msk [vmem:[#allocation3 + $0x128] sm:$0xff] %vm2521_vm10, %v12672_v38 }
 0x2ab   : > { %4563 = vst.msk [vmem:[#allocation3 + $0x138] sm:$0xff] %vm2521_vm10, %v12672_v38  ;;  %4564 = vst.msk [vmem:[#allocation3 + $0x140] sm:$0xff] %vm2521_vm10, %v12672_v38  ;;  %v2436_v9 = vpop.permute.xlu1 %2435  ;;  %v2442_v37 = vpop.permute.xlu0 %2441 }
 0x2ac   : > { %4566 = vst.msk [vmem:[#allocation3 + $0x150] sm:$0xff] %vm2521_vm10, %v12672_v38  ;;  %4567 = vst.msk [vmem:[#allocation3 + $0x158] sm:$0xff] %vm2521_vm10, %v12672_v38 }
 0x2ad   : > { %4569 = vst.msk [vmem:[#allocation3 + $0x168] sm:$0xff] %vm2521_vm10, %v12672_v38  ;;  %4570 = vst.msk [vmem:[#allocation3 + $0x170] sm:$0xff] %vm2521_vm10, %v12672_v38 }
 0x2ae   : > { %4572 = vst.msk [vmem:[#allocation3 + $0x180] sm:$0xff] %vm2521_vm10, %v12672_v38  ;;  %4573 = vst.msk [vmem:[#allocation3 + $0x188] sm:$0xff] %vm2521_vm10, %v12672_v38 }
 0x2af   : > { %4575 = vst.msk [vmem:[#allocation3 + $0x198] sm:$0xff] %vm2521_vm10, %v12672_v38  ;;  %4576 = vst.msk [vmem:[#allocation3 + $0x1a0] sm:$0xff] %vm2521_vm10, %v12672_v38  ;;  %v2440_v54 = vpop.permute.xlu1 %2439  ;;  %v9261_v3 = vpop.permute.xlu0 %2445 }
 0x2b3   : > { %v2444_v36 = vpop.permute.xlu1 %2443  ;;  %v9273_v45 = vpop.permute.xlu0 %2449 }
 0x2b7   : > { %v9258_v33 = vpop.permute.xlu1 %2447  ;;  %v2454_v34 = vpop.permute.xlu0 %2453 }
 0x2bb   : > { %v9270_v28 = vpop.permute.xlu1 %2451  ;;  %v2458_v63 = vpop.permute.xlu0 %2457 }
 0x2bf   : > { %v2456_v23 = vpop.permute.xlu1 %2455 }
 0x2c3   : > { %v2460_v62 = vpop.permute.xlu1 %2459 }
 0x338   : > { %v6907_v2 = vpop.f32.mrb[0].mxu0 }
 0x339   : > { %v2208_v6 = vadd.f32 %v6907_v2, %v9256_v44  ;;  %v2202_v35 = vpop.f32.mrb[1].mxu0 }
 0x33a   : > { %v2203_v19 = vadd.f32 %v9256_v44, %v2202_v35 }
 0x33b   : > { %v2523_v51 = vsel %vm2521_vm10, %v2208_v6, %v2428_v29 }
 0x33c   : > { %2555 = vst.msk [vmem:[#allocation2 + $0x21] sm:$0xff] %vm326_vm0, %v2523_v51  ;;  %v2522_v58 = vsel %vm2521_vm10, %v2203_v19, %v2426_v25  ;;  %v6910_v20 = vpop.f32.mrb[2].mxu0  ;;  %v2464_v25 = vpop.permute.xlu1 %2463 }
 0x33d   : > { %2554 = vst.msk [vmem:[#allocation2 + $0x19] sm:$0xff] %vm326_vm0, %v2522_v58  ;;  %v2218_v10 = vadd.f32 %v6910_v20, %v9256_v44  ;;  %v2212_v30 = vpop.f32.mrb[3].mxu0 }
 0x33e   : > { %v2213_v22 = vadd.f32 %v9256_v44, %v2212_v30 }
 0x33f   : > { %v2525_v11 = vsel %vm2521_vm10, %v2218_v10, %v2432_v7 }
 0x340   : > { %2557 = vst.msk [vmem:[#allocation2 + $0x39] sm:$0xff] %vm326_vm0, %v2525_v11  ;;  %v2524_v43 = vsel %vm2521_vm10, %v2213_v22, %v2430_v5  ;;  %v6913_v14 = vpop.f32.mrb[4].mxu0 }
 0x341   : > { %2556 = vst.msk [vmem:[#allocation2 + $0x31] sm:$0xff] %vm326_vm0, %v2524_v43  ;;  %v2228_v52 = vadd.f32 %v6913_v14, %v9256_v44  ;;  %v2222_v61 = vpop.f32.mrb[5].mxu0 }
 0x342   : > { %v2223_v8 = vadd.f32 %v9256_v44, %v2222_v61 }
 0x343   : > { %v2527_v15 = vsel %vm2521_vm10, %v2228_v52, %v2436_v9  ;;  %v9281_v16 = vld [vmem:[#allocation2 + $0x21] sm:$0xff]  ;;  %v2462_v9 = vpop.permute.xlu0 %2461 }
 0x344   : > { %2559 = vst.msk [vmem:[#allocation2 + $0x51] sm:$0xff] %vm326_vm0, %v2527_v15  ;;  %v2526_v55 = vsel %vm2521_vm10, %v2223_v8, %v2434_v31  ;;  %2912 = vrot.lane.b32.xlu1 %v9281_v16, %s7223_s12  ;;  %v6916_v59 = vpop.f32.mrb[6].mxu0  ;;  %v9287_v49 = vld [vmem:[#allocation2 + $0x19] sm:$0xff] }
 0x345   : > { %2558 = vst.msk [vmem:[#allocation2 + $0x49] sm:$0xff] %vm326_vm0, %v2526_v55  ;;  %v2238_v39 = vadd.f32 %v6916_v59, %v9256_v44  ;;  %2910 = vrot.lane.b32.xlu0 %v9287_v49, %s7223_s12  ;;  %v2232_v24 = vpop.f32.mrb[7].mxu0 }
 0x346   : > { %v2233_v27 = vadd.f32 %v9256_v44, %v2232_v24 }
 0x347   : > { %v2529_v40 = vsel %vm2521_vm10, %v2238_v39, %v2440_v54  ;;  %v9295_v46 = vld [vmem:[#allocation2 + $0x39] sm:$0xff]  ;;  %v2466_v58 = vpop.permute.xlu0 %2465 }
 0x348   : > { %2561 = vst.msk [vmem:[#allocation2 + $0x69] sm:$0xff] %vm326_vm0, %v2529_v40  ;;  %v2528_v48 = vsel %vm2521_vm10, %v2233_v27, %v2438_v50  ;;  %2916 = vrot.lane.b32.xlu1 %v9295_v46, %s7223_s12  ;;  %v6919_v12 = vpop.f32.mrb[8].mxu0  ;;  %v9301_v0 = vld [vmem:[#allocation2 + $0x31] sm:$0xff] }
 0x349   : > { %2560 = vst.msk [vmem:[#allocation2 + $0x61] sm:$0xff] %vm326_vm0, %v2528_v48  ;;  %v2248_v4 = vadd.f32 %v6919_v12, %v9256_v44  ;;  %v2242_v21 = vpop.f32.mrb[9].mxu0  ;;  %2914 = vrot.lane.b32.xlu0 %v9301_v0, %s7223_s12 }
 0x34a   : > { %v2243_v42 = vadd.f32 %v9256_v44, %v2242_v21 }
 0x34b   : > { %v2531_v13 = vsel %vm2521_vm10, %v2248_v4, %v2444_v36  ;;  %v9309_v32 = vld [vmem:[#allocation2 + $0x51] sm:$0xff]  ;;  %v2470_v59 = vpop.permute.xlu0 %2469 }
 0x34c   : > { %2563 = vst.msk [vmem:[#allocation2 + $0x81] sm:$0xff] %vm326_vm0, %v2531_v13  ;;  %v2530_v47 = vsel %vm2521_vm10, %v2243_v42, %v2442_v37  ;;  %2920 = vrot.lane.b32.xlu1 %v9309_v32, %s7223_s12  ;;  %v6922_v60 = vpop.f32.mrb[10].mxu0  ;;  %v9315_v57 = vld [vmem:[#allocation2 + $0x49] sm:$0xff] }
 0x34d   : > { %2562 = vst.msk [vmem:[#allocation2 + $0x79] sm:$0xff] %vm326_vm0, %v2530_v47  ;;  %v2258_v53 = vadd.f32 %v6922_v60, %v9256_v44  ;;  %v2252_v18 = vpop.f32.mrb[11].mxu0  ;;  %2918 = vrot.lane.b32.xlu0 %v9315_v57, %s7223_s12 }
 0x34e   : > { %v2253_v56 = vadd.f32 %v9256_v44, %v2252_v18 }
 0x34f   : > { %v2533_v17 = vsel %vm2521_vm10, %v2258_v53, %v9258_v33  ;;  %v9324_v41 = vld [vmem:[#allocation2 + $0x69] sm:$0xff]  ;;  %v2474_v13 = vpop.permute.xlu0 %2473 }
 0x350   : > { %2565 = vst.msk [vmem:[#allocation2 + $0x99] sm:$0xff] %vm326_vm0, %v2533_v17  ;;  %v2532_v26 = vsel %vm2521_vm10, %v2253_v56, %v9261_v3  ;;  %2924 = vrot.lane.b32.xlu1 %v9324_v41, %s7223_s12  ;;  %v6925_v1 = vpop.f32.mrb[12].mxu0  ;;  %v9331_v29 = vld [vmem:[#allocation2 + $0x61] sm:$0xff]  ;;  %v2468_v3 = vpop.permute.xlu1 %2467 }
 0x351   : > { %2564 = vst.msk [vmem:[#allocation2 + $0x91] sm:$0xff] %vm326_vm0, %v2532_v26  ;;  %v2268_v7 = vadd.f32 %v6925_v1, %v9256_v44  ;;  %v2262_v5 = vpop.f32.mrb[13].mxu0  ;;  %2922 = vrot.lane.b32.xlu0 %v9331_v29, %s7223_s12 }
 0x352   : > { %v2263_v31 = vadd.f32 %v9256_v44, %v2262_v5 }
 0x353   : > { %v2535_v54 = vsel %vm2521_vm10, %v2268_v7, %v9270_v28  ;;  %v9340_v50 = vld [vmem:[#allocation2 + $0x81] sm:$0xff] }
 0x354   : > { %2567 = vst.msk [vmem:[#allocation2 + $0xb1] sm:$0xff] %vm326_vm0, %v2535_v54  ;;  %v2534_v36 = vsel %vm2521_vm10, %v2263_v31, %v9273_v45  ;;  %2928 = vrot.lane.b32.xlu1 %v9340_v50, %s7223_s12  ;;  %v6928_v37 = vpop.f32.mrb[14].mxu0  ;;  %v9347_v2 = vld [vmem:[#allocation2 + $0x79] sm:$0xff]  ;;  %v2472_v8 = vpop.permute.xlu1 %2471 }
 0x355   : > { %2566 = vst.msk [vmem:[#allocation2 + $0xa9] sm:$0xff] %vm326_vm0, %v2534_v36  ;;  %v2278_v33 = vadd.f32 %v6928_v37, %v9256_v44  ;;  %v2272_v6 = vpop.f32.mrb[15].mxu0  ;;  %2926 = vrot.lane.b32.xlu0 %v9347_v2, %s7223_s12  ;;  %v2478_v54 = vpop.permute.xlu0 %2477 }
 0x356   : > { %v2273_v35 = vadd.f32 %v9256_v44, %v2272_v6 }
 0x357   : > { %v2537_v19 = vsel %vm2521_vm10, %v2278_v33, %v2456_v23  ;;  %v9355_v51 = vld [vmem:[#allocation2 + $0x99] sm:$0xff] }
 0x358   : > { %2569 = vst.msk [vmem:[#allocation2 + $0xc9] sm:$0xff] %vm326_vm0, %v2537_v19  ;;  %v2536_v20 = vsel %vm2521_vm10, %v2273_v35, %v2454_v34  ;;  %v6931_v10 = vpop.f32.mrb[0].mxu1  ;;  %2932 = vrot.lane.b32.xlu1 %v9355_v51, %s7223_s12  ;;  %v9361_v30 = vld [vmem:[#allocation2 + $0x91] sm:$0xff]  ;;  %v2476_v21 = vpop.permute.xlu1 %2475 }
 0x359   : > { %2568 = vst.msk [vmem:[#allocation2 + $0xc1] sm:$0xff] %vm326_vm0, %v2536_v20  ;;  %v2288_v22 = vadd.f32 %v6931_v10, %v9256_v44  ;;  %v2282_v28 = vpop.f32.mrb[1].mxu1  ;;  %2930 = vrot.lane.b32.xlu0 %v9361_v30, %s7223_s12 }
 0x35a   : > { %v2283_v11 = vadd.f32 %v9256_v44, %v2282_v28 }
 0x35b   : > { %v2539_v45 = vsel %vm2521_vm10, %v2288_v22, %v2460_v62  ;;  %v9369_v43 = vld [vmem:[#allocation2 + $0xb1] sm:$0xff] }
 0x35c   : > { %2571 = vst.msk [vmem:[#allocation2 + $0xe1] sm:$0xff] %vm326_vm0, %v2539_v45  ;;  %v2538_v14 = vsel %vm2521_vm10, %v2283_v11, %v2458_v63  ;;  %v6934_v52 = vpop.f32.mrb[2].mxu1  ;;  %2936 = vrot.lane.b32.xlu1 %v9369_v43, %s7223_s12  ;;  %v9375_v61 = vld [vmem:[#allocation2 + $0xa9] sm:$0xff]  ;;  %v2480_v5 = vpop.permute.xlu1 %2479 }
 0x35d   : > { %2570 = vst.msk [vmem:[#allocation2 + $0xd9] sm:$0xff] %vm326_vm0, %v2538_v14  ;;  %v2298_v15 = vadd.f32 %v6934_v52, %v9256_v44  ;;  %v2292_v55 = vpop.f32.mrb[3].mxu1  ;;  %2934 = vrot.lane.b32.xlu0 %v9375_v61, %s7223_s12  ;;  %v2482_v11 = vpop.permute.xlu0 %2481 }
 0x35e   : > { %v2293_v23 = vadd.f32 %v9256_v44, %v2292_v55 }
 0x35f   : > { %v2541_v39 = vsel %vm2521_vm10, %v2298_v15, %v2464_v25  ;;  %v9383_v24 = vld [vmem:[#allocation2 + $0xc9] sm:$0xff] }
 0x360   : > { %2573 = vst.msk [vmem:[#allocation2 + $0xf9] sm:$0xff] %vm326_vm0, %v2541_v39  ;;  %v2540_v34 = vsel %vm2521_vm10, %v2293_v23, %v2462_v9  ;;  %v6937_v27 = vpop.f32.mrb[4].mxu1  ;;  %2940 = vrot.lane.b32.xlu1 %v9383_v24, %s7223_s12  ;;  %v9389_v40 = vld [vmem:[#allocation2 + $0xc1] sm:$0xff]  ;;  %v2484_v10 = vpop.permute.xlu1 %2483 }
 0x361   : > { %2572 = vst.msk [vmem:[#allocation2 + $0xf1] sm:$0xff] %vm326_vm0, %v2540_v34  ;;  %v2308_v48 = vadd.f32 %v6937_v27, %v9256_v44  ;;  %v2302_v12 = vpop.f32.mrb[5].mxu1  ;;  %2938 = vrot.lane.b32.xlu0 %v9389_v40, %s7223_s12 }
 0x362   : > { %v2303_v4 = vadd.f32 %v9256_v44, %v2302_v12 }
 0x363   : > { %v2543_v42 = vsel %vm2521_vm10, %v2308_v48, %v2468_v3  ;;  %v9397_v62 = vld [vmem:[#allocation2 + $0xe1] sm:$0xff] }
 0x364   : > { %2575 = vst.msk [vmem:[#allocation2 + $0x111] sm:$0xff] %vm326_vm0, %v2543_v42  ;;  %v2542_v63 = vsel %vm2521_vm10, %v2303_v4, %v2466_v58  ;;  %2944 = vrot.lane.b32.xlu1 %v9397_v62, %s7223_s12  ;;  %v9403_v60 = vld [vmem:[#allocation2 + $0xd9] sm:$0xff]  ;;  %v2488_v48 = vpop.permute.xlu1 %2487 }
 0x365   : > { %2574 = vst.msk [vmem:[#allocation2 + $0x109] sm:$0xff] %vm326_vm0, %v2542_v63  ;;  %2942 = vrot.lane.b32.xlu0 %v9403_v60, %s7223_s12 }
 0x366   : > { %v6940_v47 = vpop.f32.mrb[6].mxu1 }
 0x367   : > { %v2318_v53 = vadd.f32 %v6940_v47, %v9256_v44  ;;  %v2312_v18 = vpop.f32.mrb[7].mxu1  ;;  %v9411_v26 = vld [vmem:[#allocation2 + $0xf9] sm:$0xff] }
 0x368   : > { %v2313_v56 = vadd.f32 %v9256_v44, %v2312_v18  ;;  %2948 = vrot.lane.b32.xlu1 %v9411_v26, %s7223_s12  ;;  %v9417_v7 = vld [vmem:[#allocation2 + $0xf1] sm:$0xff] }
 0x369   : > { %v2545_v17 = vsel %vm2521_vm10, %v2318_v53, %v2472_v8  ;;  %2946 = vrot.lane.b32.xlu0 %v9417_v7, %s7223_s12 }
 0x36a   : > { %2577 = vst.msk [vmem:[#allocation2 + $0x129] sm:$0xff] %vm326_vm0, %v2545_v17  ;;  %v2544_v1 = vsel %vm2521_vm10, %v2313_v56, %v2470_v59  ;;  %v2651_v56 = vld [vmem:[#allocation2 + $0xa] sm:$0xff]  ;;  %v2650_v17 = vld [vmem:[#allocation2 + $0x2] sm:$0xff] }
 0x36b   : > { %v6943_v25 = vpop.f32.mrb[8].mxu1  ;;  %2576 = vst.msk [vmem:[#allocation2 + $0x121] sm:$0xff] %vm326_vm0, %v2544_v1  ;;  %v9425_v33 = vld [vmem:[#allocation2 + $0x111] sm:$0xff]  ;;  %v9488_v1 = vld [vmem:[#allocation2 + $0x22] sm:$0xff] }
 0x36c   : > { %v2328_v9 = vadd.f32 %v6943_v25, %v9256_v44  ;;  %v2322_v31 = vpop.f32.mrb[9].mxu1  ;;  %2952 = vrot.lane.b32.xlu1 %v9425_v33, %s7223_s12  ;;  %v9431_v3 = vld [vmem:[#allocation2 + $0x109] sm:$0xff]  ;;  %v9492_v25 = vld [vmem:[#allocation2 + $0x1a] sm:$0xff] }
 0x36d   : > { %v2323_v36 = vadd.f32 %v9256_v44, %v2322_v31  ;;  %2950 = vrot.lane.b32.xlu0 %v9431_v3, %s7223_s12  ;;  %v9504_v31 = vld [vmem:[#allocation2 + $0x52] sm:$0xff] }
 0x36e   : > { %v2547_v37 = vsel %vm2521_vm10, %v2328_v9, %v2476_v21  ;;  %v2486_v21 = vpop.permute.xlu0 %2485  ;;  %v9500_v9 = vld [vmem:[#allocation2 + $0x32] sm:$0xff] }
 0x36f   : > { %2579 = vst.msk [vmem:[#allocation2 + $0x141] sm:$0xff] %vm326_vm0, %v2547_v37  ;;  %v2546_v6 = vsel %vm2521_vm10, %v2323_v36, %v2474_v13  ;;  %v9512_v36 = vld [vmem:[#allocation2 + $0x6a] sm:$0xff]  ;;  %v9516_v37 = vld [vmem:[#allocation2 + $0x62] sm:$0xff] }
 0x370   : > { %2578 = vst.msk [vmem:[#allocation2 + $0x139] sm:$0xff] %vm326_vm0, %v2546_v6  ;;  %v9520_v6 = vld [vmem:[#allocation2 + $0x82] sm:$0xff] }
 0x371   : > { %v6946_v35 = vpop.f32.mrb[10].mxu1  ;;  %v9439_v28 = vld [vmem:[#allocation2 + $0x129] sm:$0xff] }
 0x372   : > { %v2338_v19 = vadd.f32 %v6946_v35, %v9256_v44  ;;  %v2332_v58 = vpop.f32.mrb[11].mxu1  ;;  %2956 = vrot.lane.b32.xlu1 %v9439_v28, %s7223_s12  ;;  %v9445_v52 = vld [vmem:[#allocation2 + $0x121] sm:$0xff] }
 0x373   : > { %v2333_v20 = vadd.f32 %v9256_v44, %v2332_v58  ;;  %2954 = vrot.lane.b32.xlu0 %v9445_v52, %s7223_s12  ;;  %v9524_v35 = vld [vmem:[#allocation2 + $0x7a] sm:$0xff]  ;;  %v9532_v58 = vld [vmem:[#allocation2 + $0x92] sm:$0xff] }
 0x374   : > { %v2549_v22 = vsel %vm2521_vm10, %v2338_v19, %v2480_v5  ;;  %v9496_v5 = vld [vmem:[#allocation2 + $0x3a] sm:$0xff] }
 0x375   : > { %2581 = vst.msk [vmem:[#allocation2 + $0x159] sm:$0xff] %vm326_vm0, %v2549_v22  ;;  %v2548_v45 = vsel %vm2521_vm10, %v2333_v20, %v2478_v54  ;;  %v6949_v14 = vpop.f32.mrb[12].mxu1  ;;  %v9508_v54 = vld [vmem:[#allocation2 + $0x4a] sm:$0xff]  ;;  %v9528_v19 = vld [vmem:[#allocation2 + $0x9a] sm:$0xff]  ;;  %v9536_v20 = vld [vmem:[#allocation2 + $0xb2] sm:$0xff] }
 0x376   : > { %2580 = vst.msk [vmem:[#allocation2 + $0x151] sm:$0xff] %vm326_vm0, %v2548_v45  ;;  %v2348_v8 = vadd.f32 %v6949_v14, %v9256_v44  ;;  %v2342_v15 = vpop.f32.mrb[13].mxu1  ;;  %v9453_v23 = vld [vmem:[#allocation2 + $0x141] sm:$0xff]  ;;  %v9544_v22 = vld [vmem:[#allocation2 + $0xca] sm:$0xff] }
 0x377   : > { %v2343_v55 = vadd.f32 %v9256_v44, %v2342_v15  ;;  %2960 = vrot.lane.b32.xlu1 %v9453_v23, %s7223_s12  ;;  %v9459_v27 = vld [vmem:[#allocation2 + $0x139] sm:$0xff]  ;;  %v9552_v45 = vld [vmem:[#allocation2 + $0xe2] sm:$0xff] }
 0x378   : > { %v2551_v59 = vsel %vm2521_vm10, %v2348_v8, %v2484_v10  ;;  %2958 = vrot.lane.b32.xlu0 %v9459_v27, %s7223_s12  ;;  %v9540_v10 = vld [vmem:[#allocation2 + $0xaa] sm:$0xff]  ;;  %v9556_v14 = vld [vmem:[#allocation2 + $0xda] sm:$0xff]  ;;  %v9564_v15 = vld [vmem:[#allocation2 + $0xf2] sm:$0xff] }
 0x379   : > { %2583 = vst.msk [vmem:[#allocation2 + $0x171] sm:$0xff] %vm326_vm0, %v2551_v59  ;;  %v2550_v39 = vsel %vm2521_vm10, %v2343_v55, %v2482_v11  ;;  %v6952_v34 = vpop.f32.mrb[14].mxu1  ;;  %v9548_v11 = vld [vmem:[#allocation2 + $0xc2] sm:$0xff]  ;;  %v9560_v8 = vld [vmem:[#allocation2 + $0xfa] sm:$0xff]  ;;  %v9568_v55 = vld [vmem:[#allocation2 + $0x112] sm:$0xff] }
 0x37a   : > { %2582 = vst.msk [vmem:[#allocation2 + $0x169] sm:$0xff] %vm326_vm0, %v2550_v39  ;;  %v2358_v12 = vadd.f32 %v6952_v34, %v9256_v44  ;;  %v2352_v4 = vpop.f32.mrb[15].mxu1  ;;  %v9572_v59 = vld [vmem:[#allocation2 + $0x10a] sm:$0xff]  ;;  %v9580_v34 = vld [vmem:[#allocation2 + $0x122] sm:$0xff] }
 0x37b   : > { %v2353_v42 = vadd.f32 %v9256_v44, %v2352_v4  ;;  %v9576_v39 = vld [vmem:[#allocation2 + $0x12a] sm:$0xff]  ;;  %v9588_v4 = vld [vmem:[#allocation2 + $0x142] sm:$0xff] }
 0x37c   : > { %v2553_v13 = vsel %vm2521_vm10, %v2358_v12, %v2488_v48  ;;  %v9467_v63 = vld [vmem:[#allocation2 + $0x159] sm:$0xff]  ;;  %v9582_v48 = vpop.permute.xlu1 %2908  ;;  %v9586_v12 = vpop.permute.xlu0 %2906 }
 0x37d   : > { %2585 = vst.msk [vmem:[#allocation2 + $0x189] sm:$0xff] %vm326_vm0, %v2553_v13  ;;  %v2552_v47 = vsel %vm2521_vm10, %v2353_v42, %v2486_v21  ;;  %2964 = vrot.lane.b32.xlu1 %v9467_v63, %s7223_s12  ;;  %v9473_v53 = vld [vmem:[#allocation2 + $0x151] sm:$0xff]  ;;  %12673 = vst [vmem:[#allocation5_spill] sm:$0xff] %v9582_v48  ;;  %v9592_v21 = vld [vmem:[#allocation2 + $0x13a] sm:$0xff] }
 0x37e   : > { %2584 = vst.msk [vmem:[#allocation2 + $0x181] sm:$0xff] %vm326_vm0, %v2552_v47  ;;  %2962 = vrot.lane.b32.xlu0 %v9473_v53, %s7223_s12  ;;  %12674 = vst [vmem:[#allocation7_spill] sm:$0xff] %v9586_v12  ;;  %v9600_v47 = vld [vmem:[#allocation2 + $0x15a] sm:$0xff] }
 0x37f   : > { %12675 = vst [vmem:[#allocation9_spill] sm:$0xff] %v9592_v21  ;;  %12678 = vst [vmem:[#allocation12_spill] sm:$0xff] %v9600_v47  ;;  %v2589_v12 = vld [vmem:[#allocation2 + $0x20] sm:$0xff] }
 0x380   : > { %v9478_v18 = vld [vmem:[#allocation2 + $0x171] sm:$0xff] }
 0x381   : > { %2968 = vrot.lane.b32.xlu1 %v9478_v18, %s7223_s12  ;;  %v9482_v44 = vld [vmem:[#allocation2 + $0x169] sm:$0xff]  ;;  %v9612_v48 = vld [vmem:[#allocation2 + $0x172] sm:$0xff] }
 0x382   : > { %2966 = vrot.lane.b32.xlu0 %v9482_v44, %s7223_s12  ;;  %12682 = vst [vmem:[#allocation17_spill] sm:$0xff] %v9612_v48 }
 0x385   : > { %3036 = vrot.lane.b32.xlu1 %v2651_v56, %s7224_s13  ;;  %v9604_v56 = vld [vmem:[#allocation2 + $0x152] sm:$0xff] }
 0x386   : > { %3034 = vrot.lane.b32.xlu0 %v2650_v17, %s7224_s13  ;;  %12679 = vst [vmem:[#allocation66_spill] sm:$0xff] %v9604_v56 }
 0x389   : > { %3040 = vrot.lane.b32.xlu1 %v9488_v1, %s7224_s13 }
 0x38a   : > { %3038 = vrot.lane.b32.xlu0 %v9492_v25, %s7224_s13 }
 0x38d   : > { %3044 = vrot.lane.b32.xlu1 %v9496_v5, %s7224_s13 }
 0x38e   : > { %3042 = vrot.lane.b32.xlu0 %v9500_v9, %s7224_s13 }
 0x391   : > { %3048 = vrot.lane.b32.xlu1 %v9504_v31, %s7224_s13 }
 0x392   : > { %3046 = vrot.lane.b32.xlu0 %v9508_v54, %s7224_s13 }
 0x395   : > { %3052 = vrot.lane.b32.xlu1 %v9512_v36, %s7224_s13 }
 0x396   : > { %3050 = vrot.lane.b32.xlu0 %v9516_v37, %s7224_s13 }
 0x399   : > { %3056 = vrot.lane.b32.xlu1 %v9520_v6, %s7224_s13 }
 0x39a   : > { %3054 = vrot.lane.b32.xlu0 %v9524_v35, %s7224_s13 }
 0x39d   : > { %3060 = vrot.lane.b32.xlu1 %v9528_v19, %s7224_s13 }
 0x39e   : > { %3058 = vrot.lane.b32.xlu0 %v9532_v58, %s7224_s13 }
 0x3a1   : > { %3064 = vrot.lane.b32.xlu1 %v9536_v20, %s7224_s13 }
 0x3a2   : > { %3062 = vrot.lane.b32.xlu0 %v9540_v10, %s7224_s13 }
 0x3a5   : > { %3068 = vrot.lane.b32.xlu1 %v9544_v22, %s7224_s13 }
 0x3a6   : > { %3066 = vrot.lane.b32.xlu0 %v9548_v11, %s7224_s13 }
 0x3a9   : > { %3072 = vrot.lane.b32.xlu1 %v9552_v45, %s7224_s13 }
 0x3aa   : > { %3070 = vrot.lane.b32.xlu0 %v9556_v14, %s7224_s13 }
 0x3ad   : > { %3076 = vrot.lane.b32.xlu1 %v9560_v8, %s7224_s13 }
 0x3ae   : > { %3074 = vrot.lane.b32.xlu0 %v9564_v15, %s7224_s13 }
 0x3b1   : > { %3080 = vrot.lane.b32.xlu1 %v9568_v55, %s7224_s13 }
 0x3b2   : > { %3078 = vrot.lane.b32.xlu0 %v9572_v59, %s7224_s13 }
 0x3b5   : > { %3084 = vrot.lane.b32.xlu1 %v9576_v39, %s7224_s13 }
 0x3b6   : > { %3082 = vrot.lane.b32.xlu0 %v9580_v34, %s7224_s13  ;;  %v9596_v42 = vpop.permute.xlu1 %2912 }
 0x3b7   : > { %12676 = vst [vmem:[#allocation11_spill] sm:$0xff] %v9596_v42  ;;  %v9598_v13 = vpop.permute.xlu0 %2910  ;;  %v9616_v42 = vld [vmem:[#allocation2 + $0x16a] sm:$0xff] }
 0x3b8   : > { %12677 = vst [vmem:[#allocation67_spill] sm:$0xff] %v9598_v13 }
 0x3b9   : > { %3088 = vrot.lane.b32.xlu1 %v9588_v4, %s7224_s13 }
 0x3ba   : > { %3086 = vrot.lane.b32.xlu0 %v9592_v21, %s7224_s13  ;;  %v9608_v17 = vpop.permute.xlu1 %2916  ;;  %v9635_v21 = vld [vmem:[#allocation2 + $0x30] sm:$0xff] }
 0x3bb   : > { %12680 = vst [vmem:[#allocation14_spill] sm:$0xff] %v9608_v17  ;;  %v9610_v38 = vpop.permute.xlu0 %2914  ;;  %12689 = vst [vmem:[#allocation71_spill] sm:$0xff] %v9635_v21 }
 0x3bc   : > { %12681 = vst [vmem:[#allocation15_spill] sm:$0xff] %v9610_v38  ;;  %v9631_v38 = vld [vmem:[#allocation2 + $0x38] sm:$0xff] }
 0x3bd   : > { %3092 = vrot.lane.b32.xlu1 %v9600_v47, %s7224_s13  ;;  %12687 = vst [vmem:[#allocation22_spill] sm:$0xff] %v9631_v38 }
 0x3be   : > { %3090 = vrot.lane.b32.xlu0 %v9604_v56, %s7224_s13  ;;  %v9620_v13 = vpop.permute.xlu1 %2920  ;;  %v9624_v56 = vld [vmem:[#allocation2 + $0x18] sm:$0xff] }
 0x3bf   : > { %12683 = vst [vmem:[#allocation18_spill] sm:$0xff] %v9620_v13  ;;  %v9622_v47 = vpop.permute.xlu0 %2918  ;;  %12685 = vst [vmem:[#allocation70_spill] sm:$0xff] %v9624_v56 }
 0x3c0   : > { %12684 = vst [vmem:[#allocation20_spill] sm:$0xff] %v9622_v47 }
 0x3c1   : > { %3096 = vrot.lane.b32.xlu1 %v9612_v48, %s7224_s13 }
 0x3c2   : > { %3094 = vrot.lane.b32.xlu0 %v9616_v42, %s7224_s13  ;;  %v9629_v17 = vpop.permute.xlu1 %2924 }
 0x3c3   : > { %12686 = vst [vmem:[#allocation69_spill] sm:$0xff] %v9629_v17  ;;  %v9633_v48 = vpop.permute.xlu0 %2922 }
 0x3c4   : > { %12688 = vst [vmem:[#allocation72_spill] sm:$0xff] %v9633_v48  ;;  %v9655_v48 = vld [vmem:[#allocation2 + $0x68] sm:$0xff] }
 0x3c5   : > { %3164 = vrot.lane.b32.xlu1 %v2589_v12, %s7225_s14  ;;  %v9643_v12 = vld [vmem:[#allocation2 + $0x50] sm:$0xff]  ;;  %12695 = vst [vmem:[#allocation28_spill] sm:$0xff] %v9655_v48 }
 0x3c6   : > { %3162 = vrot.lane.b32.xlu0 %v9624_v56, %s7225_s14  ;;  %v9641_v13 = vpop.permute.xlu1 %2928  ;;  %12691 = vst [vmem:[#allocation73_spill] sm:$0xff] %v9643_v12  ;;  %v9647_v56 = vld [vmem:[#allocation2 + $0x48] sm:$0xff] }
 0x3c7   : > { %12690 = vst [vmem:[#allocation24_spill] sm:$0xff] %v9641_v13  ;;  %v9645_v47 = vpop.permute.xlu0 %2926  ;;  %12693 = vst [vmem:[#allocation8_spill] sm:$0xff] %v9647_v56 }
 0x3c8   : > { %12692 = vst [vmem:[#allocation26_spill] sm:$0xff] %v9645_v47  ;;  %v9667_v47 = vld [vmem:[#allocation2 + $0x80] sm:$0xff] }
 0x3c9   : > { %3168 = vrot.lane.b32.xlu1 %v9631_v38, %s7225_s14  ;;  %12699 = vst [vmem:[#allocation75_spill] sm:$0xff] %v9667_v47 }
 0x3ca   : > { %3166 = vrot.lane.b32.xlu0 %v9635_v21, %s7225_s14  ;;  %v9653_v17 = vpop.permute.xlu1 %2932  ;;  %v9659_v21 = vld [vmem:[#allocation2 + $0x60] sm:$0xff] }
 0x3cb   : > { %12694 = vst [vmem:[#allocation155_spill] sm:$0xff] %v9653_v17  ;;  %v9657_v38 = vpop.permute.xlu0 %2930  ;;  %12697 = vst [vmem:[#allocation57_spill] sm:$0xff] %v9659_v21 }
 0x3cc   : > { %12696 = vst [vmem:[#allocation6_spill] sm:$0xff] %v9657_v38  ;;  %v9679_v38 = vld [vmem:[#allocation2 + $0x98] sm:$0xff] }
 0x3cd   : > { %3172 = vrot.lane.b32.xlu1 %v9643_v12, %s7225_s14  ;;  %12703 = vst [vmem:[#allocation96_spill] sm:$0xff] %v9679_v38 }
 0x3ce   : > { %3170 = vrot.lane.b32.xlu0 %v9647_v56, %s7225_s14  ;;  %v9665_v13 = vpop.permute.xlu1 %2936  ;;  %v9671_v56 = vld [vmem:[#allocation2 + $0x78] sm:$0xff] }
 0x3cf   : > { %12698 = vst [vmem:[#allocation30_spill] sm:$0xff] %v9665_v13  ;;  %v9669_v12 = vpop.permute.xlu0 %2934  ;;  %12701 = vst [vmem:[#allocation133_spill] sm:$0xff] %v9671_v56 }
 0x3d0   : > { %12700 = vst [vmem:[#allocation55_spill] sm:$0xff] %v9669_v12  ;;  %v9691_v12 = vld [vmem:[#allocation2 + $0xb0] sm:$0xff] }
 0x3d1   : > { %3176 = vrot.lane.b32.xlu1 %v9655_v48, %s7225_s14  ;;  %12707 = vst [vmem:[#allocation13_spill] sm:$0xff] %v9691_v12 }
 0x3d2   : > { %3174 = vrot.lane.b32.xlu0 %v9659_v21, %s7225_s14  ;;  %v9677_v17 = vpop.permute.xlu1 %2940  ;;  %v9683_v21 = vld [vmem:[#allocation2 + $0x90] sm:$0xff] }
 0x3d3   : > { %12702 = vst [vmem:[#allocation74_spill] sm:$0xff] %v9677_v17  ;;  %v9681_v48 = vpop.permute.xlu0 %2938  ;;  %12705 = vst [vmem:[#allocation157_spill] sm:$0xff] %v9683_v21 }
 0x3d4   : > { %12704 = vst [vmem:[#allocation132_spill] sm:$0xff] %v9681_v48  ;;  %v9703_v48 = vld [vmem:[#allocation2 + $0xc8] sm:$0xff] }
 0x3d5   : > { %3180 = vrot.lane.b32.xlu1 %v9667_v47, %s7225_s14  ;;  %12711 = vst [vmem:[#allocation61_spill] sm:$0xff] %v9703_v48 }
 0x3d6   : > { %3178 = vrot.lane.b32.xlu0 %v9671_v56, %s7225_s14  ;;  %v9689_v13 = vpop.permute.xlu1 %2944  ;;  %v9695_v56 = vld [vmem:[#allocation2 + $0xa8] sm:$0xff] }
 0x3d7   : > { %12706 = vst [vmem:[#allocation95_spill] sm:$0xff] %v9689_v13  ;;  %v9693_v47 = vpop.permute.xlu0 %2942  ;;  %12709 = vst [vmem:[#allocation32_spill] sm:$0xff] %v9695_v56 }
 0x3d8   : > { %12708 = vst [vmem:[#allocation156_spill] sm:$0xff] %v9693_v47  ;;  %v9715_v47 = vld [vmem:[#allocation2 + $0xe0] sm:$0xff] }
 0x3d9   : > { %3184 = vrot.lane.b32.xlu1 %v9679_v38, %s7225_s14  ;;  %12715 = vst [vmem:[#allocation135_spill] sm:$0xff] %v9715_v47 }
 0x3da   : > { %3182 = vrot.lane.b32.xlu0 %v9683_v21, %s7225_s14  ;;  %v9701_v17 = vpop.permute.xlu1 %2948  ;;  %v9707_v21 = vld [vmem:[#allocation2 + $0xc0] sm:$0xff] }
 0x3db   : > { %12710 = vst [vmem:[#allocation10_spill] sm:$0xff] %v9701_v17  ;;  %v9705_v38 = vpop.permute.xlu0 %2946  ;;  %12713 = vst [vmem:[#allocation77_spill] sm:$0xff] %v9707_v21 }
 0x3dc   : > { %12712 = vst [vmem:[#allocation76_spill] sm:$0xff] %v9705_v38  ;;  %v9727_v38 = vld [vmem:[#allocation2 + $0xf8] sm:$0xff] }
 0x3dd   : > { %3188 = vrot.lane.b32.xlu1 %v9691_v12, %s7225_s14  ;;  %12719 = vst [vmem:[#allocation159_spill] sm:$0xff] %v9727_v38 }
 0x3de   : > { %3186 = vrot.lane.b32.xlu0 %v9695_v56, %s7225_s14  ;;  %v9713_v13 = vpop.permute.xlu1 %2952  ;;  %v9719_v56 = vld [vmem:[#allocation2 + $0xd8] sm:$0xff] }
 0x3df   : > { %12714 = vst [vmem:[#allocation59_spill] sm:$0xff] %v9713_v13  ;;  %v9717_v12 = vpop.permute.xlu0 %2950  ;;  %12717 = vst [vmem:[#allocation98_spill] sm:$0xff] %v9719_v56 }
 0x3e0   : > { %12716 = vst [vmem:[#allocation78_spill] sm:$0xff] %v9717_v12  ;;  %v9739_v12 = vld [vmem:[#allocation2 + $0x110] sm:$0xff] }
 0x3e1   : > { %3192 = vrot.lane.b32.xlu1 %v9703_v48, %s7225_s14  ;;  %12723 = vst [vmem:[#allocation99_spill] sm:$0xff] %v9739_v12 }
 0x3e2   : > { %3190 = vrot.lane.b32.xlu0 %v9707_v21, %s7225_s14  ;;  %v9731_v21 = vld [vmem:[#allocation2 + $0xf0] sm:$0xff] }
 0x3e3   : > { %12721 = vst [vmem:[#allocation19_spill] sm:$0xff] %v9731_v21 }
 0x3e4   : > { %v9725_v17 = vpop.permute.xlu1 %2956 }
 0x3e5   : > { %3196 = vrot.lane.b32.xlu1 %v9715_v47, %s7225_s14  ;;  %12718 = vst [vmem:[#allocation134_spill] sm:$0xff] %v9725_v17  ;;  %v9729_v48 = vpop.permute.xlu0 %2954 }
 0x3e6   : > { %3194 = vrot.lane.b32.xlu0 %v9719_v56, %s7225_s14  ;;  %12720 = vst [vmem:[#allocation97_spill] sm:$0xff] %v9729_v48  ;;  %v9743_v56 = vld [vmem:[#allocation2 + $0x108] sm:$0xff] }
 0x3e7   : > { %12725 = vst [vmem:[#allocation65_spill] sm:$0xff] %v9743_v56  ;;  %v9751_v48 = vld [vmem:[#allocation2 + $0x128] sm:$0xff] }
 0x3e8   : > { %12727 = vst [vmem:[#allocation21_spill] sm:$0xff] %v9751_v48 }
 0x3e9   : > { %3200 = vrot.lane.b32.xlu1 %v9727_v38, %s7225_s14  ;;  %v9737_v13 = vpop.permute.xlu1 %2960 }
 0x3ea   : > { %3198 = vrot.lane.b32.xlu0 %v9731_v21, %s7225_s14  ;;  %12722 = vst [vmem:[#allocation158_spill] sm:$0xff] %v9737_v13  ;;  %v9741_v47 = vpop.permute.xlu0 %2958  ;;  %v9755_v21 = vld [vmem:[#allocation2 + $0x120] sm:$0xff] }
 0x3eb   : > { %12724 = vst [vmem:[#allocation16_spill] sm:$0xff] %v9741_v47  ;;  %12729 = vst [vmem:[#allocation137_spill] sm:$0xff] %v9755_v21  ;;  %v9763_v47 = vld [vmem:[#allocation2 + $0x140] sm:$0xff] }
 0x3ec   : > { %12731 = vst [vmem:[#allocation68_spill] sm:$0xff] %v9763_v47 }
 0x3ed   : > { %3204 = vrot.lane.b32.xlu1 %v9739_v12, %s7225_s14 }
 0x3ee   : > { %3202 = vrot.lane.b32.xlu0 %v9743_v56, %s7225_s14  ;;  %v9767_v56 = vld [vmem:[#allocation2 + $0x138] sm:$0xff] }
 0x3ef   : > { %v9749_v17 = vpop.permute.xlu1 %2964  ;;  %12733 = vst [vmem:[#allocation161_spill] sm:$0xff] %v9767_v56 }
 0x3f0   : > { %12726 = vst [vmem:[#allocation79_spill] sm:$0xff] %v9749_v17  ;;  %v9753_v38 = vpop.permute.xlu0 %2962 }
 0x3f1   : > { %12728 = vst [vmem:[#allocation63_spill] sm:$0xff] %v9753_v38  ;;  %3208 = vrot.lane.b32.xlu1 %v9751_v48, %s7225_s14  ;;  %v9775_v38 = vld [vmem:[#allocation2 + $0x158] sm:$0xff] }
 0x3f2   : > { %3206 = vrot.lane.b32.xlu0 %v9755_v21, %s7225_s14  ;;  %12735 = vst [vmem:[#allocation138_spill] sm:$0xff] %v9775_v38  ;;  %v9779_v21 = vld [vmem:[#allocation2 + $0x150] sm:$0xff] }
 0x3f3   : > { %v9761_v13 = vpop.permute.xlu1 %2968 }
 0x3f4   : > { %12730 = vst [vmem:[#allocation100_spill] sm:$0xff] %v9761_v13  ;;  %v9765_v12 = vpop.permute.xlu0 %2966 }
 0x3f5   : > { %12732 = vst [vmem:[#allocation136_spill] sm:$0xff] %v9765_v12  ;;  %3212 = vrot.lane.b32.xlu1 %v9763_v47, %s7225_s14  ;;  %v9787_v12 = vld [vmem:[#allocation2 + $0x170] sm:$0xff] }
 0x3f6   : > { %3210 = vrot.lane.b32.xlu0 %v9767_v56, %s7225_s14  ;;  %12738 = vst [vmem:[#allocation116_spill] sm:$0xff] %v9787_v12  ;;  %v9791_v56 = vld [vmem:[#allocation2 + $0x168] sm:$0xff] }
 0x3f7   : > { %v9773_v17 = vpop.permute.xlu1 %3036 }
 0x3f8   : > { %12734 = vst [vmem:[#allocation23_spill] sm:$0xff] %v9773_v17  ;;  %v9777_v48 = vpop.permute.xlu0 %3034 }
 0x3f9   : > { %12736 = vst [vmem:[#allocation160_spill] sm:$0xff] %v9777_v48  ;;  %3216 = vrot.lane.b32.xlu1 %v9775_v38, %s7225_s14  ;;  %v9801_v38 = vld [vmem:[#allocation2 + $0x188] sm:$0xff] }
 0x3fa   : > { %3214 = vrot.lane.b32.xlu0 %v9779_v21, %s7225_s14 }
 0x3fb   : > { %v9785_v13 = vpop.permute.xlu1 %3040 }
 0x3fc   : > { %12737 = vst [vmem:[#allocation36_spill] sm:$0xff] %v9785_v13  ;;  %v9789_v47 = vpop.permute.xlu0 %3038  ;;  %v9805_v13 = vld [vmem:[#allocation2 + $0x180] sm:$0xff] }
 0x3fd   : > { %12739 = vst [vmem:[#allocation162_spill] sm:$0xff] %v9789_v47  ;;  %3220 = vrot.lane.b32.xlu1 %v9787_v12, %s7225_s14  ;;  %12742 = vst [vmem:[#allocation139_spill] sm:$0xff] %v9805_v13 }
 0x3fe   : > { %3218 = vrot.lane.b32.xlu0 %v9791_v56, %s7225_s14 }
 0x3ff   : > { %v9797_v17 = vpop.permute.xlu1 %3044 }
 0x400   : > { %12740 = vst [vmem:[#allocation34_spill] sm:$0xff] %v9797_v17  ;;  %v9799_v48 = vpop.permute.xlu0 %3042 }
 0x401   : > { %12741 = vst [vmem:[#allocation81_spill] sm:$0xff] %v9799_v48  ;;  %3224 = vrot.lane.b32.xlu1 %v9801_v38, %s7225_s14 }
 0x402   : > { %3222 = vrot.lane.b32.xlu0 %v9805_v13, %s7225_s14 }
 0x403   : > { %v9809_v47 = vpop.permute.xlu1 %3048 }
 0x404   : > { %12743 = vst [vmem:[#allocation80_spill] sm:$0xff] %v9809_v47  ;;  %v9811_v12 = vpop.permute.xlu0 %3046 }
 0x405   : > { %3292 = vrot.lane.b32.xlu1 %v9281_v16, %s7226_s15 }
 0x406   : > { %3290 = vrot.lane.b32.xlu0 %v9287_v49, %s7226_s15 }
 0x407   : > { %v9817_v17 = vpop.permute.xlu1 %3052 }
 0x408   : > { %v9819_v48 = vpop.permute.xlu0 %3050 }
 0x409   : > { %3296 = vrot.lane.b32.xlu1 %v9295_v46, %s7226_s15 }
 0x40a   : > { %3294 = vrot.lane.b32.xlu0 %v9301_v0, %s7226_s15 }
 0x40b   : > { %v9825_v13 = vpop.permute.xlu1 %3056 }
 0x40c   : > { %12744 = vst [vmem:[#allocation102_spill] sm:$0xff] %v9825_v13  ;;  %v9827_v47 = vpop.permute.xlu0 %3054 }
 0x40d   : > { %3300 = vrot.lane.b32.xlu1 %v9309_v32, %s7226_s15 }
 0x40e   : > { %3298 = vrot.lane.b32.xlu0 %v9315_v57, %s7226_s15 }
 0x40f   : > { %v9833_v16 = vpop.permute.xlu1 %3060 }
 0x410   : > { %12745 = vst [vmem:[#allocation163_spill] sm:$0xff] %v9833_v16  ;;  %v9835_v49 = vpop.permute.xlu0 %3058 }
 0x411   : > { %12746 = vst [vmem:[#allocation101_spill] sm:$0xff] %v9835_v49  ;;  %3304 = vrot.lane.b32.xlu1 %v9324_v41, %s7226_s15  ;;  %v2861_v49 = vld [vmem:[#allocation2 + $0x112] sm:$0xff] }
 0x412   : > { %3302 = vrot.lane.b32.xlu0 %v9331_v29, %s7226_s15 }
 0x413   : > { %v9841_v46 = vpop.permute.xlu1 %3064 }
 0x414   : > { %12747 = vst [vmem:[#allocation27_spill] sm:$0xff] %v9841_v46  ;;  %v9843_v0 = vpop.permute.xlu0 %3062 }
 0x415   : > { %12748 = vst [vmem:[#allocation40_spill] sm:$0xff] %v9843_v0  ;;  %3308 = vrot.lane.b32.xlu1 %v9340_v50, %s7226_s15  ;;  %v2857_v0 = vld [vmem:[#allocation2 + $0xe2] sm:$0xff] }
 0x416   : > { %3306 = vrot.lane.b32.xlu0 %v9347_v2, %s7226_s15 }
 0x417   : > { %v9849_v32 = vpop.permute.xlu1 %3068 }
 0x418   : > { %12749 = vst [vmem:[#allocation25_spill] sm:$0xff] %v9849_v32  ;;  %v9851_v57 = vpop.permute.xlu0 %3066 }
 0x419   : > { %12750 = vst [vmem:[#allocation118_spill] sm:$0xff] %v9851_v57  ;;  %3312 = vrot.lane.b32.xlu1 %v9355_v51, %s7226_s15 }
 0x41a   : > { %3310 = vrot.lane.b32.xlu0 %v9361_v30, %s7226_s15 }
 0x41b   : > { %v9857_v41 = vpop.permute.xlu1 %3072 }
 0x41c   : > { %12751 = vst [vmem:[#allocation38_spill] sm:$0xff] %v9857_v41  ;;  %v9859_v29 = vpop.permute.xlu0 %3070  ;;  %v12817_v41 = vld [vmem:[#allocation135_spill] sm:$0xff] }
 0x41d   : > { %12752 = vst [vmem:[#allocation83_spill] sm:$0xff] %v9859_v29  ;;  %3316 = vrot.lane.b32.xlu1 %v9369_v43, %s7226_s15  ;;  %v2808_v29 = vld [vmem:[#allocation2 + $0x198] sm:$0xff] }
 0x41e   : > { %3314 = vrot.lane.b32.xlu0 %v9375_v61, %s7226_s15 }
 0x41f   : > { %v9865_v50 = vpop.permute.xlu1 %3076 }
 0x420   : > { %12753 = vst [vmem:[#allocation117_spill] sm:$0xff] %v9865_v50  ;;  %v9867_v2 = vpop.permute.xlu0 %3074  ;;  %v12809_v50 = vld [vmem:[#allocation13_spill] sm:$0xff] }
 0x421   : > { %12754 = vst [vmem:[#allocation141_spill] sm:$0xff] %v9867_v2  ;;  %3320 = vrot.lane.b32.xlu1 %v9383_v24, %s7226_s15 }
 0x422   : > { %3318 = vrot.lane.b32.xlu0 %v9389_v40, %s7226_s15 }
 0x423   : > { %v9873_v51 = vpop.permute.xlu1 %3080 }
 0x424   : > { %12755 = vst [vmem:[#allocation82_spill] sm:$0xff] %v9873_v51  ;;  %v9875_v30 = vpop.permute.xlu0 %3078  ;;  %v12801_v51 = vld [vmem:[#allocation75_spill] sm:$0xff] }
 0x425   : > { %12756 = vst [vmem:[#allocation104_spill] sm:$0xff] %v9875_v30  ;;  %3324 = vrot.lane.b32.xlu1 %v9397_v62, %s7226_s15 }
 0x426   : > { %3322 = vrot.lane.b32.xlu0 %v9403_v60, %s7226_s15 }
 0x427   : > { %v9881_v43 = vpop.permute.xlu1 %3084 }
 0x428   : > { %12757 = vst [vmem:[#allocation140_spill] sm:$0xff] %v9881_v43  ;;  %v9883_v61 = vpop.permute.xlu0 %3082 }
 0x429   : > { %12758 = vst [vmem:[#allocation165_spill] sm:$0xff] %v9883_v61  ;;  %3328 = vrot.lane.b32.xlu1 %v9411_v26, %s7226_s15 }
 0x42a   : > { %3326 = vrot.lane.b32.xlu0 %v9417_v7, %s7226_s15 }
 0x42b   : > { %v9889_v24 = vpop.permute.xlu1 %3088 }
 0x42c   : > { %12759 = vst [vmem:[#allocation103_spill] sm:$0xff] %v9889_v24  ;;  %v9891_v40 = vpop.permute.xlu0 %3086 }
 0x42d   : > { %12760 = vst [vmem:[#allocation31_spill] sm:$0xff] %v9891_v40  ;;  %3332 = vrot.lane.b32.xlu1 %v9425_v33, %s7226_s15 }
 0x42e   : > { %3330 = vrot.lane.b32.xlu0 %v9431_v3, %s7226_s15 }
 0x42f   : > { %v9897_v62 = vpop.permute.xlu1 %3092 }
 0x430   : > { %12761 = vst [vmem:[#allocation164_spill] sm:$0xff] %v9897_v62  ;;  %v9899_v60 = vpop.permute.xlu0 %3090 }
 0x431   : > { %12762 = vst [vmem:[#allocation44_spill] sm:$0xff] %v9899_v60  ;;  %3336 = vrot.lane.b32.xlu1 %v9439_v28, %s7226_s15 }
 0x432   : > { %3334 = vrot.lane.b32.xlu0 %v9445_v52, %s7226_s15 }
 0x433   : > { %v9905_v26 = vpop.permute.xlu1 %3096 }
 0x434   : > { %12763 = vst [vmem:[#allocation29_spill] sm:$0xff] %v9905_v26  ;;  %v9907_v7 = vpop.permute.xlu0 %3094  ;;  %v9933_v26 = vld [vmem:[#allocation2 + $0x189] sm:$0xff] }
 0x435   : > { %12764 = vst [vmem:[#allocation120_spill] sm:$0xff] %v9907_v7  ;;  %3340 = vrot.lane.b32.xlu1 %v9453_v23, %s7226_s15 }
 0x436   : > { %3338 = vrot.lane.b32.xlu0 %v9459_v27, %s7226_s15 }
 0x437   : > { %v9913_v33 = vpop.permute.xlu1 %3164 }
 0x438   : > { %v9915_v3 = vpop.permute.xlu0 %3162 }
 0x439   : > { %3344 = vrot.lane.b32.xlu1 %v9467_v63, %s7226_s15  ;;  %v9937_v63 = vld [vmem:[#allocation2 + $0x181] sm:$0xff] }
 0x43a   : > { %3342 = vrot.lane.b32.xlu0 %v9473_v53, %s7226_s15 }
 0x43b   : > { %v9921_v28 = vpop.permute.xlu1 %3168 }
 0x43c   : > { %v9923_v52 = vpop.permute.xlu0 %3166 }
 0x43d   : > { %3348 = vrot.lane.b32.xlu1 %v9478_v18, %s7226_s15 }
 0x43e   : > { %3346 = vrot.lane.b32.xlu0 %v9482_v44, %s7226_s15 }
 0x43f   : > { %v9929_v23 = vpop.permute.xlu1 %3172 }
 0x440   : > { %v9931_v27 = vpop.permute.xlu0 %3170 }
 0x441   : > { %3352 = vrot.lane.b32.xlu1 %v9933_v26, %s7226_s15 }
 0x442   : > { %3350 = vrot.lane.b32.xlu0 %v9937_v63, %s7226_s15 }
 0x443   : > { %v9941_v53 = vpop.permute.xlu1 %3176 }
 0x444   : > { %v9943_v18 = vpop.permute.xlu0 %3174 }
 0x445   : > { %3420 = vrot.lane.b32.xlu1 %v9488_v1, %s7227_s16 }
 0x446   : > { %3418 = vrot.lane.b32.xlu0 %v9492_v25, %s7227_s16 }
 0x447   : > { %v9949_v44 = vpop.permute.xlu1 %3180 }
 0x448   : > { %v9951_v7 = vpop.permute.xlu0 %3178 }
 0x449   : > { %3424 = vrot.lane.b32.xlu1 %v9496_v5, %s7227_s16 }
 0x44a   : > { %3422 = vrot.lane.b32.xlu0 %v9500_v9, %s7227_s16 }
 0x44b   : > { %v9957_v62 = vpop.permute.xlu1 %3184 }
 0x44c   : > { %12765 = vst [vmem:[#allocation42_spill] sm:$0xff] %v9957_v62  ;;  %v9959_v60 = vpop.permute.xlu0 %3182  ;;  %v12887_v62 = vld [vmem:[#allocation23_spill] sm:$0xff] }
 0x44d   : > { %12766 = vst [vmem:[#allocation85_spill] sm:$0xff] %v9959_v60  ;;  %3428 = vrot.lane.b32.xlu1 %v9504_v31, %s7227_s16 }
 0x44e   : > { %3426 = vrot.lane.b32.xlu0 %v9508_v54, %s7227_s16 }
 0x44f   : > { %v9965_v1 = vpop.permute.xlu1 %3188 }
 0x450   : > { %12767 = vst [vmem:[#allocation119_spill] sm:$0xff] %v9965_v1  ;;  %v9967_v25 = vpop.permute.xlu0 %3186 }
 0x451   : > { %12768 = vst [vmem:[#allocation143_spill] sm:$0xff] %v9967_v25  ;;  %3432 = vrot.lane.b32.xlu1 %v9512_v36, %s7227_s16  ;;  %v2829_v25 = vld [vmem:[#allocation2 + $0x111] sm:$0xff] }
 0x452   : > { %3430 = vrot.lane.b32.xlu0 %v9516_v37, %s7227_s16 }
 0x453   : > { %v9973_v5 = vpop.permute.xlu1 %3192 }
 0x454   : > { %12769 = vst [vmem:[#allocation84_spill] sm:$0xff] %v9973_v5  ;;  %v9975_v9 = vpop.permute.xlu0 %3190 }
 0x455   : > { %12770 = vst [vmem:[#allocation106_spill] sm:$0xff] %v9975_v9  ;;  %3436 = vrot.lane.b32.xlu1 %v9520_v6, %s7227_s16  ;;  %v2847_v9 = vld [vmem:[#allocation2 + $0x6a] sm:$0xff] }
 0x456   : > { %3434 = vrot.lane.b32.xlu0 %v9524_v35, %s7227_s16 }
 0x457   : > { %v9981_v31 = vpop.permute.xlu1 %3196 }
 0x458   : > { %12771 = vst [vmem:[#allocation142_spill] sm:$0xff] %v9981_v31  ;;  %v9983_v54 = vpop.permute.xlu0 %3194  ;;  %v4162_v31 = vld [vmem:[%s12188_s4 + $0x40] sm:$0xff] }
 0x459   : > { %12772 = vst [vmem:[#allocation167_spill] sm:$0xff] %v9983_v54  ;;  %3440 = vrot.lane.b32.xlu1 %v9528_v19, %s7227_s16  ;;  %v2815_v54 = vld [vmem:[#allocation2 + $0x69] sm:$0xff] }
 0x45a   : > { %3438 = vrot.lane.b32.xlu0 %v9532_v58, %s7227_s16 }
 0x45b   : > { %v9989_v36 = vpop.permute.xlu1 %3200 }
 0x45c   : > { %12773 = vst [vmem:[#allocation105_spill] sm:$0xff] %v9989_v36  ;;  %v9991_v37 = vpop.permute.xlu0 %3198  ;;  %v12813_v36 = vld [vmem:[#allocation61_spill] sm:$0xff] }
 0x45d   : > { %12774 = vst [vmem:[#allocation35_spill] sm:$0xff] %v9991_v37  ;;  %3444 = vrot.lane.b32.xlu1 %v9536_v20, %s7227_s16 }
 0x45e   : > { %3442 = vrot.lane.b32.xlu0 %v9540_v10, %s7227_s16 }
 0x45f   : > { %v9997_v6 = vpop.permute.xlu1 %3204 }
 0x460   : > { %12775 = vst [vmem:[#allocation166_spill] sm:$0xff] %v9997_v6  ;;  %v9999_v35 = vpop.permute.xlu0 %3202  ;;  %v12805_v6 = vld [vmem:[#allocation96_spill] sm:$0xff] }
 0x461   : > { %12776 = vst [vmem:[#allocation48_spill] sm:$0xff] %v9999_v35  ;;  %3448 = vrot.lane.b32.xlu1 %v9544_v22, %s7227_s16 }
 0x462   : > { %3446 = vrot.lane.b32.xlu0 %v9548_v11, %s7227_s16 }
 0x463   : > { %v10005_v19 = vpop.permute.xlu1 %3208 }
 0x464   : > { %12777 = vst [vmem:[#allocation33_spill] sm:$0xff] %v10005_v19  ;;  %v10007_v58 = vpop.permute.xlu0 %3206  ;;  %v12797_v19 = vld [vmem:[#allocation28_spill] sm:$0xff] }
 0x465   : > { %12778 = vst [vmem:[#allocation122_spill] sm:$0xff] %v10007_v58  ;;  %3452 = vrot.lane.b32.xlu1 %v9552_v45, %s7227_s16 }
 0x466   : > { %3450 = vrot.lane.b32.xlu0 %v9556_v14, %s7227_s16 }
 0x467   : > { %v10013_v20 = vpop.permute.xlu1 %3212 }
 0x468   : > { %12779 = vst [vmem:[#allocation46_spill] sm:$0xff] %v10013_v20  ;;  %v10015_v10 = vpop.permute.xlu0 %3210  ;;  %v12793_v20 = vld [vmem:[#allocation73_spill] sm:$0xff] }
 0x469   : > { %12780 = vst [vmem:[#allocation87_spill] sm:$0xff] %v10015_v10  ;;  %3456 = vrot.lane.b32.xlu1 %v9560_v8, %s7227_s16  ;;  %v12794_v10 = vld [vmem:[#allocation8_spill] sm:$0xff] }
 0x46a   : > { %3454 = vrot.lane.b32.xlu0 %v9564_v15, %s7227_s16 }
 0x46b   : > { %v10021_v22 = vpop.permute.xlu1 %3216 }
 0x46c   : > { %12781 = vst [vmem:[#allocation121_spill] sm:$0xff] %v10021_v22  ;;  %v10023_v11 = vpop.permute.xlu0 %3214  ;;  %v10065_v22 = vld [vmem:[#allocation2 + $0x18a] sm:$0xff] }
 0x46d   : > { %12782 = vst [vmem:[#allocation145_spill] sm:$0xff] %v10023_v11  ;;  %3460 = vrot.lane.b32.xlu1 %v9568_v55, %s7227_s16  ;;  %v12787_v55 = vld [vmem:[#allocation9_spill] sm:$0xff]  ;;  %v12792_v11 = vld [vmem:[#allocation71_spill] sm:$0xff] }
 0x46e   : > { %3458 = vrot.lane.b32.xlu0 %v9572_v59, %s7227_s16 }
 0x46f   : > { %v10029_v45 = vpop.permute.xlu1 %3220 }
 0x470   : > { %12783 = vst [vmem:[#allocation86_spill] sm:$0xff] %v10029_v45  ;;  %v10031_v14 = vpop.permute.xlu0 %3218 }
 0x471   : > { %12784 = vst [vmem:[#allocation108_spill] sm:$0xff] %v10031_v14  ;;  %3464 = vrot.lane.b32.xlu1 %v9576_v39, %s7227_s16  ;;  %v12788_v14 = vld [vmem:[#allocation12_spill] sm:$0xff]  ;;  %v12789_v39 = vld [vmem:[#allocation66_spill] sm:$0xff] }
 0x472   : > { %3462 = vrot.lane.b32.xlu0 %v9580_v34, %s7227_s16 }
 0x473   : > { %v10037_v8 = vpop.permute.xlu1 %3224 }
 0x474   : > { %12785 = vst [vmem:[#allocation144_spill] sm:$0xff] %v10037_v8  ;;  %v10039_v15 = vpop.permute.xlu0 %3222 }
 0x475   : > { %12786 = vst [vmem:[#allocation169_spill] sm:$0xff] %v10039_v15  ;;  %3468 = vrot.lane.b32.xlu1 %v9588_v4, %s7227_s16  ;;  %v12790_v15 = vld [vmem:[#allocation17_spill] sm:$0xff] }
 0x476   : > { %3466 = vrot.lane.b32.xlu0 %v12787_v55, %s7227_s16 }
 0x477   : > { %v10045_v59 = vpop.permute.xlu1 %3292 }
 0x478   : > { %v10047_v45 = vpop.permute.xlu0 %3290 }
 0x479   : > { %3472 = vrot.lane.b32.xlu1 %v12788_v14, %s7227_s16  ;;  %v10069_v14 = vld [vmem:[#allocation2 + $0x182] sm:$0xff] }
 0x47a   : > { %3470 = vrot.lane.b32.xlu0 %v12789_v39, %s7227_s16 }
 0x47b   : > { %v10053_v34 = vpop.permute.xlu1 %3296 }
 0x47c   : > { %v10055_v8 = vpop.permute.xlu0 %3294 }
 0x47d   : > { %3476 = vrot.lane.b32.xlu1 %v12790_v15, %s7227_s16 }
 0x47e   : > { %3474 = vrot.lane.b32.xlu0 %v9616_v42, %s7227_s16  ;;  %v12791_v42 = vld [vmem:[#allocation22_spill] sm:$0xff] }
 0x47f   : > { %v10061_v4 = vpop.permute.xlu1 %3300 }
 0x480   : > { %v10063_v55 = vpop.permute.xlu0 %3298 }
 0x481   : > { %3480 = vrot.lane.b32.xlu1 %v10065_v22, %s7227_s16 }
 0x482   : > { %3478 = vrot.lane.b32.xlu0 %v10069_v14, %s7227_s16 }
 0x483   : > { %v10073_v39 = vpop.permute.xlu1 %3304 }
 0x484   : > { %v10075_v15 = vpop.permute.xlu0 %3302 }
 0x485   : > { %3548 = vrot.lane.b32.xlu1 %v12791_v42, %s7228_s17  ;;  %v12798_v42 = vld [vmem:[#allocation57_spill] sm:$0xff] }
 0x486   : > { %3546 = vrot.lane.b32.xlu0 %v12792_v11, %s7228_s17 }
 0x487   : > { %v10081_v24 = vpop.permute.xlu1 %3308 }
 0x488   : > { %v10083_v40 = vpop.permute.xlu0 %3306 }
 0x489   : > { %3552 = vrot.lane.b32.xlu1 %v12793_v20, %s7228_s17  ;;  %v12802_v20 = vld [vmem:[#allocation133_spill] sm:$0xff] }
 0x48a   : > { %3550 = vrot.lane.b32.xlu0 %v12794_v10, %s7228_s17 }
 0x48b   : > { %v10089_v43 = vpop.permute.xlu1 %3312 }
 0x48c   : > { %12795 = vst [vmem:[#allocation107_spill] sm:$0xff] %v10089_v43  ;;  %v10091_v61 = vpop.permute.xlu0 %3310 }
 0x48d   : > { %12796 = vst [vmem:[#allocation39_spill] sm:$0xff] %v10091_v61  ;;  %3556 = vrot.lane.b32.xlu1 %v12797_v19, %s7228_s17  ;;  %v12806_v19 = vld [vmem:[#allocation157_spill] sm:$0xff]  ;;  %v2872_v61 = vld [vmem:[#allocation2 + $0x19a] sm:$0xff] }
 0x48e   : > { %3554 = vrot.lane.b32.xlu0 %v12798_v42, %s7228_s17 }
 0x48f   : > { %v10097_v11 = vpop.permute.xlu1 %3316 }
 0x490   : > { %12799 = vst [vmem:[#allocation168_spill] sm:$0xff] %v10097_v11  ;;  %v10099_v58 = vpop.permute.xlu0 %3314 }
 0x491   : > { %12800 = vst [vmem:[#allocation52_spill] sm:$0xff] %v10099_v58  ;;  %3560 = vrot.lane.b32.xlu1 %v12801_v51, %s7228_s17  ;;  %v12810_v51 = vld [vmem:[#allocation32_spill] sm:$0xff] }
 0x492   : > { %3558 = vrot.lane.b32.xlu0 %v12802_v20, %s7228_s17  ;;  %v2859_v58 = vld [vmem:[#allocation2 + $0xfa] sm:$0xff] }
 0x493   : > { %v10105_v10 = vpop.permute.xlu1 %3320 }
 0x494   : > { %12803 = vst [vmem:[#allocation37_spill] sm:$0xff] %v10105_v10  ;;  %v10107_v30 = vpop.permute.xlu0 %3318 }
 0x495   : > { %12804 = vst [vmem:[#allocation124_spill] sm:$0xff] %v10107_v30  ;;  %3564 = vrot.lane.b32.xlu1 %v12805_v6, %s7228_s17  ;;  %v12814_v6 = vld [vmem:[#allocation77_spill] sm:$0xff]  ;;  %v2845_v30 = vld [vmem:[#allocation2 + $0x52] sm:$0xff] }
 0x496   : > { %3562 = vrot.lane.b32.xlu0 %v12806_v19, %s7228_s17 }
 0x497   : > { %v10113_v42 = vpop.permute.xlu1 %3324 }
 0x498   : > { %12807 = vst [vmem:[#allocation50_spill] sm:$0xff] %v10113_v42  ;;  %v10115_v35 = vpop.permute.xlu0 %3322  ;;  %v4160_v42 = vld [vmem:[%s12188_s4 + $0x30] sm:$0xff] }
 0x499   : > { %12808 = vst [vmem:[#allocation89_spill] sm:$0xff] %v10115_v35  ;;  %3568 = vrot.lane.b32.xlu1 %v12809_v50, %s7228_s17  ;;  %v12818_v50 = vld [vmem:[#allocation98_spill] sm:$0xff]  ;;  %v2811_v35 = vld [vmem:[#allocation2 + $0x39] sm:$0xff] }
 0x49a   : > { %3566 = vrot.lane.b32.xlu0 %v12810_v51, %s7228_s17 }
 0x49b   : > { %v10121_v20 = vpop.permute.xlu1 %3328 }
 0x49c   : > { %12811 = vst [vmem:[#allocation123_spill] sm:$0xff] %v10121_v20  ;;  %v10123_v2 = vpop.permute.xlu0 %3326 }
 0x49d   : > { %12812 = vst [vmem:[#allocation147_spill] sm:$0xff] %v10123_v2  ;;  %3572 = vrot.lane.b32.xlu1 %v12813_v36, %s7228_s17  ;;  %v12821_v2 = vld [vmem:[#allocation159_spill] sm:$0xff] }
 0x49e   : > { %3570 = vrot.lane.b32.xlu0 %v12814_v6, %s7228_s17  ;;  %v12822_v36 = vld [vmem:[#allocation19_spill] sm:$0xff] }
 0x49f   : > { %v10129_v19 = vpop.permute.xlu1 %3332 }
 0x4a0   : > { %12815 = vst [vmem:[#allocation88_spill] sm:$0xff] %v10129_v19  ;;  %v10131_v37 = vpop.permute.xlu0 %3330 }
 0x4a1   : > { %12816 = vst [vmem:[#allocation110_spill] sm:$0xff] %v10131_v37  ;;  %3576 = vrot.lane.b32.xlu1 %v12817_v41, %s7228_s17  ;;  %v12825_v37 = vld [vmem:[#allocation99_spill] sm:$0xff]  ;;  %v12826_v41 = vld [vmem:[#allocation65_spill] sm:$0xff] }
 0x4a2   : > { %3574 = vrot.lane.b32.xlu0 %v12818_v50, %s7228_s17 }
 0x4a3   : > { %v10137_v51 = vpop.permute.xlu1 %3336 }
 0x4a4   : > { %12819 = vst [vmem:[#allocation146_spill] sm:$0xff] %v10137_v51  ;;  %v10139_v20 = vpop.permute.xlu0 %3334 }
 0x4a5   : > { %12820 = vst [vmem:[#allocation171_spill] sm:$0xff] %v10139_v20  ;;  %3580 = vrot.lane.b32.xlu1 %v12821_v2, %s7228_s17  ;;  %v12829_v20 = vld [vmem:[#allocation21_spill] sm:$0xff] }
 0x4a6   : > { %3578 = vrot.lane.b32.xlu0 %v12822_v36, %s7228_s17  ;;  %v12830_v2 = vld [vmem:[#allocation137_spill] sm:$0xff] }
 0x4a7   : > { %v10145_v6 = vpop.permute.xlu1 %3340 }
 0x4a8   : > { %12823 = vst [vmem:[#allocation109_spill] sm:$0xff] %v10145_v6  ;;  %v10147_v19 = vpop.permute.xlu0 %3338 }
 0x4a9   : > { %12824 = vst [vmem:[#allocation43_spill] sm:$0xff] %v10147_v19  ;;  %3584 = vrot.lane.b32.xlu1 %v12825_v37, %s7228_s17  ;;  %v12833_v19 = vld [vmem:[#allocation68_spill] sm:$0xff]  ;;  %v12834_v37 = vld [vmem:[#allocation161_spill] sm:$0xff] }
 0x4aa   : > { %3582 = vrot.lane.b32.xlu0 %v12826_v41, %s7228_s17 }
 0x4ab   : > { %v10153_v50 = vpop.permute.xlu1 %3344 }
 0x4ac   : > { %12827 = vst [vmem:[#allocation170_spill] sm:$0xff] %v10153_v50  ;;  %v10155_v51 = vpop.permute.xlu0 %3342 }
 0x4ad   : > { %12828 = vst [vmem:[#allocation56_spill] sm:$0xff] %v10155_v51  ;;  %3588 = vrot.lane.b32.xlu1 %v12829_v20, %s7228_s17  ;;  %v4154_v20 = vld [vmem:[%s12188_s4] sm:$0xff]  ;;  %v4159_v51 = vld [vmem:[%s12188_s4 + $0x28] sm:$0xff] }
 0x4ae   : > { %3586 = vrot.lane.b32.xlu0 %v12830_v2, %s7228_s17  ;;  %v4155_v2 = vld [vmem:[%s12188_s4 + $0x8] sm:$0xff] }
 0x4af   : > { %v10161_v36 = vpop.permute.xlu1 %3348 }
 0x4b0   : > { %12831 = vst [vmem:[#allocation41_spill] sm:$0xff] %v10161_v36  ;;  %v10163_v6 = vpop.permute.xlu0 %3346  ;;  %v12837_v36 = vld [vmem:[#allocation138_spill] sm:$0xff] }
 0x4b1   : > { %12832 = vst [vmem:[#allocation126_spill] sm:$0xff] %v10163_v6  ;;  %3592 = vrot.lane.b32.xlu1 %v12833_v19, %s7228_s17  ;;  %v7093_v6 = vpack.c.bf16 %v4155_v2, %v4154_v20 }
 0x4b2   : > { %3590 = vrot.lane.b32.xlu0 %v12834_v37, %s7228_s17 }
 0x4b3   : > { %v10169_v41 = vpop.permute.xlu1 %3352  ;;  %7094 = vmatprep.subr.bf16.mxu1 %v7093_v6 }
 0x4b4   : > { %12835 = vst [vmem:[#allocation54_spill] sm:$0xff] %v10169_v41  ;;  %v10171_v50 = vpop.permute.xlu0 %3350  ;;  %7096 = vmatpush3.bf16.msra.mxu1 %v7093_v6  ;;  %v4156_v41 = vld [vmem:[%s12188_s4 + $0x10] sm:$0xff]  ;;  %v4158_v6 = vld [vmem:[%s12188_s4 + $0x20] sm:$0xff] }
 0x4b5   : > { %12836 = vst [vmem:[#allocation91_spill] sm:$0xff] %v10171_v50  ;;  %3596 = vrot.lane.b32.xlu1 %v12837_v36, %s7228_s17  ;;  %v4157_v50 = vld [vmem:[%s12188_s4 + $0x18] sm:$0xff]  ;;  %v12838_v36 = vld [vmem:[#allocation116_spill] sm:$0xff] }
 0x4b6   : > { %3594 = vrot.lane.b32.xlu0 %v9779_v21, %s7228_s17  ;;  %v7097_v20 = vpack.c.bf16 %v4157_v50, %v4156_v41  ;;  %v7101_v50 = vpack.c.bf16 %v4159_v51, %v4158_v6  ;;  %v2809_v41 = vld [vmem:[#allocation2 + $0x1a0] sm:$0xff] }
 0x4b7   : > { %v10183_v19 = vpop.permute.xlu1 %3420 }
 0x4b8   : > { %v10185_v37 = vpop.permute.xlu0 %3418  ;;  %7098 = vmatprep.subr.bf16.mxu1 %v7097_v20 }
 0x4b9   : > { %3600 = vrot.lane.b32.xlu1 %v12838_v36, %s7228_s17  ;;  %7100 = vmatpush3.bf16.msra.mxu1 %v7097_v20 }
 0x4ba   : > { %3598 = vrot.lane.b32.xlu0 %v9791_v56, %s7228_s17  ;;  %v12839_v56 = vld [vmem:[#allocation139_spill] sm:$0xff]  ;;  %7102 = vmatprep.subr.bf16.mxu1 %v7101_v50 }
 0x4bb   : > { %v10197_v21 = vpop.permute.xlu1 %3424 }
 0x4bc   : > { %v10199_v2 = vpop.permute.xlu0 %3422 }
 0x4bd   : > { %3604 = vrot.lane.b32.xlu1 %v9801_v38, %s7228_s17  ;;  %7104 = vmatpush3.bf16.msra.mxu1 %v7101_v50  ;;  %v4161_v38 = vld [vmem:[%s12188_s4 + $0x38] sm:$0xff] }
 0x4be   : > { %3602 = vrot.lane.b32.xlu0 %v12839_v56, %s7228_s17  ;;  %v7105_v51 = vpack.c.bf16 %v4161_v38, %v4160_v42  ;;  %v2810_v50 = vld [vmem:[#allocation2 + $0x31] sm:$0xff]  ;;  %v2812_v38 = vld [vmem:[#allocation2 + $0x49] sm:$0xff] }
 0x4bf   : > { %v10211_v36 = vpop.permute.xlu1 %3428 }
 0x4c0   : > { %v10213_v20 = vpop.permute.xlu0 %3426  ;;  %7106 = vmatprep.subr.bf16.mxu1 %v7105_v51 }
 0x4c1   : > { %3608 = vrot.lane.b32.xlu1 %v2809_v41, %s7228_s17  ;;  %7108 = vmatpush3.bf16.msra.mxu1 %v7105_v51  ;;  %v2813_v41 = vld [vmem:[#allocation2 + $0x51] sm:$0xff] }
 0x4c2   : > { %3606 = vrot.lane.b32.xlu0 %v2808_v29, %s7228_s17  ;;  %6969 = vmatprep.subr.mxu1 %v4162_v31 }
 0x4c3   : > { %v10223_v6 = vpop.permute.xlu1 %3432 }
 0x4c4   : > { %v10225_v56 = vpop.permute.xlu0 %3430 }
 0x4c5   : > { %3676 = vrot.lane.b32.xlu1 %v2811_v35, %s7229_s18  ;;  %6970 = vmatpush3.msra.mxu1 %v4162_v31  ;;  %v2843_v31 = vld [vmem:[#allocation2 + $0x3a] sm:$0xff] }
 0x4c6   : > { %3674 = vrot.lane.b32.xlu0 %v2810_v50, %s7229_s18  ;;  %v2814_v50 = vld [vmem:[#allocation2 + $0x61] sm:$0xff] }
 0x4c7   : > { %v10232_v42 = vpop.permute.xlu1 %3436 }
 0x4c8   : > { %v10234_v29 = vpop.permute.xlu0 %3434 }
 0x4c9   : > { %3680 = vrot.lane.b32.xlu1 %v2813_v41, %s7229_s18  ;;  %v2842_v41 = vld [vmem:[#allocation2 + $0x32] sm:$0xff] }
 0x4ca   : > { %3678 = vrot.lane.b32.xlu0 %v2812_v38, %s7229_s18 }
 0x4cb   : > { %v10238_v35 = vpop.permute.xlu1 %3440 }
 0x4cc   : > { %12840 = vst [vmem:[#allocation125_spill] sm:$0xff] %v10238_v35  ;;  %v10240_v51 = vpop.permute.xlu0 %3438  ;;  %v12885_v35 = vld [vmem:[#allocation5_spill] sm:$0xff] }
 0x4cd   : > { %12841 = vst [vmem:[#allocation149_spill] sm:$0xff] %v10240_v51  ;;  %3684 = vrot.lane.b32.xlu1 %v2815_v54, %s7229_s18  ;;  %v2844_v54 = vld [vmem:[#allocation2 + $0x4a] sm:$0xff]  ;;  %v12886_v51 = vld [vmem:[#allocation160_spill] sm:$0xff] }
 0x4ce   : > { %3682 = vrot.lane.b32.xlu0 %v2814_v50, %s7229_s18 }
 0x4cf   : > { %v10244_v32 = vpop.permute.xlu1 %3444 }
 0x4d0   : > { %12842 = vst [vmem:[#allocation90_spill] sm:$0xff] %v10244_v32  ;;  %v10246_v57 = vpop.permute.xlu0 %3442 }
 0x4d1   : > { %12843 = vst [vmem:[#allocation112_spill] sm:$0xff] %v10246_v57  ;;  %3804 = vrot.lane.b32.xlu1 %v2843_v31, %s7230_s24  ;;  %v2846_v31 = vld [vmem:[#allocation2 + $0x62] sm:$0xff]  ;;  %v2827_v57 = vld [vmem:[#allocation2 + $0xf9] sm:$0xff] }
 0x4d2   : > { %3802 = vrot.lane.b32.xlu0 %v2842_v41, %s7230_s24 }
 0x4d3   : > { %v10250_v38 = vpop.permute.xlu1 %3448 }
 0x4d4   : > { %12844 = vst [vmem:[#allocation148_spill] sm:$0xff] %v10250_v38  ;;  %v10252_v10 = vpop.permute.xlu0 %3446 }
 0x4d5   : > { %12845 = vst [vmem:[#allocation173_spill] sm:$0xff] %v10252_v10  ;;  %3808 = vrot.lane.b32.xlu1 %v2845_v30, %s7230_s24  ;;  %v2817_v10 = vld [vmem:[#allocation2 + $0x81] sm:$0xff]  ;;  %v2816_v30 = vld [vmem:[#allocation2 + $0x79] sm:$0xff] }
 0x4d6   : > { %3806 = vrot.lane.b32.xlu0 %v2844_v54, %s7230_s24 }
 0x4d7   : > { %v10256_v50 = vpop.permute.xlu1 %3452 }
 0x4d8   : > { %12846 = vst [vmem:[#allocation111_spill] sm:$0xff] %v10256_v50  ;;  %v10258_v5 = vpop.permute.xlu0 %3450 }
 0x4d9   : > { %12847 = vst [vmem:[#allocation47_spill] sm:$0xff] %v10258_v5  ;;  %3812 = vrot.lane.b32.xlu1 %v2847_v9, %s7230_s24  ;;  %v2849_v5 = vld [vmem:[#allocation2 + $0x82] sm:$0xff]  ;;  %v2848_v9 = vld [vmem:[#allocation2 + $0x7a] sm:$0xff] }
 0x4da   : > { %3810 = vrot.lane.b32.xlu0 %v2846_v31, %s7230_s24 }
 0x4db   : > { %v10262_v41 = vpop.permute.xlu1 %3456 }
 0x4dc   : > { %12848 = vst [vmem:[#allocation172_spill] sm:$0xff] %v10262_v41  ;;  %v10264_v38 = vpop.permute.xlu0 %3454 }
 0x4dd   : > { %12849 = vst [vmem:[#allocation60_spill] sm:$0xff] %v10264_v38  ;;  %3688 = vrot.lane.b32.xlu1 %v2817_v10, %s7229_s18  ;;  %v2819_v38 = vld [vmem:[#allocation2 + $0x99] sm:$0xff]  ;;  %v2818_v10 = vld [vmem:[#allocation2 + $0x91] sm:$0xff] }
 0x4de   : > { %3686 = vrot.lane.b32.xlu0 %v2816_v30, %s7229_s18 }
 0x4df   : > { %v10268_v54 = vpop.permute.xlu1 %3460 }
 0x4e0   : > { %12850 = vst [vmem:[#allocation45_spill] sm:$0xff] %v10268_v54  ;;  %v10270_v50 = vpop.permute.xlu0 %3458 }
 0x4e1   : > { %12851 = vst [vmem:[#allocation128_spill] sm:$0xff] %v10270_v50  ;;  %3816 = vrot.lane.b32.xlu1 %v2849_v5, %s7230_s24  ;;  %v2851_v50 = vld [vmem:[#allocation2 + $0x9a] sm:$0xff]  ;;  %v2850_v5 = vld [vmem:[#allocation2 + $0x92] sm:$0xff] }
 0x4e2   : > { %3814 = vrot.lane.b32.xlu0 %v2848_v9, %s7230_s24 }
 0x4e3   : > { %v10274_v31 = vpop.permute.xlu1 %3464 }
 0x4e4   : > { %12852 = vst [vmem:[#allocation58_spill] sm:$0xff] %v10274_v31  ;;  %v10276_v41 = vpop.permute.xlu0 %3462 }
 0x4e5   : > { %12853 = vst [vmem:[#allocation93_spill] sm:$0xff] %v10276_v41  ;;  %3692 = vrot.lane.b32.xlu1 %v2819_v38, %s7229_s18  ;;  %v2821_v41 = vld [vmem:[#allocation2 + $0xb1] sm:$0xff]  ;;  %v2820_v38 = vld [vmem:[#allocation2 + $0xa9] sm:$0xff] }
 0x4e6   : > { %3690 = vrot.lane.b32.xlu0 %v2818_v10, %s7229_s18 }
 0x4e7   : > { %v10280_v30 = vpop.permute.xlu1 %3468 }
 0x4e8   : > { %12854 = vst [vmem:[#allocation127_spill] sm:$0xff] %v10280_v30  ;;  %v10282_v54 = vpop.permute.xlu0 %3466 }
 0x4e9   : > { %12855 = vst [vmem:[#allocation151_spill] sm:$0xff] %v10282_v54  ;;  %3820 = vrot.lane.b32.xlu1 %v2851_v50, %s7230_s24  ;;  %v2853_v54 = vld [vmem:[#allocation2 + $0xb2] sm:$0xff]  ;;  %v2852_v50 = vld [vmem:[#allocation2 + $0xaa] sm:$0xff] }
 0x4ea   : > { %3818 = vrot.lane.b32.xlu0 %v2850_v5, %s7230_s24 }
 0x4eb   : > { %v10286_v9 = vpop.permute.xlu1 %3472 }
 0x4ec   : > { %12856 = vst [vmem:[#allocation92_spill] sm:$0xff] %v10286_v9  ;;  %v10288_v31 = vpop.permute.xlu0 %3470 }
 0x4ed   : > { %12857 = vst [vmem:[#allocation114_spill] sm:$0xff] %v10288_v31  ;;  %3696 = vrot.lane.b32.xlu1 %v2821_v41, %s7229_s18  ;;  %v2823_v31 = vld [vmem:[#allocation2 + $0xc9] sm:$0xff]  ;;  %v2822_v41 = vld [vmem:[#allocation2 + $0xc1] sm:$0xff] }
 0x4ee   : > { %3694 = vrot.lane.b32.xlu0 %v2820_v38, %s7229_s18 }
 0x4ef   : > { %v10292_v10 = vpop.permute.xlu1 %3476 }
 0x4f0   : > { %12858 = vst [vmem:[#allocation150_spill] sm:$0xff] %v10292_v10  ;;  %v10294_v30 = vpop.permute.xlu0 %3474 }
 0x4f1   : > { %12859 = vst [vmem:[#allocation4_spill] sm:$0xff] %v10294_v30  ;;  %3824 = vrot.lane.b32.xlu1 %v2853_v54, %s7230_s24  ;;  %v2855_v30 = vld [vmem:[#allocation2 + $0xca] sm:$0xff]  ;;  %v2854_v54 = vld [vmem:[#allocation2 + $0xc2] sm:$0xff] }
 0x4f2   : > { %3822 = vrot.lane.b32.xlu0 %v2852_v50, %s7230_s24 }
 0x4f3   : > { %v10298_v5 = vpop.permute.xlu1 %3480 }
 0x4f4   : > { %12860 = vst [vmem:[#allocation113_spill] sm:$0xff] %v10298_v5  ;;  %v10300_v9 = vpop.permute.xlu0 %3478 }
 0x4f5   : > { %12861 = vst [vmem:[#allocation51_spill] sm:$0xff] %v10300_v9  ;;  %3700 = vrot.lane.b32.xlu1 %v2823_v31, %s7229_s18  ;;  %v2825_v9 = vld [vmem:[#allocation2 + $0xe1] sm:$0xff]  ;;  %v2824_v31 = vld [vmem:[#allocation2 + $0xd9] sm:$0xff] }
 0x4f6   : > { %3698 = vrot.lane.b32.xlu0 %v2822_v41, %s7229_s18 }
 0x4f7   : > { %v10304_v38 = vpop.permute.xlu1 %3548 }
 0x4f8   : > { %v10306_v10 = vpop.permute.xlu0 %3546 }
 0x4f9   : > { %3828 = vrot.lane.b32.xlu1 %v2855_v30, %s7230_s24  ;;  %v2856_v30 = vld [vmem:[#allocation2 + $0xda] sm:$0xff] }
 0x4fa   : > { %3826 = vrot.lane.b32.xlu0 %v2854_v54, %s7230_s24 }
 0x4fb   : > { %v10310_v50 = vpop.permute.xlu1 %3552 }
 0x4fc   : > { %v10312_v5 = vpop.permute.xlu0 %3550 }
 0x4fd   : > { %3704 = vrot.lane.b32.xlu1 %v2825_v9, %s7229_s18  ;;  %v2826_v9 = vld [vmem:[#allocation2 + $0xf1] sm:$0xff] }
 0x4fe   : > { %3702 = vrot.lane.b32.xlu0 %v2824_v31, %s7229_s18 }
 0x4ff   : > { %v10316_v41 = vpop.permute.xlu1 %3556 }
 0x500   : > { %v10318_v46 = vpop.permute.xlu0 %3554 }
 0x501   : > { %3832 = vrot.lane.b32.xlu1 %v2857_v0, %s7230_s24  ;;  %v2858_v0 = vld [vmem:[#allocation2 + $0xf2] sm:$0xff] }
 0x502   : > { %3830 = vrot.lane.b32.xlu0 %v2856_v30, %s7230_s24 }
 0x503   : > { %v10322_v54 = vpop.permute.xlu1 %3560 }
 0x504   : > { %v10324_v32 = vpop.permute.xlu0 %3558 }
 0x505   : > { %3708 = vrot.lane.b32.xlu1 %v2827_v57, %s7229_s18  ;;  %v2828_v57 = vld [vmem:[#allocation2 + $0x109] sm:$0xff] }
 0x506   : > { %3706 = vrot.lane.b32.xlu0 %v2826_v9, %s7229_s18 }
 0x507   : > { %v10328_v31 = vpop.permute.xlu1 %3564 }
 0x508   : > { %v10330_v11 = vpop.permute.xlu0 %3562 }
 0x509   : > { %3836 = vrot.lane.b32.xlu1 %v2859_v58, %s7230_s24  ;;  %v2860_v58 = vld [vmem:[#allocation2 + $0x10a] sm:$0xff] }
 0x50a   : > { %3834 = vrot.lane.b32.xlu0 %v2858_v0, %s7230_s24 }
 0x50b   : > { %v10334_v30 = vpop.permute.xlu1 %3568 }
 0x50c   : > { %12862 = vst [vmem:[#allocation174_spill] sm:$0xff] %v10334_v30  ;;  %v10336_v1 = vpop.permute.xlu0 %3566 }
 0x50d   : > { %12863 = vst [vmem:[#allocation64_spill] sm:$0xff] %v10336_v1  ;;  %3712 = vrot.lane.b32.xlu1 %v2829_v25, %s7229_s18  ;;  %v2831_v1 = vld [vmem:[#allocation2 + $0x129] sm:$0xff]  ;;  %v2830_v25 = vld [vmem:[#allocation2 + $0x121] sm:$0xff] }
 0x50e   : > { %3710 = vrot.lane.b32.xlu0 %v2828_v57, %s7229_s18 }
 0x50f   : > { %v10340_v9 = vpop.permute.xlu1 %3572 }
 0x510   : > { %12864 = vst [vmem:[#allocation49_spill] sm:$0xff] %v10340_v9  ;;  %v10342_v16 = vpop.permute.xlu0 %3570 }
 0x511   : > { %12865 = vst [vmem:[#allocation130_spill] sm:$0xff] %v10342_v16  ;;  %3840 = vrot.lane.b32.xlu1 %v2861_v49, %s7230_s24  ;;  %v2863_v16 = vld [vmem:[#allocation2 + $0x12a] sm:$0xff]  ;;  %v2862_v49 = vld [vmem:[#allocation2 + $0x122] sm:$0xff] }
 0x512   : > { %3838 = vrot.lane.b32.xlu0 %v2860_v58, %s7230_s24 }
 0x513   : > { %v10346_v0 = vpop.permute.xlu1 %3576 }
 0x514   : > { %12866 = vst [vmem:[#allocation94_spill] sm:$0xff] %v10346_v0  ;;  %v10348_v30 = vpop.permute.xlu0 %3574 }
 0x515   : > { %12867 = vst [vmem:[#allocation129_spill] sm:$0xff] %v10348_v30  ;;  %3716 = vrot.lane.b32.xlu1 %v2831_v1, %s7229_s18  ;;  %v2833_v30 = vld [vmem:[#allocation2 + $0x141] sm:$0xff]  ;;  %v2832_v1 = vld [vmem:[#allocation2 + $0x139] sm:$0xff] }
 0x516   : > { %3714 = vrot.lane.b32.xlu0 %v2830_v25, %s7229_s18 }
 0x517   : > { %v10352_v57 = vpop.permute.xlu1 %3580 }
 0x518   : > { %12868 = vst [vmem:[#allocation153_spill] sm:$0xff] %v10352_v57  ;;  %v10354_v9 = vpop.permute.xlu0 %3578 }
 0x519   : > { %12869 = vst [vmem:[#allocation115_spill] sm:$0xff] %v10354_v9  ;;  %3844 = vrot.lane.b32.xlu1 %v2863_v16, %s7230_s24  ;;  %v2865_v9 = vld [vmem:[#allocation2 + $0x142] sm:$0xff]  ;;  %v2864_v16 = vld [vmem:[#allocation2 + $0x13a] sm:$0xff] }
 0x51a   : > { %3842 = vrot.lane.b32.xlu0 %v2862_v49, %s7230_s24 }
 0x51b   : > { %v10358_v58 = vpop.permute.xlu1 %3584 }
 0x51c   : > { %12870 = vst [vmem:[#allocation152_spill] sm:$0xff] %v10358_v58  ;;  %v10360_v0 = vpop.permute.xlu0 %3582 }
 0x51d   : > { %12871 = vst [vmem:[#allocation175_spill] sm:$0xff] %v10360_v0  ;;  %3720 = vrot.lane.b32.xlu1 %v2833_v30, %s7229_s18  ;;  %v2835_v0 = vld [vmem:[#allocation2 + $0x159] sm:$0xff]  ;;  %v2834_v30 = vld [vmem:[#allocation2 + $0x151] sm:$0xff] }
 0x51e   : > { %3718 = vrot.lane.b32.xlu0 %v2832_v1, %s7229_s18 }
 0x51f   : > { %v10364_v25 = vpop.permute.xlu1 %3588 }
 0x520   : > { %12872 = vst [vmem:[#allocation53_spill] sm:$0xff] %v10364_v25  ;;  %v10366_v57 = vpop.permute.xlu0 %3586 }
 0x521   : > { %12873 = vst [vmem:[#allocation62_spill] sm:$0xff] %v10366_v57  ;;  %3848 = vrot.lane.b32.xlu1 %v2865_v9, %s7230_s24  ;;  %v2867_v57 = vld [vmem:[#allocation2 + $0x15a] sm:$0xff]  ;;  %v2866_v9 = vld [vmem:[#allocation2 + $0x152] sm:$0xff] }
 0x522   : > { %3846 = vrot.lane.b32.xlu0 %v2864_v16, %s7230_s24 }
 0x523   : > { %v10370_v49 = vpop.permute.xlu1 %3592 }
 0x524   : > { %12874 = vst [vmem:[#allocation131_spill] sm:$0xff] %v10370_v49  ;;  %v10372_v58 = vpop.permute.xlu0 %3590 }
 0x525   : > { %12875 = vst [vmem:[#allocation154_spill] sm:$0xff] %v10372_v58  ;;  %3724 = vrot.lane.b32.xlu1 %v2835_v0, %s7229_s18  ;;  %v2837_v58 = vld [vmem:[#allocation2 + $0x171] sm:$0xff]  ;;  %v2836_v0 = vld [vmem:[#allocation2 + $0x169] sm:$0xff] }
 0x526   : > { %3722 = vrot.lane.b32.xlu0 %v2834_v30, %s7229_s18 }
 0x527   : > { %v10376_v1 = vpop.permute.xlu1 %3596 }
 0x528   : > { %12876 = vst [vmem:[#allocation9_spill] sm:$0xff] %v10376_v1  ;;  %v10378_v25 = vpop.permute.xlu0 %3594 }
 0x529   : > { %12877 = vst [vmem:[#allocation12_spill] sm:$0xff] %v10378_v25  ;;  %3852 = vrot.lane.b32.xlu1 %v2867_v57, %s7230_s24  ;;  %v2869_v25 = vld [vmem:[#allocation2 + $0x172] sm:$0xff]  ;;  %v2868_v57 = vld [vmem:[#allocation2 + $0x16a] sm:$0xff] }
 0x52a   : > { %3850 = vrot.lane.b32.xlu0 %v2866_v9, %s7230_s24 }
 0x52b   : > { %v10382_v16 = vpop.permute.xlu1 %3600 }
 0x52c   : > { %12878 = vst [vmem:[#allocation66_spill] sm:$0xff] %v10382_v16  ;;  %v10384_v49 = vpop.permute.xlu0 %3598 }
 0x52d   : > { %12879 = vst [vmem:[#allocation17_spill] sm:$0xff] %v10384_v49  ;;  %3728 = vrot.lane.b32.xlu1 %v2837_v58, %s7229_s18 }
 0x52e   : > { %3726 = vrot.lane.b32.xlu0 %v2836_v0, %s7229_s18 }
 0x52f   : > { %v10388_v30 = vpop.permute.xlu1 %3604 }
 0x530   : > { %12880 = vst [vmem:[#allocation22_spill] sm:$0xff] %v10388_v30  ;;  %v10390_v1 = vpop.permute.xlu0 %3602 }
 0x531   : > { %12881 = vst [vmem:[#allocation71_spill] sm:$0xff] %v10390_v1  ;;  %3856 = vrot.lane.b32.xlu1 %v2869_v25, %s7230_s24  ;;  %v2841_v25 = vld [vmem:[#allocation2 + $0x1a1] sm:$0xff] }
 0x532   : > { %3854 = vrot.lane.b32.xlu0 %v2868_v57, %s7230_s24  ;;  %v2586_v57 = vld [vmem:[#allocation2] sm:$0xff]  ;;  %v2587_v1 = vld [vmem:[#allocation2 + $0x8] sm:$0xff] }
 0x533   : > { %v10394_v9 = vpop.permute.xlu1 %3608 }
 0x534   : > { %12882 = vst [vmem:[#allocation73_spill] sm:$0xff] %v10394_v9  ;;  %v10396_v16 = vpop.permute.xlu0 %3606  ;;  %v2840_v9 = vld [vmem:[#allocation2 + $0x199] sm:$0xff] }
 0x535   : > { %12883 = vst [vmem:[#allocation8_spill] sm:$0xff] %v10396_v16  ;;  %3732 = vrot.lane.b32.xlu1 %v9933_v26, %s7229_s18  ;;  %v12884_v26 = vld [vmem:[#allocation7_spill] sm:$0xff] }
 0x536   : > { %3730 = vrot.lane.b32.xlu0 %v9937_v63, %s7229_s18  ;;  %v3898_v49 = vsel %vm326_vm0, %v2586_v57, %v12884_v26  ;;  %v2873_v63 = vld [vmem:[#allocation2 + $0x1a2] sm:$0xff]  ;;  %v12890_v26 = vld [vmem:[#allocation11_spill] sm:$0xff] }
 0x537   : > { %v3677_v58 = vpop.permute.xlu1 %3676 }
 0x538   : > { %v3675_v0 = vpop.permute.xlu0 %3674 }
 0x539   : > { %3860 = vrot.lane.b32.xlu1 %v10065_v22, %s7230_s24  ;;  %v3899_v22 = vsel %vm326_vm0, %v2587_v1, %v12885_v35  ;;  %v12888_v35 = vld [vmem:[#allocation67_spill] sm:$0xff]  ;;  %v12889_v1 = vld [vmem:[#allocation70_spill] sm:$0xff] }
 0x53a   : > { %3858 = vrot.lane.b32.xlu0 %v10069_v14, %s7230_s24  ;;  %v3930_v14 = vsel %vm1792_vm2, %v3898_v49, %v12886_v51  ;;  %v3931_v60 = vsel %vm1792_vm2, %v3899_v22, %v12887_v62  ;;  %v3900_v51 = vsel %vm326_vm0, %v12889_v1, %v12888_v35 }
 0x53b   : > { %v3681_v30 = vpop.permute.xlu1 %3680  ;;  %v3963_v57 = vsel %vm1825_vm3, %v3931_v60, %v9913_v33  ;;  %v12891_v33 = vld [vmem:[#allocation162_spill] sm:$0xff] }
 0x53c   : > { %v3679_v16 = vpop.permute.xlu0 %3678  ;;  %v3995_v49 = vsel %vm1858_vm4, %v3963_v57, %v10045_v59  ;;  %v12892_v59 = vld [vmem:[#allocation36_spill] sm:$0xff] }
 0x53d   : > { %3736 = vrot.lane.b32.xlu1 %v2841_v25, %s7229_s18  ;;  %v3962_v25 = vsel %vm1825_vm3, %v3930_v14, %v9915_v3  ;;  %v7178_v3 = vld [vmem:[#allocation2 + $0x20] sm:$0xff] }
 0x53e   : > { %3734 = vrot.lane.b32.xlu0 %v2840_v9, %s7229_s18  ;;  %v3994_v9 = vsel %vm1858_vm4, %v3962_v25, %v10047_v45  ;;  %v3901_v60 = vsel %vm326_vm0, %v7178_v3, %v12890_v26  ;;  %v3932_v45 = vsel %vm1792_vm2, %v3900_v51, %v12891_v33  ;;  %v7179_v51 = vld [vmem:[#allocation2 + $0x30] sm:$0xff]  ;;  %v12895_v3 = vld [vmem:[#allocation81_spill] sm:$0xff] }
 0x53f   : > { %v3685_v43 = vpop.permute.xlu1 %3684  ;;  %v4026_v62 = vsel %vm1891_vm5, %v3994_v9, %v10185_v37  ;;  %v3933_v25 = vsel %vm1792_vm2, %v3901_v60, %v12892_v59 }
 0x540   : > { %v3683_v13 = vpop.permute.xlu0 %3682  ;;  %v4058_v22 = vsel %vm1924_vm6, %v4026_v62, %v10306_v10  ;;  %v3965_v35 = vsel %vm1825_vm3, %v3933_v25, %v9921_v28  ;;  %v7180_v28 = vld [vmem:[#allocation2 + $0x38] sm:$0xff] }
 0x541   : > { %3864 = vrot.lane.b32.xlu1 %v2873_v63, %s7230_s24  ;;  %v4027_v63 = vsel %vm1891_vm5, %v3995_v49, %v10183_v19  ;;  %v4090_v57 = vsel %vm1957_vm7, %v4058_v22, %v3675_v0  ;;  %v12893_v49 = vld [vmem:[#allocation15_spill] sm:$0xff] }
 0x542   : > { %3862 = vrot.lane.b32.xlu0 %v2872_v61, %s7230_s24  ;;  %v3964_v61 = vsel %vm1825_vm3, %v3932_v45, %v9923_v52  ;;  %v4059_v37 = vsel %vm1924_vm6, %v4027_v63, %v10304_v38  ;;  %v3902_v52 = vsel %vm326_vm0, %v7179_v51, %v12893_v49  ;;  %v3997_v38 = vsel %vm1858_vm4, %v3965_v35, %v10053_v34  ;;  %v7181_v35 = vld [vmem:[#allocation2 + $0x48] sm:$0xff]  ;;  %s7232_s24 = smov 12  }
 0x543   : > { %v3805_v14 = vpop.permute.xlu1 %3804  ;;  %v3996_v19 = vsel %vm1858_vm4, %v3964_v61, %v10055_v8  ;;  %v4091_v10 = vsel %vm1957_vm7, %v4059_v37, %v3677_v58  ;;  %v12894_v8 = vld [vmem:[#allocation14_spill] sm:$0xff]  ;;  %v3934_v26 = vsel %vm1792_vm2, %v3902_v52, %v12895_v3  ;;  %v4029_v60 = vsel %vm1891_vm5, %v3997_v38, %v10197_v21 }
 0x544   : > { %v3803_v9 = vpop.permute.xlu0 %3802  ;;  %v4028_v0 = vsel %vm1891_vm5, %v3996_v19, %v10199_v2  ;;  %v4123_v62 = vsel %vm1990_vm8, %v4091_v10, %v3805_v14  ;;  %v3903_v58 = vsel %vm326_vm0, %v7180_v28, %v12894_v8  ;;  %v12896_v2 = vld [vmem:[#allocation34_spill] sm:$0xff]  ;;  %v3966_v63 = vsel %vm1825_vm3, %v3934_v26, %v9931_v27  ;;  %v12897_v19 = vld [vmem:[#allocation20_spill] sm:$0xff] }
 0x545   : > { %v4122_v1 = vsel %vm1990_vm8, %v4090_v57, %v3803_v9  ;;  %v4060_v34 = vsel %vm1924_vm6, %v4028_v0, %v10312_v5  ;;  %v3935_v45 = vsel %vm1792_vm2, %v3903_v58, %v12896_v2  ;;  %v4061_v22 = vsel %vm1924_vm6, %v4029_v60, %v10310_v50  ;;  %v7183_v60 = vld [vmem:[#allocation2 + $0x60] sm:$0xff] }
 0x546   : > { %6971 = vmatprep.mubr.msk.f32.mxu1 %vm2039_vm9, %v4122_v1  ;;  %v4092_v14 = vsel %vm1957_vm7, %v4060_v34, %v3679_v16  ;;  %v3967_v21 = vsel %vm1825_vm3, %v3935_v45, %v9929_v23  ;;  %v3998_v5 = vsel %vm1858_vm4, %v3966_v63, %v10063_v55  ;;  %v4093_v25 = vsel %vm1957_vm7, %v4061_v22, %v3681_v30  ;;  %v12898_v1 = vld [vmem:[#allocation18_spill] sm:$0xff]  ;;  %v12900_v34 = vld [vmem:[#allocation72_spill] sm:$0xff] }
 0x547   : > { %v3809_v33 = vpop.permute.xlu1 %3808  ;;  %6972 = vmatmul.mubr.msk.f32.vlgmr.msra.gmra.mrb[16].mxu1 %vm2039_vm9, %v4123_v62  ;;  %v3999_v37 = vsel %vm1858_vm4, %v3967_v21, %v10061_v4  ;;  %v4030_v27 = vsel %vm1891_vm5, %v3998_v5, %v10213_v20 }
 0x548   : > { %v3807_v59 = vpop.permute.xlu0 %3806  ;;  %v4125_v50 = vsel %vm1990_vm8, %v4093_v25, %v3809_v33  ;;  %v4031_v23 = vsel %vm1891_vm5, %v3999_v37, %v10211_v36  ;;  %v4062_v55 = vsel %vm1924_vm6, %v4030_v27, %v10318_v46  ;;  %v3904_v36 = vsel %vm326_vm0, %v7181_v35, %v12897_v19  ;;  %v7182_v46 = vld [vmem:[#allocation2 + $0x50] sm:$0xff]  ;;  %v12901_v33 = vld [vmem:[#allocation69_spill] sm:$0xff]  ;;  %v7185_v27 = vld [vmem:[#allocation2 + $0x78] sm:$0xff] }
 0x549   : > { %v4124_v61 = vsel %vm1990_vm8, %v4092_v14, %v3807_v59  ;;  %v4063_v30 = vsel %vm1924_vm6, %v4031_v23, %v10316_v41  ;;  %v4094_v4 = vsel %vm1957_vm7, %v4062_v55, %v3683_v13  ;;  %v3905_v51 = vsel %vm326_vm0, %v7182_v46, %v12898_v1  ;;  %v12903_v23 = vld [vmem:[#allocation24_spill] sm:$0xff]  ;;  %v12906_v35 = vld [vmem:[#allocation42_spill] sm:$0xff]  ;;  %v12908_v46 = vld [vmem:[#allocation107_spill] sm:$0xff] }
 0x54a   : > { %6974 = vmatprep.mubr.msk.f32.mxu1 %vm2039_vm9, %v4124_v61  ;;  %v4095_v20 = vsel %vm1957_vm7, %v4063_v30, %v3685_v43  ;;  %v3936_v13 = vsel %vm1792_vm2, %v3904_v36, %v9811_v12  ;;  %v12899_v43 = vld [vmem:[#allocation80_spill] sm:$0xff]  ;;  %v12904_v30 = vld [vmem:[#allocation102_spill] sm:$0xff]  ;;  %v12907_v36 = vld [vmem:[#allocation39_spill] sm:$0xff] }
 0x54b   : > { %v3813_v16 = vpop.permute.xlu1 %3812  ;;  %6975 = vmatmul.mubr.msk.f32.gmra.mrb[18].mxu1 %vm2039_vm9, %v4125_v50  ;;  %v3937_v49 = vsel %vm1792_vm2, %v3905_v51, %v12899_v43  ;;  %v3968_v52 = vsel %vm1825_vm3, %v3936_v13, %v9943_v18  ;;  %v12902_v50 = vld [vmem:[#allocation26_spill] sm:$0xff]  ;;  %v12910_v13 = vld [vmem:[#allocation125_spill] sm:$0xff]  ;;  %v12911_v43 = vld [vmem:[#allocation64_spill] sm:$0xff] }
 0x54c   : > { %v3811_v57 = vpop.permute.xlu0 %3810  ;;  %v4127_v10 = vsel %vm1990_vm8, %v4095_v20, %v3813_v16  ;;  %v3969_v0 = vsel %vm1825_vm3, %v3937_v49, %v9941_v53  ;;  %v4000_v62 = vsel %vm1858_vm4, %v3968_v52, %v10075_v15 }
 0x54d   : > { %v4126_v9 = vsel %vm1990_vm8, %v4094_v4, %v3811_v57  ;;  %v4001_v28 = vsel %vm1858_vm4, %v3969_v0, %v10073_v39  ;;  %v4032_v12 = vsel %vm1891_vm5, %v4000_v62, %v10225_v56  ;;  %v3906_v56 = vsel %vm326_vm0, %v7183_v60, %v12900_v34  ;;  %v12905_v57 = vld [vmem:[#allocation85_spill] sm:$0xff] }
 0x54e   : > { %6977 = vmatprep.mubr.msk.f32.mxu1 %vm2039_vm9, %v4126_v9  ;;  %v4033_v8 = vsel %vm1891_vm5, %v4001_v28, %v10223_v6  ;;  %v4064_v58 = vsel %vm1924_vm6, %v4032_v12, %v10324_v32  ;;  %v7184_v32 = vld [vmem:[#allocation2 + $0x68] sm:$0xff] }
 0x54f   : > { %v3689_v41 = vpop.permute.xlu1 %3688  ;;  %6978 = vmatmul.mubr.msk.f32.gmra.mrb[20].mxu1 %vm2039_vm9, %v4127_v10  ;;  %v4065_v3 = vsel %vm1924_vm6, %v4033_v8, %v10322_v54  ;;  %v3907_v2 = vsel %vm326_vm0, %v7184_v32, %v12901_v33  ;;  %v3938_v54 = vsel %vm1792_vm2, %v3906_v56, %v9819_v48  ;;  %v12915_v60 = vld [vmem:[#allocation101_spill] sm:$0xff]  ;;  %v12917_v33 = vld [vmem:[#allocation143_spill] sm:$0xff] }
 0x550   : > { %v3687_v38 = vpop.permute.xlu0 %3686  ;;  %v4097_v15 = vsel %vm1957_vm7, %v4065_v3, %v3689_v41  ;;  %v3939_v63 = vsel %vm1792_vm2, %v3907_v2, %v9817_v17  ;;  %v3970_v22 = vsel %vm1825_vm3, %v3938_v54, %v9951_v7 }
 0x551   : > { %v4096_v53 = vsel %vm1957_vm7, %v4064_v58, %v3687_v38  ;;  %v3971_v59 = vsel %vm1825_vm3, %v3939_v63, %v9949_v44  ;;  %v4002_v21 = vsel %vm1858_vm4, %v3970_v22, %v10083_v40  ;;  %v12912_v38 = vld [vmem:[#allocation174_spill] sm:$0xff]  ;;  %v12919_v22 = vld [vmem:[#allocation52_spill] sm:$0xff] }
 0x552   : > { %v4003_v5 = vsel %vm1858_vm4, %v3971_v59, %v10081_v24  ;;  %v4034_v48 = vsel %vm1891_vm5, %v4002_v21, %v10234_v29  ;;  %v3908_v29 = vsel %vm326_vm0, %v7185_v27, %v12902_v50  ;;  %v7187_v58 = vld [vmem:[#allocation2 + $0x90] sm:$0xff]  ;;  %v12920_v59 = vld [vmem:[#allocation168_spill] sm:$0xff] }
 0x553   : > { %v3817_v18 = vpop.permute.xlu1 %3816  ;;  %v4035_v25 = vsel %vm1891_vm5, %v4003_v5, %v10232_v42  ;;  %v4066_v17 = vsel %vm1924_vm6, %v4034_v48, %v10330_v11  ;;  %v7186_v11 = vld [vmem:[#allocation2 + $0x80] sm:$0xff] }
 0x554   : > { %v3815_v26 = vpop.permute.xlu0 %3814  ;;  %v4129_v6 = vsel %vm1990_vm8, %v4097_v15, %v3817_v18  ;;  %v4067_v61 = vsel %vm1924_vm6, %v4035_v25, %v10328_v31  ;;  %v3909_v55 = vsel %vm326_vm0, %v7186_v11, %v12903_v23  ;;  %v3940_v31 = vsel %vm1792_vm2, %v3908_v29, %v9827_v47  ;;  %v12909_v47 = vld [vmem:[#allocation149_spill] sm:$0xff]  ;;  %v12913_v18 = vld [vmem:[#allocation6_spill] sm:$0xff]  ;;  %v12914_v15 = vld [vmem:[#allocation155_spill] sm:$0xff] }
 0x555   : > { %v4128_v39 = vsel %vm1990_vm8, %v4096_v53, %v3815_v26  ;;  %v3941_v4 = vsel %vm1792_vm2, %v3909_v55, %v12904_v30  ;;  %v3972_v20 = vsel %vm1825_vm3, %v3940_v31, %v12905_v57  ;;  %v3910_v3 = vsel %vm326_vm0, %v7187_v58, %v12913_v18  ;;  %v7188_v26 = vld [vmem:[#allocation2 + $0x98] sm:$0xff]  ;;  %v12921_v5 = vld [vmem:[#allocation112_spill] sm:$0xff]  ;;  %v12922_v25 = vld [vmem:[#allocation90_spill] sm:$0xff] }
 0x556   : > { %6980 = vmatprep.mubr.msk.f32.mxu1 %vm2039_vm9, %v4128_v39  ;;  %v3973_v19 = vsel %vm1825_vm3, %v3941_v4, %v12906_v35  ;;  %v4004_v10 = vsel %vm1858_vm4, %v3972_v20, %v12907_v36  ;;  %v3911_v39 = vsel %vm326_vm0, %v7188_v26, %v12914_v15  ;;  %v3942_v34 = vsel %vm1792_vm2, %v3910_v3, %v12915_v60  ;;  %v12925_v11 = vld [vmem:[#allocation55_spill] sm:$0xff]  ;;  %v7190_v31 = vld [vmem:[#allocation2 + $0xb0] sm:$0xff]  ;;  %v12927_v4 = vld [vmem:[#allocation40_spill] sm:$0xff] }
 0x557   : > { %v3693_v45 = vpop.permute.xlu1 %3692  ;;  %6981 = vmatmul.mubr.msk.f32.gmra.mrb[22].mxu1 %vm2039_vm9, %v4129_v6  ;;  %v4005_v1 = vsel %vm1858_vm4, %v3973_v19, %v12908_v46  ;;  %v4036_v51 = vsel %vm1891_vm5, %v4004_v10, %v12909_v47  ;;  %v12916_v6 = vld [vmem:[#allocation163_spill] sm:$0xff]  ;;  %v3974_v2 = vsel %vm1825_vm3, %v3942_v34, %v12917_v33  ;;  %v12929_v19 = vld [vmem:[#allocation106_spill] sm:$0xff]  ;;  %v12930_v46 = vld [vmem:[#allocation84_spill] sm:$0xff] }
 0x558   : > { %v3691_v14 = vpop.permute.xlu0 %3690  ;;  %v4099_v40 = vsel %vm1957_vm7, %v4067_v61, %v3693_v45  ;;  %v4037_v41 = vsel %vm1891_vm5, %v4005_v1, %v12910_v13  ;;  %v4068_v49 = vsel %vm1924_vm6, %v4036_v51, %v12911_v43  ;;  %v3943_v32 = vsel %vm1792_vm2, %v3911_v39, %v12916_v6  ;;  %v12918_v45 = vld [vmem:[#allocation119_spill] sm:$0xff]  ;;  %v12931_v47 = vld [vmem:[#allocation124_spill] sm:$0xff]  ;;  %v12932_v13 = vld [vmem:[#allocation37_spill] sm:$0xff] }
 0x559   : > { %v4098_v44 = vsel %vm1957_vm7, %v4066_v17, %v3691_v14  ;;  %v4069_v0 = vsel %vm1924_vm6, %v4037_v41, %v12912_v38  ;;  %v3975_v63 = vsel %vm1825_vm3, %v3943_v32, %v12918_v45  ;;  %v4006_v14 = vsel %vm1858_vm4, %v3974_v2, %v12919_v22  ;;  %v12933_v43 = vld [vmem:[#allocation173_spill] sm:$0xff]  ;;  %v7191_v26 = vld [vmem:[#allocation2 + $0xc0] sm:$0xff]  ;;  %v12939_v32 = vld [vmem:[#allocation118_spill] sm:$0xff] }
 0x55a   : > { %v4007_v21 = vsel %vm1858_vm4, %v3975_v63, %v12920_v59  ;;  %v4038_v48 = vsel %vm1891_vm5, %v4006_v14, %v12921_v5  ;;  %v12937_v15 = vld [vmem:[#allocation132_spill] sm:$0xff]  ;;  %v7192_v34 = vld [vmem:[#allocation2 + $0xc8] sm:$0xff]  ;;  %v12941_v63 = vld [vmem:[#allocation167_spill] sm:$0xff] }
 0x55b   : > { %v3821_v7 = vpop.permute.xlu1 %3820  ;;  %v4039_v17 = vsel %vm1891_vm5, %v4007_v21, %v12922_v25  ;;  %v3914_v39 = vsel %vm326_vm0, %v7191_v26, %v12937_v15  ;;  %v12942_v59 = vld [vmem:[#allocation142_spill] sm:$0xff]  ;;  %v12943_v5 = vld [vmem:[#allocation89_spill] sm:$0xff] }
 0x55c   : > { %v3819_v37 = vpop.permute.xlu0 %3818  ;;  %v4131_v42 = vsel %vm1990_vm8, %v4099_v40, %v3821_v7  ;;  %v12923_v7 = vld [vmem:[#allocation130_spill] sm:$0xff]  ;;  %v3946_v33 = vsel %vm1792_vm2, %v3914_v39, %v12939_v32 }
 0x55d   : > { %v4130_v24 = vsel %vm1990_vm8, %v4098_v44, %v3819_v37  ;;  %v4070_v61 = vsel %vm1924_vm6, %v4038_v48, %v12923_v7  ;;  %v12924_v37 = vld [vmem:[#allocation49_spill] sm:$0xff]  ;;  %v3978_v22 = vsel %vm1825_vm3, %v3946_v33, %v12941_v63  ;;  %v12944_v25 = vld [vmem:[#allocation50_spill] sm:$0xff]  ;;  %v12945_v7 = vld [vmem:[#allocation47_spill] sm:$0xff] }
 0x55e   : > { %6983 = vmatprep.mubr.msk.f32.mxu1 %vm2039_vm9, %v4130_v24  ;;  %v4071_v40 = vsel %vm1924_vm6, %v4039_v17, %v12924_v37  ;;  %v4010_v48 = vsel %vm1858_vm4, %v3978_v22, %v12943_v5  ;;  %v7196_v33 = vld [vmem:[#allocation2 + $0xf8] sm:$0xff] }
 0x55f   : > { %v3697_v16 = vpop.permute.xlu1 %3696  ;;  %6984 = vmatmul.mubr.msk.f32.gmra.mrb[24].mxu1 %vm2039_vm9, %v4131_v42  ;;  %v7189_v42 = vld [vmem:[#allocation2 + $0xa8] sm:$0xff] }
 0x560   : > { %v3695_v9 = vpop.permute.xlu0 %3694  ;;  %v4101_v12 = vsel %vm1957_vm7, %v4069_v0, %v3697_v16  ;;  %v3912_v23 = vsel %vm326_vm0, %v7189_v42, %v12925_v11  ;;  %v12926_v16 = vld [vmem:[#allocation30_spill] sm:$0xff]  ;;  %v12935_v0 = vld [vmem:[#allocation129_spill] sm:$0xff] }
 0x561   : > { %v4100_v62 = vsel %vm1957_vm7, %v4068_v49, %v3695_v9  ;;  %v3913_v30 = vsel %vm326_vm0, %v7190_v31, %v12926_v16  ;;  %v3944_v57 = vsel %vm1792_vm2, %v3912_v23, %v12927_v4  ;;  %v12928_v9 = vld [vmem:[#allocation27_spill] sm:$0xff]  ;;  %v12949_v16 = vld [vmem:[#allocation156_spill] sm:$0xff] }
 0x562   : > { %v3945_v35 = vsel %vm1792_vm2, %v3913_v30, %v12928_v9  ;;  %v3976_v36 = vsel %vm1825_vm3, %v3944_v57, %v12929_v19  ;;  %v7193_v31 = vld [vmem:[#allocation2 + $0xd8] sm:$0xff]  ;;  %v7194_v57 = vld [vmem:[#allocation2 + $0xe0] sm:$0xff] }
 0x563   : > { %v3825_v52 = vpop.permute.xlu1 %3824  ;;  %v3977_v1 = vsel %vm1825_vm3, %v3945_v35, %v12930_v46  ;;  %v4008_v51 = vsel %vm1858_vm4, %v3976_v36, %v12931_v47  ;;  %v3916_v30 = vsel %vm326_vm0, %v7193_v31, %v12949_v16  ;;  %v12951_v35 = vld [vmem:[#allocation83_spill] sm:$0xff] }
 0x564   : > { %v3823_v28 = vpop.permute.xlu0 %3822  ;;  %v4133_v53 = vsel %vm1990_vm8, %v4101_v12, %v3825_v52  ;;  %v4009_v41 = vsel %vm1858_vm4, %v3977_v1, %v12932_v13  ;;  %v4040_v49 = vsel %vm1891_vm5, %v4008_v51, %v12933_v43  ;;  %v12934_v52 = vld [vmem:[#allocation148_spill] sm:$0xff]  ;;  %v12936_v12 = vld [vmem:[#allocation94_spill] sm:$0xff]  ;;  %v3948_v19 = vsel %vm1792_vm2, %v3916_v30, %v12951_v35  ;;  %v12953_v1 = vld [vmem:[#allocation35_spill] sm:$0xff] }
 0x565   : > { %v4132_v8 = vsel %vm1990_vm8, %v4100_v62, %v3823_v28  ;;  %v4041_v38 = vsel %vm1891_vm5, %v4009_v41, %v12934_v52  ;;  %v4072_v62 = vsel %vm1924_vm6, %v4040_v49, %v12935_v0  ;;  %v3980_v47 = vsel %vm1825_vm3, %v3948_v19, %v12953_v1  ;;  %v12954_v13 = vld [vmem:[#allocation105_spill] sm:$0xff]  ;;  %v12955_v43 = vld [vmem:[#allocation147_spill] sm:$0xff]  ;;  %v12957_v0 = vld [vmem:[#allocation60_spill] sm:$0xff] }
 0x566   : > { %6986 = vmatprep.mubr.msk.f32.mxu1 %vm2039_vm9, %v4132_v8  ;;  %v4073_v8 = vsel %vm1924_vm6, %v4041_v38, %v12936_v12  ;;  %v4012_v49 = vsel %vm1858_vm4, %v3980_v47, %v12955_v43  ;;  %v12956_v52 = vld [vmem:[#allocation123_spill] sm:$0xff]  ;;  %v7198_v19 = vld [vmem:[#allocation2 + $0x110] sm:$0xff] }
 0x567   : > { %v3701_v56 = vpop.permute.xlu1 %3700  ;;  %6987 = vmatmul.mubr.msk.f32.gmra.mrb[26].mxu1 %vm2039_vm9, %v4133_v53 }
 0x568   : > { %v3699_v54 = vpop.permute.xlu0 %3698  ;;  %v4103_v50 = vsel %vm1957_vm7, %v4071_v40, %v3701_v56  ;;  %v12938_v56 = vld [vmem:[#allocation74_spill] sm:$0xff]  ;;  %v12947_v40 = vld [vmem:[#allocation115_spill] sm:$0xff] }
 0x569   : > { %v4102_v24 = vsel %vm1957_vm7, %v4070_v61, %v3699_v54  ;;  %v3915_v6 = vsel %vm326_vm0, %v7192_v34, %v12938_v56  ;;  %v12940_v54 = vld [vmem:[#allocation25_spill] sm:$0xff]  ;;  %v4042_v61 = vsel %vm1891_vm5, %v4010_v48, %v12945_v7  ;;  %v7195_v34 = vld [vmem:[#allocation2 + $0xf0] sm:$0xff]  ;;  %v12961_v56 = vld [vmem:[#allocation76_spill] sm:$0xff] }
 0x56a   : > { %v3947_v45 = vsel %vm1792_vm2, %v3915_v6, %v12940_v54  ;;  %v3918_v6 = vsel %vm326_vm0, %v7195_v34, %v12961_v56  ;;  %v12967_v7 = vld [vmem:[#allocation110_spill] sm:$0xff] }
 0x56b   : > { %v3829_v44 = vpop.permute.xlu1 %3828  ;;  %v3979_v21 = vsel %vm1825_vm3, %v3947_v45, %v12942_v59  ;;  %v12963_v45 = vld [vmem:[#allocation141_spill] sm:$0xff] }
 0x56c   : > { %v3827_v27 = vpop.permute.xlu0 %3826  ;;  %v4135_v55 = vsel %vm1990_vm8, %v4103_v50, %v3829_v44  ;;  %v4011_v17 = vsel %vm1858_vm4, %v3979_v21, %v12944_v25  ;;  %v12946_v44 = vld [vmem:[#allocation111_spill] sm:$0xff]  ;;  %v12948_v50 = vld [vmem:[#allocation153_spill] sm:$0xff]  ;;  %v3950_v63 = vsel %vm1792_vm2, %v3918_v6, %v12963_v45  ;;  %v12965_v21 = vld [vmem:[#allocation48_spill] sm:$0xff] }
 0x56d   : > { %v4134_v29 = vsel %vm1990_vm8, %v4102_v24, %v3827_v27  ;;  %v4043_v37 = vsel %vm1891_vm5, %v4011_v17, %v12946_v44  ;;  %v4074_v24 = vsel %vm1924_vm6, %v4042_v61, %v12947_v40  ;;  %v3982_v5 = vsel %vm1825_vm3, %v3950_v63, %v12965_v21  ;;  %v12966_v25 = vld [vmem:[#allocation166_spill] sm:$0xff]  ;;  %v12968_v44 = vld [vmem:[#allocation88_spill] sm:$0xff]  ;;  %v7200_v63 = vld [vmem:[#allocation2 + $0x128] sm:$0xff] }
 0x56e   : > { %6989 = vmatprep.mubr.msk.f32.mxu1 %vm2039_vm9, %v4134_v29  ;;  %v4075_v29 = vsel %vm1924_vm6, %v4043_v37, %v12948_v50  ;;  %v4014_v61 = vsel %vm1858_vm4, %v3982_v5, %v12967_v7  ;;  %v12969_v40 = vld [vmem:[#allocation128_spill] sm:$0xff] }
 0x56f   : > { %v3705_v20 = vpop.permute.xlu1 %3704  ;;  %6990 = vmatmul.mubr.msk.f32.gmra.mrb[28].mxu1 %vm2039_vm9, %v4135_v55 }
 0x570   : > { %v3703_v10 = vpop.permute.xlu0 %3702  ;;  %v4105_v3 = vsel %vm1957_vm7, %v4073_v8, %v3705_v20  ;;  %v12950_v20 = vld [vmem:[#allocation95_spill] sm:$0xff] }
 0x571   : > { %v4104_v58 = vsel %vm1957_vm7, %v4072_v62, %v3703_v10  ;;  %v3917_v9 = vsel %vm326_vm0, %v7194_v57, %v12950_v20  ;;  %v12952_v10 = vld [vmem:[#allocation38_spill] sm:$0xff]  ;;  %v4044_v62 = vsel %vm1891_vm5, %v4012_v49, %v12957_v0  ;;  %v12959_v8 = vld [vmem:[#allocation175_spill] sm:$0xff]  ;;  %v7197_v57 = vld [vmem:[#allocation2 + $0x108] sm:$0xff] }
 0x572   : > { %v3949_v46 = vsel %vm1792_vm2, %v3917_v9, %v12952_v10  ;;  %v12973_v20 = vld [vmem:[#allocation78_spill] sm:$0xff]  ;;  %v12979_v0 = vld [vmem:[#allocation171_spill] sm:$0xff] }
 0x573   : > { %v3833_v28 = vpop.permute.xlu1 %3832  ;;  %v3981_v41 = vsel %vm1825_vm3, %v3949_v46, %v12954_v13  ;;  %v3920_v9 = vsel %vm326_vm0, %v7197_v57, %v12973_v20  ;;  %v12975_v46 = vld [vmem:[#allocation104_spill] sm:$0xff] }
 0x574   : > { %v3831_v18 = vpop.permute.xlu0 %3830  ;;  %v4137_v60 = vsel %vm1990_vm8, %v4105_v3, %v3833_v28  ;;  %v4013_v38 = vsel %vm1858_vm4, %v3981_v41, %v12956_v52  ;;  %v12958_v28 = vld [vmem:[#allocation172_spill] sm:$0xff]  ;;  %v3952_v1 = vsel %vm1792_vm2, %v3920_v9, %v12975_v46  ;;  %v12977_v41 = vld [vmem:[#allocation122_spill] sm:$0xff]  ;;  %v12978_v52 = vld [vmem:[#allocation33_spill] sm:$0xff] }
 0x575   : > { %v4136_v53 = vsel %vm1990_vm8, %v4104_v58, %v3831_v18  ;;  %v4045_v12 = vsel %vm1891_vm5, %v4013_v38, %v12958_v28  ;;  %v4076_v58 = vsel %vm1924_vm6, %v4044_v62, %v12959_v8  ;;  %v12960_v3 = vld [vmem:[#allocation152_spill] sm:$0xff]  ;;  %v3984_v43 = vsel %vm1825_vm3, %v3952_v1, %v12977_v41  ;;  %v12980_v28 = vld [vmem:[#allocation146_spill] sm:$0xff]  ;;  %v12981_v8 = vld [vmem:[#allocation93_spill] sm:$0xff] }
 0x576   : > { %6992 = vmatprep.mubr.msk.f32.mxu1 %vm2039_vm9, %v4136_v53  ;;  %v4077_v53 = vsel %vm1924_vm6, %v4045_v12, %v12960_v3  ;;  %v4016_v62 = vsel %vm1858_vm4, %v3984_v43, %v12979_v0  ;;  %v13000_v41 = vld [vmem:[#allocation31_spill] sm:$0xff]  ;;  %v13002_v0 = vld [vmem:[#allocation145_spill] sm:$0xff] }
 0x577   : > { %v3709_v2 = vpop.permute.xlu1 %3708  ;;  %6993 = vmatmul.mubr.msk.f32.gmra.mrb[30].mxu1 %vm2039_vm9, %v4137_v60 }
 0x578   : > { %v3707_v14 = vpop.permute.xlu0 %3706  ;;  %v4107_v23 = vsel %vm1957_vm7, %v4075_v29, %v3709_v2  ;;  %v12962_v2 = vld [vmem:[#allocation10_spill] sm:$0xff] }
 0x579   : > { %v4106_v42 = vsel %vm1957_vm7, %v4074_v24, %v3707_v14  ;;  %v3919_v54 = vsel %vm326_vm0, %v7196_v33, %v12962_v2  ;;  %v12964_v14 = vld [vmem:[#allocation117_spill] sm:$0xff]  ;;  %v4046_v24 = vsel %vm1891_vm5, %v4014_v61, %v12969_v40  ;;  %v12971_v29 = vld [vmem:[#allocation62_spill] sm:$0xff]  ;;  %v7199_v33 = vld [vmem:[#allocation2 + $0x120] sm:$0xff] }
 0x57a   : > { %v3951_v59 = vsel %vm1792_vm2, %v3919_v54, %v12964_v14  ;;  %v12985_v2 = vld [vmem:[#allocation97_spill] sm:$0xff]  ;;  %v12991_v40 = vld [vmem:[#allocation43_spill] sm:$0xff] }
 0x57b   : > { %v3837_v27 = vpop.permute.xlu1 %3836  ;;  %v3983_v17 = vsel %vm1825_vm3, %v3951_v59, %v12966_v25  ;;  %v3922_v54 = vsel %vm326_vm0, %v7199_v33, %v12985_v2  ;;  %v12987_v59 = vld [vmem:[#allocation165_spill] sm:$0xff] }
 0x57c   : > { %v3835_v11 = vpop.permute.xlu0 %3834  ;;  %v4139_v4 = vsel %vm1990_vm8, %v4107_v23, %v3837_v27  ;;  %v4015_v37 = vsel %vm1858_vm4, %v3983_v17, %v12968_v44  ;;  %v12970_v27 = vld [vmem:[#allocation45_spill] sm:$0xff]  ;;  %v3954_v21 = vsel %vm1792_vm2, %v3922_v54, %v12987_v59  ;;  %v12989_v17 = vld [vmem:[#allocation87_spill] sm:$0xff]  ;;  %v12990_v44 = vld [vmem:[#allocation46_spill] sm:$0xff] }
 0x57d   : > { %v4138_v55 = vsel %vm1990_vm8, %v4106_v42, %v3835_v11  ;;  %v4047_v50 = vsel %vm1891_vm5, %v4015_v37, %v12970_v27  ;;  %v4078_v42 = vsel %vm1924_vm6, %v4046_v24, %v12971_v29  ;;  %v12972_v23 = vld [vmem:[#allocation53_spill] sm:$0xff]  ;;  %v3986_v7 = vsel %vm1825_vm3, %v3954_v21, %v12989_v17  ;;  %v12993_v29 = vld [vmem:[#allocation151_spill] sm:$0xff]  ;;  %v7203_v59 = vld [vmem:[#allocation2 + $0x150] sm:$0xff] }
 0x57e   : > { %6995 = vmatprep.mubr.msk.f32.mxu1 %vm2039_vm9, %v4138_v55  ;;  %v4079_v55 = vsel %vm1924_vm6, %v4047_v50, %v12972_v23  ;;  %v4018_v24 = vsel %vm1858_vm4, %v3986_v7, %v12991_v40  ;;  %v12992_v27 = vld [vmem:[#allocation109_spill] sm:$0xff]  ;;  %v13010_v21 = vld [vmem:[#allocation63_spill] sm:$0xff]  ;;  %v13013_v40 = vld [vmem:[#allocation164_spill] sm:$0xff] }
 0x57f   : > { %v3713_v36 = vpop.permute.xlu1 %3712  ;;  %6996 = vmatmul.mubr.msk.f32.gmra.mrb[32].mxu1 %vm2039_vm9, %v4139_v4  ;;  %v13011_v17 = vld [vmem:[#allocation79_spill] sm:$0xff] }
 0x580   : > { %v3711_v51 = vpop.permute.xlu0 %3710  ;;  %v4109_v39 = vsel %vm1957_vm7, %v4077_v53, %v3713_v36  ;;  %v12974_v36 = vld [vmem:[#allocation59_spill] sm:$0xff]  ;;  %v12983_v53 = vld [vmem:[#allocation154_spill] sm:$0xff] }
 0x581   : > { %v4108_v26 = vsel %vm1957_vm7, %v4076_v58, %v3711_v51  ;;  %v3921_v10 = vsel %vm326_vm0, %v7198_v19, %v12974_v36  ;;  %v12976_v51 = vld [vmem:[#allocation82_spill] sm:$0xff]  ;;  %v4048_v58 = vsel %vm1891_vm5, %v4016_v62, %v12981_v8  ;;  %v12997_v19 = vmov 0.0   ;;  %v7201_v36 = vld [vmem:[#allocation2 + $0x138] sm:$0xff] }
 0x582   : > { %v3953_v13 = vsel %vm1792_vm2, %v3921_v10, %v12976_v51  ;;  %4529 = vst.msk [vmem:[#allocation3 + $0x28] sm:$0x3] %vm4525_vm11, %v12997_v19  ;;  %4526 = vst.msk [vmem:[#allocation3 + $0x10] sm:$0x3] %vm4525_vm11, %v12997_v19  ;;  %v12998_v10 = vld [vmem:[#allocation16_spill] sm:$0xff]  ;;  %v12999_v51 = vld [vmem:[#allocation158_spill] sm:$0xff] }
 0x583   : > { %v3841_v18 = vpop.permute.xlu1 %3840  ;;  %v3985_v38 = vsel %vm1825_vm3, %v3953_v13, %v12978_v52  ;;  %4532 = vst.msk [vmem:[#allocation3 + $0x40] sm:$0x3] %vm4525_vm11, %v12997_v19  ;;  %4535 = vst.msk [vmem:[#allocation3 + $0x58] sm:$0x3] %vm4525_vm11, %v12997_v19  ;;  %v3924_v46 = vsel %vm326_vm0, %v7201_v36, %v12998_v10  ;;  %v13001_v52 = vld [vmem:[#allocation103_spill] sm:$0xff]  ;;  %v13021_v36 = vld [vmem:[#allocation22_spill] sm:$0xff] }
 0x584   : > { %v3839_v15 = vpop.permute.xlu0 %3838  ;;  %v4141_v32 = vsel %vm1990_vm8, %v4109_v39, %v3841_v18  ;;  %v4017_v12 = vsel %vm1858_vm4, %v3985_v38, %v12980_v28  ;;  %v12982_v18 = vld [vmem:[#allocation58_spill] sm:$0xff]  ;;  %v12984_v39 = vld [vmem:[#allocation131_spill] sm:$0xff]  ;;  %4538 = vst.msk [vmem:[#allocation3 + $0x70] sm:$0x3] %vm4525_vm11, %v12997_v19  ;;  %4541 = vst.msk [vmem:[#allocation3 + $0x88] sm:$0x3] %vm4525_vm11, %v12997_v19  ;;  %v3956_v43 = vsel %vm1792_vm2, %v3924_v46, %v13000_v41 }
 0x585   : > { %v4140_v60 = vsel %vm1990_vm8, %v4108_v26, %v3839_v15  ;;  %v4049_v3 = vsel %vm1891_vm5, %v4017_v12, %v12982_v18  ;;  %v4080_v26 = vsel %vm1924_vm6, %v4048_v58, %v12983_v53  ;;  %4544 = vst.msk [vmem:[#allocation3 + $0xa0] sm:$0x3] %vm4525_vm11, %v12997_v19  ;;  %4547 = vst.msk [vmem:[#allocation3 + $0xb8] sm:$0x3] %vm4525_vm11, %v12997_v19  ;;  %v13003_v12 = vld [vmem:[#allocation121_spill] sm:$0xff]  ;;  %v13004_v58 = vld [vmem:[#allocation56_spill] sm:$0xff] }
 0x586   : > { %6998 = vmatprep.mubr.msk.f32.mxu1 %vm2039_vm9, %v4140_v60  ;;  %v4081_v60 = vsel %vm1924_vm6, %v4049_v3, %v12984_v39  ;;  %4550 = vst.msk [vmem:[#allocation3 + $0xd0] sm:$0x3] %vm4525_vm11, %v12997_v19  ;;  %4553 = vst.msk [vmem:[#allocation3 + $0xe8] sm:$0x3] %vm4525_vm11, %v12997_v19  ;;  %v3988_v62 = vsel %vm1825_vm3, %v3956_v43, %v13002_v0  ;;  %v13005_v3 = vld [vmem:[#allocation170_spill] sm:$0xff]  ;;  %v13007_v39 = vld [vmem:[#allocation92_spill] sm:$0xff] }
 0x587   : > { %v3717_v22 = vpop.permute.xlu1 %3716  ;;  %6999 = vmatmul.mubr.msk.f32.gmra.mrb[34].mxu1 %vm2039_vm9, %v4141_v32  ;;  %4556 = vst.msk [vmem:[#allocation3 + $0x100] sm:$0x3] %vm4525_vm11, %v12997_v19  ;;  %4559 = vst.msk [vmem:[#allocation3 + $0x118] sm:$0x3] %vm4525_vm11, %v12997_v19  ;;  %v4020_v18 = vsel %vm1858_vm4, %v3988_v62, %v13004_v58  ;;  %v13022_v41 = vld [vmem:[#allocation136_spill] sm:$0xff] }
 0x588   : > { %v3715_v48 = vpop.permute.xlu0 %3714  ;;  %v4111_v30 = vsel %vm1957_vm7, %v4079_v55, %v3717_v22  ;;  %v12986_v22 = vld [vmem:[#allocation134_spill] sm:$0xff]  ;;  %v12995_v55 = vld [vmem:[#allocation12_spill] sm:$0xff]  ;;  %4562 = vst.msk [vmem:[#allocation3 + $0x130] sm:$0x3] %vm4525_vm11, %v12997_v19  ;;  %4565 = vst.msk [vmem:[#allocation3 + $0x148] sm:$0x3] %vm4525_vm11, %v12997_v19 }
 0x589   : > { %v4110_v31 = vsel %vm1957_vm7, %v4078_v42, %v3715_v48  ;;  %v3923_v14 = vsel %vm326_vm0, %v7200_v63, %v12986_v22  ;;  %v12988_v48 = vld [vmem:[#allocation140_spill] sm:$0xff]  ;;  %v4050_v42 = vsel %vm1891_vm5, %v4018_v24, %v12993_v29  ;;  %4568 = vst.msk [vmem:[#allocation3 + $0x160] sm:$0x3] %vm4525_vm11, %v12997_v19  ;;  %4571 = vst.msk [vmem:[#allocation3 + $0x178] sm:$0x3] %vm4525_vm11, %v12997_v19 }
 0x58a   : > { %v3955_v25 = vsel %vm1792_vm2, %v3923_v14, %v12988_v48  ;;  %4574 = vst.msk [vmem:[#allocation3 + $0x190] sm:$0x3] %vm4525_vm11, %v12997_v19  ;;  %4577 = vst.msk [vmem:[#allocation3 + $0x1a8] sm:$0x3] %vm4525_vm11, %v12997_v19  ;;  %v4643_v14 = vld [vmem:[#allocation3 + $0x1] sm:$0xff]  ;;  %v13024_v62 = vld [vmem:[#allocation120_spill] sm:$0xff] }
 0x58b   : > { %v3845_v11 = vpop.permute.xlu1 %3844  ;;  %v3987_v37 = vsel %vm1825_vm3, %v3955_v25, %v12990_v44  ;;  %4932 = vrot.lane.b32.xlu0 %v4643_v14, %s7231_s29  ;;  %v7204_v25 = vld [vmem:[#allocation2 + $0x158] sm:$0xff] }
 0x58c   : > { %v3843_v16 = vpop.permute.xlu0 %3842  ;;  %v4143_v35 = vsel %vm1990_vm8, %v4111_v30, %v3845_v11  ;;  %v4019_v50 = vsel %vm1858_vm4, %v3987_v37, %v12992_v27  ;;  %v12994_v11 = vld [vmem:[#allocation127_spill] sm:$0xff]  ;;  %v12996_v30 = vld [vmem:[#allocation9_spill] sm:$0xff]  ;;  %v3927_v7 = vsel %vm326_vm0, %v7204_v25, %v13011_v17  ;;  %v13014_v27 = vld [vmem:[#allocation108_spill] sm:$0xff] }
 0x58d   : > { %v4142_v4 = vsel %vm1990_vm8, %v4110_v31, %v3843_v16  ;;  %v4051_v23 = vsel %vm1891_vm5, %v4019_v50, %v12994_v11  ;;  %v4082_v31 = vsel %vm1924_vm6, %v4050_v42, %v12995_v55  ;;  %v3959_v24 = vsel %vm1792_vm2, %v3927_v7, %v13013_v40  ;;  %v13015_v42 = vld [vmem:[#allocation86_spill] sm:$0xff]  ;;  %v10932_v17 = vld [vmem:[%s12189_s5] ss:$0 sm:$0xff] }
 0x58e   : > { %7001 = vmatprep.mubr.msk.f32.mxu1 %vm2039_vm9, %v4142_v4  ;;  %v4083_v4 = vsel %vm1924_vm6, %v4051_v23, %v12996_v30  ;;  %v3991_v11 = vsel %vm1825_vm3, %v3959_v24, %v13015_v42  ;;  %v13016_v23 = vld [vmem:[#allocation126_spill] sm:$0xff]  ;;  %v13018_v30 = vld [vmem:[#allocation4_spill] sm:$0xff] }
 0x58f   : > { %v3721_v47 = vpop.permute.xlu1 %3720  ;;  %7002 = vmatmul.mubr.msk.f32.gmra.mrb[36].mxu1 %vm2039_vm9, %v4143_v35 }
 0x590   : > { %v3719_v49 = vpop.permute.xlu0 %3718  ;;  %v4113_v6 = vsel %vm1957_vm7, %v4081_v60, %v3721_v47  ;;  %v7202_v47 = vld [vmem:[#allocation2 + $0x140] sm:$0xff] }
 0x591   : > { %v4112_v34 = vsel %vm1957_vm7, %v4080_v26, %v3719_v49  ;;  %v3925_v13 = vsel %vm326_vm0, %v7202_v47, %v12999_v51  ;;  %v13006_v26 = vld [vmem:[#allocation114_spill] sm:$0xff] }
 0x592   : > { %v3957_v38 = vsel %vm1792_vm2, %v3925_v13, %v13001_v52  ;;  %v7205_v13 = vld [vmem:[#allocation2 + $0x168] sm:$0xff]  ;;  %v7206_v52 = vld [vmem:[#allocation2 + $0x170] sm:$0xff] }
 0x593   : > { %v3849_v15 = vpop.permute.xlu1 %3848  ;;  %v3989_v8 = vsel %vm1825_vm3, %v3957_v38, %v13003_v12  ;;  %v3928_v43 = vsel %vm326_vm0, %v7205_v13, %v13022_v41  ;;  %v13023_v38 = vld [vmem:[#allocation100_spill] sm:$0xff] }
 0x594   : > { %v3847_v56 = vpop.permute.xlu0 %3846  ;;  %v4145_v45 = vsel %vm1990_vm8, %v4113_v6, %v3849_v15  ;;  %v4021_v53 = vsel %vm1858_vm4, %v3989_v8, %v13005_v3  ;;  %v4052_v15 = vsel %vm1891_vm5, %v4020_v18, %v13006_v26  ;;  %v3929_v0 = vsel %vm326_vm0, %v7206_v52, %v13023_v38  ;;  %v13025_v8 = vld [vmem:[#allocation29_spill] sm:$0xff]  ;;  %v13027_v26 = vld [vmem:[#allocation144_spill] sm:$0xff] }
 0x595   : > { %v4144_v32 = vsel %vm1990_vm8, %v4112_v34, %v3847_v56  ;;  %v4053_v60 = vsel %vm1891_vm5, %v4021_v53, %v13007_v39  ;;  %v13008_v34 = vld [vmem:[#allocation17_spill] sm:$0xff]  ;;  %v3961_v58 = vsel %vm1792_vm2, %v3929_v0, %v13025_v8  ;;  %v13028_v39 = vld [vmem:[#allocation91_spill] sm:$0xff] }
 0x596   : > { %7004 = vmatprep.mubr.msk.f32.mxu1 %vm2039_vm9, %v4144_v32  ;;  %v4084_v56 = vsel %vm1924_vm6, %v4052_v15, %v13008_v34  ;;  %v13009_v32 = vld [vmem:[#allocation66_spill] sm:$0xff]  ;;  %v13026_v18 = vld [vmem:[#allocation169_spill] sm:$0xff]  ;;  %v3993_v15 = vsel %vm1825_vm3, %v3961_v58, %v13027_v26 }
 0x597   : > { %v3725_v5 = vpop.permute.xlu1 %3724  ;;  %7005 = vmatmul.mubr.msk.f32.gmra.mrb[38].mxu1 %vm2039_vm9, %v4145_v45  ;;  %v4085_v33 = vsel %vm1924_vm6, %v4053_v60, %v13009_v32  ;;  %v4644_v45 = vld [vmem:[#allocation3 + $0x9] sm:$0xff]  ;;  %v13029_v34 = vld [vmem:[#allocation54_spill] sm:$0xff] }
 0x598   : > { %v3723_v61 = vpop.permute.xlu0 %3722  ;;  %v4115_v9 = vsel %vm1957_vm7, %v4083_v4, %v3725_v5  ;;  %4934 = vrot.lane.b32.xlu1 %v4644_v45, %s7231_s29  ;;  %v3926_v5 = vsel %vm326_vm0, %v7203_v59, %v13010_v21 }
 0x599   : > { %v4114_v57 = vsel %vm1957_vm7, %v4082_v31, %v3723_v61  ;;  %v13012_v61 = vld [vmem:[#allocation44_spill] sm:$0xff]  ;;  %v13017_v31 = vld [vmem:[#allocation41_spill] sm:$0xff] }
 0x59a   : > { %v3958_v44 = vsel %vm1792_vm2, %v3926_v5, %v13012_v61 }
 0x59b   : > { %v3853_v16 = vpop.permute.xlu1 %3852  ;;  %v3990_v50 = vsel %vm1825_vm3, %v3958_v44, %v13014_v27 }
 0x59c   : > { %v3851_v20 = vpop.permute.xlu0 %3850  ;;  %v4147_v1 = vsel %vm1990_vm8, %v4115_v9, %v3853_v16  ;;  %v4022_v55 = vsel %vm1858_vm4, %v3990_v50, %v13016_v23  ;;  %v4023_v16 = vsel %vm1858_vm4, %v3991_v11, %v13017_v31  ;;  %v13020_v9 = vld [vmem:[#allocation71_spill] sm:$0xff] }
 0x59d   : > { %v4146_v35 = vsel %vm1990_vm8, %v4114_v57, %v3851_v20  ;;  %v4054_v4 = vsel %vm1891_vm5, %v4022_v55, %v13018_v30  ;;  %v13019_v57 = vld [vmem:[#allocation150_spill] sm:$0xff] }
 0x59e   : > { %7007 = vmatprep.mubr.msk.f32.mxu1 %vm2039_vm9, %v4146_v35  ;;  %v4055_v20 = vsel %vm1891_vm5, %v4023_v16, %v13019_v57  ;;  %v4086_v35 = vsel %vm1924_vm6, %v4054_v4, %v13020_v9 }
 0x59f   : > { %v3729_v49 = vpop.permute.xlu1 %3728  ;;  %7008 = vmatmul.mubr.msk.f32.gmra.mrb[40].mxu1 %vm2039_vm9, %v4147_v1  ;;  %v4087_v10 = vsel %vm1924_vm6, %v4055_v20, %v13021_v36 }
 0x5a0   : > { %v3727_v28 = vpop.permute.xlu0 %3726  ;;  %v4117_v63 = vsel %vm1957_vm7, %v4085_v33, %v3729_v49  ;;  %v13031_v33 = vld [vmem:[#allocation113_spill] sm:$0xff] }
 0x5a1   : > { %v4116_v2 = vsel %vm1957_vm7, %v4084_v56, %v3727_v28  ;;  %v3960_v28 = vsel %vm1792_vm2, %v3928_v43, %v13024_v62  ;;  %v4025_v56 = vsel %vm1858_vm4, %v3993_v15, %v13029_v34 }
 0x5a2   : > { %v3992_v3 = vsel %vm1825_vm3, %v3960_v28, %v13026_v18 }
 0x5a3   : > { %v3857_v6 = vpop.permute.xlu1 %3856  ;;  %v4024_v60 = vsel %vm1858_vm4, %v3992_v3, %v13028_v39 }
 0x5a4   : > { %v3855_v54 = vpop.permute.xlu0 %3854  ;;  %v4149_v48 = vsel %vm1990_vm8, %v4117_v63, %v3857_v6  ;;  %v13030_v6 = vld [vmem:[#allocation51_spill] sm:$0xff] }
 0x5a5   : > { %v4148_v22 = vsel %vm1990_vm8, %v4116_v2, %v3855_v54  ;;  %v4056_v32 = vsel %vm1891_vm5, %v4024_v60, %v13030_v6  ;;  %v4057_v2 = vsel %vm1891_vm5, %v4025_v56, %v13031_v33  ;;  %v13032_v54 = vld [vmem:[#allocation8_spill] sm:$0xff] }
 0x5a6   : > { %7010 = vmatprep.mubr.msk.f32.mxu1 %vm2039_vm9, %v4148_v22  ;;  %v4088_v45 = vsel %vm1924_vm6, %v4056_v32, %v13032_v54  ;;  %v13033_v22 = vld [vmem:[#allocation73_spill] sm:$0xff] }
 0x5a7   : > { %v3733_v37 = vpop.permute.xlu1 %3732  ;;  %7011 = vmatmul.mubr.msk.f32.gmra.mrb[42].mxu1 %vm2039_vm9, %v4149_v48  ;;  %v4089_v14 = vsel %vm1924_vm6, %v4057_v2, %v13033_v22 }
 0x5a8   : > { %v3731_v29 = vpop.permute.xlu0 %3730  ;;  %v4119_v47 = vsel %vm1957_vm7, %v4087_v10, %v3733_v37 }
 0x5a9   : > { %v4118_v46 = vsel %vm1957_vm7, %v4086_v35, %v3731_v29 }
 0x5ab   : > { %v3861_v19 = vpop.permute.xlu1 %3860 }
 0x5ac   : > { %v3859_v1 = vpop.permute.xlu0 %3858  ;;  %v4151_v49 = vsel %vm1990_vm8, %v4119_v47, %v3861_v19 }
 0x5ad   : > { %v4150_v51 = vsel %vm1990_vm8, %v4118_v46, %v3859_v1 }
 0x5ae   : > { %7013 = vmatprep.mubr.msk.f32.mxu1 %vm2039_vm9, %v4150_v51 }
 0x5af   : > { %v3737_v12 = vpop.permute.xlu1 %3736  ;;  %7014 = vmatmul.mubr.msk.f32.gmra.mrb[44].mxu1 %vm2039_vm9, %v4151_v49 }
 0x5b0   : > { %v3735_v53 = vpop.permute.xlu0 %3734  ;;  %v4121_v5 = vsel %vm1957_vm7, %v4089_v14, %v3737_v12 }
 0x5b1   : > { %v4120_v59 = vsel %vm1957_vm7, %v4088_v45, %v3735_v53 }
 0x5b3   : > { %v3865_v63 = vpop.permute.xlu1 %3864 }
 0x5b4   : > { %v3863_v21 = vpop.permute.xlu0 %3862  ;;  %v4153_v25 = vsel %vm1990_vm8, %v4121_v5, %v3865_v63 }
 0x5b5   : > { %v4152_v48 = vsel %vm1990_vm8, %v4120_v59, %v3863_v21 }
 0x5b6   : > { %7016 = vmatprep.mubr.msk.f32.mxu1 %vm2039_vm9, %v4152_v48 }
 0x5b7   : > { %7017 = vmatmul.mubr.msk.f32.gmra.mrb[46].mxu1 %vm2039_vm9, %v4153_v25 }
 0x61a   : > { %v6973_v7 = vpop.f32.mrb[16].mxu1 }
 0x61b   : > { %v4338_v61 = vadd.f32 %v6973_v7, %v10932_v17  ;;  %v4332_v44 = vpop.f32.mrb[17].mxu1 }
 0x61c   : > { %v4333_v37 = vadd.f32 %v10932_v17, %v4332_v44 }
 0x61d   : > { %v4492_v40 = vmax.f32 %v4338_v61, 0.0 }
 0x61e   : > { %v4491_v24 = vmax.f32 %v4333_v37, 0.0  ;;  %v6976_v27 = vpop.f32.mrb[18].mxu1 }
 0x61f   : > { %4580 = vst.msk [vmem:[#allocation3 + $0x21] sm:$0xff] %vm2521_vm10, %v4492_v40  ;;  %v4348_v50 = vadd.f32 %v6976_v27, %v10932_v17  ;;  %v4342_v29 = vpop.f32.mrb[19].mxu1 }
 0x620   : > { %4579 = vst.msk [vmem:[#allocation3 + $0x19] sm:$0xff] %vm2521_vm10, %v4491_v24  ;;  %v4343_v42 = vadd.f32 %v10932_v17, %v4342_v29 }
 0x621   : > { %v4494_v11 = vmax.f32 %v4348_v50, 0.0 }
 0x622   : > { %v4493_v23 = vmax.f32 %v4343_v42, 0.0  ;;  %v6979_v55 = vpop.f32.mrb[20].mxu1 }
 0x623   : > { %4582 = vst.msk [vmem:[#allocation3 + $0x39] sm:$0xff] %vm2521_vm10, %v4494_v11  ;;  %v4358_v31 = vadd.f32 %v6979_v55, %v10932_v17  ;;  %v4352_v16 = vpop.f32.mrb[21].mxu1 }
 0x624   : > { %4581 = vst.msk [vmem:[#allocation3 + $0x31] sm:$0xff] %vm2521_vm10, %v4493_v23  ;;  %v4353_v30 = vadd.f32 %v10932_v17, %v4352_v16 }
 0x625   : > { %v4496_v4 = vmax.f32 %v4358_v31, 0.0 }
 0x626   : > { %v4495_v57 = vmax.f32 %v4353_v30, 0.0  ;;  %v10944_v20 = vld [vmem:[#allocation3 + $0x21] sm:$0xff] }
 0x627   : > { %4584 = vst.msk [vmem:[#allocation3 + $0x51] sm:$0xff] %vm2521_vm10, %v4496_v4  ;;  %4938 = vrot.lane.b32.xlu1 %v10944_v20, %s7231_s29  ;;  %v10949_v9 = vld [vmem:[#allocation3 + $0x19] sm:$0xff] }
 0x628   : > { %4583 = vst.msk [vmem:[#allocation3 + $0x49] sm:$0xff] %vm2521_vm10, %v4495_v57  ;;  %4936 = vrot.lane.b32.xlu0 %v10949_v9, %s7231_s29 }
 0x62a   : > { %v6982_v35 = vpop.f32.mrb[22].mxu1  ;;  %v10954_v19 = vld [vmem:[#allocation3 + $0x39] sm:$0xff] }
 0x62b   : > { %v4368_v36 = vadd.f32 %v6982_v35, %v10932_v17  ;;  %4942 = vrot.lane.b32.xlu1 %v10954_v19, %s7231_s29  ;;  %v4362_v10 = vpop.f32.mrb[23].mxu1  ;;  %v10959_v46 = vld [vmem:[#allocation3 + $0x31] sm:$0xff] }
 0x62c   : > { %v4363_v1 = vadd.f32 %v10932_v17, %v4362_v10  ;;  %4940 = vrot.lane.b32.xlu0 %v10959_v46, %s7231_s29 }
 0x62d   : > { %v4498_v47 = vmax.f32 %v4368_v36, 0.0 }
 0x62e   : > { %v4497_v51 = vmax.f32 %v4363_v1, 0.0  ;;  %v10964_v13 = vld [vmem:[#allocation3 + $0x51] sm:$0xff] }
 0x62f   : > { %4586 = vst.msk [vmem:[#allocation3 + $0x69] sm:$0xff] %vm2521_vm10, %v4498_v47  ;;  %4946 = vrot.lane.b32.xlu1 %v10964_v13, %s7231_s29  ;;  %v10969_v41 = vld [vmem:[#allocation3 + $0x49] sm:$0xff] }
 0x630   : > { %4585 = vst.msk [vmem:[#allocation3 + $0x61] sm:$0xff] %vm2521_vm10, %v4497_v51  ;;  %4944 = vrot.lane.b32.xlu0 %v10969_v41, %s7231_s29 }
 0x632   : > { %v6985_v43 = vpop.f32.mrb[24].mxu1 }
 0x633   : > { %v4378_v49 = vadd.f32 %v6985_v43, %v10932_v17  ;;  %v4372_v52 = vpop.f32.mrb[25].mxu1 }
 0x634   : > { %v4373_v38 = vadd.f32 %v10932_v17, %v4372_v52 }
 0x635   : > { %v4500_v0 = vmax.f32 %v4378_v49, 0.0 }
 0x636   : > { %v4499_v62 = vmax.f32 %v4373_v38, 0.0  ;;  %v10976_v28 = vld [vmem:[#allocation3 + $0x69] sm:$0xff] }
 0x637   : > { %4588 = vst.msk [vmem:[#allocation3 + $0x81] sm:$0xff] %vm2521_vm10, %v4500_v0  ;;  %4950 = vrot.lane.b32.xlu1 %v10976_v28, %s7231_s29  ;;  %v10981_v12 = vld [vmem:[#allocation3 + $0x61] sm:$0xff] }
 0x638   : > { %4587 = vst.msk [vmem:[#allocation3 + $0x79] sm:$0xff] %vm2521_vm10, %v4499_v62  ;;  %4948 = vrot.lane.b32.xlu0 %v10981_v12, %s7231_s29 }
 0x63a   : > { %v6988_v8 = vpop.f32.mrb[26].mxu1 }
 0x63b   : > { %v4388_v58 = vadd.f32 %v6988_v8, %v10932_v17  ;;  %v4382_v18 = vpop.f32.mrb[27].mxu1 }
 0x63c   : > { %v4383_v3 = vadd.f32 %v10932_v17, %v4382_v18 }
 0x63d   : > { %v4502_v53 = vmax.f32 %v4388_v58, 0.0 }
 0x63e   : > { %v4501_v26 = vmax.f32 %v4383_v3, 0.0  ;;  %v10988_v15 = vld [vmem:[#allocation3 + $0x81] sm:$0xff] }
 0x63f   : > { %4590 = vst.msk [vmem:[#allocation3 + $0x99] sm:$0xff] %vm2521_vm10, %v4502_v53  ;;  %4954 = vrot.lane.b32.xlu1 %v10988_v15, %s7231_s29  ;;  %v10993_v39 = vld [vmem:[#allocation3 + $0x79] sm:$0xff] }
 0x640   : > { %4589 = vst.msk [vmem:[#allocation3 + $0x91] sm:$0xff] %vm2521_vm10, %v4501_v26  ;;  %4952 = vrot.lane.b32.xlu0 %v10993_v39, %s7231_s29 }
 0x642   : > { %v6991_v60 = vpop.f32.mrb[28].mxu1 }
 0x643   : > { %v4398_v34 = vadd.f32 %v6991_v60, %v10932_v17  ;;  %v4392_v56 = vpop.f32.mrb[29].mxu1 }
 0x644   : > { %v4393_v6 = vadd.f32 %v10932_v17, %v4392_v56 }
 0x645   : > { %v4504_v32 = vmax.f32 %v4398_v34, 0.0 }
 0x646   : > { %v4503_v33 = vmax.f32 %v4393_v6, 0.0  ;;  %v11000_v2 = vld [vmem:[#allocation3 + $0x99] sm:$0xff] }
 0x647   : > { %4592 = vst.msk [vmem:[#allocation3 + $0xb1] sm:$0xff] %vm2521_vm10, %v4504_v32  ;;  %4958 = vrot.lane.b32.xlu1 %v11000_v2, %s7231_s29  ;;  %v11005_v54 = vld [vmem:[#allocation3 + $0x91] sm:$0xff] }
 0x648   : > { %4591 = vst.msk [vmem:[#allocation3 + $0xa9] sm:$0xff] %vm2521_vm10, %v4503_v33  ;;  %4956 = vrot.lane.b32.xlu0 %v11005_v54, %s7231_s29 }
 0x64a   : > { %v6994_v45 = vpop.f32.mrb[30].mxu1 }
 0x64b   : > { %v4408_v63 = vadd.f32 %v6994_v45, %v10932_v17  ;;  %v4402_v22 = vpop.f32.mrb[31].mxu1 }
 0x64c   : > { %v4403_v14 = vadd.f32 %v10932_v17, %v4402_v22 }
 0x64d   : > { %v4506_v59 = vmax.f32 %v4408_v63, 0.0 }
 0x64e   : > { %v4505_v21 = vmax.f32 %v4403_v14, 0.0  ;;  %v4658_v5 = vld [vmem:[#allocation3 + $0xb1] sm:$0xff] }
 0x64f   : > { %4594 = vst.msk [vmem:[#allocation3 + $0xc9] sm:$0xff] %vm2521_vm10, %v4506_v59  ;;  %4962 = vrot.lane.b32.xlu1 %v4658_v5, %s7231_s29  ;;  %v4657_v48 = vld [vmem:[#allocation3 + $0xa9] sm:$0xff] }
 0x650   : > { %4593 = vst.msk [vmem:[#allocation3 + $0xc1] sm:$0xff] %vm2521_vm10, %v4505_v21  ;;  %4960 = vrot.lane.b32.xlu0 %v4657_v48, %s7231_s29 }
 0x652   : > { %v6997_v25 = vpop.f32.mrb[32].mxu1 }
 0x653   : > { %v4418_v7 = vadd.f32 %v6997_v25, %v10932_v17  ;;  %v4412_v61 = vpop.f32.mrb[33].mxu1 }
 0x654   : > { %v4413_v44 = vadd.f32 %v10932_v17, %v4412_v61 }
 0x655   : > { %v4508_v37 = vmax.f32 %v4418_v7, 0.0 }
 0x656   : > { %v4507_v40 = vmax.f32 %v4413_v44, 0.0  ;;  %v4660_v24 = vld [vmem:[#allocation3 + $0xc9] sm:$0xff] }
 0x657   : > { %4596 = vst.msk [vmem:[#allocation3 + $0xe1] sm:$0xff] %vm2521_vm10, %v4508_v37  ;;  %4966 = vrot.lane.b32.xlu1 %v4660_v24, %s7231_s29  ;;  %v4659_v27 = vld [vmem:[#allocation3 + $0xc1] sm:$0xff] }
 0x658   : > { %4595 = vst.msk [vmem:[#allocation3 + $0xd9] sm:$0xff] %vm2521_vm10, %v4507_v40  ;;  %4964 = vrot.lane.b32.xlu0 %v4659_v27, %s7231_s29 }
 0x65a   : > { %v7000_v50 = vpop.f32.mrb[34].mxu1 }
 0x65b   : > { %v4428_v29 = vadd.f32 %v7000_v50, %v10932_v17  ;;  %v4422_v42 = vpop.f32.mrb[35].mxu1 }
 0x65c   : > { %v4423_v11 = vadd.f32 %v10932_v17, %v4422_v42 }
 0x65d   : > { %v4510_v23 = vmax.f32 %v4428_v29, 0.0 }
 0x65e   : > { %v4509_v55 = vmax.f32 %v4423_v11, 0.0  ;;  %v4662_v31 = vld [vmem:[#allocation3 + $0xe1] sm:$0xff] }
 0x65f   : > { %4598 = vst.msk [vmem:[#allocation3 + $0xf9] sm:$0xff] %vm2521_vm10, %v4510_v23  ;;  %4970 = vrot.lane.b32.xlu1 %v4662_v31, %s7231_s29  ;;  %v4661_v16 = vld [vmem:[#allocation3 + $0xd9] sm:$0xff]  ;;  %v4675_v31 = vld [vmem:[#allocation3 + $0x2] sm:$0xff] }
 0x660   : > { %4597 = vst.msk [vmem:[#allocation3 + $0xf1] sm:$0xff] %vm2521_vm10, %v4509_v55  ;;  %4968 = vrot.lane.b32.xlu0 %v4661_v16, %s7231_s29  ;;  %v4676_v55 = vld [vmem:[#allocation3 + $0xa] sm:$0xff]  ;;  %v11066_v16 = vld [vmem:[#allocation3 + $0x22] sm:$0xff] }
 0x662   : > { %v7003_v30 = vpop.f32.mrb[36].mxu1 }
 0x663   : > { %v4438_v4 = vadd.f32 %v7003_v30, %v10932_v17  ;;  %v4432_v57 = vpop.f32.mrb[37].mxu1  ;;  %v11074_v30 = vld [vmem:[#allocation3 + $0x3a] sm:$0xff] }
 0x664   : > { %v4433_v35 = vadd.f32 %v10932_v17, %v4432_v57  ;;  %v11082_v57 = vld [vmem:[#allocation3 + $0x52] sm:$0xff] }
 0x665   : > { %v4512_v36 = vmax.f32 %v4438_v4, 0.0  ;;  %v11078_v4 = vld [vmem:[#allocation3 + $0x32] sm:$0xff] }
 0x666   : > { %v4511_v10 = vmax.f32 %v4433_v35, 0.0  ;;  %v4664_v1 = vld [vmem:[#allocation3 + $0xf9] sm:$0xff]  ;;  %v11086_v35 = vld [vmem:[#allocation3 + $0x4a] sm:$0xff] }
 0x667   : > { %4600 = vst.msk [vmem:[#allocation3 + $0x111] sm:$0xff] %vm2521_vm10, %v4512_v36  ;;  %4974 = vrot.lane.b32.xlu1 %v4664_v1, %s7231_s29  ;;  %v4663_v47 = vld [vmem:[#allocation3 + $0xf1] sm:$0xff]  ;;  %v11098_v1 = vld [vmem:[#allocation3 + $0x82] sm:$0xff] }
 0x668   : > { %4599 = vst.msk [vmem:[#allocation3 + $0x109] sm:$0xff] %vm2521_vm10, %v4511_v10  ;;  %4972 = vrot.lane.b32.xlu0 %v4663_v47, %s7231_s29  ;;  %v11090_v36 = vld [vmem:[#allocation3 + $0x6a] sm:$0xff]  ;;  %v11094_v10 = vld [vmem:[#allocation3 + $0x62] sm:$0xff]  ;;  %v11102_v47 = vld [vmem:[#allocation3 + $0x7a] sm:$0xff] }
 0x66a   : > { %v7006_v51 = vpop.f32.mrb[38].mxu1 }
 0x66b   : > { %v4448_v43 = vadd.f32 %v7006_v51, %v10932_v17  ;;  %v4442_v49 = vpop.f32.mrb[39].mxu1  ;;  %v11106_v51 = vld [vmem:[#allocation3 + $0x9a] sm:$0xff] }
 0x66c   : > { %v4443_v52 = vadd.f32 %v10932_v17, %v4442_v49  ;;  %v11114_v49 = vld [vmem:[#allocation3 + $0xb2] sm:$0xff] }
 0x66d   : > { %v4514_v38 = vmax.f32 %v4448_v43, 0.0  ;;  %v11110_v43 = vld [vmem:[#allocation3 + $0x92] sm:$0xff] }
 0x66e   : > { %v4513_v0 = vmax.f32 %v4443_v52, 0.0  ;;  %v4666_v62 = vld [vmem:[#allocation3 + $0x111] sm:$0xff] }
 0x66f   : > { %4602 = vst.msk [vmem:[#allocation3 + $0x129] sm:$0xff] %vm2521_vm10, %v4514_v38  ;;  %4978 = vrot.lane.b32.xlu1 %v4666_v62, %s7231_s29  ;;  %v4665_v8 = vld [vmem:[#allocation3 + $0x109] sm:$0xff] }
 0x670   : > { %4601 = vst.msk [vmem:[#allocation3 + $0x121] sm:$0xff] %vm2521_vm10, %v4513_v0  ;;  %4976 = vrot.lane.b32.xlu0 %v4665_v8, %s7231_s29  ;;  %v11118_v52 = vld [vmem:[#allocation3 + $0xaa] sm:$0xff]  ;;  %v11126_v0 = vld [vmem:[#allocation3 + $0xc2] sm:$0xff]  ;;  %v11134_v8 = vld [vmem:[#allocation3 + $0xda] sm:$0xff] }
 0x671   : > { %v11122_v38 = vld [vmem:[#allocation3 + $0xca] sm:$0xff]  ;;  %v11130_v62 = vld [vmem:[#allocation3 + $0xe2] sm:$0xff] }
 0x672   : > { %v7009_v58 = vpop.f32.mrb[40].mxu1 }
 0x673   : > { %v4458_v18 = vadd.f32 %v7009_v58, %v10932_v17  ;;  %v4452_v3 = vpop.f32.mrb[41].mxu1  ;;  %v4696_v58 = vld [vmem:[#allocation3 + $0xfa] sm:$0xff] }
 0x674   : > { %v4453_v53 = vadd.f32 %v10932_v17, %v4452_v3  ;;  %v4698_v3 = vld [vmem:[#allocation3 + $0x112] sm:$0xff] }
 0x675   : > { %v4516_v26 = vmax.f32 %v4458_v18, 0.0  ;;  %v11139_v18 = vld [vmem:[#allocation3 + $0xf2] sm:$0xff] }
 0x676   : > { %v4515_v60 = vmax.f32 %v4453_v53, 0.0  ;;  %v4668_v34 = vld [vmem:[#allocation3 + $0x129] sm:$0xff]  ;;  %v11143_v53 = vpop.permute.xlu1 %4934 }
 0x677   : > { %4604 = vst.msk [vmem:[#allocation3 + $0x141] sm:$0xff] %vm2521_vm10, %v4516_v26  ;;  %4982 = vrot.lane.b32.xlu1 %v4668_v34, %s7231_s29  ;;  %v4667_v56 = vld [vmem:[#allocation3 + $0x121] sm:$0xff]  ;;  %v4697_v26 = vld [vmem:[#allocation3 + $0x10a] sm:$0xff] }
 0x678   : > { %4603 = vst.msk [vmem:[#allocation3 + $0x139] sm:$0xff] %vm2521_vm10, %v4515_v60  ;;  %4980 = vrot.lane.b32.xlu0 %v4667_v56, %s7231_s29  ;;  %v11146_v60 = vpop.permute.xlu0 %4932  ;;  %v4700_v34 = vld [vmem:[#allocation3 + $0x12a] sm:$0xff]  ;;  %v4699_v56 = vld [vmem:[#allocation3 + $0x122] sm:$0xff] }
 0x67a   : > { %v7012_v6 = vpop.f32.mrb[42].mxu1 }
 0x67b   : > { %v4468_v32 = vadd.f32 %v7012_v6, %v10932_v17  ;;  %v4462_v33 = vpop.f32.mrb[43].mxu1 }
 0x67c   : > { %v4463_v45 = vadd.f32 %v10932_v17, %v4462_v33 }
 0x67d   : > { %v4518_v63 = vmax.f32 %v4468_v32, 0.0 }
 0x67e   : > { %v4517_v22 = vmax.f32 %v4463_v45, 0.0  ;;  %v4670_v14 = vld [vmem:[#allocation3 + $0x141] sm:$0xff] }
 0x67f   : > { %4606 = vst.msk [vmem:[#allocation3 + $0x159] sm:$0xff] %vm2521_vm10, %v4518_v63  ;;  %4986 = vrot.lane.b32.xlu1 %v4670_v14, %s7231_s29  ;;  %v4669_v59 = vld [vmem:[#allocation3 + $0x139] sm:$0xff]  ;;  %v4702_v33 = vld [vmem:[#allocation3 + $0x142] sm:$0xff] }
 0x680   : > { %4605 = vst.msk [vmem:[#allocation3 + $0x151] sm:$0xff] %vm2521_vm10, %v4517_v22  ;;  %4984 = vrot.lane.b32.xlu0 %v4669_v59, %s7231_s29  ;;  %v4701_v45 = vld [vmem:[#allocation3 + $0x13a] sm:$0xff] }
 0x682   : > { %v7015_v21 = vpop.f32.mrb[44].mxu1 }
 0x683   : > { %v4478_v5 = vadd.f32 %v7015_v21, %v10932_v17  ;;  %v4472_v48 = vpop.f32.mrb[45].mxu1 }
 0x684   : > { %v4473_v25 = vadd.f32 %v10932_v17, %v4472_v48 }
 0x685   : > { %v4520_v7 = vmax.f32 %v4478_v5, 0.0 }
 0x686   : > { %v4519_v61 = vmax.f32 %v4473_v25, 0.0  ;;  %v4672_v44 = vld [vmem:[#allocation3 + $0x159] sm:$0xff] }
 0x687   : > { %4608 = vst.msk [vmem:[#allocation3 + $0x171] sm:$0xff] %vm2521_vm10, %v4520_v7  ;;  %4990 = vrot.lane.b32.xlu1 %v4672_v44, %s7231_s29  ;;  %v4671_v37 = vld [vmem:[#allocation3 + $0x151] sm:$0xff]  ;;  %v4704_v63 = vld [vmem:[#allocation3 + $0x15a] sm:$0xff] }
 0x688   : > { %4607 = vst.msk [vmem:[#allocation3 + $0x169] sm:$0xff] %vm2521_vm10, %v4519_v61  ;;  %4988 = vrot.lane.b32.xlu0 %v4671_v37, %s7231_s29  ;;  %v4703_v14 = vld [vmem:[#allocation3 + $0x152] sm:$0xff]  ;;  %v11167_v25 = vld [vmem:[#allocation3 + $0x20] sm:$0xff] }
 0x689   : > { %v11171_v61 = vld [vmem:[#allocation3 + $0x18] sm:$0xff] }
 0x68a   : > { %v7018_v40 = vpop.f32.mrb[46].mxu1  ;;  %v11179_v37 = vld [vmem:[#allocation3 + $0x38] sm:$0xff] }
 0x68b   : > { %v4488_v24 = vadd.f32 %v7018_v40, %v10932_v17  ;;  %v4482_v27 = vpop.f32.mrb[47].mxu1 }
 0x68c   : > { %v4483_v50 = vadd.f32 %v10932_v17, %v4482_v27  ;;  %v11070_v17 = vld [vmem:[#allocation3 + $0x1a] sm:$0xff] }
 0x68d   : > { %v4522_v29 = vmax.f32 %v4488_v24, 0.0  ;;  %v11183_v24 = vld [vmem:[#allocation3 + $0x30] sm:$0xff] }
 0x68e   : > { %v4521_v42 = vmax.f32 %v4483_v50, 0.0  ;;  %v4674_v11 = vld [vmem:[#allocation3 + $0x171] sm:$0xff] }
 0x68f   : > { %4610 = vst.msk [vmem:[#allocation3 + $0x189] sm:$0xff] %vm2521_vm10, %v4522_v29  ;;  %4994 = vrot.lane.b32.xlu1 %v4674_v11, %s7231_s29  ;;  %v4673_v23 = vld [vmem:[#allocation3 + $0x169] sm:$0xff]  ;;  %v4706_v21 = vld [vmem:[#allocation3 + $0x172] sm:$0xff] }
 0x690   : > { %4609 = vst.msk [vmem:[#allocation3 + $0x181] sm:$0xff] %vm2521_vm10, %v4521_v42  ;;  %4992 = vrot.lane.b32.xlu0 %v4673_v23, %s7231_s29  ;;  %v4705_v5 = vld [vmem:[#allocation3 + $0x16a] sm:$0xff] }
 0x691   : > { %v11191_v50 = vld [vmem:[#allocation3 + $0x50] sm:$0xff]  ;;  %v11195_v42 = vld [vmem:[#allocation3 + $0x48] sm:$0xff] }
 0x692   : > { %v11203_v23 = vld [vmem:[#allocation3 + $0x68] sm:$0xff] }
 0x693   : > { %5062 = vrot.lane.b32.xlu1 %v4676_v55, %s7223_s12 }
 0x694   : > { %5060 = vrot.lane.b32.xlu0 %v4675_v31, %s7223_s12  ;;  %v11207_v31 = vld [vmem:[#allocation3 + $0x60] sm:$0xff] }
 0x697   : > { %5066 = vrot.lane.b32.xlu1 %v11066_v16, %s7223_s12 }
 0x698   : > { %5064 = vrot.lane.b32.xlu0 %v11070_v17, %s7223_s12 }
 0x699   : > { %v11151_v6 = vpop.permute.xlu1 %4938 }
 0x69a   : > { %v11153_v32 = vpop.permute.xlu0 %4936 }
 0x69b   : > { %5070 = vrot.lane.b32.xlu1 %v11074_v30, %s7223_s12 }
 0x69c   : > { %5068 = vrot.lane.b32.xlu0 %v11078_v4, %s7223_s12 }
 0x69d   : > { %v11157_v22 = vpop.permute.xlu1 %4942 }
 0x69e   : > { %v11160_v59 = vpop.permute.xlu0 %4940 }
 0x69f   : > { %5074 = vrot.lane.b32.xlu1 %v11082_v57, %s7223_s12 }
 0x6a0   : > { %5072 = vrot.lane.b32.xlu0 %v11086_v35, %s7223_s12 }
 0x6a1   : > { %v11165_v48 = vpop.permute.xlu1 %4946 }
 0x6a2   : > { %13034 = vst [vmem:[#allocation28_spill] sm:$0xff] %v11165_v48  ;;  %v11169_v7 = vpop.permute.xlu0 %4944  ;;  %v11291_v48 = vld [vmem:[#allocation3 + $0x108] sm:$0xff] }
 0x6a3   : > { %5078 = vrot.lane.b32.xlu1 %v11090_v36, %s7223_s12  ;;  %13059 = vst [vmem:[#allocation160_spill] sm:$0xff] %v11291_v48 }
 0x6a4   : > { %5076 = vrot.lane.b32.xlu0 %v11094_v10, %s7223_s12 }
 0x6a7   : > { %5082 = vrot.lane.b32.xlu1 %v11098_v1, %s7223_s12 }
 0x6a8   : > { %5080 = vrot.lane.b32.xlu0 %v11102_v47, %s7223_s12 }
 0x6a9   : > { %v11177_v44 = vpop.permute.xlu1 %4950 }
 0x6aa   : > { %13035 = vst [vmem:[#allocation57_spill] sm:$0xff] %v11177_v44  ;;  %v11181_v40 = vpop.permute.xlu0 %4948  ;;  %v11279_v44 = vld [vmem:[#allocation3 + $0xf0] sm:$0xff] }
 0x6ab   : > { %5086 = vrot.lane.b32.xlu1 %v11106_v51, %s7223_s12  ;;  %13036 = vst [vmem:[#allocation75_spill] sm:$0xff] %v11181_v40 }
 0x6ac   : > { %5084 = vrot.lane.b32.xlu0 %v11110_v43, %s7223_s12 }
 0x6af   : > { %5090 = vrot.lane.b32.xlu1 %v11114_v49, %s7223_s12 }
 0x6b0   : > { %5088 = vrot.lane.b32.xlu0 %v11118_v52, %s7223_s12 }
 0x6b1   : > { %v11189_v27 = vpop.permute.xlu1 %4954 }
 0x6b2   : > { %13037 = vst [vmem:[#allocation133_spill] sm:$0xff] %v11189_v27  ;;  %v11193_v29 = vpop.permute.xlu0 %4952  ;;  %v11267_v27 = vld [vmem:[#allocation3 + $0xd8] sm:$0xff] }
 0x6b3   : > { %5094 = vrot.lane.b32.xlu1 %v11122_v38, %s7223_s12  ;;  %13038 = vst [vmem:[#allocation96_spill] sm:$0xff] %v11193_v29 }
 0x6b4   : > { %5092 = vrot.lane.b32.xlu0 %v11126_v0, %s7223_s12 }
 0x6b7   : > { %5098 = vrot.lane.b32.xlu1 %v11130_v62, %s7223_s12 }
 0x6b8   : > { %5096 = vrot.lane.b32.xlu0 %v11134_v8, %s7223_s12 }
 0x6b9   : > { %v11201_v11 = vpop.permute.xlu1 %4958 }
 0x6ba   : > { %13039 = vst [vmem:[#allocation157_spill] sm:$0xff] %v11201_v11  ;;  %v11205_v55 = vpop.permute.xlu0 %4956  ;;  %v11255_v11 = vld [vmem:[#allocation3 + $0xc0] sm:$0xff] }
 0x6bb   : > { %5102 = vrot.lane.b32.xlu1 %v4696_v58, %s7223_s12  ;;  %13040 = vst [vmem:[#allocation13_spill] sm:$0xff] %v11205_v55 }
 0x6bc   : > { %5100 = vrot.lane.b32.xlu0 %v11139_v18, %s7223_s12 }
 0x6bf   : > { %5106 = vrot.lane.b32.xlu1 %v4698_v3, %s7223_s12  ;;  %v11215_v3 = vld [vmem:[#allocation3 + $0x80] sm:$0xff] }
 0x6c0   : > { %5104 = vrot.lane.b32.xlu0 %v4697_v26, %s7223_s12 }
 0x6c1   : > { %v11213_v58 = vpop.permute.xlu1 %4962 }
 0x6c2   : > { %13041 = vst [vmem:[#allocation32_spill] sm:$0xff] %v11213_v58  ;;  %v11217_v26 = vpop.permute.xlu0 %4960  ;;  %v11243_v58 = vld [vmem:[#allocation3 + $0xa8] sm:$0xff] }
 0x6c3   : > { %5110 = vrot.lane.b32.xlu1 %v4700_v34, %s7223_s12  ;;  %13042 = vst [vmem:[#allocation61_spill] sm:$0xff] %v11217_v26  ;;  %v11219_v34 = vld [vmem:[#allocation3 + $0x78] sm:$0xff]  ;;  %13049 = vst [vmem:[#allocation65_spill] sm:$0xff] %v11243_v58 }
 0x6c4   : > { %5108 = vrot.lane.b32.xlu0 %v4699_v56, %s7223_s12 }
 0x6c7   : > { %5114 = vrot.lane.b32.xlu1 %v4702_v33, %s7223_s12  ;;  %v11227_v33 = vld [vmem:[#allocation3 + $0x98] sm:$0xff] }
 0x6c8   : > { %5112 = vrot.lane.b32.xlu0 %v4701_v45, %s7223_s12  ;;  %13044 = vst [vmem:[#allocation135_spill] sm:$0xff] %v11227_v33 }
 0x6c9   : > { %v11225_v56 = vpop.permute.xlu1 %4966 }
 0x6ca   : > { %13043 = vst [vmem:[#allocation77_spill] sm:$0xff] %v11225_v56  ;;  %v11229_v45 = vpop.permute.xlu0 %4964 }
 0x6cb   : > { %5118 = vrot.lane.b32.xlu1 %v4704_v63, %s7223_s12  ;;  %13045 = vst [vmem:[#allocation98_spill] sm:$0xff] %v11229_v45  ;;  %v11231_v63 = vld [vmem:[#allocation3 + $0x90] sm:$0xff]  ;;  %v11251_v45 = vld [vmem:[#allocation3 + $0xc8] sm:$0xff] }
 0x6cc   : > { %5116 = vrot.lane.b32.xlu0 %v4703_v14, %s7223_s12 }
 0x6cf   : > { %5122 = vrot.lane.b32.xlu1 %v4706_v21, %s7223_s12  ;;  %v11239_v21 = vld [vmem:[#allocation3 + $0xb0] sm:$0xff] }
 0x6d0   : > { %5120 = vrot.lane.b32.xlu0 %v4705_v5, %s7223_s12  ;;  %13047 = vst [vmem:[#allocation19_spill] sm:$0xff] %v11239_v21 }
 0x6d1   : > { %v11237_v14 = vpop.permute.xlu1 %4970 }
 0x6d2   : > { %13046 = vst [vmem:[#allocation159_spill] sm:$0xff] %v11237_v14  ;;  %v11241_v5 = vpop.permute.xlu0 %4968 }
 0x6d3   : > { %5190 = vrot.lane.b32.xlu1 %v11167_v25, %s7232_s24  ;;  %13048 = vst [vmem:[#allocation99_spill] sm:$0xff] %v11241_v5  ;;  %v11263_v5 = vld [vmem:[#allocation3 + $0xe0] sm:$0xff] }
 0x6d4   : > { %5188 = vrot.lane.b32.xlu0 %v11171_v61, %s7232_s24 }
 0x6d7   : > { %5194 = vrot.lane.b32.xlu1 %v11179_v37, %s7232_s24 }
 0x6d8   : > { %5192 = vrot.lane.b32.xlu0 %v11183_v24, %s7232_s24 }
 0x6d9   : > { %v11249_v56 = vpop.permute.xlu1 %4974 }
 0x6da   : > { %13050 = vst [vmem:[#allocation21_spill] sm:$0xff] %v11249_v56  ;;  %v11253_v26 = vpop.permute.xlu0 %4972 }
 0x6db   : > { %5198 = vrot.lane.b32.xlu1 %v11191_v50, %s7232_s24  ;;  %13051 = vst [vmem:[#allocation137_spill] sm:$0xff] %v11253_v26  ;;  %v11275_v26 = vld [vmem:[#allocation3 + $0xf8] sm:$0xff] }
 0x6dc   : > { %5196 = vrot.lane.b32.xlu0 %v11195_v42, %s7232_s24 }
 0x6df   : > { %5202 = vrot.lane.b32.xlu1 %v11203_v23, %s7232_s24 }
 0x6e0   : > { %5200 = vrot.lane.b32.xlu0 %v11207_v31, %s7232_s24 }
 0x6e1   : > { %v11261_v14 = vpop.permute.xlu1 %4978 }
 0x6e2   : > { %13052 = vst [vmem:[#allocation68_spill] sm:$0xff] %v11261_v14  ;;  %v11265_v55 = vpop.permute.xlu0 %4976 }
 0x6e3   : > { %5206 = vrot.lane.b32.xlu1 %v11215_v3, %s7232_s24  ;;  %13053 = vst [vmem:[#allocation161_spill] sm:$0xff] %v11265_v55  ;;  %v11287_v55 = vld [vmem:[#allocation3 + $0x110] sm:$0xff] }
 0x6e4   : > { %5204 = vrot.lane.b32.xlu0 %v11219_v34, %s7232_s24  ;;  %13057 = vst [vmem:[#allocation7_spill] sm:$0xff] %v11287_v55 }
 0x6e7   : > { %5210 = vrot.lane.b32.xlu1 %v11227_v33, %s7232_s24 }
 0x6e8   : > { %5208 = vrot.lane.b32.xlu0 %v11231_v63, %s7232_s24 }
 0x6e9   : > { %v11273_v56 = vpop.permute.xlu1 %4982 }
 0x6ea   : > { %13054 = vst [vmem:[#allocation138_spill] sm:$0xff] %v11273_v56  ;;  %v11277_v29 = vpop.permute.xlu0 %4980 }
 0x6eb   : > { %5214 = vrot.lane.b32.xlu1 %v11239_v21, %s7232_s24  ;;  %13055 = vst [vmem:[#allocation116_spill] sm:$0xff] %v11277_v29 }
 0x6ec   : > { %5212 = vrot.lane.b32.xlu0 %v11243_v58, %s7232_s24 }
 0x6ef   : > { %5218 = vrot.lane.b32.xlu1 %v11251_v45, %s7232_s24 }
 0x6f0   : > { %5216 = vrot.lane.b32.xlu0 %v11255_v11, %s7232_s24 }
 0x6f1   : > { %v11285_v14 = vpop.permute.xlu1 %4986 }
 0x6f2   : > { %13056 = vst [vmem:[#allocation139_spill] sm:$0xff] %v11285_v14  ;;  %v11289_v40 = vpop.permute.xlu0 %4984 }
 0x6f3   : > { %5222 = vrot.lane.b32.xlu1 %v11263_v5, %s7232_s24  ;;  %13058 = vst [vmem:[#allocation5_spill] sm:$0xff] %v11289_v40  ;;  %v6183_v40 = vld [vmem:[%s12190_s6] sm:$0xff] }
 0x6f4   : > { %5220 = vrot.lane.b32.xlu0 %v11267_v27, %s7232_s24 }
 0x6f7   : > { %5226 = vrot.lane.b32.xlu1 %v11275_v26, %s7232_s24 }
 0x6f8   : > { %5224 = vrot.lane.b32.xlu0 %v11279_v44, %s7232_s24 }
 0x6f9   : > { %v11297_v56 = vpop.permute.xlu1 %4990 }
 0x6fa   : > { %13060 = vst [vmem:[#allocation23_spill] sm:$0xff] %v11297_v56  ;;  %v11299_v29 = vpop.permute.xlu0 %4988 }
 0x6fb   : > { %5230 = vrot.lane.b32.xlu1 %v11287_v55, %s7232_s24  ;;  %13061 = vst [vmem:[#allocation67_spill] sm:$0xff] %v11299_v29 }
 0x6fc   : > { %5228 = vrot.lane.b32.xlu0 %v11291_v48, %s7232_s24  ;;  %v6184_v48 = vld [vmem:[%s12190_s6 + $0x8] sm:$0xff] }
 0x6fd   : > { %v7109_v56 = vpack.c.bf16 %v6184_v48, %v6183_v40 }
 0x6ff   : > { %5318 = vrot.lane.b32.xlu1 %v10944_v20, %s7224_s13  ;;  %7110 = vmatprep.subr.bf16.mxu0 %v7109_v56 }
 0x700   : > { %5316 = vrot.lane.b32.xlu0 %v10949_v9, %s7224_s13  ;;  %7112 = vmatpush3.bf16.msra.mxu0 %v7109_v56  ;;  %v6185_v9 = vld [vmem:[%s12190_s6 + $0x10] sm:$0xff]  ;;  %v6187_v56 = vld [vmem:[%s12190_s6 + $0x20] sm:$0xf] }
 0x701   : > { %v11305_v14 = vpop.permute.xlu1 %4994 }
 0x702   : > { %13062 = vst [vmem:[#allocation70_spill] sm:$0xff] %v11305_v14  ;;  %v11313_v55 = vpop.permute.xlu0 %4992  ;;  %v6186_v14 = vld [vmem:[%s12190_s6 + $0x18] sm:$0xff] }
 0x703   : > { %13063 = vst [vmem:[#allocation11_spill] sm:$0xff] %v11313_v55  ;;  %5446 = vrot.lane.b32.xlu1 %v11066_v16, %s7233_s26  ;;  %v7113_v40 = vpack.c.bf16 %v6186_v14, %v6185_v9 }
 0x704   : > { %5444 = vrot.lane.b32.xlu0 %v11070_v17, %s7233_s26 }
 0x705   : > { %v11319_v20 = vpop.permute.xlu1 %5062  ;;  %7114 = vmatprep.subr.bf16.mxu0 %v7113_v40 }
 0x706   : > { %v11327_v48 = vpop.permute.xlu0 %5060  ;;  %7116 = vmatpush3.bf16.msra.mxu0 %v7113_v40 }
 0x707   : > { %5574 = vrot.lane.b32.xlu1 %v11179_v37, %s7225_s14  ;;  %7027 = vmatprep.subr.msk.mxu0 %vm6292_vm12, %v6187_v56 }
 0x708   : > { %5572 = vrot.lane.b32.xlu0 %v11183_v24, %s7225_s14 }
 0x709   : > { %v11333_v16 = vpop.permute.xlu1 %5066 }
 0x70a   : > { %v11335_v17 = vpop.permute.xlu0 %5064  ;;  %7028 = vmatpush3.msk.msra.mxu0 %vm6292_vm12, %v6187_v56 }
 0x70b   : > { %5320 = vrot.lane.b32.xlu1 %v10959_v46, %s7224_s13 }
 0x70c   : > { %5700 = vrot.lane.b32.xlu0 %v10959_v46, %s7234_s20 }
 0x70d   : > { %v11344_v14 = vpop.permute.xlu1 %5070 }
 0x70e   : > { %v11346_v9 = vpop.permute.xlu0 %5068 }
 0x70f   : > { %5828 = vrot.lane.b32.xlu1 %v11078_v4, %s7226_s15 }
 0x710   : > { %5702 = vrot.lane.b32.xlu0 %v10954_v19, %s7234_s20 }
 0x711   : > { %v11352_v40 = vpop.permute.xlu1 %5074 }
 0x712   : > { %13064 = vst [vmem:[#allocation162_spill] sm:$0xff] %v11352_v40  ;;  %v11354_v55 = vpop.permute.xlu0 %5072 }
 0x713   : > { %5448 = vrot.lane.b32.xlu1 %v11078_v4, %s7233_s26 }
 0x714   : > { %5322 = vrot.lane.b32.xlu0 %v10954_v19, %s7224_s13 }
 0x715   : > { %v11360_v46 = vpop.permute.xlu1 %5078 }
 0x716   : > { %v11362_v56 = vpop.permute.xlu0 %5076 }
 0x717   : > { %5450 = vrot.lane.b32.xlu1 %v11074_v30, %s7233_s26 }
 0x718   : > { %5830 = vrot.lane.b32.xlu0 %v11074_v30, %s7226_s15 }
 0x719   : > { %v11368_v29 = vpop.permute.xlu1 %5082 }
 0x71a   : > { %13065 = vst [vmem:[#allocation36_spill] sm:$0xff] %v11368_v29  ;;  %v11370_v40 = vpop.permute.xlu0 %5080 }
 0x71b   : > { %13066 = vst [vmem:[#allocation15_spill] sm:$0xff] %v11370_v40  ;;  %5578 = vrot.lane.b32.xlu1 %v11191_v50, %s7225_s14 }
 0x71c   : > { %5576 = vrot.lane.b32.xlu0 %v11195_v42, %s7225_s14 }
 0x71d   : > { %v11376_v19 = vpop.permute.xlu1 %5086 }
 0x71e   : > { %13067 = vst [vmem:[#allocation14_spill] sm:$0xff] %v11376_v19  ;;  %v11378_v4 = vpop.permute.xlu0 %5084 }
 0x71f   : > { %13068 = vst [vmem:[#allocation81_spill] sm:$0xff] %v11378_v4  ;;  %5324 = vrot.lane.b32.xlu1 %v10969_v41, %s7224_s13 }
 0x720   : > { %5704 = vrot.lane.b32.xlu0 %v10969_v41, %s7234_s20 }
 0x721   : > { %v11384_v30 = vpop.permute.xlu1 %5090 }
 0x722   : > { %13069 = vst [vmem:[#allocation34_spill] sm:$0xff] %v11384_v30  ;;  %v11386_v29 = vpop.permute.xlu0 %5088 }
 0x723   : > { %13070 = vst [vmem:[#allocation20_spill] sm:$0xff] %v11386_v29  ;;  %5832 = vrot.lane.b32.xlu1 %v11086_v35, %s7226_s15 }
 0x724   : > { %5706 = vrot.lane.b32.xlu0 %v10964_v13, %s7234_s20 }
 0x725   : > { %v11392_v40 = vpop.permute.xlu1 %5094 }
 0x726   : > { %13071 = vst [vmem:[#allocation18_spill] sm:$0xff] %v11392_v40  ;;  %v11394_v19 = vpop.permute.xlu0 %5092 }
 0x727   : > { %13072 = vst [vmem:[#allocation80_spill] sm:$0xff] %v11394_v19  ;;  %5452 = vrot.lane.b32.xlu1 %v11086_v35, %s7233_s26 }
 0x728   : > { %5326 = vrot.lane.b32.xlu0 %v10964_v13, %s7224_s13 }
 0x729   : > { %v11400_v41 = vpop.permute.xlu1 %5098 }
 0x72a   : > { %13073 = vst [vmem:[#allocation72_spill] sm:$0xff] %v11400_v41  ;;  %v11402_v30 = vpop.permute.xlu0 %5096 }
 0x72b   : > { %13074 = vst [vmem:[#allocation69_spill] sm:$0xff] %v11402_v30  ;;  %5454 = vrot.lane.b32.xlu1 %v11082_v57, %s7233_s26 }
 0x72c   : > { %5834 = vrot.lane.b32.xlu0 %v11082_v57, %s7226_s15 }
 0x72d   : > { %v11408_v29 = vpop.permute.xlu1 %5102 }
 0x72e   : > { %13075 = vst [vmem:[#allocation26_spill] sm:$0xff] %v11408_v29  ;;  %v11410_v40 = vpop.permute.xlu0 %5100 }
 0x72f   : > { %13076 = vst [vmem:[#allocation24_spill] sm:$0xff] %v11410_v40  ;;  %5582 = vrot.lane.b32.xlu1 %v11203_v23, %s7225_s14 }
 0x730   : > { %5580 = vrot.lane.b32.xlu0 %v11207_v31, %s7225_s14 }
 0x731   : > { %v11416_v13 = vpop.permute.xlu1 %5106 }
 0x732   : > { %13077 = vst [vmem:[#allocation102_spill] sm:$0xff] %v11416_v13  ;;  %v11418_v35 = vpop.permute.xlu0 %5104 }
 0x733   : > { %13078 = vst [vmem:[#allocation85_spill] sm:$0xff] %v11418_v35  ;;  %5328 = vrot.lane.b32.xlu1 %v10981_v12, %s7224_s13 }
 0x734   : > { %5708 = vrot.lane.b32.xlu0 %v10981_v12, %s7234_s20 }
 0x735   : > { %v11424_v57 = vpop.permute.xlu1 %5110 }
 0x736   : > { %13079 = vst [vmem:[#allocation42_spill] sm:$0xff] %v11424_v57  ;;  %v11426_v29 = vpop.permute.xlu0 %5108 }
 0x737   : > { %13080 = vst [vmem:[#allocation39_spill] sm:$0xff] %v11426_v29  ;;  %5836 = vrot.lane.b32.xlu1 %v11094_v10, %s7226_s15 }
 0x738   : > { %5710 = vrot.lane.b32.xlu0 %v10976_v28, %s7234_s20 }
 0x739   : > { %v11432_v40 = vpop.permute.xlu1 %5114 }
 0x73a   : > { %13081 = vst [vmem:[#allocation107_spill] sm:$0xff] %v11432_v40  ;;  %v11434_v13 = vpop.permute.xlu0 %5112 }
 0x73b   : > { %13082 = vst [vmem:[#allocation149_spill] sm:$0xff] %v11434_v13  ;;  %5456 = vrot.lane.b32.xlu1 %v11094_v10, %s7233_s26 }
 0x73c   : > { %5330 = vrot.lane.b32.xlu0 %v10976_v28, %s7224_s13 }
 0x73d   : > { %v11440_v12 = vpop.permute.xlu1 %5118 }
 0x73e   : > { %13083 = vst [vmem:[#allocation125_spill] sm:$0xff] %v11440_v12  ;;  %v11442_v57 = vpop.permute.xlu0 %5116 }
 0x73f   : > { %13084 = vst [vmem:[#allocation64_spill] sm:$0xff] %v11442_v57  ;;  %5458 = vrot.lane.b32.xlu1 %v11090_v36, %s7233_s26 }
 0x740   : > { %5838 = vrot.lane.b32.xlu0 %v11090_v36, %s7226_s15 }
 0x741   : > { %v11448_v29 = vpop.permute.xlu1 %5122 }
 0x742   : > { %13085 = vst [vmem:[#allocation174_spill] sm:$0xff] %v11448_v29  ;;  %v11450_v40 = vpop.permute.xlu0 %5120 }
 0x743   : > { %13086 = vst [vmem:[#allocation6_spill] sm:$0xff] %v11450_v40  ;;  %5586 = vrot.lane.b32.xlu1 %v11215_v3, %s7225_s14 }
 0x744   : > { %5584 = vrot.lane.b32.xlu0 %v11219_v34, %s7225_s14 }
 0x745   : > { %v11456_v28 = vpop.permute.xlu1 %5190 }
 0x746   : > { %v11458_v10 = vpop.permute.xlu0 %5188 }
 0x747   : > { %5332 = vrot.lane.b32.xlu1 %v10993_v39, %s7224_s13 }
 0x748   : > { %5712 = vrot.lane.b32.xlu0 %v10993_v39, %s7234_s20 }
 0x749   : > { %v11464_v36 = vpop.permute.xlu1 %5194 }
 0x74a   : > { %v11466_v29 = vpop.permute.xlu0 %5192 }
 0x74b   : > { %5840 = vrot.lane.b32.xlu1 %v11102_v47, %s7226_s15 }
 0x74c   : > { %5714 = vrot.lane.b32.xlu0 %v10988_v15, %s7234_s20 }
 0x74d   : > { %v11472_v40 = vpop.permute.xlu1 %5198 }
 0x74e   : > { %v11474_v12 = vpop.permute.xlu0 %5196 }
 0x74f   : > { %5460 = vrot.lane.b32.xlu1 %v11102_v47, %s7233_s26 }
 0x750   : > { %5334 = vrot.lane.b32.xlu0 %v10988_v15, %s7224_s13 }
 0x751   : > { %v11480_v39 = vpop.permute.xlu1 %5202 }
 0x752   : > { %v11482_v57 = vpop.permute.xlu0 %5200 }
 0x753   : > { %5462 = vrot.lane.b32.xlu1 %v11098_v1, %s7233_s26 }
 0x754   : > { %5842 = vrot.lane.b32.xlu0 %v11098_v1, %s7226_s15 }
 0x755   : > { %v11488_v13 = vpop.permute.xlu1 %5206 }
 0x756   : > { %v11490_v35 = vpop.permute.xlu0 %5204 }
 0x757   : > { %5590 = vrot.lane.b32.xlu1 %v11227_v33, %s7225_s14  ;;  %v4750_v33 = vld [vmem:[#allocation3 + $0x99] sm:$0xff] }
 0x758   : > { %5588 = vrot.lane.b32.xlu0 %v11231_v63, %s7225_s14 }
 0x759   : > { %v11496_v15 = vpop.permute.xlu1 %5210 }
 0x75a   : > { %v11498_v47 = vpop.permute.xlu0 %5208 }
 0x75b   : > { %5336 = vrot.lane.b32.xlu1 %v11005_v54, %s7224_s13 }
 0x75c   : > { %5716 = vrot.lane.b32.xlu0 %v11005_v54, %s7234_s20 }
 0x75d   : > { %v11504_v1 = vpop.permute.xlu1 %5214 }
 0x75e   : > { %13087 = vst [vmem:[#allocation155_spill] sm:$0xff] %v11504_v1  ;;  %v11506_v41 = vpop.permute.xlu0 %5212 }
 0x75f   : > { %13088 = vst [vmem:[#allocation101_spill] sm:$0xff] %v11506_v41  ;;  %5844 = vrot.lane.b32.xlu1 %v11110_v43, %s7226_s15 }
 0x760   : > { %5718 = vrot.lane.b32.xlu0 %v11000_v2, %s7234_s20 }
 0x761   : > { %v11512_v30 = vpop.permute.xlu1 %5218 }
 0x762   : > { %13089 = vst [vmem:[#allocation163_spill] sm:$0xff] %v11512_v30  ;;  %v11514_v19 = vpop.permute.xlu0 %5216 }
 0x763   : > { %13090 = vst [vmem:[#allocation143_spill] sm:$0xff] %v11514_v19  ;;  %5464 = vrot.lane.b32.xlu1 %v11110_v43, %s7233_s26 }
 0x764   : > { %5338 = vrot.lane.b32.xlu0 %v4750_v33, %s7224_s13 }
 0x765   : > { %v11519_v54 = vpop.permute.xlu1 %5222 }
 0x766   : > { %13091 = vst [vmem:[#allocation119_spill] sm:$0xff] %v11519_v54  ;;  %v11521_v1 = vpop.permute.xlu0 %5220  ;;  %v4751_v54 = vld [vmem:[#allocation3 + $0xa9] sm:$0xff] }
 0x767   : > { %13092 = vst [vmem:[#allocation52_spill] sm:$0xff] %v11521_v1  ;;  %5466 = vrot.lane.b32.xlu1 %v11106_v51, %s7233_s26 }
 0x768   : > { %5846 = vrot.lane.b32.xlu0 %v11106_v51, %s7226_s15 }
 0x769   : > { %v11527_v2 = vpop.permute.xlu1 %5226 }
 0x76a   : > { %13093 = vst [vmem:[#allocation168_spill] sm:$0xff] %v11527_v2  ;;  %v11529_v30 = vpop.permute.xlu0 %5224  ;;  %v4847_v2 = vld [vmem:[#allocation3 + $0xb1] sm:$0xff] }
 0x76b   : > { %13094 = vst [vmem:[#allocation112_spill] sm:$0xff] %v11529_v30  ;;  %5594 = vrot.lane.b32.xlu1 %v11239_v21, %s7225_s14 }
 0x76c   : > { %5592 = vrot.lane.b32.xlu0 %v11243_v58, %s7225_s14 }
 0x76d   : > { %v11535_v43 = vpop.permute.xlu1 %5230 }
 0x76e   : > { %13095 = vst [vmem:[#allocation90_spill] sm:$0xff] %v11535_v43  ;;  %v11537_v33 = vpop.permute.xlu0 %5228  ;;  %v4611_v43 = vld [vmem:[#allocation3] sm:$0xff] }
 0x76f   : > { %13096 = vst [vmem:[#allocation130_spill] sm:$0xff] %v11537_v33  ;;  %5340 = vrot.lane.b32.xlu1 %v4751_v54, %s7224_s13 }
 0x770   : > { %5720 = vrot.lane.b32.xlu0 %v4751_v54, %s7234_s20  ;;  %v5924_v54 = vsel %vm2521_vm10, %v4611_v43, %v11146_v60 }
 0x771   : > { %v5319_v51 = vpop.permute.xlu1 %5318  ;;  %v5956_v58 = vsel %vm326_vm0, %v5924_v54, %v11327_v48  ;;  %v4753_v54 = vld [vmem:[#allocation3 + $0xc1] sm:$0xff] }
 0x772   : > { %v5317_v1 = vpop.permute.xlu0 %5316 }
 0x773   : > { %5848 = vrot.lane.b32.xlu1 %v11118_v52, %s7226_s15 }
 0x774   : > { %5722 = vrot.lane.b32.xlu0 %v4847_v2, %s7234_s20 }
 0x775   : > { %v5447_v30 = vpop.permute.xlu1 %5446 }
 0x776   : > { %v5445_v21 = vpop.permute.xlu0 %5444 }
 0x777   : > { %5468 = vrot.lane.b32.xlu1 %v11118_v52, %s7233_s26  ;;  %v5989_v52 = vsel %vm5988_vm13, %v5956_v58, %v11458_v10 }
 0x778   : > { %5342 = vrot.lane.b32.xlu0 %v4847_v2, %s7224_s13  ;;  %v6021_v41 = vsel %vm1792_vm2, %v5989_v52, %v5317_v1 }
 0x779   : > { %v5575_v33 = vpop.permute.xlu1 %5574  ;;  %v6054_v60 = vsel %vm6053_vm14, %v6021_v41, %v5445_v21 }
 0x77a   : > { %v5573_v19 = vpop.permute.xlu0 %5572 }
 0x77b   : > { %5470 = vrot.lane.b32.xlu1 %v11114_v49, %s7233_s26  ;;  %v6086_v43 = vsel %vm1825_vm3, %v6054_v60, %v5573_v19  ;;  %v4849_v60 = vld [vmem:[#allocation3 + $0xc9] sm:$0xff] }
 0x77c   : > { %5850 = vrot.lane.b32.xlu0 %v11114_v49, %s7226_s15  ;;  %v4612_v49 = vld [vmem:[#allocation3 + $0x8] sm:$0xff] }
 0x77d   : > { %v5321_v2 = vpop.permute.xlu1 %5320 }
 0x77e   : > { %v5701_v4 = vpop.permute.xlu0 %5700 }
 0x77f   : > { %5598 = vrot.lane.b32.xlu1 %v11251_v45, %s7225_s14  ;;  %v6119_v48 = vsel %vm6118_vm15, %v6086_v43, %v5701_v4  ;;  %v5925_v45 = vsel %vm2521_vm10, %v4612_v49, %v11143_v53 }
 0x780   : > { %5596 = vrot.lane.b32.xlu0 %v11255_v11, %s7225_s14  ;;  %v5957_v21 = vsel %vm326_vm0, %v5925_v45, %v11319_v20 }
 0x781   : > { %v5829_v58 = vpop.permute.xlu1 %5828  ;;  %v5990_v4 = vsel %vm5988_vm13, %v5957_v21, %v11456_v28  ;;  %v4755_v21 = vld [vmem:[#allocation3 + $0xd9] sm:$0xff] }
 0x782   : > { %v6151_v10 = vsel %vm1858_vm4, %v6119_v48, %v5829_v58  ;;  %v5703_v1 = vpop.permute.xlu0 %5702  ;;  %v6022_v52 = vsel %vm1792_vm2, %v5990_v4, %v5319_v51 }
 0x783   : > { %5344 = vrot.lane.b32.xlu1 %v4753_v54, %s7224_s13  ;;  %7029 = vmatprep.mubr.msk.f32.mxu0 %vm6195_vm1, %v6151_v10  ;;  %v6055_v43 = vsel %vm6053_vm14, %v6022_v52, %v5447_v30  ;;  %v5926_v30 = vsel %vm2521_vm10, %v11171_v61, %v11153_v32 }
 0x784   : > { %5724 = vrot.lane.b32.xlu0 %v4753_v54, %s7234_s20  ;;  %v6087_v53 = vsel %vm1825_vm3, %v6055_v43, %v5575_v33  ;;  %v5958_v33 = vsel %vm326_vm0, %v5926_v30, %v11335_v17 }
 0x785   : > { %v5449_v19 = vpop.permute.xlu1 %5448  ;;  %v6120_v20 = vsel %vm6118_vm15, %v6087_v53, %v5703_v1 }
 0x786   : > { %v5323_v41 = vpop.permute.xlu0 %5322 }
 0x787   : > { %5852 = vrot.lane.b32.xlu1 %v11126_v0, %s7226_s15 }
 0x788   : > { %5726 = vrot.lane.b32.xlu0 %v4849_v60, %s7234_s20 }
 0x789   : > { %v5451_v49 = vpop.permute.xlu1 %5450 }
 0x78a   : > { %v5831_v48 = vpop.permute.xlu0 %5830 }
 0x78b   : > { %v6152_v58 = vsel %vm1858_vm4, %v6120_v20, %v5831_v48  ;;  %5472 = vrot.lane.b32.xlu1 %v11126_v0, %s7233_s26  ;;  %v5991_v0 = vsel %vm5988_vm13, %v5958_v33, %v11466_v29  ;;  %v4757_v33 = vld [vmem:[#allocation3 + $0xf1] sm:$0xff] }
 0x78c   : > { %5346 = vrot.lane.b32.xlu0 %v4849_v60, %s7224_s13  ;;  %7030 = vmatmul.mubr.msk.f32.vlgmr.msra.gmra.mrb[16].mxu0 %vm6195_vm1, %v6152_v58  ;;  %v6023_v1 = vsel %vm1792_vm2, %v5991_v0, %v5321_v2  ;;  %v4851_v60 = vld [vmem:[#allocation3 + $0xe1] sm:$0xff] }
 0x78d   : > { %v5579_v28 = vpop.permute.xlu1 %5578  ;;  %v6056_v45 = vsel %vm6053_vm14, %v6023_v1, %v5449_v19 }
 0x78e   : > { %v5577_v51 = vpop.permute.xlu0 %5576 }
 0x78f   : > { %5474 = vrot.lane.b32.xlu1 %v11122_v38, %s7233_s26  ;;  %v6088_v32 = vsel %vm1825_vm3, %v6056_v45, %v5577_v51  ;;  %v4853_v45 = vld [vmem:[#allocation3 + $0xf9] sm:$0xff] }
 0x790   : > { %5854 = vrot.lane.b32.xlu0 %v11122_v38, %s7226_s15 }
 0x791   : > { %v5325_v10 = vpop.permute.xlu1 %5324 }
 0x792   : > { %v5705_v54 = vpop.permute.xlu0 %5704 }
 0x793   : > { %5602 = vrot.lane.b32.xlu1 %v11263_v5, %s7225_s14  ;;  %v6121_v61 = vsel %vm6118_vm15, %v6088_v32, %v5705_v54  ;;  %v5927_v5 = vsel %vm2521_vm10, %v11167_v25, %v11151_v6 }
 0x794   : > { %5600 = vrot.lane.b32.xlu0 %v11267_v27, %s7225_s14  ;;  %v5959_v27 = vsel %vm326_vm0, %v5927_v5, %v11333_v16 }
 0x795   : > { %v5833_v38 = vpop.permute.xlu1 %5832  ;;  %v5992_v19 = vsel %vm5988_vm13, %v5959_v27, %v11464_v36 }
 0x796   : > { %v6153_v17 = vsel %vm1858_vm4, %v6121_v61, %v5833_v38  ;;  %v5707_v29 = vpop.permute.xlu0 %5706  ;;  %v6024_v52 = vsel %vm1792_vm2, %v5992_v19, %v5323_v41 }
 0x797   : > { %5348 = vrot.lane.b32.xlu1 %v4755_v21, %s7224_s13  ;;  %7032 = vmatprep.mubr.msk.f32.mxu0 %vm6195_vm1, %v6153_v17  ;;  %v6057_v43 = vsel %vm6053_vm14, %v6024_v52, %v5451_v49  ;;  %v5928_v49 = vsel %vm2521_vm10, %v11183_v24, %v11160_v59  ;;  %v13097_v52 = vld [vmem:[#allocation7_spill] sm:$0xff] }
 0x798   : > { %5728 = vrot.lane.b32.xlu0 %v4755_v21, %s7234_s20  ;;  %v6089_v6 = vsel %vm1825_vm3, %v6057_v43, %v5579_v28  ;;  %v5960_v48 = vsel %vm326_vm0, %v5928_v49, %v11346_v9  ;;  %v5930_v21 = vsel %vm2521_vm10, %v11195_v42, %v11169_v7  ;;  %v13098_v42 = vld [vmem:[#allocation160_spill] sm:$0xff] }
 0x799   : > { %v5453_v2 = vpop.permute.xlu1 %5452  ;;  %v6122_v16 = vsel %vm6118_vm15, %v6089_v6, %v5707_v29  ;;  %v4790_v29 = vld [vmem:[#allocation3 + $0xfa] sm:$0xff]  ;;  %v5962_v5 = vsel %vm326_vm0, %v5930_v21, %v11354_v55  ;;  %v4759_v6 = vld [vmem:[#allocation3 + $0x109] sm:$0xff] }
 0x79a   : > { %v5327_v4 = vpop.permute.xlu0 %5326 }
 0x79b   : > { %5856 = vrot.lane.b32.xlu1 %v11134_v8, %s7226_s15 }
 0x79c   : > { %5730 = vrot.lane.b32.xlu0 %v4851_v60, %s7234_s20 }
 0x79d   : > { %v5455_v25 = vpop.permute.xlu1 %5454 }
 0x79e   : > { %v5835_v53 = vpop.permute.xlu0 %5834 }
 0x79f   : > { %v6154_v20 = vsel %vm1858_vm4, %v6122_v16, %v5835_v53  ;;  %5476 = vrot.lane.b32.xlu1 %v11134_v8, %s7233_s26  ;;  %v5993_v8 = vsel %vm5988_vm13, %v5960_v48, %v11474_v12  ;;  %v13100_v53 = vld [vmem:[#allocation162_spill] sm:$0xff]  ;;  %v4886_v48 = vld [vmem:[#allocation3 + $0x10a] sm:$0xff] }
 0x7a0   : > { %5350 = vrot.lane.b32.xlu0 %v4851_v60, %s7224_s13  ;;  %7033 = vmatmul.mubr.msk.f32.gmra.mrb[18].mxu0 %vm6195_vm1, %v6154_v20  ;;  %v6025_v28 = vsel %vm1792_vm2, %v5993_v8, %v5325_v10 }
 0x7a1   : > { %v5583_v36 = vpop.permute.xlu1 %5582  ;;  %v6058_v30 = vsel %vm6053_vm14, %v6025_v28, %v5453_v2 }
 0x7a2   : > { %v5581_v41 = vpop.permute.xlu0 %5580 }
 0x7a3   : > { %5478 = vrot.lane.b32.xlu1 %v11130_v62, %s7233_s26  ;;  %v6090_v59 = vsel %vm1825_vm3, %v6058_v30, %v5581_v41 }
 0x7a4   : > { %5858 = vrot.lane.b32.xlu0 %v11130_v62, %s7226_s15 }
 0x7a5   : > { %v5329_v58 = vpop.permute.xlu1 %5328 }
 0x7a6   : > { %v5709_v51 = vpop.permute.xlu0 %5708 }
 0x7a7   : > { %5606 = vrot.lane.b32.xlu1 %v11275_v26, %s7225_s14  ;;  %v6123_v24 = vsel %vm6118_vm15, %v6090_v59, %v5709_v51  ;;  %v5929_v26 = vsel %vm2521_vm10, %v11179_v37, %v11157_v22 }
 0x7a8   : > { %5604 = vrot.lane.b32.xlu0 %v11279_v44, %s7225_s14  ;;  %v5961_v44 = vsel %vm326_vm0, %v5929_v26, %v11344_v14 }
 0x7a9   : > { %v5837_v62 = vpop.permute.xlu1 %5836  ;;  %v5994_v10 = vsel %vm5988_vm13, %v5961_v44, %v11472_v40 }
 0x7aa   : > { %v6155_v9 = vsel %vm1858_vm4, %v6123_v24, %v5837_v62  ;;  %v5711_v12 = vpop.permute.xlu0 %5710  ;;  %v6026_v54 = vsel %vm1792_vm2, %v5994_v10, %v5327_v4  ;;  %v11718_v10 = vld [vmem:[#allocation3 + $0x120] sm:$0xff] }
 0x7ab   : > { %5352 = vrot.lane.b32.xlu1 %v4757_v33, %s7224_s13  ;;  %7035 = vmatprep.mubr.msk.f32.mxu0 %vm6195_vm1, %v6155_v9  ;;  %v6059_v32 = vsel %vm6053_vm14, %v6026_v54, %v5455_v25  ;;  %v13099_v25 = vld [vmem:[#allocation28_spill] sm:$0xff] }
 0x7ac   : > { %5732 = vrot.lane.b32.xlu0 %v4757_v33, %s7234_s20  ;;  %v6091_v22 = vsel %vm1825_vm3, %v6059_v32, %v5583_v36  ;;  %v5931_v16 = vsel %vm2521_vm10, %v11191_v50, %v13099_v25  ;;  %v4792_v9 = vld [vmem:[#allocation3 + $0x112] sm:$0xff] }
 0x7ad   : > { %v5457_v0 = vpop.permute.xlu1 %5456  ;;  %v6124_v14 = vsel %vm6118_vm15, %v6091_v22, %v5711_v12  ;;  %v5963_v20 = vsel %vm326_vm0, %v5931_v16, %v13100_v53  ;;  %v13101_v12 = vld [vmem:[#allocation75_spill] sm:$0xff] }
 0x7ae   : > { %v5331_v1 = vpop.permute.xlu0 %5330  ;;  %v5996_v41 = vsel %vm5988_vm13, %v5963_v20, %v11480_v39  ;;  %v5932_v33 = vsel %vm2521_vm10, %v11207_v31, %v13101_v12  ;;  %v4794_v53 = vld [vmem:[#allocation3 + $0x12a] sm:$0xff] }
 0x7af   : > { %5860 = vrot.lane.b32.xlu1 %v11139_v18, %s7226_s15  ;;  %v6028_v8 = vsel %vm1792_vm2, %v5996_v41, %v5331_v1  ;;  %v5964_v26 = vsel %vm326_vm0, %v5932_v33, %v11362_v56 }
 0x7b0   : > { %5734 = vrot.lane.b32.xlu0 %v4853_v45, %s7234_s20  ;;  %v5997_v44 = vsel %vm5988_vm13, %v5964_v26, %v11490_v35 }
 0x7b1   : > { %v5459_v37 = vpop.permute.xlu1 %5458 }
 0x7b2   : > { %v5839_v61 = vpop.permute.xlu0 %5838  ;;  %v6061_v28 = vsel %vm6053_vm14, %v6028_v8, %v5459_v37  ;;  %v4856_v37 = vld [vmem:[#allocation3 + $0x121] sm:$0xff]  ;;  %v13105_v8 = vld [vmem:[#allocation133_spill] sm:$0xff] }
 0x7b3   : > { %v6156_v38 = vsel %vm1858_vm4, %v6124_v14, %v5839_v61  ;;  %5480 = vrot.lane.b32.xlu1 %v11139_v18, %s7233_s26  ;;  %v5995_v18 = vsel %vm5988_vm13, %v5962_v5, %v11482_v57  ;;  %v11729_v14 = vld [vmem:[#allocation3 + $0x128] sm:$0xff]  ;;  %v13102_v61 = vld [vmem:[#allocation57_spill] sm:$0xff] }
 0x7b4   : > { %5354 = vrot.lane.b32.xlu0 %v4853_v45, %s7224_s13  ;;  %7036 = vmatmul.mubr.msk.f32.gmra.mrb[20].mxu0 %vm6195_vm1, %v6156_v38  ;;  %v6027_v2 = vsel %vm1792_vm2, %v5995_v18, %v5329_v58  ;;  %v4855_v58 = vld [vmem:[#allocation3 + $0x111] sm:$0xff]  ;;  %v5933_v38 = vsel %vm2521_vm10, %v11203_v23, %v13102_v61 }
 0x7b5   : > { %v5587_v40 = vpop.permute.xlu1 %5586  ;;  %v6060_v4 = vsel %vm6053_vm14, %v6027_v2, %v5457_v0 }
 0x7b6   : > { %v5585_v17 = vpop.permute.xlu0 %5584  ;;  %v6093_v50 = vsel %vm1825_vm3, %v6061_v28, %v5587_v40  ;;  %v5965_v40 = vsel %vm326_vm0, %v5933_v38, %v11360_v46  ;;  %v13106_v28 = vld [vmem:[#allocation36_spill] sm:$0xff] }
 0x7b7   : > { %5482 = vrot.lane.b32.xlu1 %v4790_v29, %s7233_s26  ;;  %v6092_v7 = vsel %vm1825_vm3, %v6060_v4, %v5585_v17 }
 0x7b8   : > { %5862 = vrot.lane.b32.xlu0 %v4790_v29, %s7226_s15  ;;  %v5998_v29 = vsel %vm5988_vm13, %v5965_v40, %v11488_v13  ;;  %v4857_v13 = vld [vmem:[#allocation3 + $0x129] sm:$0xff] }
 0x7b9   : > { %v5333_v27 = vpop.permute.xlu1 %5332 }
 0x7ba   : > { %v5713_v19 = vpop.permute.xlu0 %5712  ;;  %v6029_v1 = vsel %vm1792_vm2, %v5997_v44, %v5333_v27 }
 0x7bb   : > { %5610 = vrot.lane.b32.xlu1 %v13097_v52, %s7225_s14  ;;  %v6125_v55 = vsel %vm6118_vm15, %v6092_v7, %v5713_v19  ;;  %v4888_v19 = vld [vmem:[#allocation3 + $0x122] sm:$0xff] }
 0x7bc   : > { %5608 = vrot.lane.b32.xlu0 %v13098_v42, %s7225_s14  ;;  %v13103_v42 = vld [vmem:[#allocation96_spill] sm:$0xff] }
 0x7bd   : > { %v5841_v60 = vpop.permute.xlu1 %5840 }
 0x7be   : > { %v6157_v43 = vsel %vm1858_vm4, %v6125_v55, %v5841_v60  ;;  %v5715_v57 = vpop.permute.xlu0 %5714  ;;  %v5934_v55 = vsel %vm2521_vm10, %v11219_v34, %v13103_v42  ;;  %v13104_v60 = vld [vmem:[#allocation15_spill] sm:$0xff]  ;;  %v4733_v42 = vld [vmem:[#allocation3 + $0x150] sm:$0xff] }
 0x7bf   : > { %5356 = vrot.lane.b32.xlu1 %v4759_v6, %s7224_s13  ;;  %7038 = vmatprep.mubr.msk.f32.mxu0 %vm6195_vm1, %v6157_v43  ;;  %v6126_v30 = vsel %vm6118_vm15, %v6093_v50, %v5715_v57  ;;  %v5966_v43 = vsel %vm326_vm0, %v5934_v55, %v13104_v60 }
 0x7c0   : > { %5736 = vrot.lane.b32.xlu0 %v4759_v6, %s7234_s20  ;;  %v5999_v57 = vsel %vm5988_vm13, %v5966_v43, %v11498_v47  ;;  %v4731_v47 = vld [vmem:[#allocation3 + $0x138] sm:$0xff] }
 0x7c1   : > { %v5461_v36 = vpop.permute.xlu1 %5460 }
 0x7c2   : > { %v5335_v49 = vpop.permute.xlu0 %5334  ;;  %v6062_v45 = vsel %vm6053_vm14, %v6029_v1, %v5461_v36  ;;  %v4890_v1 = vld [vmem:[#allocation3 + $0x13a] sm:$0xff] }
 0x7c3   : > { %5864 = vrot.lane.b32.xlu1 %v4886_v48, %s7226_s15  ;;  %v6030_v5 = vsel %vm1792_vm2, %v5998_v29, %v5335_v49 }
 0x7c4   : > { %5738 = vrot.lane.b32.xlu0 %v4855_v58, %s7234_s20 }
 0x7c5   : > { %v5463_v51 = vpop.permute.xlu1 %5462 }
 0x7c6   : > { %v5843_v59 = vpop.permute.xlu0 %5842  ;;  %v6063_v18 = vsel %vm6053_vm14, %v6030_v5, %v5463_v51 }
 0x7c7   : > { %v6158_v24 = vsel %vm1858_vm4, %v6126_v30, %v5843_v59  ;;  %5484 = vrot.lane.b32.xlu1 %v4886_v48, %s7233_s26 }
 0x7c8   : > { %5358 = vrot.lane.b32.xlu0 %v4855_v58, %s7224_s13  ;;  %7039 = vmatmul.mubr.msk.f32.gmra.mrb[22].mxu0 %vm6195_vm1, %v6158_v24  ;;  %v5935_v58 = vsel %vm2521_vm10, %v11215_v3, %v13105_v8  ;;  %v4858_v24 = vld [vmem:[#allocation3 + $0x139] sm:$0xff] }
 0x7c9   : > { %v5591_v39 = vpop.permute.xlu1 %5590  ;;  %v5967_v50 = vsel %vm326_vm0, %v5935_v58, %v13106_v28  ;;  %v13117_v58 = vld [vmem:[#allocation143_spill] sm:$0xff] }
 0x7ca   : > { %v5589_v62 = vpop.permute.xlu0 %5588  ;;  %v6095_v23 = vsel %vm1825_vm3, %v6063_v18, %v5591_v39  ;;  %v6000_v30 = vsel %vm5988_vm13, %v5967_v50, %v11496_v15  ;;  %v4796_v18 = vld [vmem:[#allocation3 + $0x142] sm:$0xff] }
 0x7cb   : > { %5486 = vrot.lane.b32.xlu1 %v4792_v9, %s7233_s26  ;;  %v6094_v31 = vsel %vm1825_vm3, %v6062_v45, %v5589_v62  ;;  %v4827_v62 = vld [vmem:[#allocation3 + $0x140] sm:$0xff] }
 0x7cc   : > { %5866 = vrot.lane.b32.xlu0 %v4792_v9, %s7226_s15 }
 0x7cd   : > { %v5337_v0 = vpop.permute.xlu1 %5336 }
 0x7ce   : > { %v5717_v54 = vpop.permute.xlu0 %5716  ;;  %v6031_v25 = vsel %vm1792_vm2, %v5999_v57, %v5337_v0 }
 0x7cf   : > { %5232 = vrot.lane.b32.xlu1 %v11718_v10, %s7232_s24  ;;  %v6127_v56 = vsel %vm6118_vm15, %v6094_v31, %v5717_v54  ;;  %v13107_v54 = vld [vmem:[#allocation13_spill] sm:$0xff]  ;;  %v4859_v31 = vld [vmem:[#allocation3 + $0x141] sm:$0xff] }
 0x7d0   : > { %5612 = vrot.lane.b32.xlu0 %v11718_v10, %s7225_s14  ;;  %v5936_v45 = vsel %vm2521_vm10, %v11231_v63, %v13107_v54 }
 0x7d1   : > { %v5845_v32 = vpop.permute.xlu1 %5844 }
 0x7d2   : > { %v6159_v35 = vsel %vm1858_vm4, %v6127_v56, %v5845_v32  ;;  %v5719_v22 = vpop.permute.xlu0 %5718  ;;  %v13108_v56 = vld [vmem:[#allocation81_spill] sm:$0xff] }
 0x7d3   : > { %5740 = vrot.lane.b32.xlu1 %v4856_v37, %s7234_s20  ;;  %7041 = vmatprep.mubr.msk.f32.mxu0 %vm6195_vm1, %v6159_v35  ;;  %v6128_v2 = vsel %vm6118_vm15, %v6095_v23, %v5719_v22  ;;  %v5968_v32 = vsel %vm326_vm0, %v5936_v45, %v13108_v56  ;;  %v13109_v35 = vld [vmem:[#allocation101_spill] sm:$0xff]  ;;  %v13121_v45 = vld [vmem:[#allocation163_spill] sm:$0xff] }
 0x7d4   : > { %5614 = vrot.lane.b32.xlu0 %v11729_v14, %s7225_s14  ;;  %v6001_v22 = vsel %vm5988_vm13, %v5968_v32, %v13109_v35  ;;  %v13110_v23 = vld [vmem:[#allocation157_spill] sm:$0xff] }
 0x7d5   : > { %v5465_v17 = vpop.permute.xlu1 %5464  ;;  %v4798_v32 = vld [vmem:[#allocation3 + $0x15a] sm:$0xff] }
 0x7d6   : > { %v5339_v21 = vpop.permute.xlu0 %5338  ;;  %v6064_v20 = vsel %vm6053_vm14, %v6031_v25, %v5465_v17 }
 0x7d7   : > { %5360 = vrot.lane.b32.xlu1 %v4856_v37, %s7224_s13  ;;  %v6032_v39 = vsel %vm1792_vm2, %v6000_v30, %v5339_v21 }
 0x7d8   : > { %5234 = vrot.lane.b32.xlu0 %v11729_v14, %s7232_s24 }
 0x7d9   : > { %v5467_v27 = vpop.permute.xlu1 %5466 }
 0x7da   : > { %v5847_v46 = vpop.permute.xlu0 %5846  ;;  %v6065_v9 = vsel %vm6053_vm14, %v6032_v39, %v5467_v27  ;;  %v13111_v27 = vld [vmem:[#allocation135_spill] sm:$0xff]  ;;  %v4861_v39 = vld [vmem:[#allocation3 + $0x159] sm:$0xff] }
 0x7db   : > { %v6160_v4 = vsel %vm1858_vm4, %v6128_v2, %v5847_v46  ;;  %5868 = vrot.lane.b32.xlu1 %v4888_v19, %s7226_s15  ;;  %v5937_v2 = vsel %vm2521_vm10, %v13111_v27, %v13110_v23  ;;  %v13112_v46 = vld [vmem:[#allocation14_spill] sm:$0xff]  ;;  %v4831_v27 = vld [vmem:[#allocation3 + $0x170] sm:$0xff] }
 0x7dc   : > { %5742 = vrot.lane.b32.xlu0 %v4857_v13, %s7234_s20  ;;  %7042 = vmatmul.mubr.msk.f32.gmra.mrb[24].mxu0 %vm6195_vm1, %v6160_v4 }
 0x7dd   : > { %v5595_v52 = vpop.permute.xlu1 %5594 }
 0x7de   : > { %v5593_v7 = vpop.permute.xlu0 %5592  ;;  %v6097_v3 = vsel %vm1825_vm3, %v6065_v9, %v5595_v52 }
 0x7df   : > { %5488 = vrot.lane.b32.xlu1 %v4888_v19, %s7233_s26  ;;  %v6096_v34 = vsel %vm1825_vm3, %v6064_v20, %v5593_v7  ;;  %v5969_v19 = vsel %vm326_vm0, %v5937_v2, %v13112_v46  ;;  %v4829_v20 = vld [vmem:[#allocation3 + $0x158] sm:$0xff]  ;;  %v13123_v2 = vld [vmem:[#allocation80_spill] sm:$0xff] }
 0x7e0   : > { %5362 = vrot.lane.b32.xlu0 %v4857_v13, %s7224_s13  ;;  %v13113_v13 = vld [vmem:[#allocation155_spill] sm:$0xff] }
 0x7e1   : > { %v5341_v6 = vpop.permute.xlu1 %5340  ;;  %v6002_v52 = vsel %vm5988_vm13, %v5969_v19, %v13113_v13  ;;  %v13124_v19 = vld [vmem:[#allocation52_spill] sm:$0xff] }
 0x7e2   : > { %v5721_v16 = vpop.permute.xlu0 %5720  ;;  %v6033_v61 = vsel %vm1792_vm2, %v6001_v22, %v5341_v6 }
 0x7e3   : > { %5490 = vrot.lane.b32.xlu1 %v4794_v53, %s7233_s26  ;;  %v6129_v36 = vsel %vm6118_vm15, %v6096_v34, %v5721_v16  ;;  %v4860_v16 = vld [vmem:[#allocation3 + $0x151] sm:$0xff] }
 0x7e4   : > { %5870 = vrot.lane.b32.xlu0 %v4794_v53, %s7226_s15 }
 0x7e5   : > { %v5849_v41 = vpop.permute.xlu1 %5848 }
 0x7e6   : > { %v6161_v49 = vsel %vm1858_vm4, %v6129_v36, %v5849_v41  ;;  %v5723_v48 = vpop.permute.xlu0 %5722  ;;  %v13114_v41 = vld [vmem:[#allocation61_spill] sm:$0xff] }
 0x7e7   : > { %5236 = vrot.lane.b32.xlu1 %v4731_v47, %s7232_s24  ;;  %7044 = vmatprep.mubr.msk.f32.mxu0 %vm6195_vm1, %v6161_v49  ;;  %v6130_v33 = vsel %vm6118_vm15, %v6097_v3, %v5723_v48  ;;  %v13115_v49 = vld [vmem:[#allocation65_spill] sm:$0xff] }
 0x7e8   : > { %5616 = vrot.lane.b32.xlu0 %v4731_v47, %s7225_s14  ;;  %v5938_v48 = vsel %vm2521_vm10, %v13115_v49, %v13114_v41  ;;  %v13116_v47 = vld [vmem:[#allocation20_spill] sm:$0xff]  ;;  %v13127_v49 = vld [vmem:[#allocation119_spill] sm:$0xff] }
 0x7e9   : > { %v5469_v51 = vpop.permute.xlu1 %5468  ;;  %v5970_v8 = vsel %vm326_vm0, %v5938_v48, %v13116_v47 }
 0x7ea   : > { %v5343_v59 = vpop.permute.xlu0 %5342  ;;  %v6066_v40 = vsel %vm6053_vm14, %v6033_v61, %v5469_v51  ;;  %v6003_v28 = vsel %vm5988_vm13, %v5970_v8, %v13117_v58 }
 0x7eb   : > { %5744 = vrot.lane.b32.xlu1 %v4858_v24, %s7234_s20  ;;  %v6034_v55 = vsel %vm1792_vm2, %v6002_v52, %v5343_v59  ;;  %v4892_v59 = vld [vmem:[#allocation3 + $0x152] sm:$0xff] }
 0x7ec   : > { %5618 = vrot.lane.b32.xlu0 %v4827_v62, %s7225_s14 }
 0x7ed   : > { %v5471_v12 = vpop.permute.xlu1 %5470 }
 0x7ee   : > { %v5851_v26 = vpop.permute.xlu0 %5850  ;;  %v6067_v60 = vsel %vm6053_vm14, %v6034_v55, %v5471_v12 }
 0x7ef   : > { %v6162_v44 = vsel %vm1858_vm4, %v6130_v33, %v5851_v26  ;;  %5364 = vrot.lane.b32.xlu1 %v4858_v24, %s7224_s13  ;;  %v13118_v26 = vld [vmem:[#allocation32_spill] sm:$0xff] }
 0x7f0   : > { %5238 = vrot.lane.b32.xlu0 %v4827_v62, %s7232_s24  ;;  %7045 = vmatmul.mubr.msk.f32.gmra.mrb[26].mxu0 %vm6195_vm1, %v6162_v44  ;;  %v13119_v44 = vld [vmem:[#allocation19_spill] sm:$0xff] }
 0x7f1   : > { %v5599_v15 = vpop.permute.xlu1 %5598 }
 0x7f2   : > { %v5597_v0 = vpop.permute.xlu0 %5596  ;;  %v6099_v43 = vsel %vm1825_vm3, %v6067_v60, %v5599_v15  ;;  %v5939_v15 = vsel %vm2521_vm10, %v13119_v44, %v13118_v26  ;;  %v13129_v26 = vld [vmem:[#allocation69_spill] sm:$0xff] }
 0x7f3   : > { %5872 = vrot.lane.b32.xlu1 %v4890_v1, %s7226_s15  ;;  %v6098_v63 = vsel %vm1825_vm3, %v6066_v40, %v5597_v0  ;;  %v13120_v0 = vld [vmem:[#allocation34_spill] sm:$0xff] }
 0x7f4   : > { %5746 = vrot.lane.b32.xlu0 %v4859_v31, %s7234_s20 }
 0x7f5   : > { %v5345_v37 = vpop.permute.xlu1 %5344 }
 0x7f6   : > { %v5725_v38 = vpop.permute.xlu0 %5724  ;;  %v6035_v51 = vsel %vm1792_vm2, %v6003_v28, %v5345_v37 }
 0x7f7   : > { %5492 = vrot.lane.b32.xlu1 %v4890_v1, %s7233_s26  ;;  %v6131_v17 = vsel %vm6118_vm15, %v6098_v63, %v5725_v38  ;;  %v5971_v1 = vsel %vm326_vm0, %v5939_v15, %v13120_v0  ;;  %v4735_v63 = vld [vmem:[#allocation3 + $0x168] sm:$0xff]  ;;  %v13130_v15 = vld [vmem:[#allocation112_spill] sm:$0xff] }
 0x7f8   : > { %5366 = vrot.lane.b32.xlu0 %v4859_v31, %s7224_s13  ;;  %v6004_v31 = vsel %vm5988_vm13, %v5971_v1, %v13121_v45 }
 0x7f9   : > { %v5853_v29 = vpop.permute.xlu1 %5852 }
 0x7fa   : > { %v6163_v21 = vsel %vm1858_vm4, %v6131_v17, %v5853_v29  ;;  %v5727_v5 = vpop.permute.xlu0 %5726 }
 0x7fb   : > { %5494 = vrot.lane.b32.xlu1 %v4796_v18, %s7233_s26  ;;  %7047 = vmatprep.mubr.msk.f32.mxu0 %vm6195_vm1, %v6163_v21  ;;  %v6132_v6 = vsel %vm6118_vm15, %v6099_v43, %v5727_v5  ;;  %v4862_v5 = vld [vmem:[#allocation3 + $0x169] sm:$0xff] }
 0x7fc   : > { %5874 = vrot.lane.b32.xlu0 %v4796_v18, %s7226_s15  ;;  %v13122_v18 = vld [vmem:[#allocation98_spill] sm:$0xff] }
 0x7fd   : > { %v5473_v4 = vpop.permute.xlu1 %5472  ;;  %v5940_v23 = vsel %vm2521_vm10, %v11255_v11, %v13122_v18  ;;  %v13133_v18 = vld [vmem:[#allocation168_spill] sm:$0xff] }
 0x7fe   : > { %v5347_v7 = vpop.permute.xlu0 %5346  ;;  %v6068_v24 = vsel %vm6053_vm14, %v6035_v51, %v5473_v4  ;;  %v5972_v46 = vsel %vm326_vm0, %v5940_v23, %v13123_v2  ;;  %v4896_v2 = vld [vmem:[#allocation3 + $0x182] sm:$0xff] }
 0x7ff   : > { %5240 = vrot.lane.b32.xlu1 %v4733_v42, %s7232_s24  ;;  %v6036_v35 = vsel %vm1792_vm2, %v6004_v31, %v5347_v7  ;;  %v6005_v4 = vsel %vm5988_vm13, %v5972_v46, %v13124_v19  ;;  %v4864_v31 = vld [vmem:[#allocation3 + $0x181] sm:$0xff]  ;;  %v4865_v19 = vld [vmem:[#allocation3 + $0x189] sm:$0xff] }
 0x800   : > { %5620 = vrot.lane.b32.xlu0 %v4733_v42, %s7225_s14 }
 0x801   : > { %v5475_v57 = vpop.permute.xlu1 %5474 }
 0x802   : > { %v5855_v25 = vpop.permute.xlu0 %5854  ;;  %v6069_v22 = vsel %vm6053_vm14, %v6036_v35, %v5475_v57 }
 0x803   : > { %v6164_v53 = vsel %vm1858_vm4, %v6132_v6, %v5855_v25  ;;  %5748 = vrot.lane.b32.xlu1 %v4860_v16, %s7234_s20  ;;  %v4894_v6 = vld [vmem:[#allocation3 + $0x16a] sm:$0xff] }
 0x804   : > { %5622 = vrot.lane.b32.xlu0 %v4829_v20, %s7225_s14  ;;  %7048 = vmatmul.mubr.msk.f32.gmra.mrb[28].mxu0 %vm6195_vm1, %v6164_v53  ;;  %v4863_v25 = vld [vmem:[#allocation3 + $0x171] sm:$0xff] }
 0x805   : > { %v5603_v34 = vpop.permute.xlu1 %5602  ;;  %v13125_v53 = vld [vmem:[#allocation77_spill] sm:$0xff] }
 0x806   : > { %v5601_v36 = vpop.permute.xlu0 %5600  ;;  %v6101_v37 = vsel %vm1825_vm3, %v6069_v22, %v5603_v34  ;;  %v13126_v34 = vld [vmem:[#allocation18_spill] sm:$0xff] }
 0x807   : > { %5368 = vrot.lane.b32.xlu1 %v4860_v16, %s7224_s13  ;;  %v6100_v62 = vsel %vm1825_vm3, %v6068_v24, %v5601_v36  ;;  %v7207_v16 = vld [vmem:[#allocation3 + $0xc8] sm:$0xff] }
 0x808   : > { %5242 = vrot.lane.b32.xlu0 %v4829_v20, %s7232_s24  ;;  %v5941_v20 = vsel %vm2521_vm10, %v7207_v16, %v13125_v53  ;;  %v7210_v53 = vld [vmem:[#allocation3 + $0xf0] sm:$0xff] }
 0x809   : > { %v5349_v50 = vpop.permute.xlu1 %5348  ;;  %v5973_v36 = vsel %vm326_vm0, %v5941_v20, %v13126_v34  ;;  %v13134_v20 = vld [vmem:[#allocation137_spill] sm:$0xff] }
 0x80a   : > { %v5729_v30 = vpop.permute.xlu0 %5728  ;;  %v6037_v52 = vsel %vm1792_vm2, %v6005_v4, %v5349_v50  ;;  %v6006_v48 = vsel %vm5988_vm13, %v5973_v36, %v13127_v49  ;;  %v5944_v34 = vsel %vm2521_vm10, %v7210_v53, %v13134_v20  ;;  %v13135_v36 = vld [vmem:[#allocation24_spill] sm:$0xff]  ;;  %v4867_v49 = vld [vmem:[#allocation3 + $0x1a1] sm:$0xff] }
 0x80b   : > { %5876 = vrot.lane.b32.xlu1 %v4892_v59, %s7226_s15  ;;  %v6133_v9 = vsel %vm6118_vm15, %v6100_v62, %v5729_v30  ;;  %v7213_v53 = vld [vmem:[#allocation3 + $0x110] sm:$0xff] }
 0x80c   : > { %5750 = vrot.lane.b32.xlu0 %v4861_v39, %s7234_s20  ;;  %v13142_v20 = vld [vmem:[#allocation68_spill] sm:$0xff] }
 0x80d   : > { %v5857_v3 = vpop.permute.xlu1 %5856 }
 0x80e   : > { %v6165_v12 = vsel %vm1858_vm4, %v6133_v9, %v5857_v3  ;;  %v5731_v33 = vpop.permute.xlu0 %5730  ;;  %v4737_v9 = vld [vmem:[#allocation3 + $0x180] sm:$0xff]  ;;  %v7208_v3 = vld [vmem:[#allocation3 + $0xd8] sm:$0xff] }
 0x80f   : > { %5496 = vrot.lane.b32.xlu1 %v4892_v59, %s7233_s26  ;;  %7050 = vmatprep.mubr.msk.f32.mxu0 %vm6195_vm1, %v6165_v12  ;;  %v6134_v38 = vsel %vm6118_vm15, %v6101_v37, %v5731_v33  ;;  %v4800_v59 = vld [vmem:[#allocation3 + $0x172] sm:$0xff]  ;;  %v13128_v12 = vld [vmem:[#allocation99_spill] sm:$0xff] }
 0x810   : > { %5370 = vrot.lane.b32.xlu0 %v4861_v39, %s7224_s13  ;;  %v5942_v33 = vsel %vm2521_vm10, %v7208_v3, %v13128_v12  ;;  %v7211_v12 = vld [vmem:[#allocation3 + $0xf8] sm:$0xff] }
 0x811   : > { %v5477_v54 = vpop.permute.xlu1 %5476  ;;  %v5974_v44 = vsel %vm326_vm0, %v5942_v33, %v13129_v26  ;;  %v13137_v33 = vld [vmem:[#allocation21_spill] sm:$0xff] }
 0x812   : > { %v5351_v56 = vpop.permute.xlu0 %5350  ;;  %v6070_v42 = vsel %vm6053_vm14, %v6037_v52, %v5477_v54  ;;  %v6007_v0 = vsel %vm5988_vm13, %v5974_v44, %v13130_v15  ;;  %v5945_v26 = vsel %vm2521_vm10, %v7211_v12, %v13137_v33  ;;  %v13138_v44 = vld [vmem:[#allocation26_spill] sm:$0xff] }
 0x813   : > { %5498 = vrot.lane.b32.xlu1 %v4798_v32, %s7233_s26  ;;  %v6038_v8 = vsel %vm1792_vm2, %v6006_v48, %v5351_v56  ;;  %v13136_v48 = vld [vmem:[#allocation130_spill] sm:$0xff]  ;;  %v5977_v15 = vsel %vm326_vm0, %v5945_v26, %v13138_v44 }
 0x814   : > { %5878 = vrot.lane.b32.xlu0 %v4798_v32, %s7226_s15  ;;  %v4833_v32 = vld [vmem:[#allocation3 + $0x188] sm:$0xff] }
 0x815   : > { %v5479_v61 = vpop.permute.xlu1 %5478 }
 0x816   : > { %v5859_v40 = vpop.permute.xlu0 %5858  ;;  %v6071_v58 = vsel %vm6053_vm14, %v6038_v8, %v5479_v61 }
 0x817   : > { %v6166_v17 = vsel %vm1858_vm4, %v6134_v38, %v5859_v40  ;;  %5244 = vrot.lane.b32.xlu1 %v4735_v63, %s7232_s24  ;;  %v7209_v40 = vld [vmem:[#allocation3 + $0xe0] sm:$0xff] }
 0x818   : > { %5624 = vrot.lane.b32.xlu0 %v4735_v63, %s7225_s14  ;;  %7051 = vmatmul.mubr.msk.f32.gmra.mrb[30].mxu0 %vm6195_vm1, %v6166_v17  ;;  %v13131_v63 = vld [vmem:[#allocation159_spill] sm:$0xff] }
 0x819   : > { %v5607_v29 = vpop.permute.xlu1 %5606  ;;  %v5943_v17 = vsel %vm2521_vm10, %v7209_v40, %v13131_v63 }
 0x81a   : > { %v5605_v21 = vpop.permute.xlu0 %5604  ;;  %v6103_v28 = vsel %vm1825_vm3, %v6071_v58, %v5607_v29  ;;  %v13132_v29 = vld [vmem:[#allocation72_spill] sm:$0xff]  ;;  %v4866_v58 = vld [vmem:[#allocation3 + $0x199] sm:$0xff] }
 0x81b   : > { %5752 = vrot.lane.b32.xlu1 %v4862_v5, %s7234_s20  ;;  %v6102_v11 = vsel %vm1825_vm3, %v6070_v42, %v5605_v21  ;;  %v5975_v21 = vsel %vm326_vm0, %v5943_v17, %v13132_v29  ;;  %v11965_v17 = vld [vmem:[%s12191_s7] ss:$0 sm:$0xff] }
 0x81c   : > { %5626 = vrot.lane.b32.xlu0 %v4831_v27, %s7225_s14  ;;  %v6008_v23 = vsel %vm5988_vm13, %v5975_v21, %v13133_v18  ;;  %v7212_v21 = vld [vmem:[#allocation3 + $0x108] sm:$0xff] }
 0x81d   : > { %v5353_v13 = vpop.permute.xlu1 %5352 }
 0x81e   : > { %v5733_v7 = vpop.permute.xlu0 %5732  ;;  %v6039_v54 = vsel %vm1792_vm2, %v6007_v0, %v5353_v13 }
 0x81f   : > { %5372 = vrot.lane.b32.xlu1 %v4862_v5, %s7224_s13  ;;  %v6135_v55 = vsel %vm6118_vm15, %v6102_v11, %v5733_v7 }
 0x820   : > { %5246 = vrot.lane.b32.xlu0 %v4831_v27, %s7232_s24 }
 0x821   : > { %v5861_v60 = vpop.permute.xlu1 %5860 }
 0x822   : > { %v6167_v43 = vsel %vm1858_vm4, %v6135_v55, %v5861_v60  ;;  %v5735_v57 = vpop.permute.xlu0 %5734 }
 0x823   : > { %5880 = vrot.lane.b32.xlu1 %v4894_v6, %s7226_s15  ;;  %7053 = vmatprep.mubr.msk.f32.mxu0 %vm6195_vm1, %v6167_v43  ;;  %v6136_v51 = vsel %vm6118_vm15, %v6103_v28, %v5735_v57  ;;  %v4802_v43 = vld [vmem:[#allocation3 + $0x18a] sm:$0xff]  ;;  %v4835_v57 = vld [vmem:[#allocation3 + $0x1a0] sm:$0xff] }
 0x824   : > { %5754 = vrot.lane.b32.xlu0 %v4863_v25, %s7234_s20 }
 0x825   : > { %v5481_v41 = vpop.permute.xlu1 %5480 }
 0x826   : > { %v5355_v47 = vpop.permute.xlu0 %5354  ;;  %v6072_v56 = vsel %vm6053_vm14, %v6039_v54, %v5481_v41  ;;  %v5976_v41 = vsel %vm326_vm0, %v5944_v34, %v13135_v36  ;;  %v5947_v34 = vsel %vm2521_vm10, %v7213_v53, %v13142_v20  ;;  %v13143_v36 = vld [vmem:[#allocation102_spill] sm:$0xff]  ;;  %v13148_v20 = vld [vmem:[#allocation5_spill] sm:$0xff] }
 0x827   : > { %5500 = vrot.lane.b32.xlu1 %v4894_v6, %s7233_s26  ;;  %v6040_v46 = vsel %vm1792_vm2, %v6008_v23, %v5355_v47  ;;  %v6009_v47 = vsel %vm5988_vm13, %v5976_v41, %v13136_v48  ;;  %v5979_v41 = vsel %vm326_vm0, %v5947_v34, %v13143_v36  ;;  %v13149_v36 = vld [vmem:[#allocation149_spill] sm:$0xff] }
 0x828   : > { %5374 = vrot.lane.b32.xlu0 %v4863_v25, %s7224_s13  ;;  %v4834_v25 = vld [vmem:[#allocation3 + $0x198] sm:$0xff] }
 0x829   : > { %v5483_v50 = vpop.permute.xlu1 %5482 }
 0x82a   : > { %v5863_v30 = vpop.permute.xlu0 %5862  ;;  %v6073_v4 = vsel %vm6053_vm14, %v6040_v46, %v5483_v50 }
 0x82b   : > { %v6168_v24 = vsel %vm1858_vm4, %v6136_v51, %v5863_v30  ;;  %5502 = vrot.lane.b32.xlu1 %v4800_v59, %s7233_s26 }
 0x82c   : > { %5882 = vrot.lane.b32.xlu0 %v4800_v59, %s7226_s15  ;;  %7054 = vmatmul.mubr.msk.f32.gmra.mrb[32].mxu0 %vm6195_vm1, %v6168_v24  ;;  %v4899_v59 = vld [vmem:[#allocation3 + $0x1a2] sm:$0xff] }
 0x82d   : > { %v5611_v39 = vpop.permute.xlu1 %5610 }
 0x82e   : > { %v5609_v62 = vpop.permute.xlu0 %5608  ;;  %v6105_v13 = vsel %vm1825_vm3, %v6073_v4, %v5611_v39 }
 0x82f   : > { %5248 = vrot.lane.b32.xlu1 %v4737_v9, %s7232_s24  ;;  %v6104_v35 = vsel %vm1825_vm3, %v6072_v56, %v5609_v62  ;;  %v4898_v62 = vld [vmem:[#allocation3 + $0x19a] sm:$0xff] }
 0x830   : > { %5628 = vrot.lane.b32.xlu0 %v4737_v9, %s7225_s14 }
 0x831   : > { %v5357_v1 = vpop.permute.xlu1 %5356 }
 0x832   : > { %v5737_v45 = vpop.permute.xlu0 %5736  ;;  %v6041_v28 = vsel %vm1792_vm2, %v6009_v47, %v5357_v1  ;;  %v13139_v1 = vld [vmem:[#allocation90_spill] sm:$0xff] }
 0x833   : > { %5756 = vrot.lane.b32.xlu1 %v4864_v31, %s7234_s20  ;;  %v6137_v22 = vsel %vm6118_vm15, %v6104_v35, %v5737_v45  ;;  %v6010_v54 = vsel %vm5988_vm13, %v5977_v15, %v13139_v1  ;;  %v13144_v15 = vld [vmem:[#allocation116_spill] sm:$0xff] }
 0x834   : > { %5630 = vrot.lane.b32.xlu0 %v4833_v32, %s7225_s14 }
 0x835   : > { %v5865_v37 = vpop.permute.xlu1 %5864 }
 0x836   : > { %v6169_v61 = vsel %vm1858_vm4, %v6137_v22, %v5865_v37  ;;  %v5739_v38 = vpop.permute.xlu0 %5738 }
 0x837   : > { %5376 = vrot.lane.b32.xlu1 %v4864_v31, %s7224_s13  ;;  %7056 = vmatprep.mubr.msk.f32.mxu0 %vm6195_vm1, %v6169_v61  ;;  %v6138_v7 = vsel %vm6118_vm15, %v6105_v13, %v5739_v38 }
 0x838   : > { %5250 = vrot.lane.b32.xlu0 %v4833_v32, %s7232_s24 }
 0x839   : > { %v5485_v5 = vpop.permute.xlu1 %5484 }
 0x83a   : > { %v5359_v27 = vpop.permute.xlu0 %5358  ;;  %v6074_v51 = vsel %vm6053_vm14, %v6041_v28, %v5485_v5  ;;  %v13140_v5 = vld [vmem:[#allocation161_spill] sm:$0xff] }
 0x83b   : > { %5884 = vrot.lane.b32.xlu1 %v4896_v2, %s7226_s15  ;;  %v6042_v31 = vsel %vm1792_vm2, %v6010_v54, %v5359_v27  ;;  %v5946_v18 = vsel %vm2521_vm10, %v7212_v21, %v13140_v5  ;;  %v13141_v27 = vld [vmem:[#allocation85_spill] sm:$0xff]  ;;  %v13145_v54 = vld [vmem:[#allocation39_spill] sm:$0xff]  ;;  %v13147_v21 = vld [vmem:[#allocation42_spill] sm:$0xff] }
 0x83c   : > { %5758 = vrot.lane.b32.xlu0 %v4865_v19, %s7234_s20 }
 0x83d   : > { %v5487_v52 = vpop.permute.xlu1 %5486 }
 0x83e   : > { %v5867_v42 = vpop.permute.xlu0 %5866  ;;  %v6075_v56 = vsel %vm6053_vm14, %v6042_v31, %v5487_v52 }
 0x83f   : > { %v6170_v11 = vsel %vm1858_vm4, %v6138_v7, %v5867_v42  ;;  %5504 = vrot.lane.b32.xlu1 %v4896_v2, %s7233_s26  ;;  %v5978_v2 = vsel %vm326_vm0, %v5946_v18, %v13141_v27 }
 0x840   : > { %5378 = vrot.lane.b32.xlu0 %v4865_v19, %s7224_s13  ;;  %7057 = vmatmul.mubr.msk.f32.gmra.mrb[34].mxu0 %vm6195_vm1, %v6170_v11 }
 0x841   : > { %v5233_v55 = vpop.permute.xlu1 %5232 }
 0x842   : > { %v5613_v60 = vpop.permute.xlu0 %5612  ;;  %v6011_v4 = vsel %vm5988_vm13, %v5978_v2, %v5233_v55 }
 0x843   : > { %5506 = vrot.lane.b32.xlu1 %v4802_v43, %s7233_s26  ;;  %v6106_v30 = vsel %vm1825_vm3, %v6074_v51, %v5613_v60 }
 0x844   : > { %5886 = vrot.lane.b32.xlu0 %v4802_v43, %s7226_s15 }
 0x845   : > { %v5741_v6 = vpop.permute.xlu1 %5740 }
 0x846   : > { %v5615_v16 = vpop.permute.xlu0 %5614  ;;  %v6139_v24 = vsel %vm6118_vm15, %v6106_v30, %v5741_v6 }
 0x847   : > { %5634 = vrot.lane.b32.xlu1 %v4835_v57, %s7225_s14  ;;  %v6107_v32 = vsel %vm1825_vm3, %v6075_v56, %v5615_v16 }
 0x848   : > { %5632 = vrot.lane.b32.xlu0 %v4834_v25, %s7225_s14 }
 0x849   : > { %v5361_v8 = vpop.permute.xlu1 %5360 }
 0x84a   : > { %v5235_v50 = vpop.permute.xlu0 %5234  ;;  %v6043_v7 = vsel %vm1792_vm2, %v6011_v4, %v5361_v8 }
 0x84b   : > { %5762 = vrot.lane.b32.xlu1 %v4867_v49, %s7234_s20  ;;  %v6012_v48 = vsel %vm5988_vm13, %v5979_v41, %v5235_v50 }
 0x84c   : > { %5760 = vrot.lane.b32.xlu0 %v4866_v58, %s7234_s20 }
 0x84d   : > { %v5869_v39 = vpop.permute.xlu1 %5868 }
 0x84e   : > { %v6171_v9 = vsel %vm1858_vm4, %v6139_v24, %v5869_v39  ;;  %v5743_v3 = vpop.permute.xlu0 %5742 }
 0x84f   : > { %5890 = vrot.lane.b32.xlu1 %v4899_v59, %s7226_s15  ;;  %7059 = vmatprep.mubr.msk.f32.mxu0 %vm6195_vm1, %v6171_v9  ;;  %v6140_v22 = vsel %vm6118_vm15, %v6107_v32, %v5743_v3 }
 0x850   : > { %5888 = vrot.lane.b32.xlu0 %v4898_v62, %s7226_s15 }
 0x851   : > { %v5489_v0 = vpop.permute.xlu1 %5488 }
 0x852   : > { %v5363_v45 = vpop.permute.xlu0 %5362  ;;  %v6076_v60 = vsel %vm6053_vm14, %v6043_v7, %v5489_v0  ;;  %v5948_v0 = vsel %vm2521_vm10, %v11718_v10, %v13144_v15 }
 0x853   : > { %v6044_v8 = vsel %vm1792_vm2, %v6012_v48, %v5363_v45  ;;  %v5980_v45 = vsel %vm326_vm0, %v5948_v0, %v13145_v54 }
 0x855   : > { %v5491_v35 = vpop.permute.xlu1 %5490 }
 0x856   : > { %v5871_v37 = vpop.permute.xlu0 %5870  ;;  %v6077_v58 = vsel %vm6053_vm14, %v6044_v8, %v5491_v35 }
 0x857   : > { %v6172_v61 = vsel %vm1858_vm4, %v6140_v22, %v5871_v37 }
 0x858   : > { %7060 = vmatmul.mubr.msk.f32.gmra.mrb[36].mxu0 %vm6195_vm1, %v6172_v61 }
 0x859   : > { %v5237_v38 = vpop.permute.xlu1 %5236 }
 0x85a   : > { %v5617_v40 = vpop.permute.xlu0 %5616  ;;  %v6013_v31 = vsel %vm5988_vm13, %v5980_v45, %v5237_v38 }
 0x85b   : > { %v6108_v57 = vsel %vm1825_vm3, %v6076_v60, %v5617_v40 }
 0x85d   : > { %v5745_v63 = vpop.permute.xlu1 %5744 }
 0x85e   : > { %v5619_v29 = vpop.permute.xlu0 %5618  ;;  %v6141_v55 = vsel %vm6118_vm15, %v6108_v57, %v5745_v63 }
 0x85f   : > { %v7031_v23 = vpop.f32.mrb[16].mxu0  ;;  %v6109_v28 = vsel %vm1825_vm3, %v6077_v58, %v5619_v29  ;;  %v13146_v29 = vld [vmem:[#allocation138_spill] sm:$0xff] }
 0x860   : > { %v6368_v46 = vadd.f32 %v7031_v23, %v11965_v17  ;;  %v6362_v19 = vpop.f32.mrb[17].mxu0  ;;  %v5949_v38 = vsel %vm2521_vm10, %v11729_v14, %v13146_v29  ;;  %v4639_v29 = vld [vmem:[#allocation3 + $0x150] sm:$0xff] }
 0x861   : > { %v6363_v13 = vadd.f32 %v11965_v17, %v6362_v19  ;;  %v5365_v52 = vpop.permute.xlu1 %5364  ;;  %v5981_v5 = vsel %vm326_vm0, %v5949_v38, %v13147_v21  ;;  %v13152_v21 = vld [vmem:[#allocation67_spill] sm:$0xff] }
 0x862   : > { %v6522_v42 = vmax.f32 %v6368_v46, 0.0  ;;  %v5239_v11 = vpop.permute.xlu0 %5238  ;;  %v6045_v32 = vsel %vm1792_vm2, %v6013_v31, %v5365_v52 }
 0x863   : > { %v6521_v43 = vmax.f32 %v6363_v13, 0.0  ;;  %v6014_v23 = vsel %vm5988_vm13, %v5981_v5, %v5239_v11  ;;  %v5952_v5 = vsel %vm2521_vm10, %v4639_v29, %v13152_v21 }
 0x864   : > { %6554 = vst.msk [vmem:[%s11977_s22 + $0x8] sm:$0xff] %vm2521_vm10, %v6522_v42 }
 0x865   : > { %6553 = vst.msk [vmem:[%s11977_s22] sm:$0xff] %vm2521_vm10, %v6521_v43  ;;  %v5873_v6 = vpop.permute.xlu1 %5872 }
 0x866   : > { %v6173_v25 = vsel %vm1858_vm4, %v6141_v55, %v5873_v6  ;;  %v5747_v16 = vpop.permute.xlu0 %5746 }
 0x867   : > { %7062 = vmatprep.mubr.msk.f32.mxu0 %vm6195_vm1, %v6173_v25  ;;  %v6142_v30 = vsel %vm6118_vm15, %v6109_v28, %v5747_v16  ;;  %v4637_v16 = vld [vmem:[#allocation3 + $0x138] sm:$0xff] }
 0x868   : > { %v5950_v34 = vsel %vm2521_vm10, %v4637_v16, %v13148_v20 }
 0x869   : > { %v5493_v49 = vpop.permute.xlu1 %5492  ;;  %v5982_v41 = vsel %vm326_vm0, %v5950_v34, %v13149_v36 }
 0x86a   : > { %v5367_v47 = vpop.permute.xlu0 %5366  ;;  %v6078_v22 = vsel %vm6053_vm14, %v6045_v32, %v5493_v49 }
 0x86b   : > { %v6046_v2 = vsel %vm1792_vm2, %v6014_v23, %v5367_v47 }
 0x86d   : > { %v5495_v51 = vpop.permute.xlu1 %5494 }
 0x86e   : > { %v5875_v59 = vpop.permute.xlu0 %5874  ;;  %v6079_v46 = vsel %vm6053_vm14, %v6046_v2, %v5495_v51 }
 0x86f   : > { %v6174_v24 = vsel %vm1858_vm4, %v6142_v30, %v5875_v59 }
 0x870   : > { %7063 = vmatmul.mubr.msk.f32.gmra.mrb[38].mxu0 %vm6195_vm1, %v6174_v24 }
 0x871   : > { %v5241_v39 = vpop.permute.xlu1 %5240 }
 0x872   : > { %v5621_v62 = vpop.permute.xlu0 %5620  ;;  %v6015_v49 = vsel %vm5988_vm13, %v5982_v41, %v5241_v39 }
 0x873   : > { %v7034_v50 = vpop.f32.mrb[18].mxu0  ;;  %v6110_v37 = vsel %vm1825_vm3, %v6078_v22, %v5621_v62  ;;  %v4638_v62 = vld [vmem:[#allocation3 + $0x140] sm:$0xff] }
 0x874   : > { %v6378_v9 = vadd.f32 %v7034_v50, %v11965_v17  ;;  %v6372_v3 = vpop.f32.mrb[19].mxu0  ;;  %v13150_v50 = vld [vmem:[#allocation139_spill] sm:$0xff] }
 0x875   : > { %v6373_v12 = vadd.f32 %v11965_v17, %v6372_v3  ;;  %v5749_v33 = vpop.permute.xlu1 %5748  ;;  %v5951_v39 = vsel %vm2521_vm10, %v4638_v62, %v13150_v50  ;;  %v4641_v62 = vld [vmem:[#allocation3 + $0x168] sm:$0xff]  ;;  %v4642_v50 = vld [vmem:[#allocation3 + $0x170] sm:$0xff] }
 0x876   : > { %v6524_v26 = vmax.f32 %v6378_v9, 0.0  ;;  %v5623_v44 = vpop.permute.xlu0 %5622  ;;  %v6143_v10 = vsel %vm6118_vm15, %v6110_v37, %v5749_v33  ;;  %v13151_v9 = vld [vmem:[#allocation107_spill] sm:$0xff] }
 0x877   : > { %v6523_v1 = vmax.f32 %v6373_v12, 0.0  ;;  %v6111_v19 = vsel %vm1825_vm3, %v6079_v46, %v5623_v44  ;;  %v5983_v3 = vsel %vm326_vm0, %v5951_v39, %v13151_v9  ;;  %v13156_v39 = vld [vmem:[#allocation11_spill] sm:$0xff] }
 0x878   : > { %6556 = vst.msk [vmem:[%s11977_s22 + $0x18] sm:$0xff] %vm2521_vm10, %v6524_v26  ;;  %v5954_v9 = vsel %vm2521_vm10, %v4641_v62, %v13156_v39 }
 0x879   : > { %6555 = vst.msk [vmem:[%s11977_s22 + $0x10] sm:$0xff] %vm2521_vm10, %v6523_v1  ;;  %v5369_v56 = vpop.permute.xlu1 %5368 }
 0x87a   : > { %v5243_v35 = vpop.permute.xlu0 %5242  ;;  %v6047_v47 = vsel %vm1792_vm2, %v6015_v49, %v5369_v56 }
 0x87b   : > { %v6016_v33 = vsel %vm5988_vm13, %v5983_v3, %v5243_v35  ;;  %v13157_v3 = vld [vmem:[#allocation70_spill] sm:$0xff] }
 0x87d   : > { %v5877_v61 = vpop.permute.xlu1 %5876 }
 0x87e   : > { %v6175_v40 = vsel %vm1858_vm4, %v6143_v10, %v5877_v61  ;;  %v5751_v63 = vpop.permute.xlu0 %5750 }
 0x87f   : > { %7065 = vmatprep.mubr.msk.f32.mxu0 %vm6195_vm1, %v6175_v40  ;;  %v6144_v13 = vsel %vm6118_vm15, %v6111_v19, %v5751_v63 }
 0x881   : > { %v5497_v18 = vpop.permute.xlu1 %5496 }
 0x882   : > { %v5371_v27 = vpop.permute.xlu0 %5370  ;;  %v6080_v58 = vsel %vm6053_vm14, %v6047_v47, %v5497_v18  ;;  %v13153_v18 = vld [vmem:[#allocation64_spill] sm:$0xff] }
 0x883   : > { %v6048_v44 = vsel %vm1792_vm2, %v6016_v33, %v5371_v27  ;;  %v5984_v23 = vsel %vm326_vm0, %v5952_v5, %v13153_v18  ;;  %v13158_v33 = vld [vmem:[#allocation6_spill] sm:$0xff] }
 0x885   : > { %v5499_v4 = vpop.permute.xlu1 %5498 }
 0x886   : > { %v5879_v52 = vpop.permute.xlu0 %5878  ;;  %v6081_v0 = vsel %vm6053_vm14, %v6048_v44, %v5499_v4 }
 0x887   : > { %v6176_v14 = vsel %vm1858_vm4, %v6144_v13, %v5879_v52  ;;  %v7037_v7 = vpop.f32.mrb[20].mxu0 }
 0x888   : > { %v6388_v42 = vadd.f32 %v7037_v7, %v11965_v17  ;;  %v6382_v60 = vpop.f32.mrb[21].mxu0  ;;  %7066 = vmatmul.mubr.msk.f32.gmra.mrb[40].mxu0 %vm6195_vm1, %v6176_v14 }
 0x889   : > { %v6383_v11 = vadd.f32 %v11965_v17, %v6382_v60  ;;  %v5245_v43 = vpop.permute.xlu1 %5244  ;;  %v4640_v60 = vld [vmem:[#allocation3 + $0x158] sm:$0xff] }
 0x88a   : > { %v6526_v57 = vmax.f32 %v6388_v42, 0.0  ;;  %v5625_v55 = vpop.permute.xlu0 %5624  ;;  %v6017_v27 = vsel %vm5988_vm13, %v5984_v23, %v5245_v43  ;;  %v13154_v43 = vld [vmem:[#allocation23_spill] sm:$0xff] }
 0x88b   : > { %v6525_v6 = vmax.f32 %v6383_v11, 0.0  ;;  %v6112_v28 = vsel %vm1825_vm3, %v6080_v58, %v5625_v55 }
 0x88c   : > { %6558 = vst.msk [vmem:[%s11977_s22 + $0x28] sm:$0xff] %vm2521_vm10, %v6526_v57  ;;  %v5953_v57 = vsel %vm2521_vm10, %v4640_v60, %v13154_v43 }
 0x88d   : > { %6557 = vst.msk [vmem:[%s11977_s22 + $0x20] sm:$0xff] %vm2521_vm10, %v6525_v6  ;;  %v5753_v25 = vpop.permute.xlu1 %5752 }
 0x88e   : > { %v5627_v53 = vpop.permute.xlu0 %5626  ;;  %v6145_v51 = vsel %vm6118_vm15, %v6112_v28, %v5753_v25  ;;  %v13155_v25 = vld [vmem:[#allocation125_spill] sm:$0xff] }
 0x88f   : > { %v6113_v45 = vsel %vm1825_vm3, %v6081_v0, %v5627_v53  ;;  %v5985_v16 = vsel %vm326_vm0, %v5953_v57, %v13155_v25 }
 0x891   : > { %v5373_v48 = vpop.permute.xlu1 %5372 }
 0x892   : > { %v5247_v8 = vpop.permute.xlu0 %5246  ;;  %v6049_v46 = vsel %vm1792_vm2, %v6017_v27, %v5373_v48 }
 0x893   : > { %v6018_v34 = vsel %vm5988_vm13, %v5985_v16, %v5247_v8 }
 0x895   : > { %v5881_v30 = vpop.permute.xlu1 %5880 }
 0x896   : > { %v6177_v59 = vsel %vm1858_vm4, %v6145_v51, %v5881_v30  ;;  %v5755_v24 = vpop.permute.xlu0 %5754 }
 0x897   : > { %7068 = vmatprep.mubr.msk.f32.mxu0 %vm6195_vm1, %v6177_v59  ;;  %v6146_v32 = vsel %vm6118_vm15, %v6113_v45, %v5755_v24 }
 0x899   : > { %v5501_v12 = vpop.permute.xlu1 %5500 }
 0x89a   : > { %v5375_v26 = vpop.permute.xlu0 %5374  ;;  %v6082_v4 = vsel %vm6053_vm14, %v6049_v46, %v5501_v12  ;;  %v5955_v12 = vsel %vm2521_vm10, %v4642_v50, %v13157_v3 }
 0x89b   : > { %v7040_v15 = vpop.f32.mrb[22].mxu0  ;;  %v6050_v49 = vsel %vm1792_vm2, %v6018_v34, %v5375_v26  ;;  %v5986_v26 = vsel %vm326_vm0, %v5954_v9, %v13158_v33 }
 0x89c   : > { %v6398_v1 = vadd.f32 %v7040_v15, %v11965_v17  ;;  %v6392_v54 = vpop.f32.mrb[23].mxu0  ;;  %v13159_v15 = vld [vmem:[#allocation174_spill] sm:$0xff] }
 0x89d   : > { %v6393_v31 = vadd.f32 %v11965_v17, %v6392_v54  ;;  %v5503_v56 = vpop.permute.xlu1 %5502  ;;  %v5987_v0 = vsel %vm326_vm0, %v5955_v12, %v13159_v15 }
 0x89e   : > { %v6528_v22 = vmax.f32 %v6398_v1, 0.0  ;;  %v5883_v37 = vpop.permute.xlu0 %5882  ;;  %v6083_v47 = vsel %vm6053_vm14, %v6050_v49, %v5503_v56 }
 0x89f   : > { %v6527_v35 = vmax.f32 %v6393_v31, 0.0  ;;  %v6178_v10 = vsel %vm1858_vm4, %v6146_v32, %v5883_v37 }
 0x8a0   : > { %6560 = vst.msk [vmem:[%s11977_s22 + $0x38] sm:$0xff] %vm2521_vm10, %v6528_v22  ;;  %7069 = vmatmul.mubr.msk.f32.gmra.mrb[42].mxu0 %vm6195_vm1, %v6178_v10 }
 0x8a1   : > { %6559 = vst.msk [vmem:[%s11977_s22 + $0x30] sm:$0xff] %vm2521_vm10, %v6527_v35  ;;  %v5249_v61 = vpop.permute.xlu1 %5248 }
 0x8a2   : > { %v5629_v40 = vpop.permute.xlu0 %5628  ;;  %v6019_v1 = vsel %vm5988_vm13, %v5986_v26, %v5249_v61 }
 0x8a3   : > { %v6114_v13 = vsel %vm1825_vm3, %v6082_v4, %v5629_v40 }
 0x8a5   : > { %v5757_v63 = vpop.permute.xlu1 %5756 }
 0x8a6   : > { %v5631_v38 = vpop.permute.xlu0 %5630  ;;  %v6147_v52 = vsel %vm6118_vm15, %v6114_v13, %v5757_v63 }
 0x8a7   : > { %v6115_v58 = vsel %vm1825_vm3, %v6083_v47, %v5631_v38 }
 0x8a9   : > { %v5377_v2 = vpop.permute.xlu1 %5376 }
 0x8aa   : > { %v5251_v19 = vpop.permute.xlu0 %5250  ;;  %v6051_v45 = vsel %vm1792_vm2, %v6019_v1, %v5377_v2 }
 0x8ab   : > { %v6020_v31 = vsel %vm5988_vm13, %v5987_v0, %v5251_v19 }
 0x8ad   : > { %v5885_v14 = vpop.permute.xlu1 %5884 }
 0x8ae   : > { %v6179_v7 = vsel %vm1858_vm4, %v6147_v52, %v5885_v14  ;;  %v5759_v42 = vpop.permute.xlu0 %5758 }
 0x8af   : > { %v7043_v11 = vpop.f32.mrb[24].mxu0  ;;  %7071 = vmatprep.mubr.msk.f32.mxu0 %vm6195_vm1, %v6179_v7  ;;  %v6148_v51 = vsel %vm6118_vm15, %v6115_v58, %v5759_v42 }
 0x8b0   : > { %v6408_v55 = vadd.f32 %v7043_v11, %v11965_v17  ;;  %v6402_v6 = vpop.f32.mrb[25].mxu0 }
 0x8b1   : > { %v6403_v53 = vadd.f32 %v11965_v17, %v6402_v6  ;;  %v5505_v20 = vpop.permute.xlu1 %5504 }
 0x8b2   : > { %v6530_v36 = vmax.f32 %v6408_v55, 0.0  ;;  %v5379_v41 = vpop.permute.xlu0 %5378  ;;  %v6084_v56 = vsel %vm6053_vm14, %v6051_v45, %v5505_v20 }
 0x8b3   : > { %v6529_v48 = vmax.f32 %v6403_v53, 0.0  ;;  %v6052_v32 = vsel %vm1792_vm2, %v6020_v31, %v5379_v41 }
 0x8b4   : > { %6562 = vst.msk [vmem:[%s11977_s22 + $0x48] sm:$0xff] %vm2521_vm10, %v6530_v36 }
 0x8b5   : > { %6561 = vst.msk [vmem:[%s11977_s22 + $0x40] sm:$0xff] %vm2521_vm10, %v6529_v48  ;;  %v5507_v28 = vpop.permute.xlu1 %5506 }
 0x8b6   : > { %v5887_v30 = vpop.permute.xlu0 %5886  ;;  %v6085_v22 = vsel %vm6053_vm14, %v6052_v32, %v5507_v28 }
 0x8b7   : > { %v6180_v59 = vsel %vm1858_vm4, %v6148_v51, %v5887_v30 }
 0x8b8   : > { %7072 = vmatmul.mubr.msk.f32.gmra.mrb[44].mxu0 %vm6195_vm1, %v6180_v59 }
 0x8b9   : > { %v5635_v8 = vpop.permute.xlu1 %5634 }
 0x8ba   : > { %v5633_v24 = vpop.permute.xlu0 %5632  ;;  %v6117_v10 = vsel %vm1825_vm3, %v6085_v22, %v5635_v8 }
 0x8bb   : > { %v6116_v37 = vsel %vm1825_vm3, %v6084_v56, %v5633_v24 }
 0x8bd   : > { %v5763_v44 = vpop.permute.xlu1 %5762 }
 0x8be   : > { %v5761_v54 = vpop.permute.xlu0 %5760  ;;  %v6150_v63 = vsel %vm6118_vm15, %v6117_v10, %v5763_v44 }
 0x8bf   : > { %v6149_v61 = vsel %vm6118_vm15, %v6116_v37, %v5761_v54 }
 0x8c1   : > { %v5891_v35 = vpop.permute.xlu1 %5890 }
 0x8c2   : > { %v5889_v40 = vpop.permute.xlu0 %5888  ;;  %v6182_v21 = vsel %vm1858_vm4, %v6150_v63, %v5891_v35 }
 0x8c3   : > { %v6181_v29 = vsel %vm1858_vm4, %v6149_v61, %v5889_v40  ;;  %v7046_v38 = vpop.f32.mrb[26].mxu0 }
 0x8c4   : > { %v6418_v5 = vadd.f32 %v7046_v38, %v11965_v17  ;;  %v6412_v18 = vpop.f32.mrb[27].mxu0  ;;  %7074 = vmatprep.mubr.msk.f32.mxu0 %vm6195_vm1, %v6181_v29 }
 0x8c5   : > { %v6413_v23 = vadd.f32 %v11965_v17, %v6412_v18  ;;  %7075 = vmatmul.mubr.msk.f32.gmra.mrb[46].mxu0 %vm6195_vm1, %v6182_v21 }
 0x8c6   : > { %v6532_v27 = vmax.f32 %v6418_v5, 0.0 }
 0x8c7   : > { %v6531_v2 = vmax.f32 %v6413_v23, 0.0 }
 0x8c8   : > { %6564 = vst.msk [vmem:[%s11977_s22 + $0x58] sm:$0xff] %vm2521_vm10, %v6532_v27 }
 0x8c9   : > { %6563 = vst.msk [vmem:[%s11977_s22 + $0x50] sm:$0xff] %vm2521_vm10, %v6531_v2 }
 0x8d7   : > { %v7049_v46 = vpop.f32.mrb[28].mxu0 }
 0x8d8   : > { %v6428_v19 = vadd.f32 %v7049_v46, %v11965_v17  ;;  %v6422_v4 = vpop.f32.mrb[29].mxu0 }
 0x8d9   : > { %v6423_v13 = vadd.f32 %v11965_v17, %v6422_v4 }
 0x8da   : > { %v6534_v52 = vmax.f32 %v6428_v19, 0.0 }
 0x8db   : > { %v6533_v14 = vmax.f32 %v6423_v13, 0.0 }
 0x8dc   : > { %6566 = vst.msk [vmem:[%s11977_s22 + $0x68] sm:$0xff] %vm2521_vm10, %v6534_v52 }
 0x8dd   : > { %6565 = vst.msk [vmem:[%s11977_s22 + $0x60] sm:$0xff] %vm2521_vm10, %v6533_v14 }
 0x8eb   : > { %v7052_v7 = vpop.f32.mrb[30].mxu0 }
 0x8ec   : > { %v6438_v42 = vadd.f32 %v7052_v7, %v11965_v17  ;;  %v6432_v60 = vpop.f32.mrb[31].mxu0 }
 0x8ed   : > { %v6433_v11 = vadd.f32 %v11965_v17, %v6432_v60 }
 0x8ee   : > { %v6536_v43 = vmax.f32 %v6438_v42, 0.0 }
 0x8ef   : > { %v6535_v57 = vmax.f32 %v6433_v11, 0.0 }
 0x8f0   : > { %6568 = vst.msk [vmem:[%s11977_s22 + $0x78] sm:$0xff] %vm2521_vm10, %v6536_v43 }
 0x8f1   : > { %6567 = vst.msk [vmem:[%s11977_s22 + $0x70] sm:$0xff] %vm2521_vm10, %v6535_v57 }
 0x8ff   : > { %v7055_v55 = vpop.f32.mrb[32].mxu0 }
 0x900   : > { %v6448_v6 = vadd.f32 %v7055_v55, %v11965_v17  ;;  %v6442_v25 = vpop.f32.mrb[33].mxu0 }
 0x901   : > { %v6443_v16 = vadd.f32 %v11965_v17, %v6442_v25 }
 0x902   : > { %v6538_v53 = vmax.f32 %v6448_v6, 0.0 }
 0x903   : > { %v6537_v20 = vmax.f32 %v6443_v16, 0.0 }
 0x904   : > { %6570 = vst.msk [vmem:[%s11977_s22 + $0x88] sm:$0xff] %vm2521_vm10, %v6538_v53 }
 0x905   : > { %6569 = vst.msk [vmem:[%s11977_s22 + $0x80] sm:$0xff] %vm2521_vm10, %v6537_v20 }
 0x913   : > { %v7058_v34 = vpop.f32.mrb[34].mxu0 }
 0x914   : > { %v6458_v36 = vadd.f32 %v7058_v34, %v11965_v17  ;;  %v6452_v41 = vpop.f32.mrb[35].mxu0 }
 0x915   : > { %v6453_v49 = vadd.f32 %v11965_v17, %v6452_v41 }
 0x916   : > { %v6540_v48 = vmax.f32 %v6458_v36, 0.0 }
 0x917   : > { %v6539_v47 = vmax.f32 %v6453_v49, 0.0 }
 0x918   : > { %6572 = vst.msk [vmem:[%s11977_s22 + $0x98] sm:$0xff] %vm2521_vm10, %v6540_v48 }
 0x919   : > { %6571 = vst.msk [vmem:[%s11977_s22 + $0x90] sm:$0xff] %vm2521_vm10, %v6539_v47 }
 0x92b   : > { %v7061_v58 = vpop.f32.mrb[36].mxu0 }
 0x92c   : > { %v6468_v28 = vadd.f32 %v7061_v58, %v11965_v17  ;;  %v6462_v51 = vpop.f32.mrb[37].mxu0 }
 0x92d   : > { %v6463_v30 = vadd.f32 %v11965_v17, %v6462_v51 }
 0x92e   : > { %v6542_v59 = vmax.f32 %v6468_v28, 0.0 }
 0x92f   : > { %v6541_v8 = vmax.f32 %v6463_v30, 0.0 }
 0x930   : > { %6574 = vst.msk [vmem:[%s11977_s22 + $0xa8] sm:$0xff] %vm2521_vm10, %v6542_v59 }
 0x931   : > { %6573 = vst.msk [vmem:[%s11977_s22 + $0xa0] sm:$0xff] %vm2521_vm10, %v6541_v8 }
 0x943   : > { %v7064_v24 = vpop.f32.mrb[38].mxu0 }
 0x944   : > { %v6478_v62 = vadd.f32 %v7064_v24, %v11965_v17  ;;  %v6472_v50 = vpop.f32.mrb[39].mxu0 }
 0x945   : > { %v6473_v39 = vadd.f32 %v11965_v17, %v6472_v50 }
 0x946   : > { %v6544_v9 = vmax.f32 %v6478_v62, 0.0 }
 0x947   : > { %v6543_v3 = vmax.f32 %v6473_v39, 0.0 }
 0x948   : > { %6576 = vst.msk [vmem:[%s11977_s22 + $0xb8] sm:$0xff] %vm2521_vm10, %v6544_v9 }
 0x949   : > { %6575 = vst.msk [vmem:[%s11977_s22 + $0xb0] sm:$0xff] %vm2521_vm10, %v6543_v3 }
 0x95b   : > { %v7067_v12 = vpop.f32.mrb[40].mxu0 }
 0x95c   : > { %v6488_v33 = vadd.f32 %v7067_v12, %v11965_v17  ;;  %v6482_v26 = vpop.f32.mrb[41].mxu0 }
 0x95d   : > { %v6483_v44 = vadd.f32 %v11965_v17, %v6482_v26 }
 0x95e   : > { %v6546_v15 = vmax.f32 %v6488_v33, 0.0 }
 0x95f   : > { %v6545_v0 = vmax.f32 %v6483_v44, 0.0 }
 0x960   : > { %6578 = vst.msk [vmem:[%s11977_s22 + $0xc8] sm:$0xff] %vm2521_vm10, %v6546_v15 }
 0x961   : > { %6577 = vst.msk [vmem:[%s11977_s22 + $0xc0] sm:$0xff] %vm2521_vm10, %v6545_v0 }
 0x973   : > { %v7070_v1 = vpop.f32.mrb[42].mxu0 }
 0x974   : > { %v6498_v54 = vadd.f32 %v7070_v1, %v11965_v17  ;;  %v6492_v45 = vpop.f32.mrb[43].mxu0 }
 0x975   : > { %v6493_v31 = vadd.f32 %v11965_v17, %v6492_v45 }
 0x976   : > { %v6548_v56 = vmax.f32 %v6498_v54, 0.0 }
 0x977   : > { %v6547_v32 = vmax.f32 %v6493_v31, 0.0 }
 0x978   : > { %6580 = vst.msk [vmem:[%s11977_s22 + $0xd8] sm:$0xff] %vm2521_vm10, %v6548_v56 }
 0x979   : > { %6579 = vst.msk [vmem:[%s11977_s22 + $0xd0] sm:$0xff] %vm2521_vm10, %v6547_v32 }
 0x98b   : > { %v7073_v22 = vpop.f32.mrb[44].mxu0 }
 0x98c   : > { %v6508_v37 = vadd.f32 %v7073_v22, %v11965_v17  ;;  %v6502_v35 = vpop.f32.mrb[45].mxu0 }
 0x98d   : > { %v6503_v10 = vadd.f32 %v11965_v17, %v6502_v35 }
 0x98e   : > { %v6550_v61 = vmax.f32 %v6508_v37, 0.0 }
 0x98f   : > { %v6549_v40 = vmax.f32 %v6503_v10, 0.0 }
 0x990   : > { %6582 = vst.msk [vmem:[%s11977_s22 + $0xe8] sm:$0xff] %vm2521_vm10, %v6550_v61 }
 0x991   : > { %6581 = vst.msk [vmem:[%s11977_s22 + $0xe0] sm:$0xff] %vm2521_vm10, %v6549_v40 }
 0x998   : > { %v7076_v63 = vpop.f32.mrb[46].mxu0 }
 0x999   : > { %v6518_v29 = vadd.f32 %v7076_v63, %v11965_v17  ;;  %v6512_v38 = vpop.f32.mrb[47].mxu0 }
 0x99a   : > { %v6513_v21 = vadd.f32 %v11965_v17, %v6512_v38 }
 0x99b   : > { %v6552_v5 = vmax.f32 %v6518_v29, 0.0 }
 0x99c   : > { %v6551_v18 = vmax.f32 %v6513_v21, 0.0 }
 0x99d   : > { %6584 = vst.msk [vmem:[%s11977_s22 + $0xf8] sm:$0xff] %vm2521_vm10, %v6552_v5 }
 0x99e   : > { %6583 = vst.msk [vmem:[%s11977_s22 + $0xf0] sm:$0xff] %vm2521_vm10, %v6551_v18 }
 0x99f PF: > { %s18_s27 = sadd.s32 1, %s7220_s27  }
 0x9a0   : > { %p15_p4 = scmp.ge.s32.totalorder %s18_s27, 4  }
 0x9a2   :  { %17 = sbr.rel (!%p15_p4) target bundleno = 1 (0x1), region = 89 }

</bundles_post_ra>
